<compile_context>
chip_gen: v6e
topology: v6e:2x2x1
jax: 0.10.0
libtpu: 0.0.40
codegen_flags: <defaults>
</compile_context>

<pallas_src>
import functools

import jax
import jax.numpy as jnp
import numpy as np
from jax.experimental import pallas as pl
from jax.experimental.pallas import tpu as pltpu


_SQRT_HALF = 0.7071067811865476


def _erf_approx(z):
    """Abramowitz & Stegun 7.1.26 erf approximation, |err| <= 1.5e-7 (f32)."""
    a1, a2, a3, a4, a5 = (0.254829592, -0.284496736, 1.421413741,
                          -1.453152027, 1.061405429)
    p = 0.3275911
    za = jnp.abs(z)
    t = 1.0 / (1.0 + p * za)
    poly = ((((a5 * t + a4) * t + a3) * t + a2) * t + a1) * t
    e = 1.0 - poly * jnp.exp(-za * za)
    return jnp.where(z >= 0, e, -e)


def _gelu_exact(x):
    return 0.5 * x * (1.0 + _erf_approx(x * _SQRT_HALF))


# ---------------------------------------------------------------------------
# One fused layer:
#   x = x + to_out(softmax(q k^T) v)        (LN + scale folded into weights)
#   x = x + fc2(GELU(fc1(LN(x))))
# One grid step = one batch element; everything stays in VMEM in between.
# ---------------------------------------------------------------------------
def _fused_layer_kernel(x_ref, wqkv_ref, bqkv_ref, wo_ref, bo_ref,
                        w1_ref, b1_ref, w2_ref, b2_ref, o_ref,
                        *, heads, dim_head, eps):
    f32, bf16 = jnp.float32, jnp.bfloat16
    inner = heads * dim_head

    x = x_ref[0]                                        # (L, dim) f32

    # ---------------- attention sub-layer (pre-norm) ----------------
    mean = jnp.mean(x, axis=-1, keepdims=True)
    xc = x - mean
    var = jnp.mean(xc * xc, axis=-1, keepdims=True)
    xn = (xc * jax.lax.rsqrt(var + eps)).astype(bf16)   # LN affine folded in W

    # gamma/beta and 1/sqrt(dh) (Q columns) already folded into wqkv_f/bqkv_f
    qkv = jnp.dot(xn, wqkv_ref[...],
                  preferred_element_type=f32) + bqkv_ref[...]   # (L, 3*inner)

    wo = wo_ref[...]                                    # (inner, dim) bf16, permuted
    trans_b = (((1,), (1,)), ((), ()))                  # contract last dims (q k^T)
    attn_out = jnp.zeros(x.shape, f32)                  # lane-dense accumulator
    for h in range(heads):                              # static, heads is small
        lo = h * dim_head
        q = qkv[:, lo:lo + dim_head].astype(bf16)
        k = qkv[:, inner + lo:inner + lo + dim_head].astype(bf16)
        v = qkv[:, 2 * inner + lo:2 * inner + lo + dim_head].astype(bf16)
        s = jax.lax.dot_general(q, k, trans_b, preferred_element_type=f32)
        m = jnp.max(s, axis=-1, keepdims=True)
        p = jnp.exp(s - m)                              # un-normalized
        r = pl.reciprocal(jnp.sum(p, axis=-1, keepdims=True), approx=True)
        pv = jnp.dot(p.astype(bf16), v, preferred_element_type=f32)   # (L, dh)
        # deferred softmax normalization + fold this head's output directly
        # through its row-block of the (permuted) W_out -> no concatenate
        attn_out += jnp.dot((pv * r).astype(bf16), wo[lo:lo + dim_head, :],
                            preferred_element_type=f32)
    x = x + attn_out + bo_ref[...]                      # residual

    # ---------------- MLP sub-layer (pre-norm) ----------------
    mean = jnp.mean(x, axis=-1, keepdims=True)
    xc = x - mean
    var = jnp.mean(xc * xc, axis=-1, keepdims=True)
    xn2 = (xc * jax.lax.rsqrt(var + eps)).astype(bf16)  # LN affine folded into fc1

    h1 = jnp.dot(xn2, w1_ref[...], preferred_element_type=f32) + b1_ref[...]
    h1 = _gelu_exact(h1).astype(bf16)                   # exact-erf GELU in f32
    y = jnp.dot(h1, w2_ref[...], preferred_element_type=f32) + b2_ref[...]
    o_ref[0] = x + y                                    # residual


def _layer_cost_estimate(B, L, dim, heads, dim_head, mlp_dim):
    inner = heads * dim_head
    flops = 2 * B * L * (dim * 3 * inner            # qkv projection
                         + heads * L * dim_head * 2  # scores + p@v
                         + inner * dim               # output projection
                         + 2 * dim * mlp_dim)        # fc1 + fc2
    transcendentals = B * L * (heads * L + 2 * mlp_dim)   # softmax exp + GELU
    bytes_accessed = (2 * B * L * dim * 4                 # x in + out (f32)
                      + 2 * (dim * 3 * inner + inner * dim
                             + 2 * dim * mlp_dim)          # bf16 weights
                      + 4 * (3 * inner + 2 * dim + mlp_dim))
    return pl.CostEstimate(flops=flops, transcendentals=transcendentals,
                           bytes_accessed=bytes_accessed)


def _fused_layer(x, p, heads, dim_head, eps):
    B, L, dim = x.shape
    inner = heads * dim_head
    mlp_dim = p["w1_f"].shape[1]
    return pl.pallas_call(
        functools.partial(_fused_layer_kernel, heads=heads, dim_head=dim_head,
                          eps=eps),
        out_shape=jax.ShapeDtypeStruct((B, L, dim), jnp.float32),
        grid_spec=pltpu.PrefetchScalarGridSpec(
            num_scalar_prefetch=0,
            grid=(B,),
            in_specs=[
                pl.BlockSpec((1, L, dim), lambda b: (b, 0, 0)),
                pl.BlockSpec((dim, 3 * inner), lambda b: (0, 0)),
                pl.BlockSpec((1, 3 * inner), lambda b: (0, 0)),
                pl.BlockSpec((inner, dim), lambda b: (0, 0)),
                pl.BlockSpec((1, dim), lambda b: (0, 0)),
                pl.BlockSpec((dim, mlp_dim), lambda b: (0, 0)),
                pl.BlockSpec((1, mlp_dim), lambda b: (0, 0)),
                pl.BlockSpec((mlp_dim, dim), lambda b: (0, 0)),
                pl.BlockSpec((1, dim), lambda b: (0, 0)),
            ],
            out_specs=pl.BlockSpec((1, L, dim), lambda b: (b, 0, 0)),
        ),
        compiler_params=pltpu.CompilerParams(
            dimension_semantics=("parallel",)),
        cost_estimate=_layer_cost_estimate(B, L, dim, heads, dim_head, mlp_dim),
    )(x, p["wqkv_f"], p["bqkv_f"], p["wo_f"], p["bo_f"],
      p["w1_f"], p["b1_f"], p["w2_f"], p["b2_f"])


def prepare_transformer_params(layers, heads, dim_head):
    """Fold LN affine / softmax scale / head permutation into the weights ONCE
    (outside the forward) and pre-cast matmul weights to bf16."""
    inner = heads * dim_head
    dh = dim_head
    scale = float(dim_head) ** -0.5
    # column permutation folding the 'b h l d -> b l (d h)' rearrange into W_out
    perm = (np.arange(inner) % dh) * heads + (np.arange(inner) // dh)
    # fold 1/sqrt(dh) into the Q third of the qkv projection
    qscale = jnp.concatenate([jnp.full((inner,), scale, jnp.float32),
                              jnp.ones((2 * inner,), jnp.float32)])

    folded = []
    for p in layers:
        wqkv_f = (p["ln1_g"][:, None] * p["wqkv"].T) * qscale[None, :]
        bqkv_f = (p["ln1_b"] @ p["wqkv"].T)[None, :] * qscale[None, :]
        wo_f = p["wout"][:, perm].T                           # (inner, dim)
        folded.append(dict(
            wqkv_f=wqkv_f.astype(jnp.bfloat16),               # (dim, 3*inner)
            bqkv_f=bqkv_f.astype(jnp.float32),                # (1, 3*inner)
            wo_f=wo_f.astype(jnp.bfloat16),                   # (inner, dim)
            bo_f=p["bout"][None, :].astype(jnp.float32),      # (1, dim)
            w1_f=(p["ln2_g"][:, None] * p["w1"].T).astype(jnp.bfloat16),
            b1_f=(p["b1"] + p["ln2_b"] @ p["w1"].T)[None, :].astype(jnp.float32),
            w2_f=p["w2"].T.astype(jnp.bfloat16),              # (mlp_dim, dim)
            b2_f=p["b2"][None, :].astype(jnp.float32),        # (1, dim)
        ))
    return folded


def transformer_block_forward(x, folded_layers, heads, dim_head, eps=1e-5):
    """x: (B, L, dim) f32; folded_layers: output of prepare_transformer_params."""
    for p in folded_layers:
        x = _fused_layer(x, p, heads, dim_head, eps)
    return x


# ---------------------------------------------------------------------------
# Pure-JAX reference mirroring the PyTorch forward exactly (f32 everywhere).
# ---------------------------------------------------------------------------
def _reference_forward(x, layers, heads, dim_head, eps=1e-5):
    H, dh = heads, dim_head
    inner = H * dh
    scale = float(dh) ** -0.5

    def layernorm(t, g, b):
        mu = jnp.mean(t, axis=-1, keepdims=True)
        var = jnp.mean((t - mu) ** 2, axis=-1, keepdims=True)
        return (t - mu) / jnp.sqrt(var + eps) * g + b

    B, L, dim = x.shape
    for p in layers:
        xn = layernorm(x, p["ln1_g"], p["ln1_b"])
        qkv = xn @ p["wqkv"].T                                # (B, L, 3*inner)
        q, k, v = jnp.split(qkv, 3, axis=-1)

        def to_heads(t):
            return t.reshape(B, L, H, dh).transpose(0, 2, 1, 3)

        q, k, v = map(to_heads, (q, k, v))
        attn = jnp.einsum("bhid,bhjd->bhij", q, k) * scale
        attn = jax.nn.softmax(attn, axis=-1)
        att = jnp.einsum("bhij,bhjd->bhid", attn, v)          # (B, H, L, dh)
        att = att.transpose(0, 2, 3, 1).reshape(B, L, inner)  # (dim_head heads)
        x = x + (att @ p["wout"].T + p["bout"])

        xn = layernorm(x, p["ln2_g"], p["ln2_b"])
        h = xn @ p["w1"].T + p["b1"]
        h = jax.nn.gelu(h, approximate=False)                 # exact GELU (nn.GELU)
        x = x + (h @ p["w2"].T + p["b2"])
    return x


if __name__ == "__main__":
    # TransformerBlock(dim=128, depth=2, heads=4, dim_head=32, mlp_dim=256)
    B, L, dim = 2, 128, 128
    heads, dim_head = 4, 32
    mlp_dim = 256
    depth = 2
    inner = heads * dim_head

    key = jax.random.PRNGKey(0)
    layers = []
    for _ in range(depth):
        key, *ks = jax.random.split(key, 11)
        layers.append(dict(
            ln1_g=1.0 + 0.1 * jax.random.normal(ks[0], (dim,), jnp.float32),
            ln1_b=0.1 * jax.random.normal(ks[1], (dim,), jnp.float32),
            wqkv=jax.random.normal(ks[2], (3 * inner, dim), jnp.float32)
                 * (1.0 / np.sqrt(dim)),
            wout=jax.random.normal(ks[3], (dim, inner), jnp.float32)
                 * (1.0 / np.sqrt(inner)),
            bout=0.1 * jax.random.normal(ks[4], (dim,), jnp.float32),
            ln2_g=1.0 + 0.1 * jax.random.normal(ks[5], (dim,), jnp.float32),
            ln2_b=0.1 * jax.random.normal(ks[6], (dim,), jnp.float32),
            w1=jax.random.normal(ks[7], (mlp_dim, dim), jnp.float32)
               * (1.0 / np.sqrt(dim)),
            b1=0.1 * jax.random.normal(ks[8], (mlp_dim,), jnp.float32),
            w2=jax.random.normal(ks[9], (dim, mlp_dim), jnp.float32)
               * (1.0 / np.sqrt(mlp_dim)),
            b2=jnp.zeros((dim,), jnp.float32),
        ))
    key, kx = jax.random.split(key)
    x = jax.random.normal(kx, (B, L, dim), dtype=jnp.float32)

    # Weight folding / bf16 cast done once, outside the jitted forward.
    folded = prepare_transformer_params(layers, heads, dim_head)

    fwd = jax.jit(functools.partial(transformer_block_forward,
                                    heads=heads, dim_head=dim_head))
    y = jax.block_until_ready(fwd(x, folded))

    y_ref = jax.block_until_ready(_reference_forward(x, layers, heads, dim_head))
    # bf16 matmul operands (f32 accumulation) -> loosened tolerance vs f32 ref.
    np.testing.assert_allclose(np.asarray(y), np.asarray(y_ref),
                               rtol=5e-2, atol=5e-2)
    assert y.shape == (B, L, dim)
    print("KERNEL_OK")
</pallas_src>

<mosaic_0001>
module attributes {stable_mosaic.version = 11 : i64} {
  func.func @_fused_layer_kernel(%arg0: i32, %arg1: memref<1x128x128xf32, #tpu.memory_space<vmem>>, %arg2: memref<128x384xbf16, #tpu.memory_space<vmem>>, %arg3: memref<1x384xf32, #tpu.memory_space<vmem>>, %arg4: memref<128x128xbf16, #tpu.memory_space<vmem>>, %arg5: memref<1x128xf32, #tpu.memory_space<vmem>>, %arg6: memref<128x256xbf16, #tpu.memory_space<vmem>>, %arg7: memref<1x256xf32, #tpu.memory_space<vmem>>, %arg8: memref<256x128xbf16, #tpu.memory_space<vmem>>, %arg9: memref<1x128xf32, #tpu.memory_space<vmem>>, %arg10: memref<1x128x128xf32, #tpu.memory_space<vmem>>) attributes {dimension_semantics = [#tpu.dimension_semantics<parallel>], iteration_bounds = array<i64: 2>, scalar_prefetch = 0 : i64, scratch_operands = 0 : i64, tpu.core_type = #tpu.core_type<tc>, window_params = [{transform_indices = @transform_0, window_bounds = array<i64: 1, 128, 128>}, {pipeline_mode = #tpu.pipeline_mode<synchronous>, transform_indices = @transform_1, window_bounds = array<i64: 128, 384>}, {pipeline_mode = #tpu.pipeline_mode<synchronous>, transform_indices = @transform_2, window_bounds = array<i64: 1, 384>}, {pipeline_mode = #tpu.pipeline_mode<synchronous>, transform_indices = @transform_3, window_bounds = array<i64: 128, 128>}, {pipeline_mode = #tpu.pipeline_mode<synchronous>, transform_indices = @transform_4, window_bounds = array<i64: 1, 128>}, {pipeline_mode = #tpu.pipeline_mode<synchronous>, transform_indices = @transform_5, window_bounds = array<i64: 128, 256>}, {pipeline_mode = #tpu.pipeline_mode<synchronous>, transform_indices = @transform_6, window_bounds = array<i64: 1, 256>}, {pipeline_mode = #tpu.pipeline_mode<synchronous>, transform_indices = @transform_7, window_bounds = array<i64: 256, 128>}, {pipeline_mode = #tpu.pipeline_mode<synchronous>, transform_indices = @transform_8, window_bounds = array<i64: 1, 128>}, {transform_indices = @transform_9, window_bounds = array<i64: 1, 128, 128>}]} {
    %c0 = arith.constant 0 : index
    %c0_0 = arith.constant 0 : index
    %c0_1 = arith.constant 0 : index
    %0 = vector.load %arg1[%c0, %c0_0, %c0_1] : memref<1x128x128xf32, #tpu.memory_space<vmem>>, vector<1x128x128xf32>
    %1 = vector.shape_cast %0 : vector<1x128x128xf32> to vector<128x128xf32>
    %cst = arith.constant dense<0.000000e+00> : vector<128xf32>
    %2 = vector.multi_reduction <add>, %1, %cst [1] : vector<128x128xf32> to vector<128xf32>
    %3 = vector.shape_cast %2 : vector<128xf32> to vector<128x1xf32>
    %cst_2 = arith.constant 1.280000e+02 : f32
    %4 = vector.broadcast %cst_2 : f32 to vector<128x1xf32>
    %5 = arith.divf %3, %4 : vector<128x1xf32>
    %6 = vector.broadcast %5 : vector<128x1xf32> to vector<128x128xf32>
    %7 = arith.subf %1, %6 : vector<128x128xf32>
    %8 = arith.mulf %7, %7 : vector<128x128xf32>
    %cst_3 = arith.constant dense<0.000000e+00> : vector<128xf32>
    %9 = vector.multi_reduction <add>, %8, %cst_3 [1] : vector<128x128xf32> to vector<128xf32>
    %10 = vector.shape_cast %9 : vector<128xf32> to vector<128x1xf32>
    %cst_4 = arith.constant 1.280000e+02 : f32
    %11 = vector.broadcast %cst_4 : f32 to vector<128x1xf32>
    %12 = arith.divf %10, %11 : vector<128x1xf32>
    %cst_5 = arith.constant 9.99999974E-6 : f32
    %13 = vector.broadcast %cst_5 : f32 to vector<128x1xf32>
    %14 = arith.addf %12, %13 : vector<128x1xf32>
    %15 = math.rsqrt %14 : vector<128x1xf32>
    %16 = vector.broadcast %15 : vector<128x1xf32> to vector<128x128xf32>
    %17 = arith.mulf %7, %16 : vector<128x128xf32>
    %18 = arith.truncf %17 : vector<128x128xf32> to vector<128x128xbf16>
    %c0_6 = arith.constant 0 : index
    %c0_7 = arith.constant 0 : index
    %19 = vector.load %arg2[%c0_6, %c0_7] : memref<128x384xbf16, #tpu.memory_space<vmem>>, vector<128x384xbf16>
    %cst_8 = arith.constant dense<0.000000e+00> : vector<128x384xf32>
    %20 = tpu.matmul %18, %19, %cst_8 {dimension_numbers = #tpu.dot_dimension_numbers<[1], [0], [0], [1], [0, 0, 1, 1], [], []>} : vector<128x128xbf16>, vector<128x384xbf16>, vector<128x384xf32> -> vector<128x384xf32>
    %c0_9 = arith.constant 0 : index
    %c0_10 = arith.constant 0 : index
    %21 = vector.load %arg3[%c0_9, %c0_10] : memref<1x384xf32, #tpu.memory_space<vmem>>, vector<1x384xf32>
    %22 = vector.broadcast %21 : vector<1x384xf32> to vector<128x384xf32>
    %23 = arith.addf %20, %22 : vector<128x384xf32>
    %c0_11 = arith.constant 0 : index
    %c0_12 = arith.constant 0 : index
    %24 = vector.load %arg4[%c0_11, %c0_12] : memref<128x128xbf16, #tpu.memory_space<vmem>>, vector<128x128xbf16>
    %cst_13 = arith.constant 0.000000e+00 : f32
    %25 = vector.broadcast %cst_13 : f32 to vector<128x128xf32>
    %26 = vector.extract_strided_slice %23 {offsets = [0, 0], sizes = [128, 32], strides = [1, 1]} : vector<128x384xf32> to vector<128x32xf32>
    %27 = arith.truncf %26 : vector<128x32xf32> to vector<128x32xbf16>
    %28 = vector.extract_strided_slice %23 {offsets = [0, 128], sizes = [128, 32], strides = [1, 1]} : vector<128x384xf32> to vector<128x32xf32>
    %29 = arith.truncf %28 : vector<128x32xf32> to vector<128x32xbf16>
    %30 = vector.extract_strided_slice %23 {offsets = [0, 256], sizes = [128, 32], strides = [1, 1]} : vector<128x384xf32> to vector<128x32xf32>
    %31 = arith.truncf %30 : vector<128x32xf32> to vector<128x32xbf16>
    %cst_14 = arith.constant dense<0.000000e+00> : vector<128x128xf32>
    %32 = tpu.matmul %27, %29, %cst_14 {dimension_numbers = #tpu.dot_dimension_numbers<[1], [1], [0], [0], [0, 0, 1, 0], [], []>} : vector<128x32xbf16>, vector<128x32xbf16>, vector<128x128xf32> -> vector<128x128xf32>
    %cst_15 = arith.constant dense<0xFF800000> : vector<128xf32>
    %33 = vector.multi_reduction <maximumf>, %32, %cst_15 [1] : vector<128x128xf32> to vector<128xf32>
    %34 = vector.shape_cast %33 : vector<128xf32> to vector<128x1xf32>
    %35 = vector.broadcast %34 : vector<128x1xf32> to vector<128x128xf32>
    %36 = arith.subf %32, %35 : vector<128x128xf32>
    %37 = math.exp %36 : vector<128x128xf32>
    %cst_16 = arith.constant dense<0.000000e+00> : vector<128xf32>
    %38 = vector.multi_reduction <add>, %37, %cst_16 [1] : vector<128x128xf32> to vector<128xf32>
    %39 = vector.shape_cast %38 : vector<128xf32> to vector<128x1xf32>
    %40 = tpu.reciprocal %39 {approx = true} : vector<128x1xf32> -> vector<128x1xf32>
    %41 = arith.truncf %37 : vector<128x128xf32> to vector<128x128xbf16>
    %cst_17 = arith.constant dense<0.000000e+00> : vector<128x32xf32>
    %42 = tpu.matmul %41, %31, %cst_17 {dimension_numbers = #tpu.dot_dimension_numbers<[1], [0], [0], [1], [0, 0, 1, 1], [], []>} : vector<128x128xbf16>, vector<128x32xbf16>, vector<128x32xf32> -> vector<128x32xf32>
    %43 = vector.broadcast %40 : vector<128x1xf32> to vector<128x32xf32>
    %44 = arith.mulf %42, %43 : vector<128x32xf32>
    %45 = arith.truncf %44 : vector<128x32xf32> to vector<128x32xbf16>
    %46 = vector.extract_strided_slice %24 {offsets = [0, 0], sizes = [32, 128], strides = [1, 1]} : vector<128x128xbf16> to vector<32x128xbf16>
    %cst_18 = arith.constant dense<0.000000e+00> : vector<128x128xf32>
    %47 = tpu.matmul %45, %46, %cst_18 {dimension_numbers = #tpu.dot_dimension_numbers<[1], [0], [0], [1], [0, 0, 1, 1], [], []>} : vector<128x32xbf16>, vector<32x128xbf16>, vector<128x128xf32> -> vector<128x128xf32>
    %48 = arith.addf %25, %47 : vector<128x128xf32>
    %49 = vector.extract_strided_slice %23 {offsets = [0, 32], sizes = [128, 32], strides = [1, 1]} : vector<128x384xf32> to vector<128x32xf32>
    %50 = arith.truncf %49 : vector<128x32xf32> to vector<128x32xbf16>
    %51 = vector.extract_strided_slice %23 {offsets = [0, 160], sizes = [128, 32], strides = [1, 1]} : vector<128x384xf32> to vector<128x32xf32>
    %52 = arith.truncf %51 : vector<128x32xf32> to vector<128x32xbf16>
    %53 = vector.extract_strided_slice %23 {offsets = [0, 288], sizes = [128, 32], strides = [1, 1]} : vector<128x384xf32> to vector<128x32xf32>
    %54 = arith.truncf %53 : vector<128x32xf32> to vector<128x32xbf16>
    %cst_19 = arith.constant dense<0.000000e+00> : vector<128x128xf32>
    %55 = tpu.matmul %50, %52, %cst_19 {dimension_numbers = #tpu.dot_dimension_numbers<[1], [1], [0], [0], [0, 0, 1, 0], [], []>} : vector<128x32xbf16>, vector<128x32xbf16>, vector<128x128xf32> -> vector<128x128xf32>
    %cst_20 = arith.constant dense<0xFF800000> : vector<128xf32>
    %56 = vector.multi_reduction <maximumf>, %55, %cst_20 [1] : vector<128x128xf32> to vector<128xf32>
    %57 = vector.shape_cast %56 : vector<128xf32> to vector<128x1xf32>
    %58 = vector.broadcast %57 : vector<128x1xf32> to vector<128x128xf32>
    %59 = arith.subf %55, %58 : vector<128x128xf32>
    %60 = math.exp %59 : vector<128x128xf32>
    %cst_21 = arith.constant dense<0.000000e+00> : vector<128xf32>
    %61 = vector.multi_reduction <add>, %60, %cst_21 [1] : vector<128x128xf32> to vector<128xf32>
    %62 = vector.shape_cast %61 : vector<128xf32> to vector<128x1xf32>
    %63 = tpu.reciprocal %62 {approx = true} : vector<128x1xf32> -> vector<128x1xf32>
    %64 = arith.truncf %60 : vector<128x128xf32> to vector<128x128xbf16>
    %cst_22 = arith.constant dense<0.000000e+00> : vector<128x32xf32>
    %65 = tpu.matmul %64, %54, %cst_22 {dimension_numbers = #tpu.dot_dimension_numbers<[1], [0], [0], [1], [0, 0, 1, 1], [], []>} : vector<128x128xbf16>, vector<128x32xbf16>, vector<128x32xf32> -> vector<128x32xf32>
    %66 = vector.broadcast %63 : vector<128x1xf32> to vector<128x32xf32>
    %67 = arith.mulf %65, %66 : vector<128x32xf32>
    %68 = arith.truncf %67 : vector<128x32xf32> to vector<128x32xbf16>
    %69 = vector.extract_strided_slice %24 {offsets = [32, 0], sizes = [32, 128], strides = [1, 1]} : vector<128x128xbf16> to vector<32x128xbf16>
    %cst_23 = arith.constant dense<0.000000e+00> : vector<128x128xf32>
    %70 = tpu.matmul %68, %69, %cst_23 {dimension_numbers = #tpu.dot_dimension_numbers<[1], [0], [0], [1], [0, 0, 1, 1], [], []>} : vector<128x32xbf16>, vector<32x128xbf16>, vector<128x128xf32> -> vector<128x128xf32>
    %71 = arith.addf %48, %70 : vector<128x128xf32>
    %72 = vector.extract_strided_slice %23 {offsets = [0, 64], sizes = [128, 32], strides = [1, 1]} : vector<128x384xf32> to vector<128x32xf32>
    %73 = arith.truncf %72 : vector<128x32xf32> to vector<128x32xbf16>
    %74 = vector.extract_strided_slice %23 {offsets = [0, 192], sizes = [128, 32], strides = [1, 1]} : vector<128x384xf32> to vector<128x32xf32>
    %75 = arith.truncf %74 : vector<128x32xf32> to vector<128x32xbf16>
    %76 = vector.extract_strided_slice %23 {offsets = [0, 320], sizes = [128, 32], strides = [1, 1]} : vector<128x384xf32> to vector<128x32xf32>
    %77 = arith.truncf %76 : vector<128x32xf32> to vector<128x32xbf16>
    %cst_24 = arith.constant dense<0.000000e+00> : vector<128x128xf32>
    %78 = tpu.matmul %73, %75, %cst_24 {dimension_numbers = #tpu.dot_dimension_numbers<[1], [1], [0], [0], [0, 0, 1, 0], [], []>} : vector<128x32xbf16>, vector<128x32xbf16>, vector<128x128xf32> -> vector<128x128xf32>
    %cst_25 = arith.constant dense<0xFF800000> : vector<128xf32>
    %79 = vector.multi_reduction <maximumf>, %78, %cst_25 [1] : vector<128x128xf32> to vector<128xf32>
    %80 = vector.shape_cast %79 : vector<128xf32> to vector<128x1xf32>
    %81 = vector.broadcast %80 : vector<128x1xf32> to vector<128x128xf32>
    %82 = arith.subf %78, %81 : vector<128x128xf32>
    %83 = math.exp %82 : vector<128x128xf32>
    %cst_26 = arith.constant dense<0.000000e+00> : vector<128xf32>
    %84 = vector.multi_reduction <add>, %83, %cst_26 [1] : vector<128x128xf32> to vector<128xf32>
    %85 = vector.shape_cast %84 : vector<128xf32> to vector<128x1xf32>
    %86 = tpu.reciprocal %85 {approx = true} : vector<128x1xf32> -> vector<128x1xf32>
    %87 = arith.truncf %83 : vector<128x128xf32> to vector<128x128xbf16>
    %cst_27 = arith.constant dense<0.000000e+00> : vector<128x32xf32>
    %88 = tpu.matmul %87, %77, %cst_27 {dimension_numbers = #tpu.dot_dimension_numbers<[1], [0], [0], [1], [0, 0, 1, 1], [], []>} : vector<128x128xbf16>, vector<128x32xbf16>, vector<128x32xf32> -> vector<128x32xf32>
    %89 = vector.broadcast %86 : vector<128x1xf32> to vector<128x32xf32>
    %90 = arith.mulf %88, %89 : vector<128x32xf32>
    %91 = arith.truncf %90 : vector<128x32xf32> to vector<128x32xbf16>
    %92 = vector.extract_strided_slice %24 {offsets = [64, 0], sizes = [32, 128], strides = [1, 1]} : vector<128x128xbf16> to vector<32x128xbf16>
    %cst_28 = arith.constant dense<0.000000e+00> : vector<128x128xf32>
    %93 = tpu.matmul %91, %92, %cst_28 {dimension_numbers = #tpu.dot_dimension_numbers<[1], [0], [0], [1], [0, 0, 1, 1], [], []>} : vector<128x32xbf16>, vector<32x128xbf16>, vector<128x128xf32> -> vector<128x128xf32>
    %94 = arith.addf %71, %93 : vector<128x128xf32>
    %95 = vector.extract_strided_slice %23 {offsets = [0, 96], sizes = [128, 32], strides = [1, 1]} : vector<128x384xf32> to vector<128x32xf32>
    %96 = arith.truncf %95 : vector<128x32xf32> to vector<128x32xbf16>
    %97 = vector.extract_strided_slice %23 {offsets = [0, 224], sizes = [128, 32], strides = [1, 1]} : vector<128x384xf32> to vector<128x32xf32>
    %98 = arith.truncf %97 : vector<128x32xf32> to vector<128x32xbf16>
    %99 = vector.extract_strided_slice %23 {offsets = [0, 352], sizes = [128, 32], strides = [1, 1]} : vector<128x384xf32> to vector<128x32xf32>
    %100 = arith.truncf %99 : vector<128x32xf32> to vector<128x32xbf16>
    %cst_29 = arith.constant dense<0.000000e+00> : vector<128x128xf32>
    %101 = tpu.matmul %96, %98, %cst_29 {dimension_numbers = #tpu.dot_dimension_numbers<[1], [1], [0], [0], [0, 0, 1, 0], [], []>} : vector<128x32xbf16>, vector<128x32xbf16>, vector<128x128xf32> -> vector<128x128xf32>
    %cst_30 = arith.constant dense<0xFF800000> : vector<128xf32>
    %102 = vector.multi_reduction <maximumf>, %101, %cst_30 [1] : vector<128x128xf32> to vector<128xf32>
    %103 = vector.shape_cast %102 : vector<128xf32> to vector<128x1xf32>
    %104 = vector.broadcast %103 : vector<128x1xf32> to vector<128x128xf32>
    %105 = arith.subf %101, %104 : vector<128x128xf32>
    %106 = math.exp %105 : vector<128x128xf32>
    %cst_31 = arith.constant dense<0.000000e+00> : vector<128xf32>
    %107 = vector.multi_reduction <add>, %106, %cst_31 [1] : vector<128x128xf32> to vector<128xf32>
    %108 = vector.shape_cast %107 : vector<128xf32> to vector<128x1xf32>
    %109 = tpu.reciprocal %108 {approx = true} : vector<128x1xf32> -> vector<128x1xf32>
    %110 = arith.truncf %106 : vector<128x128xf32> to vector<128x128xbf16>
    %cst_32 = arith.constant dense<0.000000e+00> : vector<128x32xf32>
    %111 = tpu.matmul %110, %100, %cst_32 {dimension_numbers = #tpu.dot_dimension_numbers<[1], [0], [0], [1], [0, 0, 1, 1], [], []>} : vector<128x128xbf16>, vector<128x32xbf16>, vector<128x32xf32> -> vector<128x32xf32>
    %112 = vector.broadcast %109 : vector<128x1xf32> to vector<128x32xf32>
    %113 = arith.mulf %111, %112 : vector<128x32xf32>
    %114 = arith.truncf %113 : vector<128x32xf32> to vector<128x32xbf16>
    %115 = vector.extract_strided_slice %24 {offsets = [96, 0], sizes = [32, 128], strides = [1, 1]} : vector<128x128xbf16> to vector<32x128xbf16>
    %cst_33 = arith.constant dense<0.000000e+00> : vector<128x128xf32>
    %116 = tpu.matmul %114, %115, %cst_33 {dimension_numbers = #tpu.dot_dimension_numbers<[1], [0], [0], [1], [0, 0, 1, 1], [], []>} : vector<128x32xbf16>, vector<32x128xbf16>, vector<128x128xf32> -> vector<128x128xf32>
    %117 = arith.addf %94, %116 : vector<128x128xf32>
    %118 = arith.addf %1, %117 : vector<128x128xf32>
    %c0_34 = arith.constant 0 : index
    %c0_35 = arith.constant 0 : index
    %119 = vector.load %arg5[%c0_34, %c0_35] : memref<1x128xf32, #tpu.memory_space<vmem>>, vector<1x128xf32>
    %120 = vector.broadcast %119 : vector<1x128xf32> to vector<128x128xf32>
    %121 = arith.addf %118, %120 : vector<128x128xf32>
    %cst_36 = arith.constant dense<0.000000e+00> : vector<128xf32>
    %122 = vector.multi_reduction <add>, %121, %cst_36 [1] : vector<128x128xf32> to vector<128xf32>
    %123 = vector.shape_cast %122 : vector<128xf32> to vector<128x1xf32>
    %cst_37 = arith.constant 1.280000e+02 : f32
    %124 = vector.broadcast %cst_37 : f32 to vector<128x1xf32>
    %125 = arith.divf %123, %124 : vector<128x1xf32>
    %126 = vector.broadcast %125 : vector<128x1xf32> to vector<128x128xf32>
    %127 = arith.subf %121, %126 : vector<128x128xf32>
    %128 = arith.mulf %127, %127 : vector<128x128xf32>
    %cst_38 = arith.constant dense<0.000000e+00> : vector<128xf32>
    %129 = vector.multi_reduction <add>, %128, %cst_38 [1] : vector<128x128xf32> to vector<128xf32>
    %130 = vector.shape_cast %129 : vector<128xf32> to vector<128x1xf32>
    %cst_39 = arith.constant 1.280000e+02 : f32
    %131 = vector.broadcast %cst_39 : f32 to vector<128x1xf32>
    %132 = arith.divf %130, %131 : vector<128x1xf32>
    %cst_40 = arith.constant 9.99999974E-6 : f32
    %133 = vector.broadcast %cst_40 : f32 to vector<128x1xf32>
    %134 = arith.addf %132, %133 : vector<128x1xf32>
    %135 = math.rsqrt %134 : vector<128x1xf32>
    %136 = vector.broadcast %135 : vector<128x1xf32> to vector<128x128xf32>
    %137 = arith.mulf %127, %136 : vector<128x128xf32>
    %138 = arith.truncf %137 : vector<128x128xf32> to vector<128x128xbf16>
    %c0_41 = arith.constant 0 : index
    %c0_42 = arith.constant 0 : index
    %139 = vector.load %arg6[%c0_41, %c0_42] : memref<128x256xbf16, #tpu.memory_space<vmem>>, vector<128x256xbf16>
    %cst_43 = arith.constant dense<0.000000e+00> : vector<128x256xf32>
    %140 = tpu.matmul %138, %139, %cst_43 {dimension_numbers = #tpu.dot_dimension_numbers<[1], [0], [0], [1], [0, 0, 1, 1], [], []>} : vector<128x128xbf16>, vector<128x256xbf16>, vector<128x256xf32> -> vector<128x256xf32>
    %c0_44 = arith.constant 0 : index
    %c0_45 = arith.constant 0 : index
    %141 = vector.load %arg7[%c0_44, %c0_45] : memref<1x256xf32, #tpu.memory_space<vmem>>, vector<1x256xf32>
    %142 = vector.broadcast %141 : vector<1x256xf32> to vector<128x256xf32>
    %143 = arith.addf %140, %142 : vector<128x256xf32>
    %cst_46 = arith.constant 5.000000e-01 : f32
    %144 = vector.broadcast %cst_46 : f32 to vector<128x256xf32>
    %145 = arith.mulf %144, %143 : vector<128x256xf32>
    %cst_47 = arith.constant 0.707106769 : f32
    %146 = vector.broadcast %cst_47 : f32 to vector<128x256xf32>
    %147 = arith.mulf %143, %146 : vector<128x256xf32>
    %148 = math.absf %147 : vector<128x256xf32>
    %cst_48 = arith.constant 0.327591091 : f32
    %149 = vector.broadcast %cst_48 : f32 to vector<128x256xf32>
    %150 = arith.mulf %149, %148 : vector<128x256xf32>
    %cst_49 = arith.constant 1.000000e+00 : f32
    %151 = vector.broadcast %cst_49 : f32 to vector<128x256xf32>
    %152 = arith.addf %151, %150 : vector<128x256xf32>
    %cst_50 = arith.constant 1.000000e+00 : f32
    %153 = vector.broadcast %cst_50 : f32 to vector<128x256xf32>
    %154 = arith.divf %153, %152 : vector<128x256xf32>
    %cst_51 = arith.constant 1.06140542 : f32
    %155 = vector.broadcast %cst_51 : f32 to vector<128x256xf32>
    %156 = arith.mulf %155, %154 : vector<128x256xf32>
    %cst_52 = arith.constant -1.45315206 : f32
    %157 = vector.broadcast %cst_52 : f32 to vector<128x256xf32>
    %158 = arith.addf %156, %157 : vector<128x256xf32>
    %159 = arith.mulf %158, %154 : vector<128x256xf32>
    %cst_53 = arith.constant 1.42141378 : f32
    %160 = vector.broadcast %cst_53 : f32 to vector<128x256xf32>
    %161 = arith.addf %159, %160 : vector<128x256xf32>
    %162 = arith.mulf %161, %154 : vector<128x256xf32>
    %cst_54 = arith.constant -0.284496725 : f32
    %163 = vector.broadcast %cst_54 : f32 to vector<128x256xf32>
    %164 = arith.addf %162, %163 : vector<128x256xf32>
    %165 = arith.mulf %164, %154 : vector<128x256xf32>
    %cst_55 = arith.constant 0.254829586 : f32
    %166 = vector.broadcast %cst_55 : f32 to vector<128x256xf32>
    %167 = arith.addf %165, %166 : vector<128x256xf32>
    %168 = arith.mulf %167, %154 : vector<128x256xf32>
    %cst_56 = arith.constant 0.000000e+00 : f32
    %169 = vector.broadcast %cst_56 : f32 to vector<128x256xf32>
    %170 = arith.subf %169, %148 : vector<128x256xf32>
    %171 = arith.mulf %170, %148 : vector<128x256xf32>
    %172 = math.exp %171 : vector<128x256xf32>
    %173 = arith.mulf %168, %172 : vector<128x256xf32>
    %cst_57 = arith.constant 1.000000e+00 : f32
    %174 = vector.broadcast %cst_57 : f32 to vector<128x256xf32>
    %175 = arith.subf %174, %173 : vector<128x256xf32>
    %cst_58 = arith.constant 0.000000e+00 : f32
    %176 = vector.broadcast %cst_58 : f32 to vector<128x256xf32>
    %177 = arith.cmpf oge, %147, %176 : vector<128x256xf32>
    %cst_59 = arith.constant 0.000000e+00 : f32
    %178 = vector.broadcast %cst_59 : f32 to vector<128x256xf32>
    %179 = arith.subf %178, %175 : vector<128x256xf32>
    %180 = arith.select %177, %175, %179 : vector<128x256xi1>, vector<128x256xf32>
    %cst_60 = arith.constant 1.000000e+00 : f32
    %181 = vector.broadcast %cst_60 : f32 to vector<128x256xf32>
    %182 = arith.addf %181, %180 : vector<128x256xf32>
    %183 = arith.mulf %145, %182 : vector<128x256xf32>
    %184 = arith.truncf %183 : vector<128x256xf32> to vector<128x256xbf16>
    %c0_61 = arith.constant 0 : index
    %c0_62 = arith.constant 0 : index
    %185 = vector.load %arg8[%c0_61, %c0_62] : memref<256x128xbf16, #tpu.memory_space<vmem>>, vector<256x128xbf16>
    %cst_63 = arith.constant dense<0.000000e+00> : vector<128x128xf32>
    %186 = tpu.matmul %184, %185, %cst_63 {dimension_numbers = #tpu.dot_dimension_numbers<[1], [0], [0], [1], [0, 0, 1, 1], [], []>} : vector<128x256xbf16>, vector<256x128xbf16>, vector<128x128xf32> -> vector<128x128xf32>
    %c0_64 = arith.constant 0 : index
    %c0_65 = arith.constant 0 : index
    %187 = vector.load %arg9[%c0_64, %c0_65] : memref<1x128xf32, #tpu.memory_space<vmem>>, vector<1x128xf32>
    %188 = vector.broadcast %187 : vector<1x128xf32> to vector<128x128xf32>
    %189 = arith.addf %186, %188 : vector<128x128xf32>
    %190 = arith.addf %121, %189 : vector<128x128xf32>
    %c0_66 = arith.constant 0 : index
    %c0_67 = arith.constant 0 : index
    %c0_68 = arith.constant 0 : index
    %191 = vector.load %arg10[%c0_66, %c0_67, %c0_68] : memref<1x128x128xf32, #tpu.memory_space<vmem>>, vector<1x128x128xf32>
    %192 = vector.shape_cast %191 : vector<1x128x128xf32> to vector<128x128xf32>
    %193 = vector.shape_cast %190 : vector<128x128xf32> to vector<1x128x128xf32>
    tpu.vector_store %arg10[%c0_66, %c0_67, %c0_68], %193 {strides = array<i32>} : memref<1x128x128xf32, #tpu.memory_space<vmem>>, vector<1x128x128xf32>,
    return
  }
  func.func @transform_0(%arg0: i32) -> (i32, i32, i32) {
    %c0_i32 = arith.constant 0 : i32
    %c0_i32_0 = arith.constant 0 : i32
    %c0_i32_1 = arith.constant 0 : i32
    return %arg0, %c0_i32, %c0_i32_0 : i32, i32, i32
  }
  func.func @transform_1(%arg0: i32) -> (i32, i32) {
    %c0_i32 = arith.constant 0 : i32
    %c0_i32_0 = arith.constant 0 : i32
    %c0_i32_1 = arith.constant 0 : i32
    return %c0_i32, %c0_i32_0 : i32, i32
  }
  func.func @transform_2(%arg0: i32) -> (i32, i32) {
    %c0_i32 = arith.constant 0 : i32
    %c0_i32_0 = arith.constant 0 : i32
    %c0_i32_1 = arith.constant 0 : i32
    return %c0_i32, %c0_i32_0 : i32, i32
  }
  func.func @transform_3(%arg0: i32) -> (i32, i32) {
    %c0_i32 = arith.constant 0 : i32
    %c0_i32_0 = arith.constant 0 : i32
    %c0_i32_1 = arith.constant 0 : i32
    return %c0_i32, %c0_i32_0 : i32, i32
  }
  func.func @transform_4(%arg0: i32) -> (i32, i32) {
    %c0_i32 = arith.constant 0 : i32
    %c0_i32_0 = arith.constant 0 : i32
    %c0_i32_1 = arith.constant 0 : i32
    return %c0_i32, %c0_i32_0 : i32, i32
  }
  func.func @transform_5(%arg0: i32) -> (i32, i32) {
    %c0_i32 = arith.constant 0 : i32
    %c0_i32_0 = arith.constant 0 : i32
    %c0_i32_1 = arith.constant 0 : i32
    return %c0_i32, %c0_i32_0 : i32, i32
  }
  func.func @transform_6(%arg0: i32) -> (i32, i32) {
    %c0_i32 = arith.constant 0 : i32
    %c0_i32_0 = arith.constant 0 : i32
    %c0_i32_1 = arith.constant 0 : i32
    return %c0_i32, %c0_i32_0 : i32, i32
  }
  func.func @transform_7(%arg0: i32) -> (i32, i32) {
    %c0_i32 = arith.constant 0 : i32
    %c0_i32_0 = arith.constant 0 : i32
    %c0_i32_1 = arith.constant 0 : i32
    return %c0_i32, %c0_i32_0 : i32, i32
  }
  func.func @transform_8(%arg0: i32) -> (i32, i32) {
    %c0_i32 = arith.constant 0 : i32
    %c0_i32_0 = arith.constant 0 : i32
    %c0_i32_1 = arith.constant 0 : i32
    return %c0_i32, %c0_i32_0 : i32, i32
  }
  func.func @transform_9(%arg0: i32) -> (i32, i32, i32) {
    %c0_i32 = arith.constant 0 : i32
    %c0_i32_0 = arith.constant 0 : i32
    %c0_i32_1 = arith.constant 0 : i32
    return %arg0, %c0_i32, %c0_i32_0 : i32, i32, i32
  }
}

module attributes {stable_mosaic.version = 11 : i64} {
  func.func @_fused_layer_kernel(%arg0: i32, %arg1: memref<1x128x128xf32, #tpu.memory_space<vmem>>, %arg2: memref<128x384xbf16, #tpu.memory_space<vmem>>, %arg3: memref<1x384xf32, #tpu.memory_space<vmem>>, %arg4: memref<128x128xbf16, #tpu.memory_space<vmem>>, %arg5: memref<1x128xf32, #tpu.memory_space<vmem>>, %arg6: memref<128x256xbf16, #tpu.memory_space<vmem>>, %arg7: memref<1x256xf32, #tpu.memory_space<vmem>>, %arg8: memref<256x128xbf16, #tpu.memory_space<vmem>>, %arg9: memref<1x128xf32, #tpu.memory_space<vmem>>, %arg10: memref<1x128x128xf32, #tpu.memory_space<vmem>>) attributes {dimension_semantics = [#tpu.dimension_semantics<parallel>], iteration_bounds = array<i64: 2>, scalar_prefetch = 0 : i64, scratch_operands = 0 : i64, tpu.core_type = #tpu.core_type<tc>, window_params = [{transform_indices = @transform_0, window_bounds = array<i64: 1, 128, 128>}, {pipeline_mode = #tpu.pipeline_mode<synchronous>, transform_indices = @transform_1, window_bounds = array<i64: 128, 384>}, {pipeline_mode = #tpu.pipeline_mode<synchronous>, transform_indices = @transform_2, window_bounds = array<i64: 1, 384>}, {pipeline_mode = #tpu.pipeline_mode<synchronous>, transform_indices = @transform_3, window_bounds = array<i64: 128, 128>}, {pipeline_mode = #tpu.pipeline_mode<synchronous>, transform_indices = @transform_4, window_bounds = array<i64: 1, 128>}, {pipeline_mode = #tpu.pipeline_mode<synchronous>, transform_indices = @transform_5, window_bounds = array<i64: 128, 256>}, {pipeline_mode = #tpu.pipeline_mode<synchronous>, transform_indices = @transform_6, window_bounds = array<i64: 1, 256>}, {pipeline_mode = #tpu.pipeline_mode<synchronous>, transform_indices = @transform_7, window_bounds = array<i64: 256, 128>}, {pipeline_mode = #tpu.pipeline_mode<synchronous>, transform_indices = @transform_8, window_bounds = array<i64: 1, 128>}, {transform_indices = @transform_9, window_bounds = array<i64: 1, 128, 128>}]} {
    %c0 = arith.constant 0 : index
    %c0_0 = arith.constant 0 : index
    %c0_1 = arith.constant 0 : index
    %0 = vector.load %arg1[%c0, %c0_0, %c0_1] : memref<1x128x128xf32, #tpu.memory_space<vmem>>, vector<1x128x128xf32>
    %1 = vector.shape_cast %0 : vector<1x128x128xf32> to vector<128x128xf32>
    %cst = arith.constant dense<0.000000e+00> : vector<128xf32>
    %2 = vector.multi_reduction <add>, %1, %cst [1] : vector<128x128xf32> to vector<128xf32>
    %3 = vector.shape_cast %2 : vector<128xf32> to vector<128x1xf32>
    %cst_2 = arith.constant 1.280000e+02 : f32
    %4 = vector.broadcast %cst_2 : f32 to vector<128x1xf32>
    %5 = arith.divf %3, %4 : vector<128x1xf32>
    %6 = vector.broadcast %5 : vector<128x1xf32> to vector<128x128xf32>
    %7 = arith.subf %1, %6 : vector<128x128xf32>
    %8 = arith.mulf %7, %7 : vector<128x128xf32>
    %cst_3 = arith.constant dense<0.000000e+00> : vector<128xf32>
    %9 = vector.multi_reduction <add>, %8, %cst_3 [1] : vector<128x128xf32> to vector<128xf32>
    %10 = vector.shape_cast %9 : vector<128xf32> to vector<128x1xf32>
    %cst_4 = arith.constant 1.280000e+02 : f32
    %11 = vector.broadcast %cst_4 : f32 to vector<128x1xf32>
    %12 = arith.divf %10, %11 : vector<128x1xf32>
    %cst_5 = arith.constant 9.99999974E-6 : f32
    %13 = vector.broadcast %cst_5 : f32 to vector<128x1xf32>
    %14 = arith.addf %12, %13 : vector<128x1xf32>
    %15 = math.rsqrt %14 : vector<128x1xf32>
    %16 = vector.broadcast %15 : vector<128x1xf32> to vector<128x128xf32>
    %17 = arith.mulf %7, %16 : vector<128x128xf32>
    %18 = arith.truncf %17 : vector<128x128xf32> to vector<128x128xbf16>
    %c0_6 = arith.constant 0 : index
    %c0_7 = arith.constant 0 : index
    %19 = vector.load %arg2[%c0_6, %c0_7] : memref<128x384xbf16, #tpu.memory_space<vmem>>, vector<128x384xbf16>
    %cst_8 = arith.constant dense<0.000000e+00> : vector<128x384xf32>
    %20 = tpu.matmul %18, %19, %cst_8 {dimension_numbers = #tpu.dot_dimension_numbers<[1], [0], [0], [1], [0, 0, 1, 1], [], []>} : vector<128x128xbf16>, vector<128x384xbf16>, vector<128x384xf32> -> vector<128x384xf32>
    %c0_9 = arith.constant 0 : index
    %c0_10 = arith.constant 0 : index
    %21 = vector.load %arg3[%c0_9, %c0_10] : memref<1x384xf32, #tpu.memory_space<vmem>>, vector<1x384xf32>
    %22 = vector.broadcast %21 : vector<1x384xf32> to vector<128x384xf32>
    %23 = arith.addf %20, %22 : vector<128x384xf32>
    %c0_11 = arith.constant 0 : index
    %c0_12 = arith.constant 0 : index
    %24 = vector.load %arg4[%c0_11, %c0_12] : memref<128x128xbf16, #tpu.memory_space<vmem>>, vector<128x128xbf16>
    %cst_13 = arith.constant 0.000000e+00 : f32
    %25 = vector.broadcast %cst_13 : f32 to vector<128x128xf32>
    %26 = vector.extract_strided_slice %23 {offsets = [0, 0], sizes = [128, 32], strides = [1, 1]} : vector<128x384xf32> to vector<128x32xf32>
    %27 = arith.truncf %26 : vector<128x32xf32> to vector<128x32xbf16>
    %28 = vector.extract_strided_slice %23 {offsets = [0, 128], sizes = [128, 32], strides = [1, 1]} : vector<128x384xf32> to vector<128x32xf32>
    %29 = arith.truncf %28 : vector<128x32xf32> to vector<128x32xbf16>
    %30 = vector.extract_strided_slice %23 {offsets = [0, 256], sizes = [128, 32], strides = [1, 1]} : vector<128x384xf32> to vector<128x32xf32>
    %31 = arith.truncf %30 : vector<128x32xf32> to vector<128x32xbf16>
    %cst_14 = arith.constant dense<0.000000e+00> : vector<128x128xf32>
    %32 = tpu.matmul %27, %29, %cst_14 {dimension_numbers = #tpu.dot_dimension_numbers<[1], [1], [0], [0], [0, 0, 1, 0], [], []>} : vector<128x32xbf16>, vector<128x32xbf16>, vector<128x128xf32> -> vector<128x128xf32>
    %cst_15 = arith.constant dense<0xFF800000> : vector<128xf32>
    %33 = vector.multi_reduction <maximumf>, %32, %cst_15 [1] : vector<128x128xf32> to vector<128xf32>
    %34 = vector.shape_cast %33 : vector<128xf32> to vector<128x1xf32>
    %35 = vector.broadcast %34 : vector<128x1xf32> to vector<128x128xf32>
    %36 = arith.subf %32, %35 : vector<128x128xf32>
    %37 = math.exp %36 : vector<128x128xf32>
    %cst_16 = arith.constant dense<0.000000e+00> : vector<128xf32>
    %38 = vector.multi_reduction <add>, %37, %cst_16 [1] : vector<128x128xf32> to vector<128xf32>
    %39 = vector.shape_cast %38 : vector<128xf32> to vector<128x1xf32>
    %40 = tpu.reciprocal %39 {approx = true} : vector<128x1xf32> -> vector<128x1xf32>
    %41 = arith.truncf %37 : vector<128x128xf32> to vector<128x128xbf16>
    %cst_17 = arith.constant dense<0.000000e+00> : vector<128x32xf32>
    %42 = tpu.matmul %41, %31, %cst_17 {dimension_numbers = #tpu.dot_dimension_numbers<[1], [0], [0], [1], [0, 0, 1, 1], [], []>} : vector<128x128xbf16>, vector<128x32xbf16>, vector<128x32xf32> -> vector<128x32xf32>
    %43 = vector.broadcast %40 : vector<128x1xf32> to vector<128x32xf32>
    %44 = arith.mulf %42, %43 : vector<128x32xf32>
    %45 = arith.truncf %44 : vector<128x32xf32> to vector<128x32xbf16>
    %46 = vector.extract_strided_slice %24 {offsets = [0, 0], sizes = [32, 128], strides = [1, 1]} : vector<128x128xbf16> to vector<32x128xbf16>
    %cst_18 = arith.constant dense<0.000000e+00> : vector<128x128xf32>
    %47 = tpu.matmul %45, %46, %cst_18 {dimension_numbers = #tpu.dot_dimension_numbers<[1], [0], [0], [1], [0, 0, 1, 1], [], []>} : vector<128x32xbf16>, vector<32x128xbf16>, vector<128x128xf32> -> vector<128x128xf32>
    %48 = arith.addf %25, %47 : vector<128x128xf32>
    %49 = vector.extract_strided_slice %23 {offsets = [0, 32], sizes = [128, 32], strides = [1, 1]} : vector<128x384xf32> to vector<128x32xf32>
    %50 = arith.truncf %49 : vector<128x32xf32> to vector<128x32xbf16>
    %51 = vector.extract_strided_slice %23 {offsets = [0, 160], sizes = [128, 32], strides = [1, 1]} : vector<128x384xf32> to vector<128x32xf32>
    %52 = arith.truncf %51 : vector<128x32xf32> to vector<128x32xbf16>
    %53 = vector.extract_strided_slice %23 {offsets = [0, 288], sizes = [128, 32], strides = [1, 1]} : vector<128x384xf32> to vector<128x32xf32>
    %54 = arith.truncf %53 : vector<128x32xf32> to vector<128x32xbf16>
    %cst_19 = arith.constant dense<0.000000e+00> : vector<128x128xf32>
    %55 = tpu.matmul %50, %52, %cst_19 {dimension_numbers = #tpu.dot_dimension_numbers<[1], [1], [0], [0], [0, 0, 1, 0], [], []>} : vector<128x32xbf16>, vector<128x32xbf16>, vector<128x128xf32> -> vector<128x128xf32>
    %cst_20 = arith.constant dense<0xFF800000> : vector<128xf32>
    %56 = vector.multi_reduction <maximumf>, %55, %cst_20 [1] : vector<128x128xf32> to vector<128xf32>
    %57 = vector.shape_cast %56 : vector<128xf32> to vector<128x1xf32>
    %58 = vector.broadcast %57 : vector<128x1xf32> to vector<128x128xf32>
    %59 = arith.subf %55, %58 : vector<128x128xf32>
    %60 = math.exp %59 : vector<128x128xf32>
    %cst_21 = arith.constant dense<0.000000e+00> : vector<128xf32>
    %61 = vector.multi_reduction <add>, %60, %cst_21 [1] : vector<128x128xf32> to vector<128xf32>
    %62 = vector.shape_cast %61 : vector<128xf32> to vector<128x1xf32>
    %63 = tpu.reciprocal %62 {approx = true} : vector<128x1xf32> -> vector<128x1xf32>
    %64 = arith.truncf %60 : vector<128x128xf32> to vector<128x128xbf16>
    %cst_22 = arith.constant dense<0.000000e+00> : vector<128x32xf32>
    %65 = tpu.matmul %64, %54, %cst_22 {dimension_numbers = #tpu.dot_dimension_numbers<[1], [0], [0], [1], [0, 0, 1, 1], [], []>} : vector<128x128xbf16>, vector<128x32xbf16>, vector<128x32xf32> -> vector<128x32xf32>
    %66 = vector.broadcast %63 : vector<128x1xf32> to vector<128x32xf32>
    %67 = arith.mulf %65, %66 : vector<128x32xf32>
    %68 = arith.truncf %67 : vector<128x32xf32> to vector<128x32xbf16>
    %69 = vector.extract_strided_slice %24 {offsets = [32, 0], sizes = [32, 128], strides = [1, 1]} : vector<128x128xbf16> to vector<32x128xbf16>
    %cst_23 = arith.constant dense<0.000000e+00> : vector<128x128xf32>
    %70 = tpu.matmul %68, %69, %cst_23 {dimension_numbers = #tpu.dot_dimension_numbers<[1], [0], [0], [1], [0, 0, 1, 1], [], []>} : vector<128x32xbf16>, vector<32x128xbf16>, vector<128x128xf32> -> vector<128x128xf32>
    %71 = arith.addf %48, %70 : vector<128x128xf32>
    %72 = vector.extract_strided_slice %23 {offsets = [0, 64], sizes = [128, 32], strides = [1, 1]} : vector<128x384xf32> to vector<128x32xf32>
    %73 = arith.truncf %72 : vector<128x32xf32> to vector<128x32xbf16>
    %74 = vector.extract_strided_slice %23 {offsets = [0, 192], sizes = [128, 32], strides = [1, 1]} : vector<128x384xf32> to vector<128x32xf32>
    %75 = arith.truncf %74 : vector<128x32xf32> to vector<128x32xbf16>
    %76 = vector.extract_strided_slice %23 {offsets = [0, 320], sizes = [128, 32], strides = [1, 1]} : vector<128x384xf32> to vector<128x32xf32>
    %77 = arith.truncf %76 : vector<128x32xf32> to vector<128x32xbf16>
    %cst_24 = arith.constant dense<0.000000e+00> : vector<128x128xf32>
    %78 = tpu.matmul %73, %75, %cst_24 {dimension_numbers = #tpu.dot_dimension_numbers<[1], [1], [0], [0], [0, 0, 1, 0], [], []>} : vector<128x32xbf16>, vector<128x32xbf16>, vector<128x128xf32> -> vector<128x128xf32>
    %cst_25 = arith.constant dense<0xFF800000> : vector<128xf32>
    %79 = vector.multi_reduction <maximumf>, %78, %cst_25 [1] : vector<128x128xf32> to vector<128xf32>
    %80 = vector.shape_cast %79 : vector<128xf32> to vector<128x1xf32>
    %81 = vector.broadcast %80 : vector<128x1xf32> to vector<128x128xf32>
    %82 = arith.subf %78, %81 : vector<128x128xf32>
    %83 = math.exp %82 : vector<128x128xf32>
    %cst_26 = arith.constant dense<0.000000e+00> : vector<128xf32>
    %84 = vector.multi_reduction <add>, %83, %cst_26 [1] : vector<128x128xf32> to vector<128xf32>
    %85 = vector.shape_cast %84 : vector<128xf32> to vector<128x1xf32>
    %86 = tpu.reciprocal %85 {approx = true} : vector<128x1xf32> -> vector<128x1xf32>
    %87 = arith.truncf %83 : vector<128x128xf32> to vector<128x128xbf16>
    %cst_27 = arith.constant dense<0.000000e+00> : vector<128x32xf32>
    %88 = tpu.matmul %87, %77, %cst_27 {dimension_numbers = #tpu.dot_dimension_numbers<[1], [0], [0], [1], [0, 0, 1, 1], [], []>} : vector<128x128xbf16>, vector<128x32xbf16>, vector<128x32xf32> -> vector<128x32xf32>
    %89 = vector.broadcast %86 : vector<128x1xf32> to vector<128x32xf32>
    %90 = arith.mulf %88, %89 : vector<128x32xf32>
    %91 = arith.truncf %90 : vector<128x32xf32> to vector<128x32xbf16>
    %92 = vector.extract_strided_slice %24 {offsets = [64, 0], sizes = [32, 128], strides = [1, 1]} : vector<128x128xbf16> to vector<32x128xbf16>
    %cst_28 = arith.constant dense<0.000000e+00> : vector<128x128xf32>
    %93 = tpu.matmul %91, %92, %cst_28 {dimension_numbers = #tpu.dot_dimension_numbers<[1], [0], [0], [1], [0, 0, 1, 1], [], []>} : vector<128x32xbf16>, vector<32x128xbf16>, vector<128x128xf32> -> vector<128x128xf32>
    %94 = arith.addf %71, %93 : vector<128x128xf32>
    %95 = vector.extract_strided_slice %23 {offsets = [0, 96], sizes = [128, 32], strides = [1, 1]} : vector<128x384xf32> to vector<128x32xf32>
    %96 = arith.truncf %95 : vector<128x32xf32> to vector<128x32xbf16>
    %97 = vector.extract_strided_slice %23 {offsets = [0, 224], sizes = [128, 32], strides = [1, 1]} : vector<128x384xf32> to vector<128x32xf32>
    %98 = arith.truncf %97 : vector<128x32xf32> to vector<128x32xbf16>
    %99 = vector.extract_strided_slice %23 {offsets = [0, 352], sizes = [128, 32], strides = [1, 1]} : vector<128x384xf32> to vector<128x32xf32>
    %100 = arith.truncf %99 : vector<128x32xf32> to vector<128x32xbf16>
    %cst_29 = arith.constant dense<0.000000e+00> : vector<128x128xf32>
    %101 = tpu.matmul %96, %98, %cst_29 {dimension_numbers = #tpu.dot_dimension_numbers<[1], [1], [0], [0], [0, 0, 1, 0], [], []>} : vector<128x32xbf16>, vector<128x32xbf16>, vector<128x128xf32> -> vector<128x128xf32>
    %cst_30 = arith.constant dense<0xFF800000> : vector<128xf32>
    %102 = vector.multi_reduction <maximumf>, %101, %cst_30 [1] : vector<128x128xf32> to vector<128xf32>
    %103 = vector.shape_cast %102 : vector<128xf32> to vector<128x1xf32>
    %104 = vector.broadcast %103 : vector<128x1xf32> to vector<128x128xf32>
    %105 = arith.subf %101, %104 : vector<128x128xf32>
    %106 = math.exp %105 : vector<128x128xf32>
    %cst_31 = arith.constant dense<0.000000e+00> : vector<128xf32>
    %107 = vector.multi_reduction <add>, %106, %cst_31 [1] : vector<128x128xf32> to vector<128xf32>
    %108 = vector.shape_cast %107 : vector<128xf32> to vector<128x1xf32>
    %109 = tpu.reciprocal %108 {approx = true} : vector<128x1xf32> -> vector<128x1xf32>
    %110 = arith.truncf %106 : vector<128x128xf32> to vector<128x128xbf16>
    %cst_32 = arith.constant dense<0.000000e+00> : vector<128x32xf32>
    %111 = tpu.matmul %110, %100, %cst_32 {dimension_numbers = #tpu.dot_dimension_numbers<[1], [0], [0], [1], [0, 0, 1, 1], [], []>} : vector<128x128xbf16>, vector<128x32xbf16>, vector<128x32xf32> -> vector<128x32xf32>
    %112 = vector.broadcast %109 : vector<128x1xf32> to vector<128x32xf32>
    %113 = arith.mulf %111, %112 : vector<128x32xf32>
    %114 = arith.truncf %113 : vector<128x32xf32> to vector<128x32xbf16>
    %115 = vector.extract_strided_slice %24 {offsets = [96, 0], sizes = [32, 128], strides = [1, 1]} : vector<128x128xbf16> to vector<32x128xbf16>
    %cst_33 = arith.constant dense<0.000000e+00> : vector<128x128xf32>
    %116 = tpu.matmul %114, %115, %cst_33 {dimension_numbers = #tpu.dot_dimension_numbers<[1], [0], [0], [1], [0, 0, 1, 1], [], []>} : vector<128x32xbf16>, vector<32x128xbf16>, vector<128x128xf32> -> vector<128x128xf32>
    %117 = arith.addf %94, %116 : vector<128x128xf32>
    %118 = arith.addf %1, %117 : vector<128x128xf32>
    %c0_34 = arith.constant 0 : index
    %c0_35 = arith.constant 0 : index
    %119 = vector.load %arg5[%c0_34, %c0_35] : memref<1x128xf32, #tpu.memory_space<vmem>>, vector<1x128xf32>
    %120 = vector.broadcast %119 : vector<1x128xf32> to vector<128x128xf32>
    %121 = arith.addf %118, %120 : vector<128x128xf32>
    %cst_36 = arith.constant dense<0.000000e+00> : vector<128xf32>
    %122 = vector.multi_reduction <add>, %121, %cst_36 [1] : vector<128x128xf32> to vector<128xf32>
    %123 = vector.shape_cast %122 : vector<128xf32> to vector<128x1xf32>
    %cst_37 = arith.constant 1.280000e+02 : f32
    %124 = vector.broadcast %cst_37 : f32 to vector<128x1xf32>
    %125 = arith.divf %123, %124 : vector<128x1xf32>
    %126 = vector.broadcast %125 : vector<128x1xf32> to vector<128x128xf32>
    %127 = arith.subf %121, %126 : vector<128x128xf32>
    %128 = arith.mulf %127, %127 : vector<128x128xf32>
    %cst_38 = arith.constant dense<0.000000e+00> : vector<128xf32>
    %129 = vector.multi_reduction <add>, %128, %cst_38 [1] : vector<128x128xf32> to vector<128xf32>
    %130 = vector.shape_cast %129 : vector<128xf32> to vector<128x1xf32>
    %cst_39 = arith.constant 1.280000e+02 : f32
    %131 = vector.broadcast %cst_39 : f32 to vector<128x1xf32>
    %132 = arith.divf %130, %131 : vector<128x1xf32>
    %cst_40 = arith.constant 9.99999974E-6 : f32
    %133 = vector.broadcast %cst_40 : f32 to vector<128x1xf32>
    %134 = arith.addf %132, %133 : vector<128x1xf32>
    %135 = math.rsqrt %134 : vector<128x1xf32>
    %136 = vector.broadcast %135 : vector<128x1xf32> to vector<128x128xf32>
    %137 = arith.mulf %127, %136 : vector<128x128xf32>
    %138 = arith.truncf %137 : vector<128x128xf32> to vector<128x128xbf16>
    %c0_41 = arith.constant 0 : index
    %c0_42 = arith.constant 0 : index
    %139 = vector.load %arg6[%c0_41, %c0_42] : memref<128x256xbf16, #tpu.memory_space<vmem>>, vector<128x256xbf16>
    %cst_43 = arith.constant dense<0.000000e+00> : vector<128x256xf32>
    %140 = tpu.matmul %138, %139, %cst_43 {dimension_numbers = #tpu.dot_dimension_numbers<[1], [0], [0], [1], [0, 0, 1, 1], [], []>} : vector<128x128xbf16>, vector<128x256xbf16>, vector<128x256xf32> -> vector<128x256xf32>
    %c0_44 = arith.constant 0 : index
    %c0_45 = arith.constant 0 : index
    %141 = vector.load %arg7[%c0_44, %c0_45] : memref<1x256xf32, #tpu.memory_space<vmem>>, vector<1x256xf32>
    %142 = vector.broadcast %141 : vector<1x256xf32> to vector<128x256xf32>
    %143 = arith.addf %140, %142 : vector<128x256xf32>
    %cst_46 = arith.constant 5.000000e-01 : f32
    %144 = vector.broadcast %cst_46 : f32 to vector<128x256xf32>
    %145 = arith.mulf %144, %143 : vector<128x256xf32>
    %cst_47 = arith.constant 0.707106769 : f32
    %146 = vector.broadcast %cst_47 : f32 to vector<128x256xf32>
    %147 = arith.mulf %143, %146 : vector<128x256xf32>
    %148 = math.absf %147 : vector<128x256xf32>
    %cst_48 = arith.constant 0.327591091 : f32
    %149 = vector.broadcast %cst_48 : f32 to vector<128x256xf32>
    %150 = arith.mulf %149, %148 : vector<128x256xf32>
    %cst_49 = arith.constant 1.000000e+00 : f32
    %151 = vector.broadcast %cst_49 : f32 to vector<128x256xf32>
    %152 = arith.addf %151, %150 : vector<128x256xf32>
    %cst_50 = arith.constant 1.000000e+00 : f32
    %153 = vector.broadcast %cst_50 : f32 to vector<128x256xf32>
    %154 = arith.divf %153, %152 : vector<128x256xf32>
    %cst_51 = arith.constant 1.06140542 : f32
    %155 = vector.broadcast %cst_51 : f32 to vector<128x256xf32>
    %156 = arith.mulf %155, %154 : vector<128x256xf32>
    %cst_52 = arith.constant -1.45315206 : f32
    %157 = vector.broadcast %cst_52 : f32 to vector<128x256xf32>
    %158 = arith.addf %156, %157 : vector<128x256xf32>
    %159 = arith.mulf %158, %154 : vector<128x256xf32>
    %cst_53 = arith.constant 1.42141378 : f32
    %160 = vector.broadcast %cst_53 : f32 to vector<128x256xf32>
    %161 = arith.addf %159, %160 : vector<128x256xf32>
    %162 = arith.mulf %161, %154 : vector<128x256xf32>
    %cst_54 = arith.constant -0.284496725 : f32
    %163 = vector.broadcast %cst_54 : f32 to vector<128x256xf32>
    %164 = arith.addf %162, %163 : vector<128x256xf32>
    %165 = arith.mulf %164, %154 : vector<128x256xf32>
    %cst_55 = arith.constant 0.254829586 : f32
    %166 = vector.broadcast %cst_55 : f32 to vector<128x256xf32>
    %167 = arith.addf %165, %166 : vector<128x256xf32>
    %168 = arith.mulf %167, %154 : vector<128x256xf32>
    %cst_56 = arith.constant 0.000000e+00 : f32
    %169 = vector.broadcast %cst_56 : f32 to vector<128x256xf32>
    %170 = arith.subf %169, %148 : vector<128x256xf32>
    %171 = arith.mulf %170, %148 : vector<128x256xf32>
    %172 = math.exp %171 : vector<128x256xf32>
    %173 = arith.mulf %168, %172 : vector<128x256xf32>
    %cst_57 = arith.constant 1.000000e+00 : f32
    %174 = vector.broadcast %cst_57 : f32 to vector<128x256xf32>
    %175 = arith.subf %174, %173 : vector<128x256xf32>
    %cst_58 = arith.constant 0.000000e+00 : f32
    %176 = vector.broadcast %cst_58 : f32 to vector<128x256xf32>
    %177 = arith.cmpf oge, %147, %176 : vector<128x256xf32>
    %cst_59 = arith.constant 0.000000e+00 : f32
    %178 = vector.broadcast %cst_59 : f32 to vector<128x256xf32>
    %179 = arith.subf %178, %175 : vector<128x256xf32>
    %180 = arith.select %177, %175, %179 : vector<128x256xi1>, vector<128x256xf32>
    %cst_60 = arith.constant 1.000000e+00 : f32
    %181 = vector.broadcast %cst_60 : f32 to vector<128x256xf32>
    %182 = arith.addf %181, %180 : vector<128x256xf32>
    %183 = arith.mulf %145, %182 : vector<128x256xf32>
    %184 = arith.truncf %183 : vector<128x256xf32> to vector<128x256xbf16>
    %c0_61 = arith.constant 0 : index
    %c0_62 = arith.constant 0 : index
    %185 = vector.load %arg8[%c0_61, %c0_62] : memref<256x128xbf16, #tpu.memory_space<vmem>>, vector<256x128xbf16>
    %cst_63 = arith.constant dense<0.000000e+00> : vector<128x128xf32>
    %186 = tpu.matmul %184, %185, %cst_63 {dimension_numbers = #tpu.dot_dimension_numbers<[1], [0], [0], [1], [0, 0, 1, 1], [], []>} : vector<128x256xbf16>, vector<256x128xbf16>, vector<128x128xf32> -> vector<128x128xf32>
    %c0_64 = arith.constant 0 : index
    %c0_65 = arith.constant 0 : index
    %187 = vector.load %arg9[%c0_64, %c0_65] : memref<1x128xf32, #tpu.memory_space<vmem>>, vector<1x128xf32>
    %188 = vector.broadcast %187 : vector<1x128xf32> to vector<128x128xf32>
    %189 = arith.addf %186, %188 : vector<128x128xf32>
    %190 = arith.addf %121, %189 : vector<128x128xf32>
    %c0_66 = arith.constant 0 : index
    %c0_67 = arith.constant 0 : index
    %c0_68 = arith.constant 0 : index
    %191 = vector.load %arg10[%c0_66, %c0_67, %c0_68] : memref<1x128x128xf32, #tpu.memory_space<vmem>>, vector<1x128x128xf32>
    %192 = vector.shape_cast %191 : vector<1x128x128xf32> to vector<128x128xf32>
    %193 = vector.shape_cast %190 : vector<128x128xf32> to vector<1x128x128xf32>
    tpu.vector_store %arg10[%c0_66, %c0_67, %c0_68], %193 {strides = array<i32>} : memref<1x128x128xf32, #tpu.memory_space<vmem>>, vector<1x128x128xf32>,
    return
  }
  func.func @transform_0(%arg0: i32) -> (i32, i32, i32) {
    %c0_i32 = arith.constant 0 : i32
    %c0_i32_0 = arith.constant 0 : i32
    %c0_i32_1 = arith.constant 0 : i32
    return %arg0, %c0_i32, %c0_i32_0 : i32, i32, i32
  }
  func.func @transform_1(%arg0: i32) -> (i32, i32) {
    %c0_i32 = arith.constant 0 : i32
    %c0_i32_0 = arith.constant 0 : i32
    %c0_i32_1 = arith.constant 0 : i32
    return %c0_i32, %c0_i32_0 : i32, i32
  }
  func.func @transform_2(%arg0: i32) -> (i32, i32) {
    %c0_i32 = arith.constant 0 : i32
    %c0_i32_0 = arith.constant 0 : i32
    %c0_i32_1 = arith.constant 0 : i32
    return %c0_i32, %c0_i32_0 : i32, i32
  }
  func.func @transform_3(%arg0: i32) -> (i32, i32) {
    %c0_i32 = arith.constant 0 : i32
    %c0_i32_0 = arith.constant 0 : i32
    %c0_i32_1 = arith.constant 0 : i32
    return %c0_i32, %c0_i32_0 : i32, i32
  }
  func.func @transform_4(%arg0: i32) -> (i32, i32) {
    %c0_i32 = arith.constant 0 : i32
    %c0_i32_0 = arith.constant 0 : i32
    %c0_i32_1 = arith.constant 0 : i32
    return %c0_i32, %c0_i32_0 : i32, i32
  }
  func.func @transform_5(%arg0: i32) -> (i32, i32) {
    %c0_i32 = arith.constant 0 : i32
    %c0_i32_0 = arith.constant 0 : i32
    %c0_i32_1 = arith.constant 0 : i32
    return %c0_i32, %c0_i32_0 : i32, i32
  }
  func.func @transform_6(%arg0: i32) -> (i32, i32) {
    %c0_i32 = arith.constant 0 : i32
    %c0_i32_0 = arith.constant 0 : i32
    %c0_i32_1 = arith.constant 0 : i32
    return %c0_i32, %c0_i32_0 : i32, i32
  }
  func.func @transform_7(%arg0: i32) -> (i32, i32) {
    %c0_i32 = arith.constant 0 : i32
    %c0_i32_0 = arith.constant 0 : i32
    %c0_i32_1 = arith.constant 0 : i32
    return %c0_i32, %c0_i32_0 : i32, i32
  }
  func.func @transform_8(%arg0: i32) -> (i32, i32) {
    %c0_i32 = arith.constant 0 : i32
    %c0_i32_0 = arith.constant 0 : i32
    %c0_i32_1 = arith.constant 0 : i32
    return %c0_i32, %c0_i32_0 : i32, i32
  }
  func.func @transform_9(%arg0: i32) -> (i32, i32, i32) {
    %c0_i32 = arith.constant 0 : i32
    %c0_i32_0 = arith.constant 0 : i32
    %c0_i32_1 = arith.constant 0 : i32
    return %arg0, %c0_i32, %c0_i32_0 : i32, i32, i32
  }
}

</mosaic_0001>

<bundles_post_ra>
// kernel: transformer_block_forward.2
= control target key start
LH: loop header
LB: loop body
LE: loop exit
PB: predicated region body
PF: predicated region fallthrough
CT: control target
= control target key end

     0   :  { %14 = vsyncpa [#allocation3], 0  ;;  %s9255_s0 = inlined_call_operand.hbm [shape: f32[2,128,128], index: 0, kind: input, shape index: {}]   ;;  %s9256_s1 = inlined_call_operand.hbm [shape: bf16[128,384], index: 1, kind: input, shape index: {}]   ;;  %s9257_s2 = inlined_call_operand.vmem [shape: f32[1,384], index: 2, kind: input, shape index: {}]   ;;  %s9258_s3 = inlined_call_operand.hbm [shape: bf16[128,128], index: 3, kind: input, shape index: {}]   ;;  %s9259_s4 = inlined_call_operand.vmem [shape: f32[1,128], index: 4, kind: input, shape index: {}]   ;;  %s9260_s5 = inlined_call_operand.hbm [shape: bf16[128,256], index: 5, kind: input, shape index: {}]   ;;  %s9261_s6 = inlined_call_operand.hbm [shape: f32[1,256], index: 6, kind: input, shape index: {}]   ;;  %s9262_s7 = inlined_call_operand.hbm [shape: bf16[256,128], index: 7, kind: input, shape index: {}]   ;;  %s9263_s8 = inlined_call_operand.vmem [shape: f32[1,128], index: 8, kind: input, shape index: {}]   ;;  %s9264_s9 = inlined_call_operand.vmem [shape: f32[2,128,128], index: 9, kind: output, shape index: {}]  }
   0x1   :  { %16 = vsyncpa [#allocation3 + $0x1], 0 }
   0x2   :  { %17 = vsyncpa [#allocation5], 0 }
   0x3   :  { %18 = vsyncpa [#allocation8], 0 }
   0x4   :  { %19 = vsyncpa [#allocation11], 0  ;;  %s6839_s30 = smov 0   ;;  %s6841_s10 = smov 0  }
   0x5   :  { %s6843_s11 = smov 0   ;;  %s6845_s12 = smov 0  }
   0x6 LB: > { %s6773_s13 = smov [#allocation4]   ;;  %s6860_s15 = sadd.s32 4294967295, %s6771_s12   ;;  %s6771_s12 = sphi %s6845_s12, %s9424_s12   ;;  %s6767_s11 = sphi %s6843_s11, %s9423_s11   ;;  %s6763_s10 = sphi %s6841_s10, %s9422_s10   ;;  %s6759_s30 = sphi %s6839_s30, %s9421_s30  }
   0x7   : > { %s262_s14 = sshll.u32 %s6773_s13, 4  ;;  %p5122_p0 = scmp.ge.s32.totalorder %s6771_s12, 1  ;;  %s263_s14 = int_to_ptr.vmem [resolvable:$true] %s262_s14 }
   0x8   : > { %p9265_p1 = scmp.eq.s32.totalorder %s6860_s15, 0  ;;  %p250_p2 = scmp.lt.s32.totalorder %s6771_s12, 3 }
   0x9   : > { %s6774_s17 = smov [#allocation7]   ;;  %s6775_s20 = smov [#allocation6]  }
   0xa   : > { %p6865_p3 = pnand %p5122_p0, %p250_p2  ;;  %s294_s18 = sshll.u32 %s6774_s17, 4  ;;  %s6877_s18 = int_to_ptr.vmem [resolvable:$true] %s294_s18 }
   0xb   : > { %s6879_s21 = sshll.u32 %s6775_s20, 4  ;;  %s6578_s23 = scalar_lea.vmem %s263_s14, 3072  ;;  %s279_s21 = int_to_ptr.vmem [resolvable:$true] %s6879_s21 }
   0xc   : > { %s9302_s16 = scalar_select %p6865_p3, 1, 0 }
   0xd   : > { %p5945_p4 = pneg %p6865_p3  ;;  %p6579_p7 = scmp.ne.s32.totalorder %s263_s14, %s6578_s23 }
   0xe   : > { %p6586_p10 = scmp.lt.s32.totalorder %s263_s14, %s263_s14  ;;  %p6587_p11 = scmp.lt.s32.totalorder %s6578_s23, %s6578_s23 }
   0xf   : > { %p6873_p5 = pnand %p5945_p4, %p9265_p1 }
  0x10   : > { %p6588_p12 = por %p6587_p11, %p6586_p10 }
  0x11   : > { %p6883_p6 = pneg %p6873_p5 }
  0x13   : > { %p6581_p8 = pnand %p6579_p7, %p6883_p6 }
  0x15   : > { %p6582_p9 = pneg %p6581_p8 }
  0x17   : > { %p6589_p13 = pnand %p6588_p12, %p6582_p9 }
  0x19   : > { %6592 = shalt.err (!%p6589_p13)
}
  0x1a   : > { %s6776_s24 = smov 192   ;;  %s6777_s25 = smov 12  }
  0x1b   : > { %5948 = dma.hbm_to_vmem [thread:$0]  (!%p6873_p5), %s9256_s1, 3072, %s263_s14, [#allocation5], %s6776_s24, %s6776_s24, %s6777_s25  }
  0x1c   : > { %s6604_s28 = scalar_lea.vmem %s6877_s18, 2048  ;;  %p6612_p7 = scmp.lt.s32.totalorder %s6877_s18, %s6877_s18 }
  0x1d   : > { %p6605_p0 = scmp.ne.s32.totalorder %s6877_s18, %s6604_s28  ;;  %p6613_p8 = scmp.lt.s32.totalorder %s6604_s28, %s6604_s28 }
  0x1f   : > { %p6607_p2 = pnand %p6605_p0, %p6883_p6  ;;  %p6614_p9 = por %p6613_p8, %p6612_p7 }
  0x21   : > { %p6608_p4 = pneg %p6607_p2 }
  0x23   : > { %p6615_p10 = pnand %p6614_p9, %p6608_p4 }
  0x25   : > { %6618 = shalt.err (!%p6615_p10)
}
  0x26   : > { %s9267_s29 = smov 128   ;;  %s6779_s13 = smov 8  }
  0x27   : > { %5954 = dma.hbm_to_vmem [thread:$0]  (!%p6873_p5), %s9260_s5, 2048, %s6877_s18, [#allocation8], %s9267_s29, %s9267_s29, %s6779_s13  }
  0x28   : > { %s6630_s20 = scalar_lea.vmem %s279_s21, 1024  ;;  %p6638_p0 = scmp.lt.s32.totalorder %s279_s21, %s279_s21 }
  0x29   : > { %p6631_p11 = scmp.ne.s32.totalorder %s279_s21, %s6630_s20  ;;  %p6639_p2 = scmp.lt.s32.totalorder %s6630_s20, %s6630_s20 }
  0x2b   : > { %p6633_p12 = pnand %p6631_p11, %p6883_p6  ;;  %p6640_p4 = por %p6639_p2, %p6638_p0 }
  0x2d   : > { %p6634_p13 = pneg %p6633_p12 }
  0x2f   : > { %p6641_p7 = pnand %p6640_p4, %p6634_p13 }
  0x31   : > { %6644 = shalt.err (!%p6641_p7)
}
  0x32   : > { %s6780_s23 = smov 64   ;;  %s6781_s24 = smov 4  }
  0x33   : > { %5951 = dma.hbm_to_vmem [thread:$0]  (!%p6873_p5), %s9258_s3, 1024, %s279_s21, [#allocation5], %s6780_s23, %s6780_s23, %s6781_s24  }
  0x34   : > { %s6782_s26 = smov [#allocation9]   ;;  %s6783_s28 = smov [#allocation10]  }
  0x35   : > { %s308_s27 = sshll.u32 %s6782_s26, 4  ;;  %s318_s14 = sshll.u32 %s6783_s28, 4  ;;  %s309_s27 = int_to_ptr.vmem [resolvable:$true] %s308_s27  ;;  %s319_s14 = int_to_ptr.vmem [resolvable:$true] %s318_s14 }
  0x36   : > { %s6656_s17 = scalar_lea.vmem %s309_s27, 32  ;;  %p6664_p11 = scmp.lt.s32.totalorder %s309_s27, %s309_s27 }
  0x37   : > { %p6657_p8 = scmp.ne.s32.totalorder %s309_s27, %s6656_s17  ;;  %p6665_p12 = scmp.lt.s32.totalorder %s6656_s17, %s6656_s17 }
  0x39   : > { %p6659_p9 = pnand %p6657_p8, %p6883_p6  ;;  %p6666_p13 = por %p6665_p12, %p6664_p11 }
  0x3b   : > { %p6660_p10 = pneg %p6659_p9 }
  0x3d   : > { %p6667_p0 = pnand %p6666_p13, %p6660_p10 }
  0x3f   : > { %6670 = shalt.err (!%p6667_p0)
}
  0x40   : > { %5957 = dma.hbm_to_vmem [thread:$0]  (!%p6873_p5), %s9261_s6, 32, %s309_s27, [#allocation8]  }
  0x41   : > { %s6682_s21 = scalar_lea.vmem %s319_s14, 2048  ;;  %p6690_p8 = scmp.lt.s32.totalorder %s319_s14, %s319_s14 }
  0x42   : > { %p6683_p2 = scmp.ne.s32.totalorder %s319_s14, %s6682_s21  ;;  %p6691_p9 = scmp.lt.s32.totalorder %s6682_s21, %s6682_s21 }
  0x44   : > { %p6685_p4 = pnand %p6683_p2, %p6883_p6  ;;  %p6692_p1 = por %p6691_p9, %p6690_p8 }
  0x46   : > { %p6686_p7 = pneg %p6685_p4 }
  0x48   : > { %p6693_p3 = pnand %p6692_p1, %p6686_p7 }
  0x4a   : > { %6696 = shalt.err (!%p6693_p3)
}
  0x4b   : > { %5960 = dma.hbm_to_vmem [thread:$0]  (!%p6873_p5), %s9262_s7, 2048, %s319_s14, [#allocation11], %s6780_s23, %s6780_s23, %s6781_s24  }
  0x4c   : > { %s6938_s19 = sadd.s32 1, %s6771_s12   ;;  %s32_s27 = sadd.s32 1, %s6767_s11 }
  0x4d   : > { %s29_s22 = ssub.s32 %s6771_s12, %s6938_s19  ;;  %p39_p3 = scmp.ne.s32.totalorder %s6767_s11, %s6763_s10 }
  0x4e   : > { %p30_p1 = scmp.eq.s32.totalorder %s29_s22, 0  ;;  %p40_p6 = scmp.eq.s32.totalorder %s6771_s12, 0 }
  0x4f   : > { %p45_p10 = scmp.ne.s32.totalorder %s6763_s10, %s6759_s30  ;;  %p9305_p12 = scmp.eq.s32.totalorder %s6860_s15, 0 }
  0x50   : > { %s6949_s28 = scalar_select %p30_p1, %s6767_s11, %s32_s27  }
  0x51   : > { %p41_p11 = por %p40_p6, %p39_p3  ;;  %p6953_p13 = por %p9305_p12, %p45_p10 }
  0x52   : > { %p5970_p0 = scmp.lt.s32.totalorder %s6771_s12, 2  ;;  %s335_s20 = sand.u32 1, %s6767_s11  }
  0x53   : > { %s9306_s17 = scalar_select %p6953_p13, 1, 0 }
  0x54   : > { %s5129_s23 = sshll.u32 %s335_s20, 7  ;;  %s5273_s24 = sshll.u32 %s6771_s12, 11 }
  0x55   : > { %s6963_s21 = scalar_lea.hbm %s9255_s0, %s5273_s24  ;;  %s339_s30 = scalar_lea.vmem [#allocation2], %s5129_s23 }
  0x56   : > { %s346_s25 = sshll.u32 %s339_s30, 4  ;;  %p6967_p5 = pnand %p5970_p0, %p41_p11  ;;  %s6965_s25 = int_to_ptr.vmem [resolvable:$true] %s346_s25 }
  0x57   : > { %s6971_s22 = scalar_lea.sflag [#allocation3], %s335_s20  ;;  %s6697_s12 = scalar_lea.hbm %s6963_s21, 2048 }
  0x58   : > { %p6698_p2 = scmp.ne.s32.totalorder %s6963_s21, %s6697_s12  ;;  %p6699_p4 = pneg %p6967_p5 }
  0x59   : > { %s6702_s23 = scalar_lea.hbm %s9255_s0, 4096  ;;  %p6703_p9 = scmp.lt.s32.totalorder %s6963_s21, %s9255_s0 }
  0x5a   : > { %p6700_p7 = pnand %p6699_p4, %p6698_p2  ;;  %p6704_p1 = scmp.lt.s32.totalorder %s6702_s23, %s6697_s12 }
  0x5c   : > { %p6701_p8 = pneg %p6700_p7  ;;  %p6705_p3 = por %p6704_p1, %p6703_p9 }
  0x5e   : > { %p6706_p6 = pnand %p6705_p3, %p6701_p8 }
  0x60   : > { %6709 = shalt.err (!%p6706_p6)
}
  0x61   : > { %s6710_s20 = scalar_lea.vmem %s6965_s25, 2048  ;;  %s6784_s30 = smov [#allocation2]  }
  0x62   : > { %p6711_p10 = scmp.ne.s32.totalorder %s6965_s25, %s6710_s20  ;;  %s6715_s29 = sshll.u32 %s6784_s30, 4  ;;  %s6716_s29 = int_to_ptr.vmem [resolvable:$false] %s6715_s29 }
  0x63   : > { %s6717_s27 = scalar_lea.vmem %s6716_s29, 4096  ;;  %p6718_p0 = scmp.lt.s32.totalorder %s6965_s25, %s6716_s29 }
  0x64   : > { %p6713_p11 = pnand %p6711_p10, %p6699_p4  ;;  %p6719_p2 = scmp.lt.s32.totalorder %s6717_s27, %s6710_s20 }
  0x66   : > { %p6714_p12 = pneg %p6713_p11  ;;  %p6720_p7 = por %p6719_p2, %p6718_p0 }
  0x68   : > { %p6721_p13 = pnand %p6720_p7, %p6714_p12 }
  0x6a   : > { %6724 = shalt.err (!%p6721_p13)
}
  0x6b   : > { %s9308_s12 = smov 128   ;;  %p9309_p4 = scmp.ne.s32.totalorder %s9302_s16, 0 }
  0x6c   : > { %5964 = dma.hbm_to_vmem [thread:$0]  (!%p6967_p5), %s6963_s21, 2048, %s6965_s25, %s6971_s22, %s9308_s12, %s9308_s12, %s6779_s13  }
  0x6d   : > { %358 = sbr.rel (%p9309_p4) target bundleno = 3809 (0xee1), region = 56 }
  0x72   : > { %s360_s24 = sand.u32 1, %s6763_s10   ;;  %p9310_p13 = scmp.ne.s32.totalorder %s9306_s17, 0 }
  0x73   : > { %s5133_s29 = sshll.u32 %s360_s24, 7  ;;  %s361_s23 = scalar_lea.sflag [#allocation3], %s360_s24 }
  0x74   : > { %s6998_s14 = scalar_lea.vmem [#allocation2], %s5133_s29 }
  0x75   : > { %6742 = dma.done.wait (%p9310_p13), %s361_s23, 2048  }
  0x76   : > { %6744 = vsyncadd (%p9310_p13), %s361_s23, 4294965248  ;;  %p9311_p8 = scmp.eq.s32.totalorder %s6860_s15, 0 }
  0x78   : > { %6746 = dma.done.wait (%p9311_p8), [#allocation5], 4096   ;;  %p9312_p5 = pmov %p9311_p8 }
  0x7a   : > { %6748 = vsyncadd (%p9312_p5), [#allocation5], 4294963200  ;;  %p9313_p9 = pmov %p9312_p5 }
  0x7b   : > { %p9314_p1 = pmov %p9312_p5 }
  0x7c   : > { %6750 = dma.done.wait (%p9313_p9), [#allocation8], 2080  }
  0x7d   : > { %6752 = vsyncadd (%p9314_p1), [#allocation8], 4294965216  ;;  %p9315_p3 = pmov %p9314_p1 }
  0x7e   : > { %p9316_p6 = pmov %p9314_p1 }
  0x7f   : > { %6754 = dma.done.wait (%p9315_p3), [#allocation11], 2048  }
  0x80   : > { %6756 = vsyncadd (%p9316_p6), [#allocation11], 4294965248  ;;  %v425_v0 = vld [vmem:[%s6998_s14] sm:$0xff]  ;;  %v427_v1 = vld [vmem:[%s6998_s14 + $0x10] sm:$0xff]  ;;  %vm1053_vm0 = vcmask 261120   ;;  %s6786_s17 = smov 96  }
  0x81   : > { %441 = vadd.xlane.f32.xlu0 %v425_v0  ;;  %445 = vadd.xlane.f32.xlu1 %v427_v1  ;;  %v426_v2 = vld [vmem:[%s6998_s14 + $0x8] sm:$0xff]  ;;  %v428_v3 = vld [vmem:[%s6998_s14 + $0x18] sm:$0xff]  ;;  %v429_v4 = vld [vmem:[%s6998_s14 + $0x20] sm:$0xff]  ;;  %s6787_s21 = smov 64   ;;  %s6788_s25 = smov 32  }
  0x82   : > { %v430_v5 = vld [vmem:[%s6998_s14 + $0x28] sm:$0xff]  ;;  %v7023_v6 = vld [vmem:[%s6998_s14 + $0x30] sm:$0xff]  ;;  %v7026_v7 = vld [vmem:[%s6998_s14 + $0x38] sm:$0xff]  ;;  %p419_p10 = scmp.lt.s32.totalorder %s6860_s15, 1 }
  0x83   : > { %v7029_v8 = vld [vmem:[%s6998_s14 + $0x40] sm:$0xff]  ;;  %v7032_v9 = vld [vmem:[%s6998_s14 + $0x48] sm:$0xff]  ;;  %v7037_v10 = vld [vmem:[%s6998_s14 + $0x50] sm:$0xff] }
  0x84   : > { %v7040_v11 = vld [vmem:[%s6998_s14 + $0x58] sm:$0xff]  ;;  %v7045_v12 = vld [vmem:[%s6998_s14 + $0x60] sm:$0xff]  ;;  %v7048_v13 = vld [vmem:[%s6998_s14 + $0x68] sm:$0xff]  ;;  %s9426_s15 = smov (!%p419_p10, %s6860_s15), 1 }
  0x85   : > { %443 = vadd.xlane.f32.xlu0 %v426_v2  ;;  %447 = vadd.xlane.f32.xlu1 %v428_v3  ;;  %v7053_v14 = vld [vmem:[%s6998_s14 + $0x70] sm:$0xff]  ;;  %v7056_v15 = vld [vmem:[%s6998_s14 + $0x78] sm:$0xff]  ;;  %s5274_s30 = sshll.u32 %s9426_s15, 7 }
  0x86   : > { %v6023_v16 = vld [vmem:[#allocation4 + $0xac] ss:$12 sps:$4 sm:$0xff]   ;;  %v6025_v17 = vld [vmem:[#allocation4 + $0xa8] ss:$12 sps:$4 sm:$0xff]   ;;  %v6028_v19 = vld [vmem:[#allocation4 + $0xb0] ss:$12 sps:$4 sm:$0xff]   ;;  %s9193_s24 = scalar_lea.vmem %s9264_s9, %s5274_s30 }
  0x87   : > { %v6026_v18 = vld [vmem:[#allocation4 + $0x94] ss:$12 sps:$4 sm:$0xff]   ;;  %803 = vmatprep.subr.bf16.mxu0 %v6023_v16  ;;  %5523 = vmatprep.subr.bf16.mxu1 %v6028_v19  ;;  %v6029_v20 = vld [vmem:[#allocation4 + $0x90] ss:$12 sps:$4 sm:$0xff]   ;;  %v6032_v57 = vld [vmem:[#allocation4 + $0x98] ss:$12 sps:$4 sm:$0xff]  }
  0x88   : > { %804 = vmatpush1.bf16.msra.mxu0 %v6025_v17  ;;  %5524 = vmatpush3.bf16.msra.mxu1 %v6028_v19  ;;  %v6030_v56 = vld [vmem:[#allocation4 + $0x7c] ss:$12 sps:$4 sm:$0xff]   ;;  %v6033_v58 = vld [vmem:[#allocation4 + $0x78] ss:$12 sps:$4 sm:$0xff]  }
  0x89   : > { %449 = vadd.xlane.f32.xlu0 %v429_v4  ;;  %451 = vadd.xlane.f32.xlu1 %v430_v5 }
  0x8a   : > { %805 = vmatprep.subr.bf16.mxu0 %v6026_v18  ;;  %5525 = vmatprep.subr.bf16.mxu1 %v6032_v57 }
  0x8c   : > { %806 = vmatpush1.bf16.msra.mxu0 %v6029_v20  ;;  %5526 = vmatpush3.bf16.msra.mxu1 %v6032_v57  ;;  %v6038_v20 = vld [vmem:[#allocation4 + $0x4c] ss:$12 sps:$4 sm:$0xff]  }
  0x8d   : > { %453 = vadd.xlane.f32.xlu0 %v7023_v6  ;;  %455 = vadd.xlane.f32.xlu1 %v7026_v7 }
  0x8e   : > { %807 = vmatprep.subr.bf16.mxu0 %v6030_v56 }
  0x90   : > { %808 = vmatpush1.bf16.msra.mxu0 %v6033_v58 }
  0x91   : > { %457 = vadd.xlane.f32.xlu0 %v7029_v8  ;;  %459 = vadd.xlane.f32.xlu1 %v7032_v9 }
  0x95   : > { %461 = vadd.xlane.f32.xlu0 %v7037_v10  ;;  %463 = vadd.xlane.f32.xlu1 %v7040_v11 }
  0x99   : > { %465 = vadd.xlane.f32.xlu0 %v7045_v12  ;;  %467 = vadd.xlane.f32.xlu1 %v7048_v13 }
  0x9d   : > { %469 = vadd.xlane.f32.xlu0 %v7053_v14  ;;  %471 = vadd.xlane.f32.xlu1 %v7056_v15 }
 0x10a   : > { %v442_v21 = vpop.xlane.xlu0 %441  ;;  %v446_v22 = vpop.xlane.xlu1 %445 }
 0x10b   : > { %v474_v23 = vmul.f32 0.0078125, %v442_v21  ;;  %v476_v24 = vmul.f32 0.0078125, %v446_v22  ;;  %v6040_v21 = vld [vmem:[#allocation4 + $0x68] ss:$12 sps:$4 sm:$0xff]  }
 0x10d   : > { %v7062_v25 = vsub.f32 %v425_v0, %v474_v23  ;;  %v7064_v26 = vsub.f32 %v427_v1, %v476_v24  ;;  %v6041_v23 = vld [vmem:[#allocation4 + $0x48] ss:$12 sps:$4 sm:$0xff]  }
 0x10e   : > { %v444_v27 = vpop.xlane.xlu0 %443  ;;  %v448_v28 = vpop.xlane.xlu1 %447 }
 0x10f   : > { %v475_v29 = vmul.f32 0.0078125, %v444_v27  ;;  %v506_v30 = vmul.f32 %v7062_v25, %v7062_v25  ;;  %v477_v31 = vmul.f32 0.0078125, %v448_v28  ;;  %v508_v32 = vmul.f32 %v7064_v26, %v7064_v26 }
 0x111   : > { %522 = vadd.xlane.f32.xlu0 %v506_v30  ;;  %v7070_v33 = vsub.f32 %v426_v2, %v475_v29  ;;  %v7072_v34 = vsub.f32 %v428_v3, %v477_v31  ;;  %v6034_v3 = vld [vmem:[#allocation4 + $0x64] ss:$12 sps:$4 sm:$0xff]   ;;  %v6042_v31 = vld [vmem:[#allocation4 + $0x34] ss:$12 sps:$4 sm:$0xff]  }
 0x112   : > { %v450_v35 = vpop.xlane.xlu0 %449  ;;  %v452_v36 = vpop.xlane.xlu1 %451  ;;  %809 = vmatprep.subr.bf16.mxu0 %v6034_v3 }
 0x113   : > { %v478_v37 = vmul.f32 0.0078125, %v450_v35  ;;  %v507_v38 = vmul.f32 %v7070_v33, %v7070_v33  ;;  %v479_v39 = vmul.f32 0.0078125, %v452_v36  ;;  %v509_v40 = vmul.f32 %v7072_v34, %v7072_v34  ;;  %v6045_v36 = vld [vmem:[#allocation4 + $0x30] ss:$12 sps:$4 sm:$0xff]  }
 0x115   : > { %526 = vadd.xlane.f32.xlu0 %v508_v32  ;;  %524 = vadd.xlane.f32.xlu1 %v507_v38  ;;  %v7078_v41 = vsub.f32 %v429_v4, %v478_v37  ;;  %v7080_v42 = vsub.f32 %v430_v5, %v479_v39  ;;  %v6036_v4 = vld [vmem:[#allocation4 + $0x80] ss:$12 sps:$4 sm:$0xff]   ;;  %v6044_v32 = vld [vmem:[#allocation4 + $0x50] ss:$12 sps:$4 sm:$0xff]   ;;  %v6048_v39 = vld [vmem:[#allocation4 + $0x38] ss:$12 sps:$4 sm:$0xff]  }
 0x116   : > { %v454_v43 = vpop.xlane.xlu0 %453  ;;  %v456_v44 = vpop.xlane.xlu1 %455  ;;  %5527 = vmatprep.subr.bf16.mxu1 %v6036_v4  ;;  %v6046_v38 = vld [vmem:[#allocation4 + $0x1c] ss:$12 sps:$4 sm:$0xff]  }
 0x117   : > { %v480_v45 = vmul.f32 0.0078125, %v454_v43  ;;  %v510_v46 = vmul.f32 %v7078_v41, %v7078_v41  ;;  %v481_v47 = vmul.f32 0.0078125, %v456_v44  ;;  %v511_v48 = vmul.f32 %v7080_v42, %v7080_v42  ;;  %5528 = vmatpush3.bf16.msra.mxu1 %v6036_v4  ;;  %v6052_v43 = vld [vmem:[#allocation4 + $0x20] ss:$12 sps:$4 sm:$0xff]  }
 0x118   : > { %5529 = vmatprep.subr.bf16.mxu1 %v6040_v21  ;;  %v6053_v44 = vld [vmem:[#allocation4] ss:$12 sps:$4 sm:$0xff]  }
 0x119   : > { %528 = vadd.xlane.f32.xlu1 %v509_v40  ;;  %530 = vadd.xlane.f32.xlu0 %v510_v46  ;;  %v7087_v49 = vsub.f32 %v7023_v6, %v480_v45  ;;  %v7090_v50 = vsub.f32 %v7026_v7, %v481_v47  ;;  %v6054_v45 = vld [vmem:[#allocation4 + $0x8] ss:$12 sps:$4 sm:$0xff]   ;;  %v9271_v46 = vmov 0  }
 0x11a   : > { %v458_v51 = vpop.xlane.xlu0 %457  ;;  %v460_v52 = vpop.xlane.xlu1 %459  ;;  %835 = vmatprep.mubr.bf16.mxu0 %v9271_v46 }
 0x11b   : > { %v482_v53 = vmul.f32 0.0078125, %v458_v51  ;;  %v512_v54 = vmul.f32 %v7087_v49, %v7087_v49  ;;  %v483_v55 = vmul.f32 0.0078125, %v460_v52  ;;  %v513_v59 = vmul.f32 %v7090_v50, %v7090_v50  ;;  %5530 = vmatpush3.bf16.msra.mxu1 %v6040_v21 }
 0x11c   : > { %5531 = vmatprep.subr.bf16.mxu1 %v6044_v32 }
 0x11d   : > { %532 = vadd.xlane.f32.xlu1 %v511_v48  ;;  %534 = vadd.xlane.f32.xlu0 %v512_v54  ;;  %v7097_v60 = vsub.f32 %v7029_v8, %v482_v53  ;;  %v7100_v61 = vsub.f32 %v7032_v9, %v483_v55  ;;  %v6037_v8 = vld [vmem:[#allocation4 + $0x60] ss:$12 sps:$4 sm:$0xff]  }
 0x11e   : > { %v462_v62 = vpop.xlane.xlu0 %461  ;;  %v464_v63 = vpop.xlane.xlu1 %463  ;;  %810 = vmatpush1.bf16.msra.mxu0 %v6037_v8 }
 0x11f   : > { %v484_v0 = vmul.f32 0.0078125, %v462_v62  ;;  %v514_v1 = vmul.f32 %v7097_v60, %v7097_v60  ;;  %v485_v2 = vmul.f32 0.0078125, %v464_v63  ;;  %v515_v5 = vmul.f32 %v7100_v61, %v7100_v61  ;;  %811 = vmatprep.subr.bf16.mxu0 %v6038_v20  ;;  %5532 = vmatpush3.bf16.msra.mxu1 %v6044_v32 }
 0x120   : > { %5533 = vmatprep.subr.bf16.mxu1 %v6048_v39 }
 0x121   : > { %536 = vadd.xlane.f32.xlu1 %v513_v59  ;;  %538 = vadd.xlane.f32.xlu0 %v514_v1  ;;  %v7107_v6 = vsub.f32 %v7037_v10, %v484_v0  ;;  %v7110_v7 = vsub.f32 %v7040_v11, %v485_v2 }
 0x122   : > { %v466_v9 = vpop.xlane.xlu0 %465  ;;  %v468_v16 = vpop.xlane.xlu1 %467  ;;  %812 = vmatpush1.bf16.msra.mxu0 %v6041_v23 }
 0x123   : > { %v486_v17 = vmul.f32 0.0078125, %v466_v9  ;;  %v516_v18 = vmul.f32 %v7107_v6, %v7107_v6  ;;  %v487_v19 = vmul.f32 0.0078125, %v468_v16  ;;  %v517_v10 = vmul.f32 %v7110_v7, %v7110_v7  ;;  %813 = vmatprep.subr.bf16.mxu0 %v6042_v31  ;;  %5534 = vmatpush3.bf16.msra.mxu1 %v6048_v39 }
 0x124   : > { %5535 = vmatprep.subr.bf16.mxu1 %v6052_v43 }
 0x125   : > { %540 = vadd.xlane.f32.xlu1 %v515_v5  ;;  %542 = vadd.xlane.f32.xlu0 %v516_v18  ;;  %v7117_v11 = vsub.f32 %v7045_v12, %v486_v17  ;;  %v7120_v22 = vsub.f32 %v7048_v13, %v487_v19 }
 0x126   : > { %v470_v24 = vpop.xlane.xlu0 %469  ;;  %v472_v27 = vpop.xlane.xlu1 %471  ;;  %814 = vmatpush1.bf16.msra.mxu0 %v6045_v36 }
 0x127   : > { %v488_v28 = vmul.f32 0.0078125, %v470_v24  ;;  %v518_v29 = vmul.f32 %v7117_v11, %v7117_v11  ;;  %v489_v30 = vmul.f32 0.0078125, %v472_v27  ;;  %v519_v12 = vmul.f32 %v7120_v22, %v7120_v22  ;;  %815 = vmatprep.subr.bf16.mxu0 %v6046_v38  ;;  %5536 = vmatpush3.bf16.msra.mxu1 %v6052_v43 }
 0x128   : > { %5537 = vmatprep.subr.bf16.mxu1 %v6054_v45 }
 0x129   : > { %544 = vadd.xlane.f32.xlu1 %v517_v10  ;;  %546 = vadd.xlane.f32.xlu0 %v518_v29  ;;  %v7127_v13 = vsub.f32 %v7053_v14, %v488_v28  ;;  %v7130_v35 = vsub.f32 %v7056_v15, %v489_v30  ;;  %v6049_v14 = vld [vmem:[#allocation4 + $0x18] ss:$12 sps:$4 sm:$0xff]  }
 0x12a   : > { %816 = vmatpush1.bf16.msra.mxu0 %v6049_v14  ;;  %v6050_v15 = vld [vmem:[#allocation4 + $0x4] ss:$12 sps:$4 sm:$0xff]  }
 0x12b   : > { %v520_v37 = vmul.f32 %v7127_v13, %v7127_v13  ;;  %v521_v40 = vmul.f32 %v7130_v35, %v7130_v35  ;;  %817 = vmatprep.subr.bf16.mxu0 %v6050_v15  ;;  %5538 = vmatpush3.bf16.msra.mxu1 %v6054_v45 }
 0x12d   : > { %548 = vadd.xlane.f32.xlu1 %v519_v12  ;;  %550 = vadd.xlane.f32.xlu0 %v520_v37 }
 0x12e   : > { %818 = vmatpush1.bf16.msra.mxu0 %v6053_v44 }
 0x131   : > { %552 = vadd.xlane.f32.xlu1 %v521_v40 }
 0x19a   : > { %v523_v47 = vpop.xlane.xlu0 %522 }
 0x19b   : > { %v554_v48 = vmul.f32 0.0078125, %v523_v47 }
 0x19d   : > { %v570_v51 = vadd.f32 1e-05, %v554_v48 }
 0x19e   : > { %v525_v52 = vpop.xlane.xlu1 %524  ;;  %v527_v53 = vpop.xlane.xlu0 %526 }
 0x19f   : > { %v555_v54 = vmul.f32 0.0078125, %v525_v52  ;;  %v556_v55 = vmul.f32 0.0078125, %v527_v53  ;;  %6103 = vrsqrt.f32 %v570_v51 }
 0x1a1   : > { %v571_v56 = vadd.f32 1e-05, %v555_v54  ;;  %v572_v57 = vadd.f32 1e-05, %v556_v55 }
 0x1a2   : > { %v529_v58 = vpop.xlane.xlu1 %528  ;;  %v531_v59 = vpop.xlane.xlu0 %530 }
 0x1a3   : > { %6105 = vrsqrt.f32 %v571_v56  ;;  %v557_v62 = vmul.f32 0.0078125, %v529_v58  ;;  %v558_v63 = vmul.f32 0.0078125, %v531_v59 }
 0x1a4   : > { %6107 = vrsqrt.f32 %v572_v57 }
 0x1a5   : > { %v573_v0 = vadd.f32 1e-05, %v557_v62  ;;  %v574_v1 = vadd.f32 1e-05, %v558_v63 }
 0x1a6   : > { %v533_v2 = vpop.xlane.xlu1 %532  ;;  %v535_v3 = vpop.xlane.xlu0 %534 }
 0x1a7   : > { %6109 = vrsqrt.f32 %v573_v0  ;;  %v559_v4 = vmul.f32 0.0078125, %v533_v2  ;;  %v560_v5 = vmul.f32 0.0078125, %v535_v3 }
 0x1a8   : > { %6111 = vrsqrt.f32 %v574_v1 }
 0x1a9   : > { %v575_v8 = vadd.f32 1e-05, %v559_v4  ;;  %v576_v9 = vadd.f32 1e-05, %v560_v5 }
 0x1aa   : > { %v537_v16 = vpop.xlane.xlu1 %536  ;;  %v539_v17 = vpop.xlane.xlu0 %538 }
 0x1ab   : > { %6113 = vrsqrt.f32 %v575_v8  ;;  %v561_v18 = vmul.f32 0.0078125, %v537_v16  ;;  %v562_v19 = vmul.f32 0.0078125, %v539_v17 }
 0x1ac   : > { %v6104_v20 = vpop.eup %6103  ;;  %6115 = vrsqrt.f32 %v576_v9 }
 0x1ad   : > { %v577_v21 = vadd.f32 1e-05, %v561_v18  ;;  %v578_v10 = vadd.f32 1e-05, %v562_v19  ;;  %v602_v30 = vmul.f32 %v6104_v20, %v7062_v25 }
 0x1ae   : > { %v541_v23 = vpop.xlane.xlu1 %540  ;;  %v543_v24 = vpop.xlane.xlu0 %542 }
 0x1af   : > { %6117 = vrsqrt.f32 %v577_v21  ;;  %v563_v27 = vmul.f32 0.0078125, %v541_v23  ;;  %v564_v28 = vmul.f32 0.0078125, %v543_v24  ;;  %v658_v24 = vld [vmem:[%s9257_s2] sm:$0x7] }
 0x1b0   : > { %v6106_v29 = vpop.eup %6105  ;;  %6119 = vrsqrt.f32 %v578_v10 }
 0x1b1   : > { %v6108_v31 = vpop.eup %6107  ;;  %v579_v32 = vadd.f32 1e-05, %v563_v27  ;;  %v580_v12 = vadd.f32 1e-05, %v564_v28  ;;  %v603_v36 = vmul.f32 %v6106_v29, %v7070_v33 }
 0x1b2   : > { %v545_v37 = vpop.xlane.xlu1 %544  ;;  %v547_v38 = vpop.xlane.xlu0 %546  ;;  %v604_v43 = vmul.f32 %v6108_v31, %v7064_v26 }
 0x1b3   : > { %6121 = vrsqrt.f32 %v579_v32  ;;  %v565_v39 = vmul.f32 0.0078125, %v545_v37  ;;  %v566_v40 = vmul.f32 0.0078125, %v547_v38  ;;  %v618_v14 = vpack.c.bf16 %v603_v36, %v602_v30 }
 0x1b4   : > { %v6110_v15 = vpop.eup %6109  ;;  %6123 = vrsqrt.f32 %v580_v12 }
 0x1b5   : > { %v6112_v44 = vpop.eup %6111  ;;  %v581_v45 = vadd.f32 1e-05, %v565_v39  ;;  %v582_v47 = vadd.f32 1e-05, %v566_v40  ;;  %836 = vmatmul.mubr.bf16.vlgmr.msra.gmra.mxu0 %v618_v14  ;;  %5539 = vmatprep.mubr.bf16.mxu1 %v618_v14  ;;  %v605_v25 = vmul.f32 %v6110_v15, %v7072_v34 }
 0x1b6   : > { %v549_v48 = vpop.xlane.xlu1 %548  ;;  %v551_v51 = vpop.xlane.xlu0 %550  ;;  %845 = vmatprep.mubr.bf16.mxu0 %v9271_v46  ;;  %v606_v55 = vmul.f32 %v6112_v44, %v7078_v41 }
 0x1b7   : > { %6125 = vrsqrt.f32 %v581_v45  ;;  %v567_v33 = vmul.f32 0.0078125, %v549_v48  ;;  %v568_v52 = vmul.f32 0.0078125, %v551_v51  ;;  %v619_v53 = vpack.c.bf16 %v605_v25, %v604_v43 }
 0x1b8   : > { %v6114_v54 = vpop.eup %6113  ;;  %6127 = vrsqrt.f32 %v582_v47 }
 0x1b9   : > { %v583_v26 = vadd.f32 1e-05, %v567_v33  ;;  %v584_v56 = vadd.f32 1e-05, %v568_v52  ;;  %5540 = vmatmul.mubr.bf16.vlgmr.msra.gmra.mxu1 %v619_v53  ;;  %v607_v57 = vmul.f32 %v6114_v54, %v7080_v42  ;;  %v6116_v58 = vpop.eup %6115 }
 0x1ba   : > { %v553_v59 = vpop.xlane.xlu1 %552  ;;  %v608_v1 = vmul.f32 %v6116_v58, %v7087_v49 }
 0x1bb   : > { %6129 = vrsqrt.f32 %v583_v26  ;;  %v569_v34 = vmul.f32 0.0078125, %v553_v59  ;;  %v620_v62 = vpack.c.bf16 %v607_v57, %v606_v55 }
 0x1bc   : > { %v6118_v63 = vpop.eup %6117  ;;  %6131 = vrsqrt.f32 %v584_v56 }
 0x1bd   : > { %v585_v0 = vadd.f32 1e-05, %v569_v34  ;;  %846 = vmatmul.mubr.bf16.gmra.mxu0 %v619_v53  ;;  %5543 = vmatprep.mubr.bf16.mxu1 %v620_v62  ;;  %v609_v41 = vmul.f32 %v6118_v63, %v7090_v50  ;;  %v6120_v2 = vpop.eup %6119 }
 0x1be   : > { %855 = vmatprep.mubr.bf16.mxu0 %v9271_v46  ;;  %v610_v4 = vmul.f32 %v6120_v2, %v7097_v60 }
 0x1bf   : > { %6133 = vrsqrt.f32 %v585_v0  ;;  %v621_v3 = vpack.c.bf16 %v609_v41, %v608_v1 }
 0x1c0   : > { %v6122_v42 = vpop.eup %6121 }
 0x1c1   : > { %5544 = vmatmul.mubr.bf16.gmra.mxu1 %v621_v3  ;;  %v611_v5 = vmul.f32 %v6122_v42, %v7100_v61  ;;  %v6124_v8 = vpop.eup %6123 }
 0x1c2   : > { %v612_v49 = vmul.f32 %v6124_v8, %v7107_v6 }
 0x1c3   : > { %v622_v9 = vpack.c.bf16 %v611_v5, %v610_v4 }
 0x1c4   : > { %v6126_v16 = vpop.eup %6125 }
 0x1c5   : > { %856 = vmatmul.mubr.bf16.gmra.mxu0 %v620_v62  ;;  %5547 = vmatprep.mubr.bf16.mxu1 %v622_v9  ;;  %v613_v50 = vmul.f32 %v6126_v16, %v7110_v7  ;;  %v6128_v17 = vpop.eup %6127 }
 0x1c6   : > { %865 = vmatprep.mubr.bf16.mxu0 %v9271_v46  ;;  %v614_v20 = vmul.f32 %v6128_v17, %v7117_v11  ;;  %v660_v11 = vlaneseq }
 0x1c7   : > { %v623_v18 = vpack.c.bf16 %v613_v50, %v612_v49 }
 0x1c8   : > { %v6130_v19 = vpop.eup %6129 }
 0x1c9   : > { %5548 = vmatmul.mubr.bf16.gmra.mxu1 %v623_v18  ;;  %v615_v60 = vmul.f32 %v6130_v19, %v7120_v22  ;;  %v6132_v61 = vpop.eup %6131  ;;  %v7160_v22 = vshrl.u32 %v660_v11, 7 }
 0x1ca   : > { %v616_v23 = vmul.f32 %v6132_v61, %v7127_v13 }
 0x1cb   : > { %v624_v21 = vpack.c.bf16 %v615_v60, %v614_v20  ;;  %9317 = vst [vmem:[#allocation16_spill] sm:$0xff] %v7160_v22  ;;  %v9269_v13 = vsub.s32 1, %v7160_v22  ;;  %v670_v5 = vsub.s32 2, %v7160_v22 }
 0x1cc   : > { %v6134_v10 = vpop.eup %6133 }
 0x1cd   : > { %866 = vmatmul.mubr.bf16.gmra.mxu0 %v621_v3  ;;  %5551 = vmatprep.mubr.bf16.mxu1 %v624_v21  ;;  %v617_v6 = vmul.f32 %v6134_v10, %v7130_v35  ;;  %v9270_v35 = vsub.s32 0, %v7160_v22  ;;  %v7169_v27 = vrot.slane %v658_v24, %v9269_v13  ;;  %v7220_v17 = vrot.slane %v658_v24, %v670_v5 }
 0x1ce   : > { %875 = vmatprep.mubr.bf16.mxu0 %v9271_v46 }
 0x1cf   : > { %v625_v7 = vpack.c.bf16 %v617_v6, %v616_v23  ;;  %v7173_v29 = vrot.slane %v658_v24, %v9270_v35 }
 0x1d1   : > { %5552 = vmatmul.mubr.bf16.gmra.mxu1 %v625_v7 }
 0x1d5   : > { %876 = vmatmul.mubr.bf16.gmra.mxu0 %v622_v9 }
 0x1d6   : > { %885 = vmatprep.mubr.bf16.mxu0 %v9271_v46 }
 0x1dd   : > { %886 = vmatmul.mubr.bf16.gmra.mxu0 %v623_v18 }
 0x1de   : > { %895 = vmatprep.mubr.bf16.mxu0 %v9271_v46 }
 0x1e5   : > { %896 = vmatmul.mubr.bf16.gmra.mxu0 %v624_v21 }
 0x1e6   : > { %905 = vmatprep.mubr.bf16.mxu0 %v9271_v46 }
 0x1ed   : > { %906 = vmatmul.mubr.bf16.gmra.mxu0 %v625_v7 }
 0x275   : > { %v837_v28 = vpop.f32.mrf.mxu0 }
 0x276   : > { %v838_v36 = vadd.f32 %v837_v28, %v7173_v29 }
 0x277   : > { %v839_v30 = vpop.f32.mrf.mxu0 }
 0x278   : > { %v840_v31 = vadd.f32 %v839_v30, %v7169_v27 }
 0x279   : > { %v841_v32 = vpop.f32.mrf.mxu0  ;;  %v7176_v12 = vpop.f32.mrf.mxu1 }
 0x27a   : > { %v842_v37 = vadd.f32 %v841_v32, %v7173_v29 }
 0x27b   : > { %v843_v38 = vpop.f32.mrf.mxu0  ;;  %v7180_v39 = vpop.f32.mrf.mxu1 }
 0x27c   : > { %v7182_v40 = vpack.c.bf16 %v842_v37, %v838_v36  ;;  %v844_v14 = vadd.f32 %v843_v38, %v7169_v27 }
 0x27d   : > { %v847_v15 = vpop.f32.mrf.mxu0  ;;  %v7185_v43 = vpop.f32.mrf.mxu1 }
 0x27e   : > { %v7187_v44 = vpack.c.bf16 %v844_v14, %v840_v31  ;;  %v848_v45 = vadd.f32 %v847_v15, %v7173_v29  ;;  %5571 = vmatprep.mubr.msk.bf16.mxu0 %vm1053_vm0, %v7182_v40 }
 0x27f   : > { %v7192_v47 = vpop.f32.mrf.mxu0  ;;  %v7194_v25 = vpop.f32.mrf.mxu1 }
 0x281   : > { %v851_v48 = vpop.f32.mrf.mxu0  ;;  %v7196_v51 = vpop.f32.mrf.mxu1 }
 0x282   : > { %v852_v33 = vadd.f32 %v851_v48, %v7173_v29 }
 0x283   : > { %v7199_v52 = vpop.f32.mrf.mxu0  ;;  %v7201_v53 = vpop.f32.mrf.mxu1 }
 0x284   : > { %v7203_v54 = vpack.c.bf16 %v852_v33, %v848_v45 }
 0x285   : > { %v857_v55 = vpop.f32.mrf.mxu0  ;;  %v5546_v26 = vpop.f32.mrf.mxu1 }
 0x286   : > { %v858_v56 = vadd.f32 %v857_v55, %v7173_v29 }
 0x287   : > { %v7206_v57 = vpop.f32.mrf.mxu0  ;;  %v969_v58 = vpop.f32.mrf.mxu1 }
 0x288   : > { %v970_v5 = vadd.f32 %v969_v58, %v7220_v17  ;;  %v962_v58 = vadd.f32 %v7185_v43, %v7220_v17 }
 0x289   : > { %v861_v59 = vpop.f32.mrf.mxu0  ;;  %v5549_v34 = vpop.f32.mrf.mxu1 }
 0x28a   : > { %v862_v62 = vadd.f32 %v861_v59, %v7173_v29  ;;  %v991_v36 = vadd.f32 %v5549_v34, %v7220_v17 }
 0x28b   : > { %v7209_v63 = vpop.f32.mrf.mxu0  ;;  %v982_v0 = vpop.f32.mrf.mxu1 }
 0x28c   : > { %v7211_v1 = vpack.c.bf16 %v862_v62, %v858_v56  ;;  %v983_v33 = vadd.f32 %v982_v0, %v7220_v17  ;;  %v978_v56 = vadd.f32 %v5546_v26, %v7220_v17 }
 0x28d   : > { %v867_v41 = vpop.f32.mrf.mxu0  ;;  %v5550_v2 = vpop.f32.mrf.mxu1 }
 0x28e   : > { %v868_v3 = vadd.f32 %v867_v41, %v7173_v29  ;;  %v994_v28 = vadd.f32 %v5550_v2, %v7220_v17  ;;  %v975_v41 = vadd.f32 %v7196_v51, %v7220_v17  ;;  %v967_v51 = vadd.f32 %v7201_v53, %v7220_v17 }
 0x28f   : > { %v7214_v42 = vpop.f32.mrf.mxu0  ;;  %v985_v4 = vpop.f32.mrf.mxu1  ;;  %v959_v53 = vadd.f32 %v7176_v12, %v7220_v17  ;;  %v951_v12 = vadd.f32 %v7180_v39, %v7220_v17 }
 0x290   : > { %v7245_v14 = vpack.c.bf16 %v994_v28, %v991_v36  ;;  %v986_v15 = vadd.f32 %v985_v4, %v7220_v17  ;;  %v7264_v26 = vpack.c.bf16 %v978_v56, %v975_v41 }
 0x291   : > { %v871_v8 = vpop.f32.mrf.mxu0  ;;  %v5553_v9 = vpop.f32.mrf.mxu1  ;;  %v7289_v43 = vpack.c.bf16 %v962_v58, %v959_v53 }
 0x292   : > { %v872_v16 = vadd.f32 %v871_v8, %v7173_v29  ;;  %v1007_v60 = vadd.f32 %v5553_v9, %v7220_v17  ;;  %9319 = vst [vmem:[#allocation18_spill] sm:$0xff] %v7245_v14  ;;  %v7253_v59 = vpack.c.bf16 %v986_v15, %v983_v33  ;;  %9320 = vst [vmem:[#allocation19_spill] sm:$0xff] %v7264_v26 }
 0x293   : > { %v7218_v49 = vpop.f32.mrf.mxu0  ;;  %v998_v50 = vpop.f32.mrf.mxu1  ;;  %9322 = vst [vmem:[#allocation21_spill] sm:$0xff] %v7289_v43 }
 0x294   : > { %v7222_v18 = vpack.c.bf16 %v872_v16, %v868_v3  ;;  %v999_v6 = vadd.f32 %v998_v50, %v7220_v17  ;;  %v874_v41 = vadd.f32 %v7218_v49, %v7169_v27  ;;  %v854_v49 = vadd.f32 %v7199_v52, %v7169_v27 }
 0x295   : > { %v877_v19 = vpop.f32.mrf.mxu0  ;;  %v5554_v20 = vpop.f32.mrf.mxu1  ;;  %v1079_v52 = vsel %vm1053_vm0, %v7187_v44, 0 }
 0x296   : > { %v878_v61 = vadd.f32 %v877_v19, %v7173_v29  ;;  %v1010_v21 = vadd.f32 %v5554_v20, %v7220_v17  ;;  %v7278_v19 = vpack.c.bf16 %v970_v5, %v967_v51 }
 0x297   : > { %v7227_v10 = vpop.f32.mrf.mxu0  ;;  %v1001_v23 = vpop.f32.mrf.mxu1 }
 0x298   : > { %v7230_v7 = vpack.c.bf16 %v1010_v21, %v1007_v60  ;;  %v1002_v11 = vadd.f32 %v1001_v23, %v7220_v17  ;;  %9321 = vst [vmem:[#allocation20_spill] sm:$0xff] %v7278_v19  ;;  %v880_v56 = vadd.f32 %v7227_v10, %v7169_v27 }
 0x299   : > { %v881_v24 = vpop.f32.mrf.mxu0 }
 0x29a   : > { %9318 = vst [vmem:[#allocation17_spill] sm:$0xff] %v7230_v7  ;;  %v7234_v30 = vpack.c.bf16 %v1002_v11, %v999_v6  ;;  %v882_v31 = vadd.f32 %v881_v24, %v7173_v29  ;;  %5587 = vmatprep.subr.bf16.mxu1 %v7230_v7  ;;  %v954_v11 = vadd.f32 %v7194_v25, %v7220_v17 }
 0x29b   : > { %v7238_v32 = vpop.f32.mrf.mxu0  ;;  %5588 = vmatpush3.bf16.msra.mxu1 %v7230_v7 }
 0x29c   : > { %v7242_v37 = vpack.c.bf16 %v882_v31, %v878_v61  ;;  %5589 = vmatprep.subr.bf16.mxu1 %v7234_v30 }
 0x29d   : > { %v887_v38 = vpop.f32.mrf.mxu0 }
 0x29e   : > { %v888_v45 = vadd.f32 %v887_v38, %v7173_v29  ;;  %v7302_v38 = vpack.c.bf16 %v954_v11, %v951_v12 }
 0x29f   : > { %v889_v48 = vpop.f32.mrf.mxu0  ;;  %5590 = vmatpush3.bf16.msra.mxu1 %v7234_v30 }
 0x2a0   : > { %5591 = vmatprep.subr.bf16.mxu1 %v7245_v14  ;;  %v890_v2 = vadd.f32 %v889_v48, %v7169_v27  ;;  %9323 = vst [vmem:[#allocation22_spill] sm:$0xff] %v7302_v38 }
 0x2a1   : > { %v891_v55 = vpop.f32.mrf.mxu0 }
 0x2a2   : > { %v892_v34 = vadd.f32 %v891_v55, %v7173_v29  ;;  %v884_v55 = vadd.f32 %v7238_v32, %v7169_v27  ;;  %v864_v32 = vadd.f32 %v7209_v63, %v7169_v27 }
 0x2a3   : > { %v893_v62 = vpop.f32.mrf.mxu0  ;;  %5592 = vmatpush3.bf16.msra.mxu1 %v7245_v14 }
 0x2a4   : > { %v7260_v3 = vpack.c.bf16 %v892_v34, %v888_v45  ;;  %v894_v0 = vadd.f32 %v893_v62, %v7169_v27  ;;  %5593 = vmatprep.subr.bf16.mxu1 %v7253_v59  ;;  %v7330_v34 = vpack.c.bf16 %v884_v55, %v880_v56 }
 0x2a5   : > { %v897_v4 = vpop.f32.mrf.mxu0 }
 0x2a6   : > { %v7267_v8 = vpack.c.bf16 %v894_v0, %v890_v2  ;;  %v898_v9 = vadd.f32 %v897_v4, %v7173_v29  ;;  %v870_v2 = vadd.f32 %v7214_v42, %v7169_v27  ;;  %v1091_v10 = vsel %vm1053_vm0, %v7330_v34, 0 }
 0x2a7   : > { %v899_v16 = vpop.f32.mrf.mxu0  ;;  %5594 = vmatpush3.bf16.msra.mxu1 %v7253_v59  ;;  %v860_v4 = vadd.f32 %v7206_v57, %v7169_v27 }
 0x2a8   : > { %1498 = vrot.lane.b32.xlu0 %v7267_v8, %s6786_s17  ;;  %5595 = vmatprep.subr.bf16.mxu1 %v7264_v26  ;;  %v900_v61 = vadd.f32 %v899_v16, %v7169_v27  ;;  %v1094_v62 = vsel %vm1053_vm0, %v7267_v8, 0  ;;  %v7340_v0 = vpack.c.bf16 %v874_v41, %v870_v2 }
 0x2a9   : > { %v901_v50 = vpop.f32.mrf.mxu0  ;;  %v7350_v5 = vpack.c.bf16 %v864_v32, %v860_v4 }
 0x2aa   : > { %v902_v20 = vadd.f32 %v901_v50, %v7173_v29  ;;  %v1088_v42 = vsel %vm1053_vm0, %v7340_v0, 0 }
 0x2ab   : > { %v903_v60 = vpop.f32.mrf.mxu0  ;;  %5596 = vmatpush3.bf16.msra.mxu1 %v7264_v26  ;;  %v1085_v57 = vsel %vm1053_vm0, %v7350_v5, 0 }
 0x2ac   : > { %v7285_v21 = vpack.c.bf16 %v902_v20, %v898_v9  ;;  %v904_v23 = vadd.f32 %v903_v60, %v7169_v27  ;;  %5597 = vmatprep.subr.bf16.mxu1 %v7278_v19  ;;  %v850_v9 = vadd.f32 %v7192_v47, %v7169_v27 }
 0x2ad   : > { %v907_v6 = vpop.f32.mrf.mxu0 }
 0x2ae   : > { %v7293_v24 = vpack.c.bf16 %v904_v23, %v900_v61  ;;  %v908_v28 = vadd.f32 %v907_v6, %v7173_v29  ;;  %v7360_v16 = vpack.c.bf16 %v854_v49, %v850_v9 }
 0x2af   : > { %v909_v31 = vpop.f32.mrf.mxu0  ;;  %5598 = vmatpush3.bf16.msra.mxu1 %v7278_v19 }
 0x2b0   : > { %1500 = vrot.lane.b32.xlu1 %v7293_v24, %s6786_s17  ;;  %5599 = vmatprep.subr.bf16.mxu1 %v7289_v43  ;;  %v910_v45 = vadd.f32 %v909_v31, %v7169_v27  ;;  %v1097_v17 = vsel %vm1053_vm0, %v7293_v24, 0  ;;  %v1082_v63 = vsel %vm1053_vm0, %v7360_v16, 0 }
 0x2b1   : > { %v911_v36 = vpop.f32.mrf.mxu0 }
 0x2b2   : > { %v912_v25 = vadd.f32 %v911_v36, %v7173_v29 }
 0x2b3   : > { %v913_v15 = vpop.f32.mrf.mxu0  ;;  %5600 = vmatpush3.bf16.msra.mxu1 %v7289_v43 }
 0x2b4   : > { %v7307_v48 = vpack.c.bf16 %v912_v25, %v908_v28  ;;  %v914_v33 = vadd.f32 %v913_v15, %v7169_v27  ;;  %5601 = vmatprep.subr.bf16.mxu1 %v7302_v38 }
 0x2b6   : > { %v7311_v39 = vpack.c.bf16 %v914_v33, %v910_v45 }
 0x2b7   : > { %5602 = vmatpush3.bf16.msra.mxu1 %v7302_v38 }
 0x2b8   : > { %1502 = vrot.lane.b32.xlu0 %v7311_v39, %s6786_s17  ;;  %5891 = vmatprep.subr.msk.bf16.mxu0 %vm1053_vm0, %v7311_v39  ;;  %v1100_v29 = vsel %vm1053_vm0, %v7311_v39, 0 }
 0x2b9   : > { %5556 = vmatpush3.bf16.xpose.msra.mxu0 %v1100_v29 }
 0x2ba   : > { %5892 = vmatprep.subr.msk.bf16.mxu0 %vm1053_vm0, %v7293_v24 }
 0x2c1   : > { %5558 = vmatpush3.bf16.xpose.msra.mxu0 %v1097_v17 }
 0x2c2   : > { %5893 = vmatprep.subr.msk.bf16.mxu0 %vm1053_vm0, %v7267_v8 }
 0x2c9   : > { %5560 = vmatpush3.bf16.xpose.msra.mxu0 %v1094_v62 }
 0x2ca   : > { %5894 = vmatprep.subr.msk.bf16.mxu0 %vm1053_vm0, %v7330_v34 }
 0x2d1   : > { %5562 = vmatpush3.bf16.xpose.msra.mxu0 %v1091_v10 }
 0x2d2   : > { %5895 = vmatprep.subr.msk.bf16.mxu0 %vm1053_vm0, %v7340_v0 }
 0x2d9   : > { %5564 = vmatpush3.bf16.xpose.msra.mxu0 %v1088_v42 }
 0x2da   : > { %5896 = vmatprep.subr.msk.bf16.mxu0 %vm1053_vm0, %v7350_v5 }
 0x2e1   : > { %5566 = vmatpush3.bf16.xpose.msra.mxu0 %v1085_v57 }
 0x2e2   : > { %5897 = vmatprep.subr.msk.bf16.mxu0 %vm1053_vm0, %v7360_v16 }
 0x2e9   : > { %5568 = vmatpush3.bf16.xpose.msra.mxu0 %v1082_v63 }
 0x2ea   : > { %5898 = vmatprep.subr.msk.bf16.mxu0 %vm1053_vm0, %v7187_v44 }
 0x2f1   : > { %5570 = vmatpush3.bf16.xpose.msra.mxu0 %v1079_v52 }
 0x2f8   : > { %5572 = vmatmul.mubr.msk.bf16.vlgmr.msra.gmra.mxu0 %vm1053_vm0, %v7203_v54 }
 0x2f9   : > { %5575 = vmatprep.mubr.msk.bf16.mxu0 %vm1053_vm0, %v7211_v1 }
 0x300   : > { %5576 = vmatmul.mubr.msk.bf16.gmra.mxu0 %vm1053_vm0, %v7222_v18 }
 0x301   : > { %5579 = vmatprep.mubr.msk.bf16.mxu0 %vm1053_vm0, %v7242_v37 }
 0x308   : > { %5580 = vmatmul.mubr.msk.bf16.gmra.mxu0 %vm1053_vm0, %v7260_v3 }
 0x309   : > { %5583 = vmatprep.mubr.msk.bf16.mxu0 %vm1053_vm0, %v7285_v21 }
 0x310   : > { %5584 = vmatmul.mubr.msk.bf16.gmra.mxu0 %vm1053_vm0, %v7307_v48 }
 0x31a   : > { %v7386_v27 = vpop.permute.xlu0 %1498 }
 0x322   : > { %v1501_v45 = vpop.permute.xlu1 %1500 }
 0x32a   : > { %v7388_v47 = vpop.permute.xlu0 %1502 }
 0x32b   : > { %5899 = vmatprep.subr.msk.bf16.mxu1 %vm1053_vm0, %v7388_v47 }
 0x3b8   : > { %v5573_v51 = vpop.f32.mrf.mxu0 }
 0x3b9   : > { %1203 = vmax.xlane.f32.xlu0 %v5573_v51 }
 0x3ba   : > { %v1136_v50 = vpop.f32.mrf.mxu0 }
 0x3bc   : > { %v5574_v58 = vpop.f32.mrf.mxu0 }
 0x3bd   : > { %1199 = vmax.xlane.f32.xlu0 %v1136_v50  ;;  %1205 = vmax.xlane.f32.xlu1 %v5574_v58 }
 0x3be   : > { %v1139_v20 = vpop.f32.mrf.mxu0 }
 0x3c0   : > { %v7392_v60 = vpop.f32.mrf.mxu0 }
 0x3c1   : > { %1201 = vmax.xlane.f32.xlu1 %v1139_v20 }
 0x3c2   : > { %v7394_v53 = vpop.f32.mrf.mxu0 }
 0x3c4   : > { %v7396_v61 = vpop.f32.mrf.mxu0 }
 0x3c5   : > { %1211 = vmax.xlane.f32.xlu1 %v7392_v60 }
 0x3c6   : > { %v7399_v23 = vpop.f32.mrf.mxu0 }
 0x3c8   : > { %v7401_v6 = vpop.f32.mrf.mxu0 }
 0x3c9   : > { %1207 = vmax.xlane.f32.xlu1 %v7394_v53 }
 0x3ca   : > { %v7404_v11 = vpop.f32.mrf.mxu0 }
 0x3cc   : > { %v7407_v28 = vpop.f32.mrf.mxu0 }
 0x3cd   : > { %1213 = vmax.xlane.f32.xlu1 %v7396_v61 }
 0x3ce   : > { %v7412_v31 = vpop.f32.mrf.mxu0 }
 0x3d0   : > { %v7415_v12 = vpop.f32.mrf.mxu0 }
 0x3d1   : > { %1209 = vmax.xlane.f32.xlu1 %v7399_v23 }
 0x3d2   : > { %v7418_v36 = vpop.f32.mrf.mxu0 }
 0x3d3   : > { %1496 = vrot.lane.b32.xlu0 %v7330_v34, %s6786_s17 }
 0x3d4   : > { %v7421_v25 = vpop.f32.mrf.mxu0 }
 0x3d5   : > { %1217 = vmax.xlane.f32.xlu1 %v7412_v31 }
 0x3d6   : > { %v7424_v15 = vpop.f32.mrf.mxu0 }
 0x3d9   : > { %1227 = vmax.xlane.f32.xlu1 %v7415_v12 }
 0x3dd   : > { %1223 = vmax.xlane.f32.xlu1 %v7418_v36 }
 0x3e1   : > { %1229 = vmax.xlane.f32.xlu1 %v7421_v25 }
 0x3e5   : > { %1225 = vmax.xlane.f32.xlu1 %v7424_v15 }
 0x3f2   : > { %1219 = vmax.xlane.f32.xlu0 %v7401_v6 }
 0x3f6   : > { %1215 = vmax.xlane.f32.xlu0 %v7404_v11  ;;  %1494 = vrot.lane.b32.xlu1 %v7340_v0, %s6786_s17 }
 0x3fa   : > { %1221 = vmax.xlane.f32.xlu0 %v7407_v28  ;;  %1466 = vrot.lane.b32.xlu1 %v7203_v54, %s6786_s17 }
 0x3fe   : > { %1470 = vrot.lane.b32.xlu1 %v7222_v18, %s6786_s17 }
 0x402   : > { %1474 = vrot.lane.b32.xlu1 %v7260_v3, %s6786_s17 }
 0x406   : > { %1478 = vrot.lane.b32.xlu1 %v7307_v48, %s6786_s17 }
 0x40a   : > { %1805 = vrot.lane.b32.xlu1 %v7234_v30, %s6786_s17 }
 0x40e   : > { %1803 = vrot.lane.b32.xlu1 %v7245_v14, %s6786_s17 }
 0x410   : > { %1492 = vrot.lane.b32.xlu0 %v7350_v5, %s6786_s17 }
 0x412   : > { %1801 = vrot.lane.b32.xlu1 %v7253_v59, %s6786_s17 }
 0x414   : > { %1490 = vrot.lane.b32.xlu0 %v7360_v16, %s6786_s17 }
 0x416   : > { %1797 = vrot.lane.b32.xlu1 %v7278_v19, %s6786_s17 }
 0x418   : > { %1488 = vrot.lane.b32.xlu0 %v7187_v44, %s6786_s17 }
 0x41c   : > { %1464 = vrot.lane.b32.xlu0 %v7182_v40, %s6786_s17 }
 0x420   : > { %1468 = vrot.lane.b32.xlu0 %v7211_v1, %s6786_s17 }
 0x424   : > { %1472 = vrot.lane.b32.xlu0 %v7242_v37, %s6786_s17 }
 0x428   : > { %1476 = vrot.lane.b32.xlu0 %v7285_v21, %s6786_s17 }
 0x42c   : > { %1807 = vrot.lane.b32.xlu0 %v7230_v7, %s6786_s17 }
 0x430   : > { %1799 = vrot.lane.b32.xlu0 %v7264_v26, %s6786_s17 }
 0x442   : > { %v1204_v33 = vpop.xlane.xlu0 %1203 }
 0x443   : > { %v1233_v62 = vsub.f32 %v5573_v51, %v1204_v33 }
 0x445   : > { %v1251_v4 = vmul.f32 1.442695, %v1233_v62 }
 0x446   : > { %v1206_v29 = vpop.xlane.xlu1 %1205  ;;  %v1200_v17 = vpop.xlane.xlu0 %1199 }
 0x447   : > { %v1234_v55 = vsub.f32 %v5574_v58, %v1206_v29  ;;  %v1231_v56 = vsub.f32 %v1136_v50, %v1200_v17 }
 0x449   : > { %v1253_v41 = vmul.f32 1.442695, %v1234_v55  ;;  %v1247_v2 = vmul.f32 1.442695, %v1231_v56 }
 0x44a   : > { %v1202_v10 = vpop.xlane.xlu1 %1201 }
 0x44b   : > { %v1232_v32 = vsub.f32 %v1139_v20, %v1202_v10  ;;  %6135 = vpow2.f32 %v1253_v41 }
 0x44c   : > { %6137 = vpow2.f32 %v1247_v2 }
 0x44d   : > { %v1249_v42 = vmul.f32 1.442695, %v1232_v32  ;;  %v1547_v32 = vsel %vm1053_vm0, %v1501_v45, 0 }
 0x44e   : > { %v1212_v49 = vpop.xlane.xlu1 %1211 }
 0x44f   : > { %6139 = vpow2.f32 %v1249_v42  ;;  %v1237_v50 = vsub.f32 %v7392_v60, %v1212_v49 }
 0x450   : > { %6141 = vpow2.f32 %v1251_v4 }
 0x451   : > { %v1259_v56 = vmul.f32 1.442695, %v1237_v50 }
 0x452   : > { %v1208_v9 = vpop.xlane.xlu1 %1207 }
 0x453   : > { %v1235_v57 = vsub.f32 %v7394_v53, %v1208_v9 }
 0x455   : > { %v1255_v51 = vmul.f32 1.442695, %v1235_v57 }
 0x456   : > { %v1214_v63 = vpop.xlane.xlu1 %1213 }
 0x457   : > { %v1238_v52 = vsub.f32 %v7396_v61, %v1214_v63  ;;  %6143 = vpow2.f32 %v1255_v51 }
 0x458   : > { %v7469_v58 = vpop.eup %6135 }
 0x459   : > { %v1261_v33 = vmul.f32 1.442695, %v1238_v52  ;;  %v7471_v29 = vpop.eup %6137  ;;  %v1497_v52 = vpop.permute.xlu0 %1496 }
 0x45a   : > { %v1210_v20 = vpop.xlane.xlu1 %1209  ;;  %v1541_v51 = vsel %vm1053_vm0, %v1497_v52, 0 }
 0x45b   : > { %v1236_v17 = vsub.f32 %v7399_v23, %v1210_v20  ;;  %6145 = vpow2.f32 %v1261_v33  ;;  %v1550_v23 = vsel %vm1053_vm0, %v7388_v47, 0 }
 0x45c   : > { %v7474_v55 = vpop.eup %6139 }
 0x45d   : > { %v7476_v62 = vpop.eup %6141  ;;  %v1257_v53 = vmul.f32 1.442695, %v1236_v17  ;;  %v1327_v61 = vpack.c.bf16 %v7474_v55, %v7471_v29 }
 0x45e   : > { %v1218_v60 = vpop.xlane.xlu1 %1217  ;;  %v1328_v41 = vpack.c.bf16 %v7469_v58, %v7476_v62 }
 0x45f   : > { %6147 = vpow2.f32 %v1257_v53  ;;  %5603 = vmatprep.mubr.bf16.mxu1 %v1327_v61  ;;  %v1240_v20 = vsub.f32 %v7412_v31, %v1218_v60 }
 0x460   : > { %6149 = vpow2.f32 %v1259_v56  ;;  %5604 = vmatmul.mubr.bf16.vlgmr.msra.gmra.mxu1 %v1328_v41 }
 0x461   : > { %5620 = vmatpush3.bf16.xpose.msra.mxu1 %v1550_v23  ;;  %v1265_v53 = vmul.f32 1.442695, %v1240_v20 }
 0x462   : > { %5900 = vmatprep.subr.msk.bf16.mxu1 %vm1053_vm0, %v1501_v45  ;;  %v1228_v2 = vpop.xlane.xlu1 %1227  ;;  %v1544_v45 = vsel %vm1053_vm0, %v7386_v27, 0 }
 0x463   : > { %6151 = vpow2.f32 %v1265_v53 }
 0x464   : > { %v7486_v4 = vpop.eup %6143 }
 0x466   : > { %v1224_v10 = vpop.xlane.xlu1 %1223 }
 0x468   : > { %v7490_v42 = vpop.eup %6145 }
 0x469   : > { %5622 = vmatpush3.bf16.xpose.msra.mxu1 %v1547_v32  ;;  %v1243_v32 = vsub.f32 %v7418_v36, %v1224_v10 }
 0x46a   : > { %5901 = vmatprep.subr.msk.bf16.mxu1 %vm1053_vm0, %v7386_v27  ;;  %v1230_v47 = vpop.xlane.xlu1 %1229 }
 0x46b   : > { %v1246_v60 = vsub.f32 %v7421_v25, %v1230_v47 }
 0x46c   : > { %v7492_v49 = vpop.eup %6147 }
 0x46d   : > { %v7494_v9 = vpop.eup %6149  ;;  %v1329_v57 = vpack.c.bf16 %v7492_v49, %v7486_v4 }
 0x46e   : > { %v1330_v63 = vpack.c.bf16 %v7490_v42, %v7494_v9  ;;  %v1226_v50 = vpop.xlane.xlu1 %1225 }
 0x46f   : > { %5607 = vmatprep.mubr.bf16.mxu1 %v1329_v57  ;;  %v1244_v56 = vsub.f32 %v7424_v15, %v1226_v50  ;;  %v1271_v15 = vmul.f32 1.442695, %v1243_v32  ;;  %v1245_v50 = vsub.f32 %v7415_v12, %v1228_v2 }
 0x470   : > { %5608 = vmatmul.mubr.bf16.gmra.mxu1 %v1330_v63  ;;  %v7517_v20 = vpop.eup %6151 }
 0x471   : > { %5624 = vmatpush3.bf16.xpose.msra.mxu1 %v1544_v45  ;;  %v1273_v57 = vmul.f32 1.442695, %v1244_v56 }
 0x472   : > { %5902 = vmatprep.subr.msk.bf16.mxu1 %vm1053_vm0, %v1497_v52  ;;  %v1495_v33 = vpop.permute.xlu1 %1494 }
 0x473   : > { %v1538_v23 = vsel %vm1053_vm0, %v1495_v33, 0 }
 0x476   : > { %v1467_v10 = vpop.permute.xlu1 %1466 }
 0x479   : > { %5626 = vmatpush3.bf16.xpose.msra.mxu1 %v1541_v51  ;;  %v1277_v51 = vmul.f32 1.442695, %v1246_v60 }
 0x47a   : > { %5903 = vmatprep.subr.msk.bf16.mxu1 %vm1053_vm0, %v1495_v33  ;;  %v1471_v25 = vpop.permute.xlu1 %1470 }
 0x47b   : > { %v1220_v17 = vpop.xlane.xlu0 %1219 }
 0x47c   : > { %v1241_v61 = vsub.f32 %v7401_v6, %v1220_v17 }
 0x47e   : > { %v1267_v45 = vmul.f32 1.442695, %v1241_v61 }
 0x47f   : > { %v1216_v27 = vpop.xlane.xlu0 %1215 }
 0x480   : > { %v1239_v41 = vsub.f32 %v7404_v11, %v1216_v27 }
 0x481   : > { %5628 = vmatpush3.bf16.xpose.msra.mxu1 %v1538_v23 }
 0x482   : > { %v1263_v63 = vmul.f32 1.442695, %v1239_v41  ;;  %v1475_v41 = vpop.permute.xlu1 %1474 }
 0x483   : > { %v1222_v52 = vpop.xlane.xlu0 %1221 }
 0x484   : > { %6153 = vpow2.f32 %v1263_v63  ;;  %v1242_v31 = vsub.f32 %v7407_v28, %v1222_v52  ;;  %v1275_v28 = vmul.f32 1.442695, %v1245_v50 }
 0x485   : > { %6155 = vpow2.f32 %v1273_v57 }
 0x486   : > { %v1269_v6 = vmul.f32 1.442695, %v1242_v31  ;;  %6157 = vpow2.f32 %v1267_v45  ;;  %v1479_v31 = vpop.permute.xlu1 %1478 }
 0x487   : > { %v1493_v11 = vpop.permute.xlu0 %1492 }
 0x488   : > { %6159 = vpow2.f32 %v1269_v6  ;;  %5904 = vmatprep.subr.msk.bf16.mxu1 %vm1053_vm0, %v1493_v11  ;;  %v1535_v36 = vsel %vm1053_vm0, %v1493_v11, 0 }
 0x489   : > { %6161 = vpow2.f32 %v1271_v15  ;;  %5630 = vmatpush3.bf16.xpose.msra.mxu1 %v1535_v36 }
 0x48a   : > { %6163 = vpow2.f32 %v1277_v51  ;;  %v1806_v50 = vpop.permute.xlu1 %1805 }
 0x48b   : > { %v1491_v33 = vpop.permute.xlu0 %1490  ;;  %6165 = vpow2.f32 %v1275_v28 }
 0x48c   : > { %5905 = vmatprep.subr.msk.bf16.mxu1 %vm1053_vm0, %v1491_v33  ;;  %v1532_v12 = vsel %vm1053_vm0, %v1491_v33, 0 }
 0x48e   : > { %v1804_v51 = vpop.permute.xlu1 %1803 }
 0x48f   : > { %v1489_v47 = vpop.permute.xlu0 %1488 }
 0x490   : > { %v1529_v45 = vsel %vm1053_vm0, %v1489_v47, 0 }
 0x491   : > { %v7520_v2 = vpop.eup %6153  ;;  %5632 = vmatpush3.bf16.xpose.msra.mxu1 %v1532_v12 }
 0x492   : > { %5906 = vmatprep.subr.msk.bf16.mxu1 %vm1053_vm0, %v1489_v47  ;;  %v1331_v17 = vpack.c.bf16 %v7517_v20, %v7520_v2  ;;  %v7525_v56 = vpop.eup %6155  ;;  %v1802_v33 = vpop.permute.xlu1 %1801 }
 0x493   : > { %v1465_v53 = vpop.permute.xlu0 %1464  ;;  %v7527_v61 = vpop.eup %6157 }
 0x494   : > { %5611 = vmatprep.mubr.bf16.mxu1 %v1331_v17 }
 0x495   : > { %v7529_v27 = vpop.eup %6159 }
 0x496   : > { %v7531_v23 = vpop.eup %6161  ;;  %v1332_v32 = vpack.c.bf16 %v7529_v27, %v7527_v61  ;;  %v1798_v47 = vpop.permute.xlu1 %1797 }
 0x497   : > { %v1469_v57 = vpop.permute.xlu0 %1468  ;;  %v1333_v63 = vpack.c.bf16 %v7525_v56, %v7531_v23  ;;  %v7538_v52 = vpop.eup %6163 }
 0x498   : > { %5612 = vmatmul.mubr.bf16.gmra.mxu1 %v1332_v32  ;;  %v7540_v60 = vpop.eup %6165 }
 0x499   : > { %5615 = vmatprep.mubr.bf16.mxu1 %v1333_v63  ;;  %5634 = vmatpush3.bf16.xpose.msra.mxu1 %v1529_v45  ;;  %v1334_v6 = vpack.c.bf16 %v7538_v52, %v7540_v60 }
 0x49b   : > { %v1473_v15 = vpop.permute.xlu0 %1472 }
 0x49f   : > { %v1477_v11 = vpop.permute.xlu0 %1476 }
 0x4a0   : > { %5616 = vmatmul.mubr.bf16.gmra.mxu1 %v1334_v6 }
 0x4a1   : > { %5635 = vmatprep.mubr.msk.bf16.mxu1 %vm1053_vm0, %v1465_v53 }
 0x4a3   : > { %v1808_v36 = vpop.permute.xlu0 %1807 }
 0x4a4   : > { %5651 = vmatprep.subr.bf16.mxu0 %v1808_v36 }
 0x4a5   : > { %5652 = vmatpush3.bf16.msra.mxu0 %v1808_v36 }
 0x4a6   : > { %5653 = vmatprep.subr.bf16.mxu0 %v1806_v50 }
 0x4a7   : > { %v1800_v28 = vpop.permute.xlu0 %1799 }
 0x4a8   : > { %5636 = vmatmul.mubr.msk.bf16.vlgmr.msra.gmra.mxu1 %vm1053_vm0, %v1467_v10 }
 0x4a9   : > { %5639 = vmatprep.mubr.msk.bf16.mxu1 %vm1053_vm0, %v1469_v57  ;;  %5654 = vmatpush3.bf16.msra.mxu0 %v1806_v50 }
 0x4aa   : > { %5655 = vmatprep.subr.bf16.mxu0 %v1804_v51 }
 0x4ad   : > { %5656 = vmatpush3.bf16.msra.mxu0 %v1804_v51 }
 0x4ae   : > { %5657 = vmatprep.subr.bf16.mxu0 %v1802_v33 }
 0x4b0   : > { %5640 = vmatmul.mubr.msk.bf16.gmra.mxu1 %vm1053_vm0, %v1471_v25 }
 0x4b1   : > { %5643 = vmatprep.mubr.msk.bf16.mxu1 %vm1053_vm0, %v1473_v15  ;;  %5658 = vmatpush3.bf16.msra.mxu0 %v1802_v33 }
 0x4b2   : > { %5659 = vmatprep.subr.bf16.mxu0 %v1800_v28 }
 0x4b5   : > { %5660 = vmatpush3.bf16.msra.mxu0 %v1800_v28 }
 0x4b6   : > { %5661 = vmatprep.subr.bf16.mxu0 %v1798_v47 }
 0x4b8   : > { %5644 = vmatmul.mubr.msk.bf16.gmra.mxu1 %vm1053_vm0, %v1475_v41 }
 0x4b9   : > { %5647 = vmatprep.mubr.msk.bf16.mxu1 %vm1053_vm0, %v1477_v11  ;;  %5662 = vmatpush3.bf16.msra.mxu0 %v1798_v47 }
 0x4c0   : > { %5648 = vmatmul.mubr.msk.bf16.gmra.mxu1 %vm1053_vm0, %v1479_v31 }
 0x520   : > { %v7552_v10 = vpop.f32.mrf.mxu1 }
 0x521   : > { %9324 = vst [vmem:[#allocation23_spill] sm:$0xff] %v7552_v10 }
 0x522   : > { %v7554_v12 = vpop.f32.mrf.mxu1 }
 0x523   : > { %9325 = vst [vmem:[#allocation24_spill] sm:$0xff] %v7554_v12 }
 0x524   : > { %v7556_v25 = vpop.f32.mrf.mxu1 }
 0x525   : > { %9326 = vst [vmem:[#allocation25_spill] sm:$0xff] %v7556_v25 }
 0x526   : > { %v7558_v17 = vpop.f32.mrf.mxu1 }
 0x527   : > { %9327 = vst [vmem:[#allocation26_spill] sm:$0xff] %v7558_v17 }
 0x530   : > { %v7560_v53 = vpop.f32.mrf.mxu1 }
 0x531   : > { %9328 = vst [vmem:[#allocation27_spill] sm:$0xff] %v7560_v53 }
 0x532   : > { %v7562_v32 = vpop.f32.mrf.mxu1 }
 0x533   : > { %9329 = vst [vmem:[#allocation28_spill] sm:$0xff] %v7562_v32 }
 0x534   : > { %v7564_v57 = vpop.f32.mrf.mxu1 }
 0x535   : > { %9330 = vst [vmem:[#allocation29_spill] sm:$0xff] %v7564_v57 }
 0x536   : > { %v7566_v41 = vpop.f32.mrf.mxu1 }
 0x537   : > { %9331 = vst [vmem:[#allocation30_spill] sm:$0xff] %v7566_v41 }
 0x558   : > { %v7568_v63 = vpop.f32.mrf.mxu1 }
 0x559   : > { %9332 = vst [vmem:[#allocation31_spill] sm:$0xff] %v7568_v63 }
 0x55a   : > { %v7570_v45 = vpop.f32.mrf.mxu1 }
 0x55b   : > { %9333 = vst [vmem:[#allocation32_spill] sm:$0xff] %v7570_v45 }
 0x55c   : > { %v7572_v31 = vpop.f32.mrf.mxu1 }
 0x55d   : > { %9334 = vst [vmem:[#allocation33_spill] sm:$0xff] %v7572_v31 }
 0x55e   : > { %v7574_v15 = vpop.f32.mrf.mxu1 }
 0x55f   : > { %9335 = vst [vmem:[#allocation34_spill] sm:$0xff] %v7574_v15 }
 0x560   : > { %v7576_v6 = vpop.f32.mrf.mxu1 }
 0x561   : > { %9336 = vst [vmem:[#allocation35_spill] sm:$0xff] %v7576_v6 }
 0x562   : > { %v7578_v11 = vpop.f32.mrf.mxu1 }
 0x563   : > { %9337 = vst [vmem:[#allocation36_spill] sm:$0xff] %v7578_v11 }
 0x564   : > { %v7580_v50 = vpop.f32.mrf.mxu1 }
 0x565   : > { %9338 = vst [vmem:[#allocation37_spill] sm:$0xff] %v7580_v50 }
 0x566   : > { %v7582_v36 = vpop.f32.mrf.mxu1 }
 0x567   : > { %9339 = vst [vmem:[#allocation38_spill] sm:$0xff] %v7582_v36 }
 0x568   : > { %v5637_v51 = vpop.f32.mrf.mxu1 }
 0x569   : > { %1653 = vmax.xlane.f32.xlu0 %v5637_v51 }
 0x56a   : > { %v1586_v33 = vpop.f32.mrf.mxu1 }
 0x56c   : > { %v5638_v28 = vpop.f32.mrf.mxu1 }
 0x56d   : > { %1649 = vmax.xlane.f32.xlu0 %v1586_v33 }
 0x56e   : > { %v1589_v47 = vpop.f32.mrf.mxu1 }
 0x56f   : > { %1651 = vmax.xlane.f32.xlu1 %v1589_v47 }
 0x570   : > { %v7586_v13 = vpop.f32.mrf.mxu1 }
 0x571   : > { %1655 = vmax.xlane.f32.xlu0 %v5638_v28 }
 0x572   : > { %v7588_v35 = vpop.f32.mrf.mxu1 }
 0x574   : > { %v7592_v46 = vpop.f32.mrf.mxu1 }
 0x576   : > { %v7594_v22 = vpop.f32.mrf.mxu1 }
 0x578   : > { %v7596_v50 = vpop.f32.mrf.mxu1 }
 0x57a   : > { %v7598_v6 = vpop.f32.mrf.mxu1 }
 0x57c   : > { %v7600_v11 = vpop.f32.mrf.mxu1 }
 0x57e   : > { %v7602_v31 = vpop.f32.mrf.mxu1 }
 0x580   : > { %1793 = vrot.lane.b32.xlu1 %v7302_v38, %s6786_s17  ;;  %v7604_v38 = vpop.f32.mrf.mxu1 }
 0x582   : > { %v7608_v63 = vpop.f32.mrf.mxu1 }
 0x584   : > { %v7612_v36 = vpop.f32.mrf.mxu1 }
 0x586   : > { %v7616_v15 = vpop.f32.mrf.mxu1 }
 0x587   : > { %1795 = vrot.lane.b32.xlu0 %v7289_v43, %s6786_s17 }
 0x5a4   : > { %1659 = vmax.xlane.f32.xlu1 %v7594_v22 }
 0x5a6   : > { %1657 = vmax.xlane.f32.xlu0 %v7588_v35 }
 0x5a8   : > { %1667 = vmax.xlane.f32.xlu1 %v7602_v31 }
 0x5aa   : > { %1661 = vmax.xlane.f32.xlu0 %v7586_v13 }
 0x5ac   : > { %1671 = vmax.xlane.f32.xlu1 %v7600_v11 }
 0x5ae   : > { %1663 = vmax.xlane.f32.xlu0 %v7592_v46 }
 0x5b0   : > { %1675 = vmax.xlane.f32.xlu1 %v7616_v15 }
 0x5b2   : > { %1665 = vmax.xlane.f32.xlu0 %v7598_v6 }
 0x5b4   : > { %1679 = vmax.xlane.f32.xlu1 %v7612_v36 }
 0x5b6   : > { %1669 = vmax.xlane.f32.xlu0 %v7596_v50 }
 0x5ba   : > { %1673 = vmax.xlane.f32.xlu0 %v7608_v63 }
 0x5be   : > { %1677 = vmax.xlane.f32.xlu0 %v7604_v38 }
 0x5c5   : > { %2232 = vrot.lane.b32.xlu1 %v7293_v24, %s6787_s21 }
 0x5c9   : > { %2228 = vrot.lane.b32.xlu1 %v7330_v34, %s6787_s21 }
 0x5d4   : > { %2234 = vrot.lane.b32.xlu0 %v7311_v39, %s6787_s21 }
 0x5d8   : > { %2230 = vrot.lane.b32.xlu0 %v7267_v8, %s6787_s21 }
 0x5dc   : > { %2226 = vrot.lane.b32.xlu0 %v7340_v0, %s6787_s21 }
 0x5f2   : > { %v1654_v45 = vpop.xlane.xlu0 %1653 }
 0x5f3   : > { %v1683_v57 = vsub.f32 %v5637_v51, %v1654_v45  ;;  %v6055_v45 = vld [vmem:[#allocation6 + $0x18] sm:$0xff]  }
 0x5f5   : > { %v1701_v53 = vmul.f32 1.442695, %v1683_v57 }
 0x5f6   : > { %v1650_v19 = vpop.xlane.xlu0 %1649 }
 0x5f7   : > { %6167 = vpow2.f32 %v1701_v53  ;;  %v1681_v41 = vsub.f32 %v1586_v33, %v1650_v19 }
 0x5f8   : > { %v1652_v32 = vpop.xlane.xlu1 %1651 }
 0x5f9   : > { %v1697_v14 = vmul.f32 1.442695, %v1681_v41  ;;  %v1682_v7 = vsub.f32 %v1589_v47, %v1652_v32 }
 0x5fa   : > { %v1656_v25 = vpop.xlane.xlu0 %1655 }
 0x5fb   : > { %6169 = vpow2.f32 %v1697_v14  ;;  %v1699_v10 = vmul.f32 1.442695, %v1682_v7  ;;  %v1684_v17 = vsub.f32 %v5638_v28, %v1656_v25 }
 0x5fc   : > { %v1794_v26 = vpop.permute.xlu1 %1793 }
 0x5fd   : > { %6171 = vpow2.f32 %v1699_v10  ;;  %v1703_v12 = vmul.f32 1.442695, %v1684_v17  ;;  %v6056_v10 = vld [vmem:[#allocation6 + $0x10] sm:$0xff]  }
 0x5fe   : > { %v1796_v43 = vpop.permute.xlu0 %1795 }
 0x5ff   : > { %6173 = vpow2.f32 %v1703_v12  ;;  %5663 = vmatprep.subr.bf16.mxu0 %v1796_v43 }
 0x600   : > { %5664 = vmatpush3.bf16.msra.mxu0 %v1796_v43 }
 0x601   : > { %5665 = vmatprep.subr.bf16.mxu0 %v1794_v26 }
 0x604   : > { %v6168_v57 = vpop.eup %6167  ;;  %5666 = vmatpush3.bf16.msra.mxu0 %v1794_v26 }
 0x605   : > { %1733 = vadd.xlane.f32.xlu0 %v6168_v57  ;;  %5683 = vmatprep.subr.bf16.mxu0 %v6055_v45 }
 0x608   : > { %v6170_v19 = vpop.eup %6169 }
 0x609   : > { %1729 = vadd.xlane.f32.xlu0 %v6170_v19 }
 0x60a   : > { %v6172_v53 = vpop.eup %6171 }
 0x60b   : > { %v1777_v32 = vpack.c.bf16 %v6172_v53, %v6170_v19 }
 0x60c   : > { %v6174_v14 = vpop.eup %6173 }
 0x60d   : > { %5667 = vmatprep.mubr.bf16.mxu0 %v1777_v32  ;;  %1735 = vadd.xlane.f32.xlu1 %v6174_v14  ;;  %v1778_v7 = vpack.c.bf16 %v6174_v14, %v6168_v57 }
 0x60f   : > { %5668 = vmatmul.mubr.bf16.vlgmr.msra.gmra.mxu0 %v1778_v7 }
 0x610   : > { %5684 = vmatpush3.bf16.msra.mxu0 %v6055_v45 }
 0x611   : > { %1731 = vadd.xlane.f32.xlu1 %v6172_v53  ;;  %5685 = vmatprep.subr.bf16.mxu0 %v6056_v10 }
 0x614   : > { %5686 = vmatpush3.bf16.msra.mxu0 %v6056_v10 }
 0x61f   : > { %2222 = vrot.lane.b32.xlu0 %v7360_v16, %s6787_s21 }
 0x622   : > { %2224 = vrot.lane.b32.xlu1 %v7350_v5, %s6787_s21 }
 0x62d   : > { %v1660_v26 = vpop.xlane.xlu1 %1659 }
 0x62e   : > { %v1686_v43 = vsub.f32 %v7594_v22, %v1660_v26 }
 0x62f   : > { %v1658_v12 = vpop.xlane.xlu0 %1657 }
 0x630   : > { %v1707_v25 = vmul.f32 1.442695, %v1686_v43  ;;  %v1685_v17 = vsub.f32 %v7588_v35, %v1658_v12 }
 0x631   : > { %v1668_v41 = vpop.xlane.xlu1 %1667 }
 0x632   : > { %v1705_v51 = vmul.f32 1.442695, %v1685_v17  ;;  %6175 = vpow2.f32 %v1707_v25  ;;  %v1690_v57 = vsub.f32 %v7602_v31, %v1668_v41 }
 0x633   : > { %v1662_v33 = vpop.xlane.xlu0 %1661 }
 0x634   : > { %6177 = vpow2.f32 %v1705_v51  ;;  %v1687_v28 = vsub.f32 %v7586_v13, %v1662_v33  ;;  %v1715_v14 = vmul.f32 1.442695, %v1690_v57 }
 0x635   : > { %v1672_v47 = vpop.xlane.xlu1 %1671 }
 0x636   : > { %v1709_v45 = vmul.f32 1.442695, %v1687_v28  ;;  %v1692_v35 = vsub.f32 %v7600_v11, %v1672_v47 }
 0x637   : > { %v1664_v19 = vpop.xlane.xlu0 %1663 }
 0x638   : > { %6179 = vpow2.f32 %v1709_v45  ;;  %v1688_v53 = vsub.f32 %v7592_v46, %v1664_v19  ;;  %v1719_v13 = vmul.f32 1.442695, %v1692_v35 }
 0x639   : > { %v1676_v32 = vpop.xlane.xlu1 %1675 }
 0x63a   : > { %v1711_v22 = vmul.f32 1.442695, %v1688_v53  ;;  %v1694_v43 = vsub.f32 %v7616_v15, %v1676_v32 }
 0x63b   : > { %v1666_v7 = vpop.xlane.xlu0 %1665 }
 0x63c   : > { %6181 = vpow2.f32 %v1711_v22  ;;  %v1689_v10 = vsub.f32 %v7598_v6, %v1666_v7  ;;  %v1723_v11 = vmul.f32 1.442695, %v1694_v43 }
 0x63d   : > { %6183 = vpow2.f32 %v1715_v14  ;;  %v1680_v25 = vpop.xlane.xlu1 %1679 }
 0x63e   : > { %v1713_v26 = vmul.f32 1.442695, %v1689_v10  ;;  %v1696_v33 = vsub.f32 %v7612_v36, %v1680_v25 }
 0x63f   : > { %v1670_v12 = vpop.xlane.xlu0 %1669  ;;  %v6176_v31 = vpop.eup %6175 }
 0x640   : > { %6185 = vpow2.f32 %v1713_v26  ;;  %v1691_v46 = vsub.f32 %v7596_v50, %v1670_v12  ;;  %v1727_v45 = vmul.f32 1.442695, %v1696_v33 }
 0x641   : > { %v6178_v17 = vpop.eup %6177  ;;  %6187 = vpow2.f32 %v1719_v13 }
 0x642   : > { %v1717_v41 = vmul.f32 1.442695, %v1691_v46  ;;  %v1779_v51 = vpack.c.bf16 %v6176_v31, %v6178_v17 }
 0x643   : > { %v1674_v28 = vpop.xlane.xlu0 %1673 }
 0x644   : > { %6189 = vpow2.f32 %v1717_v41  ;;  %v1693_v6 = vsub.f32 %v7608_v63, %v1674_v28  ;;  %5671 = vmatprep.mubr.bf16.mxu0 %v1779_v51 }
 0x645   : > { %v6180_v47 = vpop.eup %6179  ;;  %6191 = vpow2.f32 %v1723_v11 }
 0x646   : > { %v1721_v15 = vmul.f32 1.442695, %v1693_v6  ;;  %1737 = vadd.xlane.f32.xlu1 %v6178_v17  ;;  %1741 = vadd.xlane.f32.xlu0 %v6180_v47 }
 0x647   : > { %v1678_v57 = vpop.xlane.xlu0 %1677 }
 0x648   : > { %6193 = vpow2.f32 %v1721_v15  ;;  %v1695_v50 = vsub.f32 %v7604_v38, %v1678_v57 }
 0x649   : > { %v6182_v19 = vpop.eup %6181  ;;  %6195 = vpow2.f32 %v1727_v45 }
 0x64a   : > { %v1725_v53 = vmul.f32 1.442695, %v1695_v50  ;;  %1739 = vadd.xlane.f32.xlu0 %v6176_v31  ;;  %1743 = vadd.xlane.f32.xlu1 %v6182_v19  ;;  %v1780_v36 = vpack.c.bf16 %v6182_v19, %v6180_v47  ;;  %v6184_v63 = vpop.eup %6183 }
 0x64b   : > { %v7650_v22 = vpop.permute.xlu0 %2234 }
 0x64c   : > { %6197 = vpow2.f32 %v1725_v53  ;;  %5672 = vmatmul.mubr.bf16.gmra.mxu0 %v1780_v36  ;;  %5907 = vmatprep.subr.msk.bf16.mxu0 %vm1053_vm0, %v7650_v22  ;;  %v2282_v15 = vsel %vm1053_vm0, %v7650_v22, 0 }
 0x64d   : > { %v6186_v32 = vpop.eup %6185 }
 0x64e   : > { %v1781_v14 = vpack.c.bf16 %v6184_v63, %v6186_v32  ;;  %v6188_v35 = vpop.eup %6187 }
 0x64f   : > { %v2231_v25 = vpop.permute.xlu0 %2230 }
 0x650   : > { %5675 = vmatprep.mubr.bf16.mxu0 %v1781_v14  ;;  %v2276_v22 = vsel %vm1053_vm0, %v2231_v25, 0 }
 0x651   : > { %v6190_v7 = vpop.eup %6189 }
 0x652   : > { %1749 = vadd.xlane.f32.xlu1 %v6190_v7  ;;  %v1782_v38 = vpack.c.bf16 %v6188_v35, %v6190_v7  ;;  %v6192_v10 = vpop.eup %6191 }
 0x654   : > { %5676 = vmatmul.mubr.bf16.gmra.mxu0 %v1782_v38 }
 0x655   : > { %v6194_v26 = vpop.eup %6193 }
 0x656   : > { %1745 = vadd.xlane.f32.xlu1 %v6186_v32  ;;  %v1783_v13 = vpack.c.bf16 %v6192_v10, %v6194_v26  ;;  %v6196_v43 = vpop.eup %6195 }
 0x658   : > { %5679 = vmatprep.mubr.bf16.mxu0 %v1783_v13 }
 0x659   : > { %v6198_v12 = vpop.eup %6197 }
 0x65a   : > { %1751 = vadd.xlane.f32.xlu1 %v6188_v35  ;;  %1757 = vadd.xlane.f32.xlu0 %v6198_v12  ;;  %v1784_v31 = vpack.c.bf16 %v6196_v43, %v6198_v12 }
 0x65c   : > { %5680 = vmatmul.mubr.bf16.gmra.mxu0 %v1784_v31 }
 0x65e   : > { %1747 = vadd.xlane.f32.xlu1 %v6184_v63  ;;  %1753 = vadd.xlane.f32.xlu0 %v6194_v26 }
 0x662   : > { %1755 = vadd.xlane.f32.xlu1 %v6192_v10  ;;  %1759 = vadd.xlane.f32.xlu0 %v6196_v43 }
 0x673   : > { %2220 = vrot.lane.b32.xlu1 %v7187_v44, %s6787_s21 }
 0x677   : > { %2206 = vrot.lane.b32.xlu1 %v7203_v54, %s6787_s21 }
 0x678   : > { %2204 = vrot.lane.b32.xlu0 %v7182_v40, %s6787_s21 }
 0x67b   : > { %2210 = vrot.lane.b32.xlu1 %v7222_v18, %s6787_s21 }
 0x67c   : > { %2208 = vrot.lane.b32.xlu0 %v7211_v1, %s6787_s21 }
 0x67f   : > { %2214 = vrot.lane.b32.xlu1 %v7260_v3, %s6787_s21 }
 0x680   : > { %2212 = vrot.lane.b32.xlu0 %v7242_v37, %s6787_s21 }
 0x683   : > { %2218 = vrot.lane.b32.xlu1 %v7307_v48, %s6787_s21 }
 0x684   : > { %2216 = vrot.lane.b32.xlu0 %v7285_v21, %s6787_s21 }
 0x687   : > { %2839 = vrot.lane.b32.xlu1 %v7293_v24, %s6788_s25  ;;  %v2233_v24 = vpop.permute.xlu1 %2232 }
 0x688   : > { %2841 = vrot.lane.b32.xlu0 %v7311_v39, %s6788_s25  ;;  %v7689_v39 = vpop.permute.xlu0 %2226  ;;  %v2279_v19 = vsel %vm1053_vm0, %v2233_v24, 0 }
 0x689   : > { %v2270_v10 = vsel %vm1053_vm0, %v7689_v39, 0 }
 0x68b   : > { %2835 = vrot.lane.b32.xlu1 %v7330_v34, %s6788_s25 }
 0x68c   : > { %2837 = vrot.lane.b32.xlu0 %v7267_v8, %s6788_s25  ;;  %v2229_v8 = vpop.permute.xlu1 %2228 }
 0x68d   : > { %v2273_v35 = vsel %vm1053_vm0, %v2229_v8, 0 }
 0x68e   : > { %v1734_v34 = vpop.xlane.xlu0 %1733 }
 0x68f   : > { %2831 = vrot.lane.b32.xlu1 %v7350_v5, %s6788_s25 }
 0x690   : > { %2833 = vrot.lane.b32.xlu0 %v7340_v0, %s6788_s25 }
 0x692   : > { %v1730_v0 = vpop.xlane.xlu0 %1729 }
 0x693   : > { %6199 = vrcp.f32 %v1730_v0 }
 0x694   : > { %2829 = vrot.lane.b32.xlu0 %v7360_v16, %s6788_s25 }
 0x696   : > { %v1736_v5 = vpop.xlane.xlu1 %1735  ;;  %v2223_v45 = vpop.permute.xlu0 %2222 }
 0x697   : > { %6201 = vrcp.f32 %v1736_v5 }
 0x69a   : > { %v1732_v16 = vpop.xlane.xlu1 %1731 }
 0x69b   : > { %6203 = vrcp.f32 %v1732_v16 }
 0x69c   : > { %6205 = vrcp.f32 %v1734_v34 }
 0x69e   : > { %v2225_v57 = vpop.permute.xlu1 %2224 }
 0x6a0   : > { %v6200_v46 = vpop.eup %6199 }
 0x6b3   : > { %1279 = vadd.xlane.f32.xlu1 %v7471_v29  ;;  %1281 = vadd.xlane.f32.xlu0 %v7474_v55  ;;  %v6057_v29 = vld [vmem:[#allocation6 + $0x8] sm:$0xff]  }
 0x6b4   : > { %5703 = vmatprep.subr.bf16.mxu1 %v6057_v29 }
 0x6b5   : > { %5704 = vmatpush3.bf16.msra.mxu1 %v6057_v29 }
 0x6b7   : > { %1283 = vadd.xlane.f32.xlu0 %v7476_v62 }
 0x6bb   : > { %1285 = vadd.xlane.f32.xlu0 %v7469_v58  ;;  %v6058_v58 = vld [vmem:[#allocation6] sm:$0xff]  }
 0x6bc   : > { %5705 = vmatprep.subr.bf16.mxu1 %v6058_v58 }
 0x6bd   : > { %5706 = vmatpush3.bf16.msra.mxu1 %v6058_v58 }
 0x6bf   : > { %1287 = vadd.xlane.f32.xlu0 %v7486_v4  ;;  %v6202_v4 = vpop.eup %6201 }
 0x6c0   : > { %v6204_v41 = vpop.eup %6203 }
 0x6c3   : > { %1289 = vadd.xlane.f32.xlu0 %v7492_v49 }
 0x6c4   : > { %2827 = vrot.lane.b32.xlu1 %v7187_v44, %s6788_s25  ;;  %v6206_v44 = vpop.eup %6205 }
 0x6cf   : > { %v5669_v55 = vpop.f32.mrf.mxu0  ;;  %v1742_v50 = vpop.xlane.xlu0 %1741 }
 0x6d0   : > { %v1916_v28 = vmul.f32 %v6206_v44, %v5669_v55  ;;  %v1738_v53 = vpop.xlane.xlu1 %1737 }
 0x6d1   : > { %v1851_v62 = vpop.f32.mrf.mxu0  ;;  %6207 = vrcp.f32 %v1738_v53 }
 0x6d2   : > { %v1914_v11 = vmul.f32 %v6200_v46, %v1851_v62 }
 0x6d3   : > { %v5670_v17 = vpop.f32.mrf.mxu0 }
 0x6d4   : > { %v1917_v49 = vmul.f32 %v6202_v4, %v5670_v17  ;;  %v1744_v36 = vpop.xlane.xlu1 %1743 }
 0x6d5   : > { %v1854_v51 = vpop.f32.mrf.mxu0  ;;  %6209 = vrcp.f32 %v1744_v36 }
 0x6d6   : > { %v1915_v33 = vmul.f32 %v6204_v41, %v1854_v51  ;;  %v1931_v47 = vpack.c.bf16 %v1917_v49, %v1916_v28 }
 0x6d8   : > { %v1930_v6 = vpack.c.bf16 %v1915_v33, %v1914_v11 }
 0x6d9   : > { %2811 = vrot.lane.b32.xlu0 %v7182_v40, %s6788_s25  ;;  %v1740_v40 = vpop.xlane.xlu0 %1739 }
 0x6da   : > { %5687 = vmatprep.mubr.msk.bf16.mxu0 %vm1053_vm0, %v1930_v6  ;;  %6211 = vrcp.f32 %v1740_v40 }
 0x6db   : > { %5688 = vmatmul.mubr.msk.bf16.vlgmr.msra.gmra.mxu0 %vm1053_vm0, %v1931_v47  ;;  %v1750_v32 = vpop.xlane.xlu1 %1749  ;;  %6213 = vrcp.f32 %v1742_v50 }
 0x6dc   : > { %5724 = vmatpush3.bf16.xpose.msra.mxu0 %v2282_v15 }
 0x6dd   : > { %5908 = vmatprep.subr.msk.bf16.mxu0 %vm1053_vm0, %v2233_v24 }
 0x6de   : > { %v6208_v24 = vpop.eup %6207 }
 0x6df   : > { %v1746_v7 = vpop.xlane.xlu1 %1745 }
 0x6e0   : > { %6215 = vrcp.f32 %v1746_v7 }
 0x6e3   : > { %v7706_v63 = vpop.xlane.xlu0 %1757 }
 0x6e4   : > { %5726 = vmatpush3.bf16.xpose.msra.mxu0 %v2279_v19 }
 0x6e5   : > { %5909 = vmatprep.subr.msk.bf16.mxu0 %vm1053_vm0, %v2231_v25 }
 0x6e7   : > { %v1754_v14 = vpop.xlane.xlu0 %1753 }
 0x6e8   : > { %1291 = vadd.xlane.f32.xlu1 %v7494_v9  ;;  %v1752_v9 = vpop.xlane.xlu1 %1751 }
 0x6e9   : > { %6217 = vrcp.f32 %v1752_v9 }
 0x6eb   : > { %v1760_v38 = vpop.xlane.xlu0 %1759 }
 0x6ec   : > { %5728 = vmatpush3.bf16.xpose.msra.mxu0 %v2276_v22  ;;  %v1748_v13 = vpop.xlane.xlu1 %1747 }
 0x6ed   : > { %5910 = vmatprep.subr.msk.bf16.mxu0 %vm1053_vm0, %v2229_v8  ;;  %6219 = vrcp.f32 %v1748_v13  ;;  %v6210_v8 = vpop.eup %6209 }
 0x6ee   : > { %6221 = vrcp.f32 %v1750_v32 }
 0x6ef   : > { %v7718_v26 = vpop.permute.xlu0 %2204  ;;  %6223 = vrcp.f32 %v1754_v14 }
 0x6f0   : > { %6225 = vrcp.f32 %v1760_v38 }
 0x6f3   : > { %v7723_v43 = vpop.permute.xlu0 %2208 }
 0x6f4   : > { %5730 = vmatpush3.bf16.xpose.msra.mxu0 %v2273_v35 }
 0x6f5   : > { %5911 = vmatprep.subr.msk.bf16.mxu0 %vm1053_vm0, %v7689_v39 }
 0x6f8   : > { %1293 = vadd.xlane.f32.xlu0 %v7490_v42  ;;  %v2267_v42 = vsel %vm1053_vm0, %v2225_v57, 0 }
 0x6f9   : > { %2813 = vrot.lane.b32.xlu1 %v7203_v54, %s6788_s25  ;;  %v1756_v54 = vpop.xlane.xlu1 %1755 }
 0x6fa   : > { %6227 = vrcp.f32 %v1756_v54 }
 0x6fb   : > { %6229 = vrcp.f32 %v7706_v63 }
 0x6fc   : > { %5732 = vmatpush3.bf16.xpose.msra.mxu0 %v2270_v10  ;;  %1295 = vadd.xlane.f32.xlu0 %v7520_v2  ;;  %v7728_v2 = vpop.permute.xlu0 %2212 }
 0x6fd   : > { %5912 = vmatprep.subr.msk.bf16.mxu0 %vm1053_vm0, %v2225_v57  ;;  %v2221_v12 = vpop.permute.xlu1 %2220 }
 0x700   : > { %1297 = vadd.xlane.f32.xlu0 %v7517_v20  ;;  %v2264_v20 = vsel %vm1053_vm0, %v2223_v45, 0 }
 0x701   : > { %v2207_v16 = vpop.permute.xlu1 %2206 }
 0x704   : > { %5734 = vmatpush3.bf16.xpose.msra.mxu0 %v2267_v42  ;;  %1301 = vadd.xlane.f32.xlu0 %v7529_v27  ;;  %v7734_v27 = vpop.permute.xlu0 %2216 }
 0x705   : > { %5913 = vmatprep.subr.msk.bf16.mxu0 %vm1053_vm0, %v2223_v45  ;;  %v2211_v33 = vpop.permute.xlu1 %2210 }
 0x708   : > { %1303 = vadd.xlane.f32.xlu0 %v7531_v23  ;;  %v6212_v23 = vpop.eup %6211  ;;  %v2842_v62 = vpop.permute.xlu0 %2841 }
 0x709   : > { %v6214_v0 = vpop.eup %6213  ;;  %v2215_v63 = vpop.permute.xlu1 %2214 }
 0x70a   : > { %v6216_v49 = vpop.eup %6215 }
 0x70b   : > { %v6218_v44 = vpop.eup %6217 }
 0x70c   : > { %5736 = vmatpush3.bf16.xpose.msra.mxu0 %v2264_v20  ;;  %v5673_v31 = vpop.f32.mrf.mxu0  ;;  %1305 = vadd.xlane.f32.xlu0 %v7525_v56  ;;  %v2261_v56 = vsel %vm1053_vm0, %v2221_v12, 0  ;;  %v6220_v11 = vpop.eup %6219 }
 0x70d   : > { %5914 = vmatprep.subr.msk.bf16.mxu0 %vm1053_vm0, %v2221_v12  ;;  %v1920_v58 = vmul.f32 %v6214_v0, %v5673_v31  ;;  %v6222_v47 = vpop.eup %6221  ;;  %v2219_v42 = vpop.permute.xlu1 %2218  ;;  %v9342_v0 = vld [vmem:[#allocation24_spill] sm:$0xff] }
 0x70e   : > { %v1867_v25 = vpop.f32.mrf.mxu0  ;;  %v6224_v36 = vpop.eup %6223 }
 0x70f   : > { %v1918_v29 = vmul.f32 %v6208_v24, %v1867_v25  ;;  %v6226_v32 = vpop.eup %6225  ;;  %v2838_v20 = vpop.permute.xlu0 %2837 }
 0x710   : > { %v5674_v39 = vpop.f32.mrf.mxu0  ;;  %v6228_v14 = vpop.eup %6227 }
 0x711   : > { %v1921_v34 = vmul.f32 %v6210_v8, %v5674_v39  ;;  %v6230_v38 = vpop.eup %6229  ;;  %v2883_v39 = vsel %vm1053_vm0, %v2838_v20, 0 }
 0x712   : > { %v1870_v5 = vpop.f32.mrf.mxu0 }
 0x713   : > { %v1919_v55 = vmul.f32 %v6212_v23, %v1870_v5  ;;  %v1933_v4 = vpack.c.bf16 %v1921_v34, %v1920_v58  ;;  %v2834_v31 = vpop.permute.xlu0 %2833  ;;  %v9341_v23 = vld [vmem:[#allocation21_spill] sm:$0xff] }
 0x714   : > { %5738 = vmatpush3.bf16.xpose.msra.mxu0 %v2261_v56  ;;  %v5677_v46 = vpop.f32.mrf.mxu0 }
 0x715   : > { %v1932_v17 = vpack.c.bf16 %v1919_v55, %v1918_v29  ;;  %5915 = vmatprep.subr.msk.bf16.mxu0 %vm1053_vm0, %v2842_v62  ;;  %v1924_v57 = vmul.f32 %v6222_v47, %v5677_v46  ;;  %v9343_v55 = vld [vmem:[#allocation26_spill] sm:$0xff]  ;;  %v2877_v46 = vsel %vm1053_vm0, %v2834_v31, 0 }
 0x716   : > { %v1883_v41 = vpop.f32.mrf.mxu0 }
 0x717   : > { %5691 = vmatprep.mubr.msk.bf16.mxu0 %vm1053_vm0, %v1932_v17  ;;  %v1922_v15 = vmul.f32 %v6216_v49, %v1883_v41  ;;  %v2830_v25 = vpop.permute.xlu0 %2829  ;;  %v9344_v41 = vld [vmem:[#allocation23_spill] sm:$0xff] }
 0x718   : > { %v5678_v51 = vpop.f32.mrf.mxu0  ;;  %5692 = vmatmul.mubr.msk.bf16.gmra.mxu0 %vm1053_vm0, %v1933_v4 }
 0x719   : > { %v1925_v28 = vmul.f32 %v6218_v44, %v5678_v51  ;;  %v9345_v51 = vld [vmem:[#allocation25_spill] sm:$0xff] }
 0x71a   : > { %v1886_v6 = vpop.f32.mrf.mxu0 }
 0x71b   : > { %v1923_v45 = vmul.f32 %v6220_v11, %v1886_v6  ;;  %v1935_v53 = vpack.c.bf16 %v1925_v28, %v1924_v57 }
 0x71c   : > { %v5681_v50 = vpop.f32.mrf.mxu0 }
 0x71d   : > { %v1934_v19 = vpack.c.bf16 %v1923_v45, %v1922_v15  ;;  %1299 = vadd.xlane.f32.xlu1 %v7527_v61  ;;  %v1928_v10 = vmul.f32 %v6230_v38, %v5681_v50  ;;  %v9347_v15 = vld [vmem:[#allocation18_spill] sm:$0xff]  ;;  %v9348_v45 = vld [vmem:[#allocation28_spill] sm:$0xff] }
 0x71e   : > { %v1899_v40 = vpop.f32.mrf.mxu0  ;;  %v9349_v50 = vld [vmem:[#allocation30_spill] sm:$0xff] }
 0x71f   : > { %5695 = vmatprep.mubr.msk.bf16.mxu0 %vm1053_vm0, %v1934_v19  ;;  %v1926_v61 = vmul.f32 %v6224_v36, %v1899_v40  ;;  %v2871_v40 = vsel %vm1053_vm0, %v2830_v25, 0 }
 0x720   : > { %v5682_v22 = vpop.f32.mrf.mxu0  ;;  %5696 = vmatmul.mubr.msk.bf16.gmra.mxu0 %vm1053_vm0, %v1935_v53 }
 0x721   : > { %1307 = vadd.xlane.f32.xlu1 %v7540_v60  ;;  %v1929_v35 = vmul.f32 %v6226_v32, %v5682_v22  ;;  %v2840_v60 = vpop.permute.xlu1 %2839 }
 0x722   : > { %2815 = vrot.lane.b32.xlu0 %v7211_v1, %s6788_s25  ;;  %v1902_v7 = vpop.f32.mrf.mxu0  ;;  %v2889_v1 = vsel %vm1053_vm0, %v2842_v62, 0  ;;  %v2886_v24 = vsel %vm1053_vm0, %v2840_v60, 0 }
 0x723   : > { %v1927_v9 = vmul.f32 %v6228_v14, %v1902_v7  ;;  %v1937_v54 = vpack.c.bf16 %v1929_v35, %v1928_v10  ;;  %v9351_v10 = vld [vmem:[#allocation27_spill] sm:$0xff] }
 0x725   : > { %v1936_v13 = vpack.c.bf16 %v1927_v9, %v1926_v61  ;;  %v2836_v12 = vpop.permute.xlu1 %2835 }
 0x726   : > { %v2880_v34 = vsel %vm1053_vm0, %v2836_v12, 0 }
 0x727   : > { %5699 = vmatprep.mubr.msk.bf16.mxu0 %vm1053_vm0, %v1936_v13 }
 0x728   : > { %5700 = vmatmul.mubr.msk.bf16.gmra.mxu0 %vm1053_vm0, %v1937_v54 }
 0x729   : > { %5739 = vmatprep.mubr.msk.bf16.mxu0 %vm1053_vm0, %v7718_v26  ;;  %v2832_v26 = vpop.permute.xlu1 %2831 }
 0x72a   : > { %v2874_v6 = vsel %vm1053_vm0, %v2832_v26, 0 }
 0x730   : > { %5740 = vmatmul.mubr.msk.bf16.vlgmr.msra.gmra.mxu0 %vm1053_vm0, %v2207_v16 }
 0x731   : > { %5808 = vmatpush3.bf16.xpose.msra.mxu0 %v2889_v1  ;;  %5743 = vmatprep.mubr.msk.bf16.mxu0 %vm1053_vm0, %v7723_v43 }
 0x732   : > { %5916 = vmatprep.subr.msk.bf16.mxu0 %vm1053_vm0, %v2840_v60  ;;  %2817 = vrot.lane.b32.xlu1 %v7222_v18, %s6788_s25 }
 0x736   : > { %2529 = vrot.lane.b32.xlu1 %v7234_v30, %s6787_s21 }
 0x738   : > { %5744 = vmatmul.mubr.msk.bf16.gmra.mxu0 %vm1053_vm0, %v2211_v33  ;;  %v9346_v33 = vld [vmem:[#allocation17_spill] sm:$0xff] }
 0x739   : > { %5810 = vmatpush3.bf16.xpose.msra.mxu0 %v2886_v24  ;;  %5747 = vmatprep.mubr.msk.bf16.mxu0 %vm1053_vm0, %v7728_v2  ;;  %v9354_v24 = vld [vmem:[#allocation34_spill] sm:$0xff] }
 0x73a   : > { %5917 = vmatprep.subr.msk.bf16.mxu0 %vm1053_vm0, %v2838_v20  ;;  %2819 = vrot.lane.b32.xlu1 %v7242_v37, %s6788_s25  ;;  %v9340_v37 = vld [vmem:[#allocation19_spill] sm:$0xff] }
 0x73c   : > { %v1280_v43 = vpop.xlane.xlu1 %1279  ;;  %v1282_v18 = vpop.xlane.xlu0 %1281 }
 0x73d   : > { %6231 = vrcp.f32 %v1280_v43 }
 0x73e   : > { %6233 = vrcp.f32 %v1282_v18  ;;  %2525 = vrot.lane.b32.xlu1 %v7253_v59, %s6787_s21 }
 0x740   : > { %5748 = vmatmul.mubr.msk.bf16.gmra.mxu0 %vm1053_vm0, %v2215_v63  ;;  %v1284_v8 = vpop.xlane.xlu0 %1283  ;;  %v2828_v36 = vpop.permute.xlu1 %2827  ;;  %v9350_v63 = vld [vmem:[#allocation20_spill] sm:$0xff] }
 0x741   : > { %5812 = vmatpush3.bf16.xpose.msra.mxu0 %v2883_v39  ;;  %1309 = vadd.xlane.f32.xlu0 %v7538_v52  ;;  %6235 = vrcp.f32 %v1284_v8  ;;  %v2868_v22 = vsel %vm1053_vm0, %v2828_v36, 0 }
 0x742   : > { %5751 = vmatprep.mubr.msk.bf16.mxu0 %vm1053_vm0, %v7734_v27  ;;  %5918 = vmatprep.subr.msk.bf16.mxu0 %vm1053_vm0, %v2836_v12 }
 0x743   : > { %2523 = vrot.lane.b32.xlu1 %v9340_v37, %s6787_s21 }
 0x744   : > { %v1286_v2 = vpop.xlane.xlu0 %1285 }
 0x745   : > { %6237 = vrcp.f32 %v1286_v2 }
 0x747   : > { %2519 = vrot.lane.b32.xlu1 %v9341_v23, %s6787_s21 }
 0x748   : > { %5752 = vmatmul.mubr.msk.bf16.gmra.mxu0 %vm1053_vm0, %v2219_v42  ;;  %v1288_v5 = vpop.xlane.xlu0 %1287  ;;  %v9352_v42 = vld [vmem:[#allocation29_spill] sm:$0xff] }
 0x749   : > { %5814 = vmatpush3.bf16.xpose.msra.mxu0 %v2880_v34  ;;  %6239 = vrcp.f32 %v1288_v5 }
 0x74a   : > { %v6232_v52 = vpop.eup %6231  ;;  %5919 = vmatprep.subr.msk.bf16.mxu0 %vm1053_vm0, %v2834_v31 }
 0x74b   : > { %v6234_v27 = vpop.eup %6233  ;;  %v1432_v16 = vmul.f32 %v6232_v52, %v9342_v0 }
 0x74c   : > { %v1290_v29 = vpop.xlane.xlu0 %1289  ;;  %v1433_v56 = vmul.f32 %v6234_v27, %v9343_v55 }
 0x74d   : > { %6241 = vrcp.f32 %v1290_v29  ;;  %v9355_v29 = vld [vmem:[#allocation38_spill] sm:$0xff] }
 0x74e   : > { %v1448_v62 = vpack.c.bf16 %v1433_v56, %v1432_v16  ;;  %v6236_v58 = vpop.eup %6235  ;;  %v9356_v56 = vld [vmem:[#allocation31_spill] sm:$0xff] }
 0x74f   : > { %v1434_v49 = vmul.f32 %v6236_v58, %v9344_v41  ;;  %v9357_v58 = vld [vmem:[#allocation33_spill] sm:$0xff] }
 0x750   : > { %5707 = vmatprep.mubr.msk.bf16.mxu1 %vm1053_vm0, %v1448_v62  ;;  %v2812_v17 = vpop.permute.xlu0 %2811 }
 0x751   : > { %5816 = vmatpush3.bf16.xpose.msra.mxu0 %v2877_v46  ;;  %5823 = vmatprep.mubr.msk.bf16.mxu0 %vm1053_vm0, %v2812_v17 }
 0x752   : > { %v6238_v4 = vpop.eup %6237  ;;  %5920 = vmatprep.subr.msk.bf16.mxu0 %vm1053_vm0, %v2832_v26  ;;  %v9353_v26 = vld [vmem:[#allocation32_spill] sm:$0xff] }
 0x753   : > { %v1435_v44 = vmul.f32 %v6238_v4, %v9345_v51  ;;  %v9358_v4 = vld [vmem:[#allocation36_spill] sm:$0xff] }
 0x755   : > { %v1449_v11 = vpack.c.bf16 %v1435_v44, %v1434_v49 }
 0x756   : > { %v6240_v28 = vpop.eup %6239 }
 0x757   : > { %2531 = vrot.lane.b32.xlu0 %v9346_v33, %s6787_s21  ;;  %5708 = vmatmul.mubr.msk.bf16.vlgmr.msra.gmra.mxu1 %vm1053_vm0, %v1449_v11  ;;  %v1436_v57 = vmul.f32 %v6240_v28, %v9348_v45 }
 0x759   : > { %5818 = vmatpush3.bf16.xpose.msra.mxu0 %v2874_v6 }
 0x75a   : > { %v6242_v47 = vpop.eup %6241  ;;  %5921 = vmatprep.subr.msk.bf16.mxu0 %vm1053_vm0, %v2830_v25 }
 0x75b   : > { %2527 = vrot.lane.b32.xlu0 %v9347_v15, %s6787_s21  ;;  %v1437_v19 = vmul.f32 %v6242_v47, %v9349_v50 }
 0x75d   : > { %v1450_v53 = vpack.c.bf16 %v1437_v19, %v1436_v57 }
 0x75f   : > { %2821 = vrot.lane.b32.xlu0 %v7260_v3, %s6788_s25  ;;  %5711 = vmatprep.mubr.msk.bf16.mxu1 %vm1053_vm0, %v1450_v53 }
 0x761   : > { %5820 = vmatpush3.bf16.xpose.msra.mxu0 %v2871_v40 }
 0x762   : > { %5922 = vmatprep.subr.msk.bf16.mxu0 %vm1053_vm0, %v2828_v36 }
 0x763   : > { %2521 = vrot.lane.b32.xlu0 %v9350_v63, %s6787_s21 }
 0x769   : > { %5822 = vmatpush3.bf16.xpose.msra.mxu0 %v2868_v22  ;;  %v9359_v22 = vld [vmem:[#allocation35_spill] sm:$0xff] }
 0x771   : > { %v1292_v32 = vpop.xlane.xlu1 %1291 }
 0x772   : > { %6243 = vrcp.f32 %v1292_v32 }
 0x775   : > { %v2814_v14 = vpop.permute.xlu1 %2813 }
 0x776   : > { %5824 = vmatmul.mubr.msk.bf16.vlgmr.msra.gmra.mxu0 %vm1053_vm0, %v2814_v14  ;;  %v9360_v14 = vld [vmem:[#allocation37_spill] sm:$0xff] }
 0x77f   : > { %v6244_v38 = vpop.eup %6243 }
 0x780   : > { %v1438_v13 = vmul.f32 %v6244_v38, %v9351_v10 }
 0x781   : > { %v1294_v3 = vpop.xlane.xlu0 %1293 }
 0x782   : > { %6245 = vrcp.f32 %v1294_v3 }
 0x785   : > { %v1296_v35 = vpop.xlane.xlu0 %1295 }
 0x786   : > { %6247 = vrcp.f32 %v1296_v35 }
 0x789   : > { %v1298_v7 = vpop.xlane.xlu0 %1297 }
 0x78a   : > { %6249 = vrcp.f32 %v1298_v7 }
 0x78d   : > { %v1302_v61 = vpop.xlane.xlu0 %1301 }
 0x78f   : > { %v6246_v9 = vpop.eup %6245 }
 0x790   : > { %v1439_v54 = vmul.f32 %v6246_v9, %v9352_v42 }
 0x791   : > { %v1304_v60 = vpop.xlane.xlu0 %1303 }
 0x792   : > { %v1451_v20 = vpack.c.bf16 %v1439_v54, %v1438_v13 }
 0x793   : > { %v6248_v1 = vpop.eup %6247 }
 0x794   : > { %5712 = vmatmul.mubr.msk.bf16.gmra.mxu1 %vm1053_vm0, %v1451_v20  ;;  %v1440_v25 = vmul.f32 %v6248_v1, %v9353_v26 }
 0x795   : > { %v1306_v12 = vpop.xlane.xlu0 %1305 }
 0x796   : > { %6251 = vrcp.f32 %v1306_v12 }
 0x797   : > { %v6250_v31 = vpop.eup %6249  ;;  %6253 = vrcp.f32 %v1302_v61 }
 0x798   : > { %v1441_v43 = vmul.f32 %v6250_v31, %v9354_v24  ;;  %6255 = vrcp.f32 %v1304_v60 }
 0x799   : > { %v2816_v18 = vpop.permute.xlu0 %2815 }
 0x79a   : > { %5827 = vmatprep.mubr.msk.bf16.mxu0 %vm1053_vm0, %v2816_v18  ;;  %v1452_v39 = vpack.c.bf16 %v1441_v43, %v1440_v25 }
 0x79b   : > { %v7823_v44 = vpop.f32.mrf.mxu0 }
 0x79c   : > { %5715 = vmatprep.mubr.msk.bf16.mxu1 %vm1053_vm0, %v1452_v39 }
 0x79d   : > { %v7825_v28 = vpop.f32.mrf.mxu0 }
 0x79f   : > { %v7827_v47 = vpop.f32.mrf.mxu0 }
 0x7a1   : > { %v7829_v57 = vpop.f32.mrf.mxu0 }
 0x7a3   : > { %v6252_v5 = vpop.eup %6251 }
 0x7a4   : > { %v6254_v52 = vpop.eup %6253  ;;  %v1445_v55 = vmul.f32 %v6252_v5, %v9355_v29 }
 0x7a5   : > { %v6256_v0 = vpop.eup %6255  ;;  %v1443_v46 = vmul.f32 %v6254_v52, %v9357_v58 }
 0x7a6   : > { %v1300_v8 = vpop.xlane.xlu1 %1299  ;;  %v1444_v41 = vmul.f32 %v6256_v0, %v9358_v4 }
 0x7a7   : > { %6257 = vrcp.f32 %v1300_v8 }
 0x7a8   : > { %v1454_v51 = vpack.c.bf16 %v1445_v55, %v1444_v41 }
 0x7aa   : > { %v1308_v2 = vpop.xlane.xlu1 %1307 }
 0x7ab   : > { %6259 = vrcp.f32 %v1308_v2 }
 0x7ae   : > { %v2818_v34 = vpop.permute.xlu1 %2817 }
 0x7af   : > { %5828 = vmatmul.mubr.msk.bf16.gmra.mxu0 %vm1053_vm0, %v2818_v34 }
 0x7b2   : > { %v2530_v27 = vpop.permute.xlu1 %2529 }
 0x7b4   : > { %v6258_v16 = vpop.eup %6257 }
 0x7b5   : > { %v1442_v62 = vmul.f32 %v6258_v16, %v9356_v56 }
 0x7b6   : > { %v2820_v17 = vpop.permute.xlu1 %2819 }
 0x7b7   : > { %5831 = vmatprep.mubr.msk.bf16.mxu0 %vm1053_vm0, %v2820_v17  ;;  %v1453_v49 = vpack.c.bf16 %v1443_v46, %v1442_v62  ;;  %v9367_v62 = vld [vmem:[#allocation22_spill] sm:$0xff] }
 0x7b8   : > { %v6260_v50 = vpop.eup %6259 }
 0x7b9   : > { %5716 = vmatmul.mubr.msk.bf16.gmra.mxu1 %vm1053_vm0, %v1453_v49  ;;  %v1446_v32 = vmul.f32 %v6260_v50, %v9359_v22 }
 0x7ba   : > { %5719 = vmatprep.mubr.msk.bf16.mxu1 %vm1053_vm0, %v1454_v51  ;;  %v2526_v19 = vpop.permute.xlu1 %2525 }
 0x7be   : > { %v2524_v38 = vpop.permute.xlu1 %2523 }
 0x7c2   : > { %v2520_v54 = vpop.permute.xlu1 %2519 }
 0x7ca   : > { %v1310_v11 = vpop.xlane.xlu0 %1309 }
 0x7cb   : > { %6261 = vrcp.f32 %v1310_v11 }
 0x7ce   : > { %v2532_v6 = vpop.permute.xlu0 %2531 }
 0x7cf   : > { %5755 = vmatprep.subr.bf16.mxu1 %v2532_v6 }
 0x7d0   : > { %5756 = vmatpush3.bf16.msra.mxu1 %v2532_v6 }
 0x7d1   : > { %5757 = vmatprep.subr.bf16.mxu1 %v2530_v27 }
 0x7d2   : > { %v2528_v45 = vpop.permute.xlu0 %2527 }
 0x7d4   : > { %5758 = vmatpush3.bf16.msra.mxu1 %v2530_v27 }
 0x7d5   : > { %5759 = vmatprep.subr.bf16.mxu1 %v2528_v45 }
 0x7d6   : > { %v2822_v53 = vpop.permute.xlu0 %2821 }
 0x7d7   : > { %5832 = vmatmul.mubr.msk.bf16.gmra.mxu0 %vm1053_vm0, %v2822_v53 }
 0x7d8   : > { %v6262_v40 = vpop.eup %6261  ;;  %v7832_v36 = vpop.f32.mrf.mxu0  ;;  %5760 = vmatpush3.bf16.msra.mxu1 %v2528_v45 }
 0x7d9   : > { %5761 = vmatprep.subr.bf16.mxu1 %v2526_v19  ;;  %v1447_v3 = vmul.f32 %v6262_v40, %v9360_v14 }
 0x7da   : > { %v7836_v35 = vpop.f32.mrf.mxu0  ;;  %v2522_v10 = vpop.permute.xlu0 %2521 }
 0x7db   : > { %v1455_v7 = vpack.c.bf16 %v1447_v3, %v1446_v32 }
 0x7dc   : > { %v7838_v61 = vpop.f32.mrf.mxu0  ;;  %5762 = vmatpush3.bf16.msra.mxu1 %v2526_v19 }
 0x7dd   : > { %5720 = vmatmul.mubr.msk.bf16.gmra.mxu1 %vm1053_vm0, %v1455_v7  ;;  %5763 = vmatprep.subr.bf16.mxu1 %v2524_v38 }
 0x7de   : > { %v7841_v9 = vpop.f32.mrf.mxu0 }
 0x7e0   : > { %v7843_v13 = vpop.f32.mrf.mxu0  ;;  %5764 = vmatpush3.bf16.msra.mxu1 %v2524_v38 }
 0x7e1   : > { %5765 = vmatprep.subr.bf16.mxu1 %v2522_v10 }
 0x7e2   : > { %v7845_v42 = vpop.f32.mrf.mxu0 }
 0x7e4   : > { %v7847_v60 = vpop.f32.mrf.mxu0  ;;  %5766 = vmatpush3.bf16.msra.mxu1 %v2522_v10 }
 0x7e5   : > { %9361 = vst [vmem:[#allocation19_spill] sm:$0xff] %v7847_v60  ;;  %5767 = vmatprep.subr.bf16.mxu1 %v2520_v54 }
 0x7e6   : > { %v7849_v20 = vpop.f32.mrf.mxu0 }
 0x7e7   : > { %9362 = vst [vmem:[#allocation21_spill] sm:$0xff] %v7849_v20 }
 0x7e8   : > { %v7851_v1 = vpop.f32.mrf.mxu0  ;;  %5768 = vmatpush3.bf16.msra.mxu1 %v2520_v54 }
 0x7e9   : > { %9363 = vst [vmem:[#allocation24_spill] sm:$0xff] %v7851_v1 }
 0x7ea   : > { %v7853_v12 = vpop.f32.mrf.mxu0 }
 0x7eb   : > { %9364 = vst [vmem:[#allocation26_spill] sm:$0xff] %v7853_v12 }
 0x7ec   : > { %v7855_v31 = vpop.f32.mrf.mxu0 }
 0x7ed   : > { %9365 = vst [vmem:[#allocation23_spill] sm:$0xff] %v7855_v31 }
 0x7ee   : > { %v7857_v26 = vpop.f32.mrf.mxu0 }
 0x7ef   : > { %9366 = vst [vmem:[#allocation25_spill] sm:$0xff] %v7857_v26 }
 0x7f0   : > { %v5741_v25 = vpop.f32.mrf.mxu0 }
 0x7f1   : > { %2385 = vmax.xlane.f32.xlu0 %v5741_v25 }
 0x7f2   : > { %v2318_v24 = vpop.f32.mrf.mxu0 }
 0x7f3   : > { %2381 = vmax.xlane.f32.xlu1 %v2318_v24 }
 0x7f4   : > { %v5742_v43 = vpop.f32.mrf.mxu0 }
 0x7f5   : > { %2387 = vmax.xlane.f32.xlu0 %v5742_v43 }
 0x7f6   : > { %v7859_v18 = vpop.f32.mrf.mxu0 }
 0x7f8   : > { %v7861_v39 = vpop.f32.mrf.mxu0 }
 0x7f9   : > { %2383 = vmax.xlane.f32.xlu0 %v7859_v18 }
 0x7fa   : > { %v7864_v8 = vpop.f32.mrf.mxu0 }
 0x7fc   : > { %v7866_v2 = vpop.f32.mrf.mxu0 }
 0x7fd   : > { %2393 = vmax.xlane.f32.xlu0 %v7861_v39 }
 0x7fe   : > { %v7869_v34 = vpop.f32.mrf.mxu0 }
 0x7ff   : > { %2391 = vmax.xlane.f32.xlu1 %v7869_v34 }
 0x800   : > { %v7872_v5 = vpop.f32.mrf.mxu0 }
 0x801   : > { %2389 = vmax.xlane.f32.xlu0 %v7864_v8 }
 0x802   : > { %v7875_v52 = vpop.f32.mrf.mxu0 }
 0x804   : > { %v7877_v27 = vpop.f32.mrf.mxu0 }
 0x805   : > { %2395 = vmax.xlane.f32.xlu0 %v7866_v2 }
 0x806   : > { %v7880_v0 = vpop.f32.mrf.mxu0 }
 0x807   : > { %2399 = vmax.xlane.f32.xlu1 %v7880_v0 }
 0x808   : > { %v7884_v16 = vpop.f32.mrf.mxu0 }
 0x809   : > { %2401 = vmax.xlane.f32.xlu0 %v7872_v5 }
 0x80a   : > { %v7888_v29 = vpop.f32.mrf.mxu0 }
 0x80b   : > { %2409 = vmax.xlane.f32.xlu1 %v7884_v16 }
 0x80c   : > { %v7892_v55 = vpop.f32.mrf.mxu0 }
 0x80d   : > { %2397 = vmax.xlane.f32.xlu0 %v7875_v52 }
 0x80e   : > { %v7895_v56 = vpop.f32.mrf.mxu0 }
 0x80f   : > { %2405 = vmax.xlane.f32.xlu1 %v7888_v29 }
 0x811   : > { %2403 = vmax.xlane.f32.xlu0 %v7877_v27 }
 0x815   : > { %2411 = vmax.xlane.f32.xlu0 %v7892_v55 }
 0x819   : > { %2407 = vmax.xlane.f32.xlu0 %v7895_v56 }
 0x820   : > { %2825 = vrot.lane.b32.xlu1 %v7307_v48, %s6788_s25 }
 0x824   : > { %2517 = vrot.lane.b32.xlu1 %v9367_v62, %s6787_s21 }
 0x828   : > { %3138 = vrot.lane.b32.xlu1 %v9346_v33, %s6788_s25 }
 0x82c   : > { %3134 = vrot.lane.b32.xlu1 %v9347_v15, %s6788_s25 }
 0x82f   : > { %2823 = vrot.lane.b32.xlu0 %v7285_v21, %s6788_s25 }
 0x830   : > { %3132 = vrot.lane.b32.xlu1 %v7253_v59, %s6788_s25 }
 0x833   : > { %3136 = vrot.lane.b32.xlu0 %v7234_v30, %s6788_s25 }
 0x834   : > { %3130 = vrot.lane.b32.xlu1 %v9340_v37, %s6788_s25 }
 0x836   : > { %v7914_v48 = vpop.f32.mrf.mxu0 }
 0x838   : > { %v7916_v58 = vpop.f32.mrf.mxu0 }
 0x83a   : > { %v7918_v33 = vpop.f32.mrf.mxu0 }
 0x83c   : > { %v7921_v15 = vpop.f32.mrf.mxu0 }
 0x852   : > { %2994 = vmax.xlane.f32.xlu0 %v7918_v33 }
 0x856   : > { %2990 = vmax.xlane.f32.xlu0 %v7921_v15 }
 0x858   : > { %2992 = vmax.xlane.f32.xlu1 %v7914_v48 }
 0x85c   : > { %2988 = vmax.xlane.f32.xlu1 %v7916_v58 }
 0x86f   : > { %v7926_v30 = vpop.f32.mrf.mxu0 }
 0x870   : > { %3000 = vmax.xlane.f32.xlu0 %v7926_v30 }
 0x871   : > { %v7929_v59 = vpop.f32.mrf.mxu0 }
 0x873   : > { %v7931_v21 = vpop.f32.mrf.mxu0 }
 0x874   : > { %2996 = vmax.xlane.f32.xlu0 %v7929_v59 }
 0x875   : > { %v7934_v37 = vpop.f32.mrf.mxu0 }
 0x876   : > { %2998 = vmax.xlane.f32.xlu1 %v7934_v37 }
 0x878   : > { %3002 = vmax.xlane.f32.xlu0 %v7931_v21 }
 0x87a   : > { %v2386_v46 = vpop.xlane.xlu0 %2385 }
 0x87b   : > { %v2415_v17 = vsub.f32 %v5741_v25, %v2386_v46 }
 0x87c   : > { %v2382_v4 = vpop.xlane.xlu1 %2381 }
 0x87d   : > { %v2433_v41 = vmul.f32 1.442695, %v2415_v17  ;;  %v2413_v49 = vsub.f32 %v2318_v24, %v2382_v4 }
 0x87e   : > { %v2388_v51 = vpop.xlane.xlu0 %2387 }
 0x87f   : > { %6263 = vpow2.f32 %v2433_v41  ;;  %v2429_v11 = vmul.f32 1.442695, %v2413_v49  ;;  %v2416_v6 = vsub.f32 %v5742_v43, %v2388_v51 }
 0x881   : > { %v2435_v45 = vmul.f32 1.442695, %v2416_v6  ;;  %6265 = vpow2.f32 %v2429_v11 }
 0x882   : > { %v2384_v50 = vpop.xlane.xlu0 %2383 }
 0x883   : > { %v2414_v19 = vsub.f32 %v7859_v18, %v2384_v50  ;;  %6267 = vpow2.f32 %v2435_v45 }
 0x885   : > { %v2431_v53 = vmul.f32 1.442695, %v2414_v19 }
 0x886   : > { %v2394_v40 = vpop.xlane.xlu0 %2393 }
 0x887   : > { %6269 = vpow2.f32 %v2431_v53  ;;  %v2419_v22 = vsub.f32 %v7861_v39, %v2394_v40 }
 0x888   : > { %v2392_v3 = vpop.xlane.xlu1 %2391 }
 0x889   : > { %v2441_v32 = vmul.f32 1.442695, %v2419_v22  ;;  %v2418_v54 = vsub.f32 %v7869_v34, %v2392_v3 }
 0x88a   : > { %v2390_v14 = vpop.xlane.xlu0 %2389 }
 0x88b   : > { %6271 = vpow2.f32 %v2441_v32  ;;  %v2417_v7 = vsub.f32 %v7864_v8, %v2390_v14  ;;  %v2439_v46 = vmul.f32 1.442695, %v2418_v54 }
 0x88c   : > { %v7941_v38 = vpop.eup %6263 }
 0x88d   : > { %v2437_v10 = vmul.f32 1.442695, %v2417_v7  ;;  %2465 = vadd.xlane.f32.xlu0 %v7941_v38 }
 0x88e   : > { %v2396_v25 = vpop.xlane.xlu0 %2395  ;;  %v6266_v43 = vpop.eup %6265 }
 0x88f   : > { %6273 = vpow2.f32 %v2437_v10  ;;  %v2420_v24 = vsub.f32 %v7866_v2, %v2396_v25  ;;  %v6059_v10 = vld [vmem:[#allocation6 + $0x28] sm:$0xff]  }
 0x890   : > { %v2400_v18 = vpop.xlane.xlu1 %2399  ;;  %v6268_v4 = vpop.eup %6267 }
 0x891   : > { %v2443_v39 = vmul.f32 1.442695, %v2420_v24  ;;  %2461 = vadd.xlane.f32.xlu0 %v6266_v43  ;;  %v2422_v11 = vsub.f32 %v7880_v0, %v2400_v18 }
 0x892   : > { %v2402_v17 = vpop.xlane.xlu0 %2401 }
 0x893   : > { %6275 = vpow2.f32 %v2443_v39  ;;  %v2423_v8 = vsub.f32 %v7872_v5, %v2402_v17  ;;  %v2447_v5 = vmul.f32 1.442695, %v2422_v11  ;;  %v2510_v39 = vpack.c.bf16 %v6268_v4, %v7941_v38 }
 0x894   : > { %v6270_v41 = vpop.eup %6269  ;;  %v2410_v49 = vpop.xlane.xlu1 %2409  ;;  %6277 = vpow2.f32 %v2439_v46 }
 0x895   : > { %v2449_v51 = vmul.f32 1.442695, %v2423_v8  ;;  %2467 = vadd.xlane.f32.xlu0 %v6268_v4  ;;  %2463 = vadd.xlane.f32.xlu1 %v6270_v41  ;;  %v2509_v34 = vpack.c.bf16 %v6270_v41, %v6266_v43  ;;  %v2427_v50 = vsub.f32 %v7884_v16, %v2410_v49 }
 0x896   : > { %v2398_v2 = vpop.xlane.xlu0 %2397 }
 0x897   : > { %6279 = vpow2.f32 %v2449_v51  ;;  %v2421_v6 = vsub.f32 %v7875_v52, %v2398_v2  ;;  %5771 = vmatprep.mubr.bf16.mxu1 %v2509_v34  ;;  %v2457_v14 = vmul.f32 1.442695, %v2427_v50 }
 0x898   : > { %v6272_v45 = vpop.eup %6271  ;;  %v2406_v19 = vpop.xlane.xlu1 %2405 }
 0x899   : > { %v2445_v53 = vmul.f32 1.442695, %v2421_v6  ;;  %2473 = vadd.xlane.f32.xlu1 %v6272_v45  ;;  %v2425_v0 = vsub.f32 %v7888_v29, %v2406_v19 }
 0x89a   : > { %v2404_v40 = vpop.xlane.xlu0 %2403 }
 0x89b   : > { %6281 = vpow2.f32 %v2445_v53  ;;  %v2424_v22 = vsub.f32 %v7877_v27, %v2404_v40  ;;  %v2453_v25 = vmul.f32 1.442695, %v2425_v0  ;;  %v7967_v40 = vpop.f32.mrf.mxu0 }
 0x89c   : > { %v6274_v32 = vpop.eup %6273  ;;  %v2826_v3 = vpop.permute.xlu1 %2825  ;;  %6283 = vpow2.f32 %v2447_v5 }
 0x89d   : > { %v2451_v7 = vmul.f32 1.442695, %v2424_v22  ;;  %2469 = vadd.xlane.f32.xlu1 %v6274_v32  ;;  %v7969_v22 = vpop.f32.mrf.mxu0 }
 0x89e   : > { %v2412_v52 = vpop.xlane.xlu0 %2411 }
 0x89f   : > { %6285 = vpow2.f32 %v2451_v7  ;;  %v2428_v16 = vsub.f32 %v7892_v55, %v2412_v52  ;;  %v6060_v55 = vld [vmem:[#allocation6 + $0x20] sm:$0xff]  }
 0x8a0   : > { %v6276_v54 = vpop.eup %6275  ;;  %6287 = vpow2.f32 %v2457_v14  ;;  %v2518_v24 = vpop.permute.xlu1 %2517 }
 0x8a1   : > { %5769 = vmatprep.subr.bf16.mxu1 %v2518_v24  ;;  %2475 = vadd.xlane.f32.xlu0 %v6276_v54  ;;  %v2459_v27 = vmul.f32 1.442695, %v2428_v16  ;;  %v6278_v18 = vpop.eup %6277  ;;  %6289 = vpow2.f32 %v2453_v25  ;;  %v2512_v51 = vpack.c.bf16 %v6276_v54, %v6272_v45 }
 0x8a2   : > { %5770 = vmatpush3.bf16.msra.mxu1 %v2518_v24  ;;  %v2408_v43 = vpop.xlane.xlu0 %2407  ;;  %v2511_v17 = vpack.c.bf16 %v6278_v18, %v6274_v32  ;;  %v7971_v32 = vpop.f32.mrf.mxu0 }
 0x8a3   : > { %v2426_v29 = vsub.f32 %v7895_v56, %v2408_v43  ;;  %5787 = vmatprep.subr.bf16.mxu1 %v6059_v10  ;;  %6291 = vpow2.f32 %v2459_v27  ;;  %v9368_v56 = vmov 0  }
 0x8a4   : > { %v6280_v46 = vpop.eup %6279  ;;  %v7958_v4 = vpop.permute.xlu1 %3138 }
 0x8a5   : > { %v2455_v8 = vmul.f32 1.442695, %v2426_v29  ;;  %5772 = vmatmul.mubr.bf16.vlgmr.msra.gmra.mxu1 %v2510_v39  ;;  %2471 = vadd.xlane.f32.xlu0 %v6278_v18  ;;  %v7973_v14 = vpop.f32.mrf.mxu0 }
 0x8a6   : > { %2481 = vadd.xlane.f32.xlu1 %v6280_v46  ;;  %5775 = vmatprep.mubr.bf16.mxu1 %v2511_v17  ;;  %v2824_v41 = vpop.permute.xlu0 %2823 }
 0x8a7   : > { %6293 = vpow2.f32 %v2455_v8  ;;  %5788 = vmatpush3.bf16.msra.mxu1 %v6059_v10  ;;  %5835 = vmatprep.mubr.msk.bf16.mxu0 %vm1053_vm0, %v2824_v41 }
 0x8a8   : > { %v6282_v49 = vpop.eup %6281  ;;  %5836 = vmatmul.mubr.msk.bf16.gmra.mxu0 %vm1053_vm0, %v2826_v3  ;;  %5789 = vmatprep.subr.bf16.mxu1 %v6060_v55  ;;  %v7985_v3 = vpop.f32.mrf.mxu1 }
 0x8a9   : > { %3781 = vmatprep.mubr.bf16.mxu0 %v9368_v56  ;;  %v6284_v38 = vpop.eup %6283 }
 0x8aa   : > { %2477 = vadd.xlane.f32.xlu1 %v6282_v49  ;;  %v2513_v11 = vpack.c.bf16 %v6284_v38, %v6282_v49  ;;  %v7989_v16 = vpop.f32.mrf.mxu1 }
 0x8ab   : > { %5790 = vmatpush3.bf16.msra.mxu1 %v6060_v55 }
 0x8ac   : > { %v6286_v34 = vpop.eup %6285  ;;  %5839 = vmatprep.subr.bf16.mxu1 %v7958_v4  ;;  %v7993_v25 = vpop.f32.mrf.mxu1 }
 0x8ad   : > { %v6288_v2 = vpop.eup %6287  ;;  %5776 = vmatmul.mubr.bf16.gmra.mxu1 %v2512_v51  ;;  %2483 = vadd.xlane.f32.xlu0 %v6286_v34  ;;  %v2514_v19 = vpack.c.bf16 %v6286_v34, %v6280_v46 }
 0x8ae   : > { %2489 = vadd.xlane.f32.xlu1 %v6288_v2  ;;  %5779 = vmatprep.mubr.bf16.mxu1 %v2513_v11  ;;  %v6290_v6 = vpop.eup %6289  ;;  %v7995_v27 = vpop.f32.mrf.mxu1 }
 0x8b0   : > { %v6292_v50 = vpop.eup %6291  ;;  %v7997_v18 = vpop.f32.mrf.mxu1 }
 0x8b1   : > { %2479 = vadd.xlane.f32.xlu0 %v6284_v38  ;;  %v2516_v45 = vpack.c.bf16 %v6292_v50, %v6288_v2 }
 0x8b2   : > { %2485 = vadd.xlane.f32.xlu1 %v6290_v6  ;;  %v8003_v46 = vpop.f32.mrf.mxu1 }
 0x8b4   : > { %v6294_v53 = vpop.eup %6293  ;;  %v8005_v8 = vpop.f32.mrf.mxu1 }
 0x8b5   : > { %5780 = vmatmul.mubr.bf16.gmra.mxu1 %v2514_v19  ;;  %2491 = vadd.xlane.f32.xlu0 %v6292_v50  ;;  %v2515_v5 = vpack.c.bf16 %v6294_v53, %v6290_v6 }
 0x8b6   : > { %v8007_v41 = vpop.f32.mrf.mxu1 }
 0x8b7   : > { %5783 = vmatprep.mubr.bf16.mxu1 %v2515_v5 }
 0x8b8   : > { %v8009_v51 = vpop.f32.mrf.mxu1 }
 0x8b9   : > { %2487 = vadd.xlane.f32.xlu0 %v6294_v53 }
 0x8ba   : > { %v8011_v34 = vpop.f32.mrf.mxu1 }
 0x8bb   : > { %9369 = vst [vmem:[#allocation17_spill] sm:$0xff] %v8011_v34 }
 0x8bc   : > { %v8013_v6 = vpop.f32.mrf.mxu1 }
 0x8bd   : > { %5784 = vmatmul.mubr.bf16.gmra.mxu1 %v2516_v45  ;;  %9370 = vst [vmem:[#allocation18_spill] sm:$0xff] %v8013_v6 }
 0x8be   : > { %v8017_v53 = vpop.f32.mrf.mxu1 }
 0x8bf   : > { %9371 = vst [vmem:[#allocation28_spill] sm:$0xff] %v8017_v53 }
 0x8c0   : > { %v8019_v5 = vpop.f32.mrf.mxu1 }
 0x8c1   : > { %9372 = vst [vmem:[#allocation30_spill] sm:$0xff] %v8019_v5 }
 0x8c2   : > { %v8021_v26 = vpop.f32.mrf.mxu1 }
 0x8c3   : > { %3126 = vrot.lane.b32.xlu1 %v9341_v23, %s6788_s25  ;;  %v7979_v23 = vpop.permute.xlu0 %3136  ;;  %9373 = vst [vmem:[#allocation20_spill] sm:$0xff] %v8021_v26 }
 0x8c4   : > { %v8026_v20 = vpop.f32.mrf.mxu1 }
 0x8c6   : > { %v8031_v26 = vpop.f32.mrf.mxu1 }
 0x8c7   : > { %3124 = vrot.lane.b32.xlu1 %v9367_v62, %s6788_s25  ;;  %v7981_v62 = vpop.permute.xlu1 %3134 }
 0x8cb   : > { %v7983_v0 = vpop.permute.xlu1 %3132 }
 0x8cf   : > { %3128 = vrot.lane.b32.xlu0 %v9350_v63, %s6788_s25  ;;  %v7987_v52 = vpop.permute.xlu1 %3130 }
 0x8db   : > { %v2995_v63 = vpop.xlane.xlu0 %2994 }
 0x8dc   : > { %v3023_v53 = vsub.f32 %v7918_v33, %v2995_v63 }
 0x8df   : > { %v2991_v7 = vpop.xlane.xlu0 %2990 }
 0x8e0   : > { %v3021_v34 = vsub.f32 %v7921_v15, %v2991_v7 }
 0x8e1   : > { %v2993_v54 = vpop.xlane.xlu1 %2992 }
 0x8e2   : > { %v3022_v5 = vsub.f32 %v7914_v48, %v2993_v54 }
 0x8e5   : > { %v2989_v43 = vpop.xlane.xlu1 %2988 }
 0x8e6   : > { %v3020_v31 = vsub.f32 %v7916_v58, %v2989_v43  ;;  %v3042_v43 = vmul.f32 1.442695, %v3023_v53 }
 0x8e8   : > { %v3036_v6 = vmul.f32 1.442695, %v3020_v31 }
 0x8eb   : > { %3006 = vmax.xlane.f32.xlu1 %v7973_v14 }
 0x8ee   : > { %3004 = vmax.xlane.f32.xlu0 %v7969_v22 }
 0x8f2   : > { %3008 = vmax.xlane.f32.xlu0 %v7967_v40 }
 0x8f6   : > { %3010 = vmax.xlane.f32.xlu0 %v7971_v32 }
 0x8f9   : > { %v7991_v10 = vpop.xlane.xlu0 %3000 }
 0x8fd   : > { %v2997_v24 = vpop.xlane.xlu0 %2996 }
 0x8fe   : > { %v3024_v58 = vsub.f32 %v7929_v59, %v2997_v24  ;;  %v3026_v59 = vsub.f32 %v7926_v30, %v7991_v10 }
 0x8ff   : > { %v8001_v39 = vpop.xlane.xlu1 %2998 }
 0x900   : > { %v3044_v33 = vmul.f32 1.442695, %v3024_v58 }
 0x901   : > { %v7999_v29 = vpop.xlane.xlu0 %3002 }
 0x916   : > { %v2466_v17 = vpop.xlane.xlu0 %2465 }
 0x91a   : > { %v2462_v49 = vpop.xlane.xlu0 %2461 }
 0x91b   : > { %6295 = vrcp.f32 %v2462_v49  ;;  %v3040_v49 = vmul.f32 1.442695, %v3022_v5 }
 0x91e   : > { %v2464_v55 = vpop.xlane.xlu1 %2463  ;;  %v2468_v11 = vpop.xlane.xlu0 %2467 }
 0x91f   : > { %6297 = vrcp.f32 %v2468_v11  ;;  %v3025_v11 = vsub.f32 %v7934_v37, %v8001_v39  ;;  %v3048_v37 = vmul.f32 1.442695, %v3026_v59 }
 0x920   : > { %6299 = vrcp.f32 %v2464_v55 }
 0x921   : > { %6301 = vrcp.f32 %v2466_v17  ;;  %v3038_v17 = vmul.f32 1.442695, %v3021_v34 }
 0x922   : > { %v2474_v38 = vpop.xlane.xlu1 %2473  ;;  %6303 = vpow2.f32 %v3036_v6  ;;  %v3027_v6 = vsub.f32 %v7931_v21, %v7999_v29 }
 0x924   : > { %v3050_v21 = vmul.f32 1.442695, %v3027_v6 }
 0x926   : > { %v2470_v2 = vpop.xlane.xlu1 %2469 }
 0x927   : > { %6305 = vrcp.f32 %v2470_v2 }
 0x928   : > { %v6296_v7 = vpop.eup %6295 }
 0x92a   : > { %v2476_v50 = vpop.xlane.xlu0 %2475 }
 0x92b   : > { %6307 = vrcp.f32 %v2476_v50 }
 0x92c   : > { %v6298_v24 = vpop.eup %6297 }
 0x92e   : > { %v2472_v45 = vpop.xlane.xlu0 %2471 }
 0x92f   : > { %v8015_v19 = vpop.xlane.xlu1 %2481  ;;  %6309 = vrcp.f32 %v2472_v45 }
 0x930   : > { %6311 = vrcp.f32 %v2474_v38  ;;  %v6300_v38 = vpop.eup %6299 }
 0x931   : > { %6313 = vpow2.f32 %v3042_v43  ;;  %v6302_v30 = vpop.eup %6301 }
 0x932   : > { %6315 = vpow2.f32 %v3040_v49  ;;  %v3046_v49 = vmul.f32 1.442695, %v3025_v11 }
 0x933   : > { %v2478_v56 = vpop.xlane.xlu1 %2477  ;;  %6317 = vpow2.f32 %v3038_v17 }
 0x934   : > { %6319 = vpow2.f32 %v3044_v33 }
 0x935   : > { %6321 = vrcp.f32 %v2478_v56  ;;  %v8056_v56 = vpop.eup %6303 }
 0x936   : > { %v2484_v12 = vpop.xlane.xlu0 %2483 }
 0x937   : > { %v8024_v1 = vpop.xlane.xlu1 %2489  ;;  %6323 = vrcp.f32 %v2484_v12 }
 0x93a   : > { %v2480_v60 = vpop.xlane.xlu0 %2479 }
 0x93b   : > { %v8034_v55 = vpop.xlane.xlu1 %2485  ;;  %6325 = vrcp.f32 %v2480_v60 }
 0x93c   : > { %6327 = vrcp.f32 %v8015_v19 }
 0x93d   : > { %6329 = vpow2.f32 %v3048_v37 }
 0x93e   : > { %v2492_v48 = vpop.xlane.xlu0 %2491  ;;  %6331 = vpow2.f32 %v3046_v49 }
 0x93f   : > { %v8042_v34 = vpop.permute.xlu1 %3126  ;;  %6333 = vpow2.f32 %v3050_v21 }
 0x940   : > { %6335 = vrcp.f32 %v8034_v55 }
 0x942   : > { %v2488_v39 = vpop.xlane.xlu0 %2487 }
 0x943   : > { %v8058_v12 = vpop.permute.xlu1 %3124 }
 0x965   : > { %v5773_v31 = vpop.f32.mrf.mxu1 }
 0x966   : > { %v2640_v58 = vmul.f32 %v6302_v30, %v5773_v31  ;;  %v6306_v31 = vpop.eup %6305  ;;  %6337 = vrcp.f32 %v2492_v48 }
 0x967   : > { %v2575_v63 = vpop.f32.mrf.mxu1 }
 0x968   : > { %v8036_v15 = vpop.f32.mrf.mxu0  ;;  %v2638_v10 = vmul.f32 %v6296_v7, %v2575_v63  ;;  %v6308_v63 = vpop.eup %6307  ;;  %6339 = vrcp.f32 %v2488_v39 }
 0x969   : > { %v5774_v54 = vpop.f32.mrf.mxu1  ;;  %v6310_v19 = vpop.eup %6309  ;;  %6341 = vrcp.f32 %v8024_v1 }
 0x96a   : > { %v8044_v2 = vpop.f32.mrf.mxu0  ;;  %v2641_v50 = vmul.f32 %v6298_v24, %v5774_v54  ;;  %v8063_v7 = vpop.permute.xlu0 %3128 }
 0x96b   : > { %v2578_v53 = vpop.f32.mrf.mxu1  ;;  %3012 = vmax.xlane.f32.xlu1 %v8044_v2  ;;  %v6312_v11 = vpop.eup %6311 }
 0x96c   : > { %v2639_v5 = vmul.f32 %v6300_v38, %v2578_v53  ;;  %v8049_v45 = vpop.f32.mrf.mxu0  ;;  %v2655_v29 = vpack.c.bf16 %v2641_v50, %v2640_v58  ;;  %v8069_v53 = vpop.eup %6313 }
 0x96d   : > { %v5777_v43 = vpop.f32.mrf.mxu1 }
 0x96e   : > { %v2654_v17 = vpack.c.bf16 %v2639_v5, %v2638_v10  ;;  %v8051_v33 = vpop.f32.mrf.mxu0  ;;  %v8072_v5 = vpop.eup %6315 }
 0x96f   : > { %v2591_v54 = vpop.f32.mrf.mxu1  ;;  %3016 = vmax.xlane.f32.xlu1 %v8036_v15  ;;  %3014 = vmax.xlane.f32.xlu0 %v8051_v33  ;;  %v8075_v58 = vpop.eup %6317 }
 0x970   : > { %5791 = vmatprep.mubr.msk.bf16.mxu1 %vm1053_vm0, %v2654_v17  ;;  %v2642_v38 = vmul.f32 %v6306_v31, %v2591_v54 }
 0x971   : > { %v5778_v60 = vpop.f32.mrf.mxu1  ;;  %5792 = vmatmul.mubr.msk.bf16.vlgmr.msra.gmra.mxu1 %vm1053_vm0, %v2655_v29 }
 0x972   : > { %5840 = vmatpush3.bf16.msra.mxu1 %v7958_v4  ;;  %v2645_v59 = vmul.f32 %v6308_v63, %v5778_v60  ;;  %v2644_v4 = vmul.f32 %v6312_v11, %v5777_v43 }
 0x973   : > { %5841 = vmatprep.subr.bf16.mxu1 %v7979_v23  ;;  %v2594_v24 = vpop.f32.mrf.mxu1  ;;  %3068 = vadd.xlane.f32.xlu1 %v8056_v56 }
 0x974   : > { %v2643_v6 = vmul.f32 %v6310_v19, %v2594_v24  ;;  %v3007_v50 = vpop.xlane.xlu1 %3006  ;;  %3018 = vmax.xlane.f32.xlu0 %v8049_v45  ;;  %v2657_v55 = vpack.c.bf16 %v2645_v59, %v2644_v4 }
 0x975   : > { %v3029_v30 = vsub.f32 %v7973_v14, %v3007_v50  ;;  %v5781_v10 = vpop.f32.mrf.mxu1  ;;  %v8080_v14 = vpop.eup %6319 }
 0x976   : > { %v2656_v37 = vpack.c.bf16 %v2643_v6, %v2642_v38  ;;  %5842 = vmatpush3.bf16.msra.mxu1 %v7979_v23  ;;  %v6322_v23 = vpop.eup %6321 }
 0x977   : > { %v3054_v49 = vmul.f32 1.442695, %v3029_v30  ;;  %5843 = vmatprep.subr.bf16.mxu1 %v7981_v62  ;;  %v2607_v17 = vpop.f32.mrf.mxu1  ;;  %3072 = vadd.xlane.f32.xlu1 %v8072_v5  ;;  %v3005_v48 = vpop.xlane.xlu0 %3004 }
 0x978   : > { %3070 = vadd.xlane.f32.xlu0 %v8075_v58  ;;  %v3028_v39 = vsub.f32 %v7969_v22, %v3005_v48  ;;  %5795 = vmatprep.mubr.msk.bf16.mxu1 %vm1053_vm0, %v2656_v37  ;;  %v6324_v1 = vpop.eup %6323  ;;  %v2646_v63 = vmul.f32 %v6322_v23, %v2607_v17 }
 0x979   : > { %6343 = vpow2.f32 %v3054_v49  ;;  %v5782_v43 = vpop.f32.mrf.mxu1  ;;  %5796 = vmatmul.mubr.msk.bf16.gmra.mxu1 %vm1053_vm0, %v2657_v55  ;;  %v6326_v29 = vpop.eup %6325 }
 0x97a   : > { %v3052_v21 = vmul.f32 1.442695, %v3028_v39  ;;  %5844 = vmatpush3.bf16.msra.mxu1 %v7981_v62  ;;  %v2649_v54 = vmul.f32 %v6324_v1, %v5782_v43  ;;  %v6328_v22 = vpop.eup %6327 }
 0x97b   : > { %5845 = vmatprep.subr.bf16.mxu1 %v7983_v0  ;;  %v2610_v31 = vpop.f32.mrf.mxu1  ;;  %3076 = vadd.xlane.f32.xlu1 %v8080_v14  ;;  %v3009_v60 = vpop.xlane.xlu0 %3008  ;;  %v2648_v24 = vmul.f32 %v6328_v22, %v5781_v10 }
 0x97c   : > { %6345 = vpow2.f32 %v3052_v21  ;;  %v2647_v19 = vmul.f32 %v6326_v29, %v2610_v31  ;;  %3074 = vadd.xlane.f32.xlu0 %v8069_v53  ;;  %v3030_v59 = vsub.f32 %v7967_v40, %v3009_v60  ;;  %v6330_v38 = vpop.eup %6329 }
 0x97d   : > { %v5785_v11 = vpop.f32.mrf.mxu1  ;;  %v6332_v50 = vpop.eup %6331  ;;  %v2659_v4 = vpack.c.bf16 %v2649_v54, %v2648_v24 }
 0x97e   : > { %v2658_v62 = vpack.c.bf16 %v2647_v19, %v2646_v63  ;;  %v3056_v6 = vmul.f32 1.442695, %v3030_v59  ;;  %5846 = vmatpush3.bf16.msra.mxu1 %v7983_v0  ;;  %v6334_v55 = vpop.eup %6333  ;;  %v3118_v63 = vpack.c.bf16 %v6332_v50, %v8080_v14  ;;  %v6061_v59 = vld [vmem:[#allocation6 + $0x38] sm:$0xff]  }
 0x97f   : > { %5847 = vmatprep.subr.bf16.mxu1 %v7987_v52  ;;  %v2623_v30 = vpop.f32.mrf.mxu1  ;;  %3080 = vadd.xlane.f32.xlu1 %v6330_v38  ;;  %v3011_v37 = vpop.xlane.xlu0 %3010 }
 0x980   : > { %6347 = vpow2.f32 %v3056_v6  ;;  %3078 = vadd.xlane.f32.xlu0 %v6332_v50  ;;  %v3031_v49 = vsub.f32 %v7971_v32, %v3011_v37  ;;  %5799 = vmatprep.mubr.msk.bf16.mxu1 %vm1053_vm0, %v2658_v62  ;;  %v6336_v40 = vpop.eup %6335 }
 0x981   : > { %v5786_v10 = vpop.f32.mrf.mxu1  ;;  %5800 = vmatmul.mubr.msk.bf16.gmra.mxu1 %vm1053_vm0, %v2659_v4  ;;  %v6338_v17 = vpop.eup %6337  ;;  %v2650_v1 = vmul.f32 %v6336_v40, %v2623_v30 }
 0x982   : > { %v3058_v0 = vmul.f32 1.442695, %v3031_v49  ;;  %5848 = vmatpush3.bf16.msra.mxu1 %v7987_v52  ;;  %v6340_v48 = vpop.eup %6339  ;;  %v2653_v39 = vmul.f32 %v6338_v17, %v5786_v10  ;;  %v3116_v52 = vpack.c.bf16 %v8075_v58, %v8056_v56  ;;  %v3119_v56 = vpack.c.bf16 %v6334_v55, %v6330_v38 }
 0x983   : > { %5849 = vmatprep.subr.bf16.mxu1 %v8063_v7  ;;  %v2626_v23 = vpop.f32.mrf.mxu1  ;;  %v6342_v43 = vpop.eup %6341  ;;  %v2150_v10 = vadd.f32 %v7985_v3, %v7823_v44  ;;  %v2166_v44 = vadd.f32 %v7997_v18, %v7832_v36  ;;  %v2161_v36 = vadd.f32 %v8007_v41, %v7841_v9 }
 0x984   : > { %6349 = vpow2.f32 %v3058_v0  ;;  %v2651_v21 = vmul.f32 %v6340_v48, %v2626_v23  ;;  %3082 = vadd.xlane.f32.xlu0 %v6334_v55  ;;  %v2652_v32 = vmul.f32 %v6342_v43, %v5785_v11 }
 0x986   : > { %v6344_v29 = vpop.eup %6343  ;;  %v2660_v54 = vpack.c.bf16 %v2651_v21, %v2650_v1  ;;  %5850 = vmatpush3.bf16.msra.mxu1 %v8063_v7  ;;  %v2661_v31 = vpack.c.bf16 %v2653_v39, %v2652_v32  ;;  %v3117_v7 = vpack.c.bf16 %v8069_v53, %v8072_v5  ;;  %v2153_v39 = vadd.f32 %v7993_v25, %v7827_v47 }
 0x987   : > { %5851 = vmatprep.subr.bf16.mxu1 %v8042_v34  ;;  %v2145_v1 = vadd.f32 %v7995_v27, %v7829_v57 }
 0x988   : > { %3086 = vadd.xlane.f32.xlu0 %v6344_v29  ;;  %5803 = vmatprep.mubr.msk.bf16.mxu1 %vm1053_vm0, %v2660_v54  ;;  %v2169_v54 = vadd.f32 %v8005_v8, %v7838_v61 }
 0x989   : > { %v6346_v60 = vpop.eup %6345  ;;  %5804 = vmatmul.mubr.msk.bf16.gmra.mxu1 %vm1053_vm0, %v2661_v31 }
 0x98a   : > { %5852 = vmatpush3.bf16.msra.mxu1 %v8042_v34  ;;  %5855 = vmatprep.mubr.bf16.mxu1 %v3116_v52  ;;  %v3120_v58 = vpack.c.bf16 %v6344_v29, %v6346_v60 }
 0x98b   : > { %5853 = vmatprep.subr.bf16.mxu1 %v8058_v12  ;;  %3084 = vadd.xlane.f32.xlu1 %v6346_v60 }
 0x98d   : > { %v6348_v22 = vpop.eup %6347 }
 0x98e   : > { %5854 = vmatpush3.bf16.msra.mxu1 %v8058_v12  ;;  %v6062_v12 = vld [vmem:[#allocation6 + $0x30] sm:$0xff]  }
 0x98f   : > { %3088 = vadd.xlane.f32.xlu1 %v6348_v22  ;;  %5871 = vmatprep.subr.bf16.mxu1 %v6061_v59 }
 0x991   : > { %v6350_v19 = vpop.eup %6349  ;;  %5856 = vmatmul.mubr.bf16.vlgmr.msra.gmra.mxu1 %v3117_v7  ;;  %v9374_v7 = vld [vmem:[#allocation17_spill] sm:$0xff] }
 0x992   : > { %5859 = vmatprep.mubr.bf16.mxu1 %v3118_v63  ;;  %3090 = vadd.xlane.f32.xlu0 %v6350_v19  ;;  %v3121_v34 = vpack.c.bf16 %v6350_v19, %v6348_v22  ;;  %v2174_v61 = vadd.f32 %v9374_v7, %v7845_v42 }
 0x993   : > { %5872 = vmatpush3.bf16.msra.mxu1 %v6061_v59  ;;  %v9377_v59 = vld [vmem:[#allocation21_spill] sm:$0xff] }
 0x994   : > { %5873 = vmatprep.subr.bf16.mxu1 %v6062_v12 }
 0x997   : > { %5874 = vmatpush3.bf16.msra.mxu1 %v6062_v12  ;;  %v9378_v12 = vld [vmem:[#allocation28_spill] sm:$0xff] }
 0x999   : > { %5860 = vmatmul.mubr.bf16.gmra.mxu1 %v3119_v56  ;;  %v9375_v56 = vld [vmem:[#allocation19_spill] sm:$0xff] }
 0x99a   : > { %5863 = vmatprep.mubr.bf16.mxu1 %v3120_v58  ;;  %v9376_v58 = vld [vmem:[#allocation18_spill] sm:$0xff] }
 0x99b   : > { %v2185_v9 = vadd.f32 %v9376_v58, %v9375_v56 }
 0x9a1   : > { %5864 = vmatmul.mubr.bf16.gmra.mxu1 %v3121_v34 }
 0x9f4   : > { %v3013_v24 = vpop.xlane.xlu1 %3012 }
 0x9f5   : > { %v3032_v53 = vsub.f32 %v8044_v2, %v3013_v24 }
 0x9f7   : > { %v3060_v5 = vmul.f32 1.442695, %v3032_v53 }
 0x9f8   : > { %v3017_v14 = vpop.xlane.xlu1 %3016  ;;  %v3015_v11 = vpop.xlane.xlu0 %3014 }
 0x9f9   : > { %6351 = vpow2.f32 %v3060_v5  ;;  %v3034_v38 = vsub.f32 %v8036_v15, %v3017_v14  ;;  %v3033_v62 = vsub.f32 %v8051_v33, %v3015_v11  ;;  %v9379_v5 = vld [vmem:[#allocation24_spill] sm:$0xff]  ;;  %v9380_v14 = vld [vmem:[#allocation30_spill] sm:$0xff] }
 0x9fa   : > { %v2198_v42 = vadd.f32 %v9380_v14, %v9379_v5 }
 0x9fb   : > { %v3064_v6 = vmul.f32 1.442695, %v3034_v38  ;;  %v3062_v50 = vmul.f32 1.442695, %v3033_v62 }
 0x9fc   : > { %v3069_v57 = vpop.xlane.xlu1 %3068 }
 0x9fd   : > { %6353 = vpow2.f32 %v3064_v6  ;;  %v3019_v4 = vpop.xlane.xlu0 %3018  ;;  %v9381_v6 = vld [vmem:[#allocation26_spill] sm:$0xff] }
 0x9fe   : > { %6355 = vpow2.f32 %v3062_v50  ;;  %v3035_v30 = vsub.f32 %v8049_v45, %v3019_v4  ;;  %v2142_v45 = vadd.f32 %v7989_v16, %v7825_v28  ;;  %v2158_v16 = vadd.f32 %v8003_v46, %v7836_v35  ;;  %v9382_v50 = vld [vmem:[#allocation20_spill] sm:$0xff] }
 0x9ff   : > { %v2182_v35 = vadd.f32 %v8009_v51, %v7843_v13  ;;  %v2177_v13 = vadd.f32 %v9378_v12, %v9377_v59  ;;  %v2190_v4 = vadd.f32 %v9382_v50, %v9381_v6 }
 0xa00   : > { %v3066_v37 = vmul.f32 1.442695, %v3035_v30  ;;  %v3073_v8 = vpop.xlane.xlu1 %3072 }
 0xa01   : > { %v3071_v29 = vpop.xlane.xlu0 %3070 }
 0xa02   : > { %6357 = vpow2.f32 %v3066_v37 }
 0xa03   : > { %6359 = vrcp.f32 %v3069_v57 }
 0xa04   : > { %v3077_v11 = vpop.xlane.xlu1 %3076 }
 0xa05   : > { %v3075_v46 = vpop.xlane.xlu0 %3074 }
 0xa06   : > { %v6352_v55 = vpop.eup %6351  ;;  %6361 = vrcp.f32 %v3075_v46 }
 0xa07   : > { %3092 = vadd.xlane.f32.xlu1 %v6352_v55  ;;  %6363 = vrcp.f32 %v3071_v29 }
 0xa08   : > { %6365 = vrcp.f32 %v3073_v8 }
 0xa09   : > { %v3079_v51 = vpop.xlane.xlu0 %3078  ;;  %6367 = vrcp.f32 %v3077_v11 }
 0xa0a   : > { %v6354_v2 = vpop.eup %6353 }
 0xa0b   : > { %v6356_v49 = vpop.eup %6355  ;;  %3096 = vadd.xlane.f32.xlu1 %v6354_v2 }
 0xa0c   : > { %3094 = vadd.xlane.f32.xlu0 %v6356_v49  ;;  %v3122_v40 = vpack.c.bf16 %v6356_v49, %v6352_v55  ;;  %v9383_v55 = vld [vmem:[#allocation23_spill] sm:$0xff] }
 0xa0d   : > { %v3083_v49 = vpop.xlane.xlu0 %3082 }
 0xa0e   : > { %5867 = vmatprep.mubr.bf16.mxu1 %v3122_v40  ;;  %6369 = vrcp.f32 %v3083_v49 }
 0xa0f   : > { %v6358_v15 = vpop.eup %6357  ;;  %6371 = vrcp.f32 %v3079_v51 }
 0xa10   : > { %3098 = vadd.xlane.f32.xlu0 %v6358_v15  ;;  %v3123_v33 = vpack.c.bf16 %v6358_v15, %v6354_v2  ;;  %v2201_v2 = vadd.f32 %v8026_v20, %v9383_v55 }
 0xa12   : > { %5868 = vmatmul.mubr.bf16.gmra.mxu1 %v3123_v33  ;;  %v3081_v33 = vpop.xlane.xlu1 %3080 }
 0xa13   : > { %6373 = vrcp.f32 %v3081_v33 }
 0xa31   : > { %v5793_v17 = vpop.f32.mrf.mxu1 }
 0xa32   : > { %v8118_v0 = vadd.f32 %v5793_v17, %v2150_v10 }
 0xa33   : > { %v2732_v48 = vpop.f32.mrf.mxu1 }
 0xa34   : > { %v8122_v23 = vadd.f32 %v2732_v48, %v2142_v45  ;;  %v3087_v48 = vpop.xlane.xlu0 %3086 }
 0xa35   : > { %v5794_v43 = vpop.f32.mrf.mxu1  ;;  %6375 = vrcp.f32 %v3087_v48 }
 0xa36   : > { %v8126_v21 = vadd.f32 %v5794_v43, %v2153_v39  ;;  %v3085_v39 = vpop.xlane.xlu1 %3084 }
 0xa37   : > { %v2735_v32 = vpop.f32.mrf.mxu1 }
 0xa38   : > { %v8130_v3 = vadd.f32 %v2735_v32, %v2145_v1  ;;  %v6360_v1 = vpop.eup %6359 }
 0xa39   : > { %v5797_v28 = vpop.f32.mrf.mxu1  ;;  %v6362_v20 = vpop.eup %6361 }
 0xa3a   : > { %v8134_v47 = vadd.f32 %v5797_v28, %v2166_v44  ;;  %v3091_v44 = vpop.xlane.xlu0 %3090  ;;  %v6364_v28 = vpop.eup %6363 }
 0xa3b   : > { %v2748_v25 = vpop.f32.mrf.mxu1  ;;  %6377 = vrcp.f32 %v3091_v44 }
 0xa3c   : > { %v8138_v27 = vadd.f32 %v2748_v25, %v2158_v16  ;;  %v6366_v25 = vpop.eup %6365  ;;  %6379 = vrcp.f32 %v3085_v39 }
 0xa3d   : > { %v5798_v31 = vpop.f32.mrf.mxu1  ;;  %v6368_v7 = vpop.eup %6367 }
 0xa3e   : > { %v8142_v18 = vadd.f32 %v5798_v31, %v2169_v54  ;;  %v3089_v54 = vpop.xlane.xlu1 %3088  ;;  %v6370_v8 = vpop.eup %6369 }
 0xa3f   : > { %v2751_v52 = vpop.f32.mrf.mxu1  ;;  %6381 = vrcp.f32 %v3089_v54 }
 0xa40   : > { %v8146_v60 = vadd.f32 %v2751_v52, %v2161_v36 }
 0xa41   : > { %v5801_v22 = vpop.f32.mrf.mxu1 }
 0xa42   : > { %v8150_v63 = vadd.f32 %v5801_v22, %v2182_v35 }
 0xa43   : > { %v2764_v19 = vpop.f32.mrf.mxu1 }
 0xa44   : > { %v8154_v41 = vadd.f32 %v2764_v19, %v2174_v61  ;;  %v6372_v19 = vpop.eup %6371 }
 0xa45   : > { %v5802_v34 = vpop.f32.mrf.mxu1 }
 0xa46   : > { %v8158_v24 = vadd.f32 %v5802_v34, %v2185_v9  ;;  %v6374_v9 = vpop.eup %6373 }
 0xa47   : > { %v2767_v53 = vpop.f32.mrf.mxu1  ;;  %v6376_v14 = vpop.eup %6375 }
 0xa48   : > { %v8162_v38 = vadd.f32 %v2767_v53, %v2177_v13  ;;  %v6378_v11 = vpop.eup %6377 }
 0xa49   : > { %v5805_v62 = vpop.f32.mrf.mxu1 }
 0xa4a   : > { %v8166_v30 = vadd.f32 %v5805_v62, %v2198_v42  ;;  %v6380_v62 = vpop.eup %6379 }
 0xa4b   : > { %v2780_v37 = vpop.f32.mrf.mxu1 }
 0xa4c   : > { %v8170_v40 = vadd.f32 %v2780_v37, %v2190_v4  ;;  %v6382_v4 = vpop.eup %6381 }
 0xa4d   : > { %v5806_v15 = vpop.f32.mrf.mxu1 }
 0xa4e   : > { %v8172_v10 = vadd.f32 %v5806_v15, %v2201_v2 }
 0xa4f   : > { %v8174_v17 = vpop.f32.mrf.mxu1 }
 0xa51   : > { %v5857_v45 = vpop.f32.mrf.mxu1 }
 0xa52   : > { %v3247_v36 = vmul.f32 %v6366_v25, %v5857_v45 }
 0xa53   : > { %v3182_v43 = vpop.f32.mrf.mxu1 }
 0xa54   : > { %v3245_v57 = vmul.f32 %v6360_v1, %v3182_v43 }
 0xa55   : > { %v5858_v32 = vpop.f32.mrf.mxu1 }
 0xa56   : > { %v3248_v16 = vmul.f32 %v6362_v20, %v5858_v32 }
 0xa57   : > { %v3185_v29 = vpop.f32.mrf.mxu1 }
 0xa58   : > { %v3246_v31 = vmul.f32 %v6364_v28, %v3185_v29  ;;  %v3262_v46 = vpack.c.bf16 %v3248_v16, %v3247_v36 }
 0xa59   : > { %v5861_v52 = vpop.f32.mrf.mxu1 }
 0xa5a   : > { %v3261_v35 = vpack.c.bf16 %v3246_v31, %v3245_v57  ;;  %v3251_v12 = vmul.f32 %v6374_v9, %v5861_v52 }
 0xa5b   : > { %v3198_v22 = vpop.f32.mrf.mxu1 }
 0xa5c   : > { %5875 = vmatprep.mubr.msk.bf16.mxu1 %vm1053_vm0, %v3261_v35  ;;  %v3249_v34 = vmul.f32 %v6368_v7, %v3198_v22 }
 0xa5d   : > { %v5862_v61 = vpop.f32.mrf.mxu1  ;;  %5876 = vmatmul.mubr.msk.bf16.vlgmr.msra.gmra.mxu1 %vm1053_vm0, %v3262_v46 }
 0xa5e   : > { %v3252_v56 = vmul.f32 %v6370_v8, %v5862_v61  ;;  %v6551_v8 = vld [vmem:[%s6998_s14] sm:$0xff] }
 0xa5f   : > { %v3201_v58 = vpop.f32.mrf.mxu1 }
 0xa60   : > { %v3250_v59 = vmul.f32 %v6372_v19, %v3201_v58  ;;  %v3264_v53 = vpack.c.bf16 %v3252_v56, %v3251_v12  ;;  %v6552_v56 = vld [vmem:[%s6998_s14 + $0x10] sm:$0xff] }
 0xa61   : > { %v5865_v13 = vpop.f32.mrf.mxu1 }
 0xa62   : > { %v3263_v51 = vpack.c.bf16 %v3250_v59, %v3249_v34  ;;  %v3255_v2 = vmul.f32 %v6382_v4, %v5865_v13  ;;  %v8191_v34 = vld [vmem:[%s9259_s4] ss:$0 sm:$0xff]  ;;  %v6553_v13 = vld [vmem:[%s6998_s14 + $0x8] sm:$0xff] }
 0xa63   : > { %v3214_v5 = vpop.f32.mrf.mxu1 }
 0xa64   : > { %5879 = vmatprep.mubr.msk.bf16.mxu1 %vm1053_vm0, %v3263_v51  ;;  %v3253_v37 = vmul.f32 %v6380_v62, %v3214_v5 }
 0xa65   : > { %v5866_v42 = vpop.f32.mrf.mxu1  ;;  %5880 = vmatmul.mubr.msk.bf16.gmra.mxu1 %vm1053_vm0, %v3264_v53 }
 0xa66   : > { %v3256_v6 = vmul.f32 %v6378_v11, %v5866_v42 }
 0xa67   : > { %v3217_v50 = vpop.f32.mrf.mxu1 }
 0xa68   : > { %v3254_v55 = vmul.f32 %v6376_v14, %v3217_v50  ;;  %v3266_v15 = vpack.c.bf16 %v3256_v6, %v3255_v2  ;;  %v6554_v14 = vld [vmem:[%s6998_s14 + $0x18] sm:$0xff]  ;;  %v6555_v6 = vld [vmem:[%s6998_s14 + $0x20] sm:$0xff] }
 0xa6a   : > { %v3265_v49 = vpack.c.bf16 %v3254_v55, %v3253_v37  ;;  %v6556_v55 = vld [vmem:[%s6998_s14 + $0x30] sm:$0xff] }
 0xa6c   : > { %5883 = vmatprep.mubr.msk.bf16.mxu1 %vm1053_vm0, %v3265_v49 }
 0xa6d   : > { %5884 = vmatmul.mubr.msk.bf16.gmra.mxu1 %vm1053_vm0, %v3266_v15 }
 0xa90   : > { %v3093_v45 = vpop.xlane.xlu1 %3092 }
 0xa91   : > { %6383 = vrcp.f32 %v3093_v45 }
 0xa94   : > { %v3097_v39 = vpop.xlane.xlu1 %3096 }
 0xa95   : > { %v3095_v33 = vpop.xlane.xlu0 %3094 }
 0xa99   : > { %v3099_v48 = vpop.xlane.xlu0 %3098 }
 0xa9a   : > { %6385 = vrcp.f32 %v3099_v48 }
 0xa9b   : > { %6387 = vrcp.f32 %v3095_v33  ;;  %v6557_v33 = vld [vmem:[%s6998_s14 + $0x28] sm:$0xff] }
 0xa9c   : > { %6389 = vrcp.f32 %v3097_v39 }
 0xa9e   : > { %v6384_v32 = vpop.eup %6383 }
 0xaa7   : > { %v6386_v44 = vpop.eup %6385 }
 0xaa8   : > { %v6388_v28 = vpop.eup %6387 }
 0xaa9   : > { %v6390_v25 = vpop.eup %6389 }
 0xad2   : > { %v5869_v43 = vpop.f32.mrf.mxu1 }
 0xad3   : > { %v3259_v31 = vmul.f32 %v6390_v25, %v5869_v43 }
 0xad4   : > { %v3230_v1 = vpop.f32.mrf.mxu1 }
 0xad5   : > { %v3257_v54 = vmul.f32 %v6384_v32, %v3230_v1 }
 0xad6   : > { %v5870_v20 = vpop.f32.mrf.mxu1 }
 0xad7   : > { %v3260_v16 = vmul.f32 %v6386_v44, %v5870_v20  ;;  %v6559_v44 = vld [vmem:[%s6998_s14 + $0x40] sm:$0xff] }
 0xad8   : > { %v3233_v29 = vpop.f32.mrf.mxu1 }
 0xad9   : > { %v3258_v57 = vmul.f32 %v6388_v28, %v3233_v29  ;;  %v3268_v52 = vpack.c.bf16 %v3260_v16, %v3259_v31  ;;  %v6560_v29 = vld [vmem:[%s6998_s14 + $0x50] sm:$0xff]  ;;  %v6561_v31 = vld [vmem:[%s6998_s14 + $0x48] sm:$0xff] }
 0xadb   : > { %v3267_v36 = vpack.c.bf16 %v3258_v57, %v3257_v54 }
 0xadd   : > { %5887 = vmatprep.mubr.msk.bf16.mxu1 %vm1053_vm0, %v3267_v36 }
 0xade   : > { %5888 = vmatmul.mubr.msk.bf16.gmra.mxu1 %vm1053_vm0, %v3268_v52  ;;  %v6562_v52 = vld [vmem:[%s6998_s14 + $0x58] sm:$0xff] }
 0xb1d   : > { %v5877_v35 = vpop.f32.mrf.mxu1 }
 0xb1e   : > { %v3404_v46 = vadd.f32 %v5877_v35, %v8118_v0 }
 0xb1f   : > { %v3339_v22 = vpop.f32.mrf.mxu1 }
 0xb20   : > { %v3402_v7 = vadd.f32 %v3339_v22, %v8122_v23  ;;  %v3420_v58 = vadd.f32 %v6552_v56, %v3404_v46 }
 0xb21   : > { %v5878_v61 = vpop.f32.mrf.mxu1 }
 0xb22   : > { %v3418_v19 = vadd.f32 %v6551_v8, %v3402_v7  ;;  %v3405_v59 = vadd.f32 %v5878_v61, %v8126_v21  ;;  %v8201_v5 = vadd.f32 %v8191_v34, %v3420_v58  ;;  %v9395_v61 = vld [vmem:[#allocation25_spill] sm:$0xff] }
 0xb23   : > { %v3342_v9 = vpop.f32.mrf.mxu1  ;;  %v2193_v8 = vadd.f32 %v8031_v26, %v9395_v61  ;;  %v6565_v26 = vld [vmem:[%s6998_s14 + $0x68] sm:$0xff] }
 0xb24   : > { %v3403_v0 = vadd.f32 %v3342_v9, %v8130_v3  ;;  %v8196_v12 = vadd.f32 %v8191_v34, %v3418_v19  ;;  %9384 = vst [vmem:[#allocation27_spill] sm:$0xff] %v8201_v5  ;;  %v3421_v42 = vadd.f32 %v6554_v14, %v3405_v59  ;;  %v6563_v59 = vld [vmem:[%s6998_s14 + $0x60] sm:$0xff] }
 0xb25   : > { %v5881_v23 = vpop.f32.mrf.mxu1  ;;  %v2808_v9 = vadd.f32 %v8174_v17, %v2193_v8 }
 0xb26   : > { %v3419_v51 = vadd.f32 %v6553_v13, %v3403_v0  ;;  %3457 = vadd.xlane.f32.xlu1 %v8196_v12  ;;  %v3408_v11 = vadd.f32 %v5881_v23, %v8134_v47  ;;  %v6564_v13 = vld [vmem:[%s6998_s14 + $0x70] sm:$0xff] }
 0xb27   : > { %v3355_v53 = vpop.f32.mrf.mxu1 }
 0xb28   : > { %v3406_v21 = vadd.f32 %v3355_v53, %v8138_v27  ;;  %v8207_v3 = vadd.f32 %v8191_v34, %v3419_v51  ;;  %v3424_v2 = vadd.f32 %v6556_v55, %v3408_v11  ;;  %v8216_v27 = vadd.f32 %v8191_v34, %v3421_v42 }
 0xb29   : > { %v5882_v62 = vpop.f32.mrf.mxu1 }
 0xb2a   : > { %9385 = vst [vmem:[#allocation29_spill] sm:$0xff] %v8207_v3  ;;  %v3422_v50 = vadd.f32 %v6555_v6, %v3406_v21  ;;  %3461 = vadd.xlane.f32.xlu1 %v8201_v5  ;;  %3459 = vadd.xlane.f32.xlu0 %v8207_v3  ;;  %v3409_v4 = vadd.f32 %v5882_v62, %v8142_v18  ;;  %9386 = vst [vmem:[#allocation32_spill] sm:$0xff] %v8216_v27  ;;  %v6558_v18 = vld [vmem:[%s6998_s14 + $0x38] sm:$0xff] }
 0xb2b   : > { %v3358_v37 = vpop.f32.mrf.mxu1  ;;  %v8228_v1 = vadd.f32 %v8191_v34, %v3424_v2 }
 0xb2c   : > { %v3407_v47 = vadd.f32 %v3358_v37, %v8146_v60  ;;  %v8219_v49 = vadd.f32 %v8191_v34, %v3422_v50  ;;  %v3425_v48 = vadd.f32 %v6558_v18, %v3409_v4 }
 0xb2d   : > { %v5885_v15 = vpop.f32.mrf.mxu1  ;;  %9388 = vst [vmem:[#allocation38_spill] sm:$0xff] %v8228_v1 }
 0xb2e   : > { %9387 = vst [vmem:[#allocation34_spill] sm:$0xff] %v8219_v49  ;;  %v3423_v45 = vadd.f32 %v6557_v33, %v3407_v47  ;;  %3463 = vadd.xlane.f32.xlu0 %v8216_v27  ;;  %3465 = vadd.xlane.f32.xlu1 %v8219_v49  ;;  %v3412_v60 = vadd.f32 %v5885_v15, %v8150_v63 }
 0xb2f   : > { %v3371_v39 = vpop.f32.mrf.mxu1  ;;  %v8237_v63 = vadd.f32 %v8191_v34, %v3425_v48 }
 0xb30   : > { %v3410_v43 = vadd.f32 %v3371_v39, %v8154_v41  ;;  %v8231_v32 = vadd.f32 %v8191_v34, %v3423_v45  ;;  %v3428_v41 = vadd.f32 %v6560_v29, %v3412_v60  ;;  %v6063_v29 = vld [vmem:[#allocation7 + $0x70] ss:$8 sps:$4 sm:$0xff]  }
 0xb31   : > { %v5886_v20 = vpop.f32.mrf.mxu1  ;;  %9390 = vst [vmem:[#allocation33_spill] sm:$0xff] %v8237_v63 }
 0xb32   : > { %9389 = vst [vmem:[#allocation31_spill] sm:$0xff] %v8231_v32  ;;  %v3426_v28 = vadd.f32 %v6559_v44, %v3410_v43  ;;  %3469 = vadd.xlane.f32.xlu1 %v8228_v1  ;;  %3467 = vadd.xlane.f32.xlu0 %v8231_v32  ;;  %v3413_v25 = vadd.f32 %v5886_v20, %v8158_v24  ;;  %v6065_v44 = vld [vmem:[#allocation7 + $0x74] ss:$8 sps:$4 sm:$0xff]  }
 0xb33   : > { %v3374_v16 = vpop.f32.mrf.mxu1  ;;  %v8250_v46 = vadd.f32 %v8191_v34, %v3428_v41  ;;  %v6068_v41 = vld [vmem:[#allocation7 + $0x64] ss:$8 sps:$4 sm:$0xff]   ;;  %3749 = vmatprep.subr.bf16.mxu0 %v6065_v44  ;;  %v6081_v44 = vld [vmem:[#allocation7 + $0x10] ss:$8 sps:$4 sm:$0xff]  }
 0xb34   : > { %v3411_v54 = vadd.f32 %v3374_v16, %v8162_v38  ;;  %v8243_v57 = vadd.f32 %v8191_v34, %v3426_v28  ;;  %v3429_v35 = vadd.f32 %v6562_v52, %v3413_v25  ;;  %3750 = vmatpush1.bf16.msra.mxu0 %v6063_v29  ;;  %v6066_v52 = vld [vmem:[#allocation7 + $0x60] ss:$8 sps:$4 sm:$0xff]  }
 0xb35   : > { %9392 = vst [vmem:[#allocation35_spill] sm:$0xff] %v8250_v46  ;;  %3751 = vmatprep.subr.bf16.mxu0 %v6068_v41 }
 0xb36   : > { %9391 = vst [vmem:[#allocation36_spill] sm:$0xff] %v8243_v57  ;;  %v3427_v36 = vadd.f32 %v6561_v31, %v3411_v54  ;;  %3471 = vadd.xlane.f32.xlu0 %v8237_v63  ;;  %3473 = vadd.xlane.f32.xlu1 %v8243_v57  ;;  %v8258_v38 = vadd.f32 %v8191_v34, %v3429_v35 }
 0xb38   : > { %v8253_v24 = vadd.f32 %v8191_v34, %v3427_v36  ;;  %9394 = vst [vmem:[#allocation22_spill] sm:$0xff] %v8258_v38  ;;  %3752 = vmatpush1.bf16.msra.mxu0 %v6066_v52 }
 0xb3a   : > { %9393 = vst [vmem:[#allocation37_spill] sm:$0xff] %v8253_v24  ;;  %3477 = vadd.xlane.f32.xlu1 %v8250_v46  ;;  %3475 = vadd.xlane.f32.xlu0 %v8253_v24 }
 0xb3e   : > { %3479 = vadd.xlane.f32.xlu0 %v8258_v38 }
 0xb9e   : > { %v5889_v22 = vpop.f32.mrf.mxu1 }
 0xb9f   : > { %v3416_v19 = vadd.f32 %v5889_v22, %v8166_v30  ;;  %v6566_v30 = vld [vmem:[%s6998_s14 + $0x78] sm:$0xff] }
 0xba0   : > { %v3387_v7 = vpop.f32.mrf.mxu1 }
 0xba1   : > { %v3414_v56 = vadd.f32 %v3387_v7, %v8170_v40  ;;  %v3432_v51 = vadd.f32 %v6564_v13, %v3416_v19 }
 0xba2   : > { %v5890_v58 = vpop.f32.mrf.mxu1 }
 0xba3   : > { %v3430_v0 = vadd.f32 %v6563_v59, %v3414_v56  ;;  %v3417_v53 = vadd.f32 %v5890_v58, %v8172_v10  ;;  %v8276_v21 = vadd.f32 %v8191_v34, %v3432_v51  ;;  %v6069_v51 = vld [vmem:[#allocation7 + $0x50] ss:$8 sps:$4 sm:$0xff]  }
 0xba4   : > { %v3390_v23 = vpop.f32.mrf.mxu1 }
 0xba5   : > { %v3415_v14 = vadd.f32 %v3390_v23, %v2808_v9  ;;  %v8270_v42 = vadd.f32 %v8191_v34, %v3430_v0  ;;  %v3433_v40 = vadd.f32 %v6566_v30, %v3417_v53  ;;  %9397 = vst [vmem:[#allocation19_spill] sm:$0xff] %v8276_v21  ;;  %v6071_v0 = vld [vmem:[#allocation7 + $0x54] ss:$8 sps:$4 sm:$0xff]  }
 0xba6   : > { %3753 = vmatprep.subr.bf16.mxu0 %v6071_v0 }
 0xba7   : > { %9396 = vst [vmem:[#allocation17_spill] sm:$0xff] %v8270_v42  ;;  %v3431_v11 = vadd.f32 %v6565_v26, %v3415_v14  ;;  %3481 = vadd.xlane.f32.xlu1 %v8270_v42  ;;  %v8284_v10 = vadd.f32 %v8191_v34, %v3433_v40  ;;  %3754 = vmatpush1.bf16.msra.mxu0 %v6069_v51 }
 0xba9   : > { %v8279_v17 = vadd.f32 %v8191_v34, %v3431_v11  ;;  %9399 = vst [vmem:[#allocation21_spill] sm:$0xff] %v8284_v10 }
 0xbab   : > { %9398 = vst [vmem:[#allocation18_spill] sm:$0xff] %v8279_v17  ;;  %3485 = vadd.xlane.f32.xlu1 %v8276_v21  ;;  %3483 = vadd.xlane.f32.xlu0 %v8279_v17 }
 0xbaf   : > { %3487 = vadd.xlane.f32.xlu0 %v8284_v10  ;;  %v3458_v62 = vpop.xlane.xlu1 %3457 }
 0xbb0   : > { %v3489_v6 = vmul.f32 0.0078125, %v3458_v62  ;;  %v6074_v62 = vld [vmem:[#allocation7 + $0x44] ss:$8 sps:$4 sm:$0xff]  }
 0xbb1   : > { %3755 = vmatprep.subr.bf16.mxu0 %v6074_v62 }
 0xbb2   : > { %v8288_v50 = vsub.f32 %v8196_v12, %v3489_v6 }
 0xbb3   : > { %v3462_v4 = vpop.xlane.xlu1 %3461  ;;  %v3460_v37 = vpop.xlane.xlu0 %3459 }
 0xbb4   : > { %v3491_v55 = vmul.f32 0.0078125, %v3462_v4  ;;  %v3490_v2 = vmul.f32 0.0078125, %v3460_v37  ;;  %v3521_v47 = vmul.f32 %v8288_v50, %v8288_v50  ;;  %v6072_v4 = vld [vmem:[#allocation7 + $0x40] ss:$8 sps:$4 sm:$0xff]  }
 0xbb5   : > { %3756 = vmatpush1.bf16.msra.mxu0 %v6072_v4 }
 0xbb6   : > { %v8293_v15 = vsub.f32 %v8201_v5, %v3491_v55  ;;  %v8296_v34 = vsub.f32 %v8207_v3, %v3490_v2  ;;  %3537 = vadd.xlane.f32.xlu1 %v3521_v47 }
 0xbb7   : > { %v3466_v33 = vpop.xlane.xlu1 %3465  ;;  %v3464_v45 = vpop.xlane.xlu0 %3463 }
 0xbb8   : > { %v3493_v18 = vmul.f32 0.0078125, %v3466_v33  ;;  %v3492_v48 = vmul.f32 0.0078125, %v3464_v45  ;;  %v3523_v39 = vmul.f32 %v8293_v15, %v8293_v15  ;;  %v3522_v60 = vmul.f32 %v8296_v34, %v8296_v34  ;;  %v6077_v33 = vld [vmem:[#allocation7 + $0x34] ss:$8 sps:$4 sm:$0xff]   ;;  %v6075_v45 = vld [vmem:[#allocation7 + $0x30] ss:$8 sps:$4 sm:$0xff]  }
 0xbb9   : > { %3757 = vmatprep.subr.bf16.mxu0 %v6077_v33 }
 0xbba   : > { %v8303_v43 = vsub.f32 %v8219_v49, %v3493_v18  ;;  %v8306_v20 = vsub.f32 %v8216_v27, %v3492_v48  ;;  %3541 = vadd.xlane.f32.xlu1 %v3523_v39  ;;  %3539 = vadd.xlane.f32.xlu0 %v3522_v60  ;;  %v6080_v48 = vld [vmem:[#allocation7 + $0x24] ss:$8 sps:$4 sm:$0xff]   ;;  %v6078_v39 = vld [vmem:[#allocation7 + $0x20] ss:$8 sps:$4 sm:$0xff]   ;;  %v6083_v60 = vld [vmem:[#allocation7 + $0x14] ss:$8 sps:$4 sm:$0xff]  }
 0xbbb   : > { %v3470_v28 = vpop.xlane.xlu1 %3469  ;;  %v3468_v16 = vpop.xlane.xlu0 %3467  ;;  %3758 = vmatpush1.bf16.msra.mxu0 %v6075_v45 }
 0xbbc   : > { %v3495_v25 = vmul.f32 0.0078125, %v3470_v28  ;;  %v3494_v54 = vmul.f32 0.0078125, %v3468_v16  ;;  %v3525_v31 = vmul.f32 %v8303_v43, %v8303_v43  ;;  %v3524_v36 = vmul.f32 %v8306_v20, %v8306_v20  ;;  %3759 = vmatprep.subr.bf16.mxu0 %v6080_v48  ;;  %v6086_v28 = vld [vmem:[#allocation7 + $0x4] ss:$8 sps:$4 sm:$0xff]   ;;  %v6084_v16 = vld [vmem:[#allocation7] ss:$8 sps:$4 sm:$0xff]  }
 0xbbe   : > { %v8313_v35 = vsub.f32 %v8228_v1, %v3495_v25  ;;  %v8316_v22 = vsub.f32 %v8231_v32, %v3494_v54  ;;  %3545 = vadd.xlane.f32.xlu1 %v3525_v31  ;;  %3543 = vadd.xlane.f32.xlu0 %v3524_v36 }
 0xbbf   : > { %v3474_v7 = vpop.xlane.xlu1 %3473  ;;  %v3472_v61 = vpop.xlane.xlu0 %3471  ;;  %3760 = vmatpush1.bf16.msra.mxu0 %v6078_v39 }
 0xbc0   : > { %v3497_v8 = vmul.f32 0.0078125, %v3474_v7  ;;  %v3496_v19 = vmul.f32 0.0078125, %v3472_v61  ;;  %v3527_v56 = vmul.f32 %v8313_v35, %v8313_v35  ;;  %v3526_v58 = vmul.f32 %v8316_v22, %v8316_v22  ;;  %3761 = vmatprep.subr.bf16.mxu0 %v6083_v60 }
 0xbc2   : > { %v8323_v9 = vsub.f32 %v8243_v57, %v3497_v8  ;;  %v8326_v59 = vsub.f32 %v8237_v63, %v3496_v19  ;;  %3549 = vadd.xlane.f32.xlu1 %v3527_v56  ;;  %3547 = vadd.xlane.f32.xlu0 %v3526_v58 }
 0xbc3   : > { %v3478_v23 = vpop.xlane.xlu1 %3477  ;;  %v3476_v13 = vpop.xlane.xlu0 %3475  ;;  %3762 = vmatpush1.bf16.msra.mxu0 %v6081_v44 }
 0xbc4   : > { %v3499_v53 = vmul.f32 0.0078125, %v3478_v23  ;;  %v3498_v14 = vmul.f32 0.0078125, %v3476_v13  ;;  %v3529_v26 = vmul.f32 %v8323_v9, %v8323_v9  ;;  %v3528_v11 = vmul.f32 %v8326_v59, %v8326_v59  ;;  %3763 = vmatprep.subr.bf16.mxu0 %v6086_v28 }
 0xbc6   : > { %v8333_v30 = vsub.f32 %v8250_v46, %v3499_v53  ;;  %v8336_v40 = vsub.f32 %v8253_v24, %v3498_v14  ;;  %3553 = vadd.xlane.f32.xlu1 %v3529_v26  ;;  %3551 = vadd.xlane.f32.xlu0 %v3528_v11 }
 0xbc7   : > { %v3480_v6 = vpop.xlane.xlu0 %3479  ;;  %3764 = vmatpush1.bf16.msra.mxu0 %v6084_v16 }
 0xbc8   : > { %v3500_v37 = vmul.f32 0.0078125, %v3480_v6  ;;  %v3531_v55 = vmul.f32 %v8333_v30, %v8333_v30  ;;  %v3530_v2 = vmul.f32 %v8336_v40, %v8336_v40 }
 0xbca   : > { %v8343_v47 = vsub.f32 %v8258_v38, %v3500_v37  ;;  %3557 = vadd.xlane.f32.xlu1 %v3531_v55  ;;  %3555 = vadd.xlane.f32.xlu0 %v3530_v2 }
 0xbcc   : > { %v3532_v18 = vmul.f32 %v8343_v47, %v8343_v47 }
 0xbce   : > { %3559 = vadd.xlane.f32.xlu0 %v3532_v18 }
 0xc30   : > { %v3482_v29 = vpop.xlane.xlu1 %3481 }
 0xc31   : > { %v3501_v41 = vmul.f32 0.0078125, %v3482_v29 }
 0xc33   : > { %v8348_v25 = vsub.f32 %v8270_v42, %v3501_v41 }
 0xc34   : > { %v3486_v54 = vpop.xlane.xlu1 %3485  ;;  %v3484_v31 = vpop.xlane.xlu0 %3483 }
 0xc35   : > { %v3503_v36 = vmul.f32 0.0078125, %v3486_v54  ;;  %v3502_v52 = vmul.f32 0.0078125, %v3484_v31  ;;  %v3533_v7 = vmul.f32 %v8348_v25, %v8348_v25 }
 0xc37   : > { %v8353_v61 = vsub.f32 %v8276_v21, %v3503_v36  ;;  %v8356_v8 = vsub.f32 %v8279_v17, %v3502_v52  ;;  %3561 = vadd.xlane.f32.xlu1 %v3533_v7 }
 0xc38   : > { %v3488_v19 = vpop.xlane.xlu0 %3487 }
 0xc39   : > { %v3504_v56 = vmul.f32 0.0078125, %v3488_v19  ;;  %v3535_v58 = vmul.f32 %v8353_v61, %v8353_v61  ;;  %v3534_v0 = vmul.f32 %v8356_v8, %v8356_v8 }
 0xc3b   : > { %v8363_v23 = vsub.f32 %v8284_v10, %v3504_v56  ;;  %3565 = vadd.xlane.f32.xlu1 %v3535_v58  ;;  %3563 = vadd.xlane.f32.xlu0 %v3534_v0 }
 0xc3d   : > { %v3536_v13 = vmul.f32 %v8363_v23, %v8363_v23 }
 0xc3f   : > { %3567 = vadd.xlane.f32.xlu0 %v3536_v13  ;;  %v3538_v51 = vpop.xlane.xlu1 %3537 }
 0xc40   : > { %v3569_v53 = vmul.f32 0.0078125, %v3538_v51 }
 0xc42   : > { %v3585_v14 = vadd.f32 1e-05, %v3569_v53  ;;  %v9400_v53 = vmov 0  }
 0xc43   : > { %v3540_v26 = vpop.xlane.xlu0 %3539  ;;  %v3542_v11 = vpop.xlane.xlu1 %3541 }
 0xc44   : > { %v3570_v62 = vmul.f32 0.0078125, %v3540_v26  ;;  %6391 = vrsqrt.f32 %v3585_v14  ;;  %v3571_v4 = vmul.f32 0.0078125, %v3542_v11 }
 0xc46   : > { %v3586_v6 = vadd.f32 1e-05, %v3570_v62  ;;  %v3587_v33 = vadd.f32 1e-05, %v3571_v4 }
 0xc47   : > { %v3544_v37 = vpop.xlane.xlu0 %3543  ;;  %v3546_v18 = vpop.xlane.xlu1 %3545 }
 0xc48   : > { %v3572_v55 = vmul.f32 0.0078125, %v3544_v37  ;;  %6393 = vrsqrt.f32 %v3586_v6  ;;  %v3573_v39 = vmul.f32 0.0078125, %v3546_v18 }
 0xc4a   : > { %v3588_v2 = vadd.f32 1e-05, %v3572_v55  ;;  %v3589_v28 = vadd.f32 1e-05, %v3573_v39 }
 0xc4b   : > { %v3548_v45 = vpop.xlane.xlu0 %3547  ;;  %v3550_v29 = vpop.xlane.xlu1 %3549 }
 0xc4c   : > { %6395 = vrsqrt.f32 %v3588_v2  ;;  %v3574_v48 = vmul.f32 0.0078125, %v3548_v45  ;;  %v3575_v52 = vmul.f32 0.0078125, %v3550_v29 }
 0xc4d   : > { %6397 = vrsqrt.f32 %v3587_v33 }
 0xc4e   : > { %v3590_v60 = vadd.f32 1e-05, %v3574_v48  ;;  %v3591_v0 = vadd.f32 1e-05, %v3575_v52 }
 0xc4f   : > { %v3552_v44 = vpop.xlane.xlu0 %3551  ;;  %v3554_v51 = vpop.xlane.xlu1 %3553 }
 0xc50   : > { %6399 = vrsqrt.f32 %v3590_v60  ;;  %v3576_v41 = vmul.f32 0.0078125, %v3552_v44 }
 0xc51   : > { %v6392_v16 = vpop.eup %6391  ;;  %6401 = vrsqrt.f32 %v3589_v28 }
 0xc52   : > { %v3617_v31 = vmul.f32 %v6392_v16, %v8288_v50  ;;  %v3592_v7 = vadd.f32 1e-05, %v3576_v41  ;;  %v3577_v50 = vmul.f32 0.0078125, %v3554_v51 }
 0xc53   : > { %v3556_v58 = vpop.xlane.xlu0 %3555  ;;  %v3558_v2 = vpop.xlane.xlu1 %3557 }
 0xc54   : > { %6403 = vrsqrt.f32 %v3592_v7  ;;  %v3578_v14 = vmul.f32 0.0078125, %v3556_v58  ;;  %v3593_v37 = vadd.f32 1e-05, %v3577_v50 }
 0xc55   : > { %v6394_v54 = vpop.eup %6393  ;;  %6405 = vrsqrt.f32 %v3591_v0 }
 0xc56   : > { %v3618_v36 = vmul.f32 %v6394_v54, %v8296_v34  ;;  %v3594_v11 = vadd.f32 1e-05, %v3578_v14 }
 0xc57   : > { %v3560_v4 = vpop.xlane.xlu0 %3559 }
 0xc58   : > { %v3633_v19 = vpack.c.bf16 %v3618_v36, %v3617_v31  ;;  %6407 = vrsqrt.f32 %v3594_v11  ;;  %v3580_v33 = vmul.f32 0.0078125, %v3560_v4 }
 0xc59   : > { %v6396_v56 = vpop.eup %6395  ;;  %6409 = vrsqrt.f32 %v3593_v37 }
 0xc5a   : > { %3782 = vmatmul.mubr.bf16.vlgmr.msra.gmra.mxu0 %v3633_v19  ;;  %v6398_v13 = vpop.eup %6397  ;;  %v3620_v26 = vmul.f32 %v6396_v56, %v8306_v20  ;;  %v3579_v20 = vmul.f32 0.0078125, %v3558_v2  ;;  %v3596_v48 = vadd.f32 1e-05, %v3580_v33 }
 0xc5b   : > { %3791 = vmatprep.mubr.bf16.mxu0 %v9400_v53  ;;  %v3619_v34 = vmul.f32 %v6398_v13, %v8293_v15 }
 0xc5c   : > { %v3595_v60 = vadd.f32 1e-05, %v3579_v20  ;;  %6411 = vrsqrt.f32 %v3596_v48  ;;  %v6088_v20 = vld [vmem:[#allocation10 + $0x38] sm:$0xff]  }
 0xc5d   : > { %v3634_v62 = vpack.c.bf16 %v3620_v26, %v3619_v34  ;;  %v6400_v6 = vpop.eup %6399  ;;  %v3657_v48 = vld [vmem:[#allocation9] sm:$0x3] }
 0xc5e   : > { %v6402_v55 = vpop.eup %6401  ;;  %v3622_v45 = vmul.f32 %v6400_v6, %v8316_v22  ;;  %6413 = vrsqrt.f32 %v3595_v60 }
 0xc5f   : > { %v3621_v18 = vmul.f32 %v6402_v55, %v8303_v43 }
 0xc61   : > { %v3635_v15 = vpack.c.bf16 %v3622_v45, %v3621_v18  ;;  %v6404_v39 = vpop.eup %6403  ;;  %v6087_v45 = vld [vmem:[#allocation10 + $0x78] sm:$0xff]   ;;  %v6089_v18 = vld [vmem:[#allocation10 + $0x70] sm:$0xff]  }
 0xc62   : > { %3792 = vmatmul.mubr.bf16.gmra.mxu0 %v3634_v62  ;;  %v6406_v44 = vpop.eup %6405  ;;  %v3624_v28 = vmul.f32 %v6404_v39, %v8326_v59  ;;  %5459 = vmatprep.subr.bf16.mxu1 %v6087_v45  ;;  %v6098_v45 = vld [vmem:[#allocation10 + $0x10] sm:$0xff]  }
 0xc63   : > { %3801 = vmatprep.mubr.bf16.mxu0 %v9400_v53  ;;  %v3623_v16 = vmul.f32 %v6406_v44, %v8313_v35  ;;  %5460 = vmatpush3.bf16.msra.mxu1 %v6088_v20  ;;  %v6092_v44 = vld [vmem:[#allocation10 + $0x28] sm:$0xff]  }
 0xc64   : > { %5461 = vmatprep.subr.bf16.mxu1 %v6089_v18 }
 0xc65   : > { %v3636_v29 = vpack.c.bf16 %v3624_v28, %v3623_v16  ;;  %v6408_v22 = vpop.eup %6407 }
 0xc66   : > { %v6410_v41 = vpop.eup %6409  ;;  %v3626_v43 = vmul.f32 %v6408_v22, %v8336_v40 }
 0xc67   : > { %v3625_v54 = vmul.f32 %v6410_v41, %v8323_v9 }
 0xc69   : > { %v3637_v31 = vpack.c.bf16 %v3626_v43, %v3625_v54  ;;  %v6412_v36 = vpop.eup %6411  ;;  %v6093_v43 = vld [vmem:[#allocation10 + $0x60] sm:$0xff]  }
 0xc6a   : > { %3802 = vmatmul.mubr.bf16.gmra.mxu0 %v3635_v15  ;;  %v3628_v59 = vmul.f32 %v6412_v36, %v8343_v47  ;;  %v9401_v15 = vld [vmem:[#allocation16_spill] sm:$0xff] }
 0xc6b   : > { %3811 = vmatprep.mubr.bf16.mxu0 %v9400_v53  ;;  %v6414_v52 = vpop.eup %6413  ;;  %v9402_v39 = vsub.s32 0, %v9401_v15 }
 0xc6c   : > { %v3627_v35 = vmul.f32 %v6414_v52, %v8333_v30 }
 0xc6e   : > { %v3638_v7 = vpack.c.bf16 %v3628_v59, %v3627_v35 }
 0xc72   : > { %3812 = vmatmul.mubr.bf16.gmra.mxu0 %v3636_v29 }
 0xc73   : > { %3821 = vmatprep.mubr.bf16.mxu0 %v9400_v53 }
 0xc7a   : > { %3822 = vmatmul.mubr.bf16.gmra.mxu0 %v3637_v31 }
 0xc7b   : > { %3831 = vmatprep.mubr.bf16.mxu0 %v9400_v53 }
 0xc82   : > { %3832 = vmatmul.mubr.bf16.gmra.mxu0 %v3638_v7 }
 0xc83   : > { %3841 = vmatprep.mubr.bf16.mxu0 %v9400_v53 }
 0xcc0   : > { %v3562_v19 = vpop.xlane.xlu1 %3561 }
 0xcc1   : > { %v3581_v56 = vmul.f32 0.0078125, %v3562_v19 }
 0xcc3   : > { %v3597_v58 = vadd.f32 1e-05, %v3581_v56 }
 0xcc4   : > { %v3564_v40 = vpop.xlane.xlu0 %3563  ;;  %v3566_v0 = vpop.xlane.xlu1 %3565 }
 0xcc5   : > { %v3582_v9 = vmul.f32 0.0078125, %v3564_v40  ;;  %6415 = vrsqrt.f32 %v3597_v58  ;;  %v3583_v51 = vmul.f32 0.0078125, %v3566_v0  ;;  %v6094_v58 = vld [vmem:[#allocation10 + $0x20] sm:$0xff]  }
 0xcc7   : > { %v3598_v13 = vadd.f32 1e-05, %v3582_v9  ;;  %v3599_v47 = vadd.f32 1e-05, %v3583_v51 }
 0xcc8   : > { %v3568_v14 = vpop.xlane.xlu0 %3567 }
 0xcc9   : > { %v3584_v26 = vmul.f32 0.0078125, %v3568_v14  ;;  %6417 = vrsqrt.f32 %v3598_v13 }
 0xccb   : > { %v3600_v50 = vadd.f32 1e-05, %v3584_v26  ;;  %v6095_v26 = vld [vmem:[#allocation10 + $0x58] sm:$0xff]  }
 0xccd   : > { %6419 = vrsqrt.f32 %v3600_v50 }
 0xcce   : > { %6421 = vrsqrt.f32 %v3599_v47 }
 0xcd2   : > { %v6416_v30 = vpop.eup %6415 }
 0xcd3   : > { %v3629_v11 = vmul.f32 %v6416_v30, %v8348_v25  ;;  %v6090_v25 = vld [vmem:[#allocation10 + $0x30] sm:$0xff]  }
 0xcd4   : > { %5462 = vmatpush3.bf16.msra.mxu1 %v6090_v25 }
 0xcd6   : > { %v6418_v34 = vpop.eup %6417 }
 0xcd7   : > { %v3630_v62 = vmul.f32 %v6418_v34, %v8356_v8  ;;  %v6091_v8 = vld [vmem:[#allocation10 + $0x68] sm:$0xff]  }
 0xcd8   : > { %5463 = vmatprep.subr.bf16.mxu1 %v6091_v8 }
 0xcd9   : > { %v3639_v6 = vpack.c.bf16 %v3630_v62, %v3629_v11  ;;  %5464 = vmatpush3.bf16.msra.mxu1 %v6092_v44  ;;  %v6096_v62 = vld [vmem:[#allocation10 + $0x18] sm:$0xff]  }
 0xcda   : > { %v6420_v4 = vpop.eup %6419  ;;  %5465 = vmatprep.subr.bf16.mxu1 %v6093_v43  ;;  %v6100_v43 = vld [vmem:[#allocation10 + $0x8] sm:$0xff]  }
 0xcdb   : > { %3842 = vmatmul.mubr.bf16.gmra.mxu0 %v3639_v6  ;;  %v6422_v37 = vpop.eup %6421  ;;  %v3632_v55 = vmul.f32 %v6420_v4, %v8363_v23  ;;  %v9403_v23 = vsub.s32 1, %v9401_v15 }
 0xcdc   : > { %3851 = vmatprep.mubr.bf16.mxu0 %v9400_v53  ;;  %v3631_v2 = vmul.f32 %v6422_v37, %v8353_v61  ;;  %v8392_v53 = vrot.slane %v3657_v48, %v9402_v39 }
 0xcdd   : > { %v8396_v61 = vrot.slane %v3657_v48, %v9403_v23  ;;  %5466 = vmatpush3.bf16.msra.mxu1 %v6094_v58  ;;  %v6099_v23 = vld [vmem:[#allocation10 + $0x48] sm:$0xff]  }
 0xcde   : > { %v3640_v33 = vpack.c.bf16 %v3632_v55, %v3631_v2  ;;  %5467 = vmatprep.subr.bf16.mxu1 %v6095_v26  ;;  %v6097_v55 = vld [vmem:[#allocation10 + $0x50] sm:$0xff]  }
 0xce1   : > { %5468 = vmatpush3.bf16.msra.mxu1 %v6096_v62 }
 0xce2   : > { %5469 = vmatprep.subr.bf16.mxu1 %v6097_v55 }
 0xce3   : > { %3852 = vmatmul.mubr.bf16.gmra.mxu0 %v3640_v33 }
 0xce5   : > { %5470 = vmatpush3.bf16.msra.mxu1 %v6098_v45 }
 0xce6   : > { %5471 = vmatprep.subr.bf16.mxu1 %v6099_v23 }
 0xce9   : > { %5472 = vmatpush3.bf16.msra.mxu1 %v6100_v43 }
 0xd1a   : > { %v3783_v60 = vpop.f32.mrf.mxu0 }
 0xd1b   : > { %v8399_v28 = vadd.f32 %v3783_v60, %v8392_v53 }
 0xd1c   : > { %v3785_v16 = vpop.f32.mrf.mxu0 }
 0xd1d   : > { %v8402_v29 = vmul.f32 0.70710677, %v8399_v28  ;;  %v8405_v22 = vadd.f32 %v3785_v16, %v8396_v61 }
 0xd1e   : > { %v3787_v41 = vpop.f32.mrf.mxu0 }
 0xd1f   : > { %v3926_v54 = vand.u32 2147483647, %v8402_v29  ;;  %v8409_v31 = vmul.f32 0.70710677, %v8405_v22  ;;  %v8412_v36 = vadd.f32 %v3787_v41, %v8392_v53  ;;  %vm4566_vm1 = vcmp.ge.f32.partialorder %v8402_v29, 0.0 }
 0xd20   : > { %v3789_v52 = vpop.f32.mrf.mxu0 }
 0xd21   : > { %v3958_v59 = vmul.f32 0.3275911, %v3926_v54  ;;  %v3927_v35 = vand.u32 2147483647, %v8409_v31  ;;  %v8416_v7 = vmul.f32 0.70710677, %v8412_v36  ;;  %v8419_v19 = vadd.f32 %v3789_v52, %v8396_v61 }
 0xd22   : > { %v3793_v56 = vpop.f32.mrf.mxu0  ;;  %v4374_v25 = vsub.f32 0.0, %v3926_v54  ;;  %vm4567_vm3 = vcmp.ge.f32.partialorder %v8409_v31, 0.0 }
 0xd23   : > { %v3990_v40 = vadd.f32 1.0, %v3958_v59  ;;  %v3959_v0 = vmul.f32 0.3275911, %v3927_v35  ;;  %v8422_v9 = vand.u32 2147483647, %v8416_v7  ;;  %v8432_v34 = vadd.f32 %v3793_v56, %v8392_v53 }
 0xd24   : > { %v8425_v13 = vmul.f32 0.70710677, %v8419_v19  ;;  %v3795_v51 = vpop.f32.mrf.mxu0  ;;  %v4375_v48 = vsub.f32 0.0, %v3927_v35  ;;  %v4406_v52 = vmul.f32 %v4374_v25, %v3926_v54  ;;  %vm4568_vm2 = vcmp.ge.f32.partialorder %v8416_v7, 0.0 }
 0xd25   : > { %6423 = vrcp.f32 %v3990_v40  ;;  %v3991_v14 = vadd.f32 1.0, %v3959_v0  ;;  %v3960_v50 = vmul.f32 0.3275911, %v8422_v9  ;;  %v8435_v11 = vadd.f32 %v3795_v51, %v8396_v61  ;;  %v6101_v51 = vld [vmem:[#allocation10 + $0x40] sm:$0xff]  }
 0xd26   : > { %v8429_v47 = vand.u32 2147483647, %v8425_v13  ;;  %v3797_v30 = vpop.f32.mrf.mxu0  ;;  %v8439_v37 = vmul.f32 0.70710677, %v8432_v34  ;;  %v4407_v58 = vmul.f32 %v4375_v48, %v3927_v35  ;;  %v4376_v40 = vsub.f32 0.0, %v8422_v9  ;;  %5473 = vmatprep.subr.bf16.mxu1 %v6101_v51 }
 0xd27   : > { %6425 = vrcp.f32 %v3991_v14  ;;  %v3992_v6 = vadd.f32 1.0, %v3960_v50  ;;  %v8445_v18 = vmul.f32 0.70710677, %v8435_v11  ;;  %v8448_v8 = vadd.f32 %v3797_v30, %v8392_v53  ;;  %v6102_v30 = vld [vmem:[#allocation10] sm:$0xff]  }
 0xd28   : > { %v3961_v4 = vmul.f32 0.3275911, %v8429_v47  ;;  %v3799_v33 = vpop.f32.mrf.mxu0  ;;  %v8442_v20 = vand.u32 2147483647, %v8439_v37  ;;  %v4377_v35 = vsub.f32 0.0, %v8429_v47  ;;  %v4408_v25 = vmul.f32 %v4376_v40, %v8422_v9  ;;  %5474 = vmatpush3.bf16.msra.mxu1 %v6102_v30 }
 0xd29   : > { %6427 = vrcp.f32 %v3992_v6  ;;  %v8452_v39 = vadd.f32 %v3799_v33, %v8396_v61  ;;  %v8455_v60 = vand.u32 2147483647, %v8445_v18  ;;  %v8458_v44 = vmul.f32 0.70710677, %v8448_v8 }
 0xd2a   : > { %v3993_v2 = vadd.f32 1.0, %v3961_v4  ;;  %v3962_v15 = vmul.f32 0.3275911, %v8442_v20  ;;  %v3803_v41 = vpop.f32.mrf.mxu0  ;;  %v4438_v4 = vmul.f32 1.442695, %v4406_v52  ;;  %v4378_v23 = vsub.f32 0.0, %v8442_v20 }
 0xd2b   : > { %v3963_v59 = vmul.f32 0.3275911, %v8455_v60  ;;  %v8462_v56 = vand.u32 2147483647, %v8458_v44  ;;  %v8466_v0 = vmul.f32 0.70710677, %v8452_v39  ;;  %v8472_v54 = vadd.f32 %v3803_v41, %v8392_v53 }
 0xd2c   : > { %6429 = vrcp.f32 %v3993_v2  ;;  %v3994_v16 = vadd.f32 1.0, %v3962_v15  ;;  %v4440_v45 = vmul.f32 1.442695, %v4407_v58  ;;  %v3805_v41 = vpop.f32.mrf.mxu0  ;;  %v4379_v21 = vsub.f32 0.0, %v8455_v60 }
 0xd2d   : > { %v3995_v26 = vadd.f32 1.0, %v3963_v59  ;;  %v3964_v50 = vmul.f32 0.3275911, %v8462_v56  ;;  %v8477_v6 = vand.u32 2147483647, %v8466_v0  ;;  %v4409_v59 = vmul.f32 %v4377_v35, %v8429_v47 }
 0xd2e   : > { %6431 = vrcp.f32 %v3994_v16  ;;  %v8486_v16 = vmul.f32 0.70710677, %v8472_v54  ;;  %v8497_v30 = vadd.f32 %v3805_v41, %v8396_v61  ;;  %v4410_v47 = vmul.f32 %v4378_v23, %v8442_v20 }
 0xd2f   : > { %6433 = vrcp.f32 %v3995_v26  ;;  %v3996_v55 = vadd.f32 1.0, %v3964_v50  ;;  %v3965_v48 = vmul.f32 0.3275911, %v8477_v6  ;;  %v4442_v50 = vmul.f32 1.442695, %v4408_v25 }
 0xd30   : > { %v8494_v51 = vand.u32 2147483647, %v8486_v16  ;;  %vm4569_vm4 = vcmp.ge.f32.partialorder %v8425_v13, 0.0  ;;  %vm4570_vm5 = vcmp.ge.f32.partialorder %v8439_v37, 0.0  ;;  %vm4571_vm6 = vcmp.ge.f32.partialorder %v8445_v18, 0.0 }
 0xd31   : > { %6435 = vrcp.f32 %v3996_v55  ;;  %v3997_v58 = vadd.f32 1.0, %v3965_v48  ;;  %v4444_v48 = vmul.f32 1.442695, %v4409_v59  ;;  %vm4572_vm7 = vcmp.ge.f32.partialorder %v8458_v44, 0.0 }
 0xd32   : > { %v8468_v14 = vpop.eup %6423  ;;  %v3966_v35 = vmul.f32 0.3275911, %v8494_v51  ;;  %vm4573_vm8 = vcmp.ge.f32.partialorder %v8466_v0, 0.0  ;;  %vm4574_vm9 = vcmp.ge.f32.partialorder %v8486_v16, 0.0 }
 0xd33   : > { %v4086_v62 = vmul.f32 1.0614054, %v8468_v14  ;;  %6437 = vrcp.f32 %v3997_v58 }
 0xd34   : > { %v8479_v2 = vpop.eup %6425  ;;  %6439 = vpow2.f32 %v4438_v4  ;;  %v3998_v41 = vadd.f32 1.0, %v3966_v35  ;;  %v4446_v4 = vmul.f32 1.442695, %v4410_v47  ;;  %v4411_v47 = vmul.f32 %v4379_v21, %v8455_v60 }
 0xd35   : > { %v4118_v33 = vadd.f32 -1.4531521, %v4086_v62  ;;  %v4087_v15 = vmul.f32 1.0614054, %v8479_v2  ;;  %6441 = vpow2.f32 %v4440_v45 }
 0xd36   : > { %v8488_v43 = vpop.eup %6427  ;;  %6443 = vpow2.f32 %v4442_v50 }
 0xd37   : > { %v4150_v52 = vmul.f32 %v8468_v14, %v4118_v33  ;;  %v4119_v9 = vadd.f32 -1.4531521, %v4087_v15  ;;  %v4088_v40 = vmul.f32 1.0614054, %v8488_v43  ;;  %6445 = vrcp.f32 %v3998_v41 }
 0xd38   : > { %6447 = vpow2.f32 %v4444_v48  ;;  %v4381_v41 = vsub.f32 0.0, %v8477_v6 }
 0xd39   : > { %v4182_v26 = vadd.f32 1.4214138, %v4150_v52  ;;  %v8499_v62 = vpop.eup %6429  ;;  %v4151_v33 = vmul.f32 %v8479_v2, %v4119_v9  ;;  %v4120_v10 = vadd.f32 -1.4531521, %v4088_v40  ;;  %v8509_v9 = vmul.f32 0.70710677, %v8497_v30 }
 0xd3a   : > { %v4089_v55 = vmul.f32 1.0614054, %v8499_v62  ;;  %6449 = vpow2.f32 %v4446_v4 }
 0xd3b   : > { %v4214_v15 = vmul.f32 %v8468_v14, %v4182_v26  ;;  %v4183_v25 = vadd.f32 1.4214138, %v4151_v33  ;;  %v4152_v52 = vmul.f32 %v8488_v43, %v4120_v10  ;;  %v8511_v20 = vpop.eup %6431  ;;  %v4380_v26 = vsub.f32 0.0, %v8462_v56 }
 0xd3c   : > { %v4121_v58 = vadd.f32 -1.4531521, %v4089_v55  ;;  %v4090_v40 = vmul.f32 1.0614054, %v8511_v20  ;;  %v8517_v10 = vand.u32 2147483647, %v8509_v9  ;;  %v8521_v55 = vpop.eup %6433 }
 0xd3d   : > { %v4184_v23 = vadd.f32 1.4214138, %v4152_v52  ;;  %v4246_v45 = vadd.f32 -0.28449672, %v4214_v15  ;;  %v4215_v33 = vmul.f32 %v8479_v2, %v4183_v25  ;;  %v4091_v17 = vmul.f32 1.0614054, %v8521_v55 }
 0xd3e   : > { %v4153_v59 = vmul.f32 %v8499_v62, %v4121_v58  ;;  %v4122_v50 = vadd.f32 -1.4531521, %v4090_v40  ;;  %v3967_v42 = vmul.f32 0.3275911, %v8517_v10  ;;  %v8530_v38 = vpop.eup %6435  ;;  %vm4575_vm10 = vcmp.ge.f32.partialorder %v8509_v9, 0.0 }
 0xd3f   : > { %v4216_v35 = vmul.f32 %v8488_v43, %v4184_v23  ;;  %v4412_v23 = vmul.f32 %v4380_v26, %v8462_v56  ;;  %v4278_v48 = vmul.f32 %v8468_v14, %v4246_v45  ;;  %v4123_v21 = vadd.f32 -1.4531521, %v4091_v17 }
 0xd40   : > { %v4185_v52 = vadd.f32 1.4214138, %v4153_v59  ;;  %v4154_v25 = vmul.f32 %v8511_v20, %v4122_v50  ;;  %v4247_v59 = vadd.f32 -0.28449672, %v4215_v33  ;;  %v3999_v60 = vadd.f32 1.0, %v3967_v42 }
 0xd41   : > { %v4248_v58 = vadd.f32 -0.28449672, %v4216_v35  ;;  %v4092_v46 = vmul.f32 1.0614054, %v8530_v38  ;;  %v4155_v50 = vmul.f32 %v8521_v55, %v4123_v21  ;;  %v4448_v56 = vmul.f32 1.442695, %v4411_v47 }
 0xd42   : > { %v4217_v15 = vmul.f32 %v8499_v62, %v4185_v52  ;;  %v4186_v35 = vadd.f32 1.4214138, %v4154_v25  ;;  %v8535_v52 = vpop.eup %6437  ;;  %6451 = vrcp.f32 %v3999_v60  ;;  %v4450_v57 = vmul.f32 1.442695, %v4412_v23 }
 0xd43   : > { %v4280_v4 = vmul.f32 %v8488_v43, %v4248_v58  ;;  %v4124_v24 = vadd.f32 -1.4531521, %v4092_v46  ;;  %v4413_v45 = vmul.f32 %v4381_v41, %v8477_v6  ;;  %v6440_v17 = vpop.eup %6439  ;;  %v4310_v42 = vadd.f32 0.2548296, %v4278_v48 }
 0xd44   : > { %v4249_v40 = vadd.f32 -0.28449672, %v4217_v15  ;;  %v4218_v26 = vmul.f32 %v8511_v20, %v4186_v35  ;;  %v4279_v33 = vmul.f32 %v8479_v2, %v4247_v59  ;;  %v4187_v58 = vadd.f32 1.4214138, %v4155_v50  ;;  %v6442_v21 = vpop.eup %6441 }
 0xd45   : > { %v4093_v15 = vmul.f32 1.0614054, %v8535_v52  ;;  %v4312_v25 = vadd.f32 0.2548296, %v4280_v4  ;;  %v4156_v47 = vmul.f32 %v8530_v38, %v4124_v24  ;;  %v8545_v60 = vmul.f32 0.5, %v8399_v28  ;;  %v6444_v23 = vpop.eup %6443 }
 0xd46   : > { %v4281_v63 = vmul.f32 %v8499_v62, %v4249_v40  ;;  %v4250_v1 = vadd.f32 -0.28449672, %v4218_v26  ;;  %v4219_v46 = vmul.f32 %v8521_v55, %v4187_v58  ;;  %6453 = vpow2.f32 %v4448_v56  ;;  %v8551_v50 = vpop.eup %6445 }
 0xd47   : > { %v4125_v6 = vadd.f32 -1.4531521, %v4093_v15  ;;  %v4188_v48 = vadd.f32 1.4214138, %v4156_v47  ;;  %6455 = vpow2.f32 %v4450_v57  ;;  %v4382_v59 = vsub.f32 0.0, %v8494_v51  ;;  %v6448_v15 = vpop.eup %6447 }
 0xd48   : > { %v4282_v41 = vmul.f32 %v8511_v20, %v4250_v1  ;;  %v4342_v4 = vmul.f32 %v8468_v14, %v4310_v42  ;;  %v4311_v40 = vadd.f32 0.2548296, %v4279_v33  ;;  %v4251_v35 = vadd.f32 -0.28449672, %v4219_v46  ;;  %v6450_v42 = vpop.eup %6449 }
 0xd49   : > { %v4452_v24 = vmul.f32 1.442695, %v4413_v45  ;;  %v4344_v28 = vmul.f32 %v8488_v43, %v4312_v25  ;;  %v4313_v26 = vadd.f32 0.2548296, %v4281_v63  ;;  %v4220_v56 = vmul.f32 %v8530_v38, %v4188_v48 }
 0xd4a   : > { %v4157_v58 = vmul.f32 %v8535_v52, %v4125_v6  ;;  %v8557_v1 = vmul.f32 0.5, %v8405_v22  ;;  %v8560_v57 = vmul.f32 0.5, %v8412_v36  ;;  %v8563_v14 = vmul.f32 0.5, %v8419_v19 }
 0xd4b   : > { %v4283_v45 = vmul.f32 %v8521_v55, %v4251_v35  ;;  %v8567_v43 = vmul.f32 0.5, %v8432_v34  ;;  %v4314_v63 = vadd.f32 0.2548296, %v4282_v41  ;;  %v4252_v33 = vadd.f32 -0.28449672, %v4220_v56  ;;  %v3807_v34 = vpop.f32.mrf.mxu0 }
 0xd4c   : > { %v4414_v25 = vmul.f32 %v4382_v59, %v8494_v51  ;;  %v8571_v47 = vmul.f32 0.5, %v8435_v11  ;;  %v4189_v22 = vadd.f32 1.4214138, %v4157_v58  ;;  %6457 = vpow2.f32 %v4452_v24 }
 0xd4d   : > { %v4094_v36 = vmul.f32 1.0614054, %v8551_v50  ;;  %v4502_v46 = vmul.f32 %v6440_v17, %v4342_v4  ;;  %v4343_v19 = vmul.f32 %v8479_v2, %v4311_v40  ;;  %v8575_v6 = vmul.f32 %v6444_v23, %v4344_v28 }
 0xd4e   : > { %v4345_v48 = vmul.f32 %v8499_v62, %v4313_v26  ;;  %v4315_v35 = vadd.f32 0.2548296, %v4283_v45  ;;  %v4284_v41 = vmul.f32 %v8530_v38, %v4252_v33  ;;  %v4221_v51 = vmul.f32 %v8535_v52, %v4189_v22 }
 0xd4f   : > { %v4126_v59 = vadd.f32 -1.4531521, %v4094_v36  ;;  %v8580_v11 = vpop.eup %6451  ;;  %v4346_v24 = vmul.f32 %v8511_v20, %v4314_v63  ;;  %v8584_v56 = vmul.f32 0.5, %v8448_v8  ;;  %v8587_v2 = vmul.f32 0.5, %v8452_v39  ;;  %v3809_v20 = vpop.f32.mrf.mxu0 }
 0xd50   : > { %v4454_v17 = vmul.f32 1.442695, %v4414_v25  ;;  %v4316_v62 = vadd.f32 0.2548296, %v4284_v41  ;;  %v4253_v23 = vadd.f32 -0.28449672, %v4221_v51  ;;  %v8594_v26 = vmul.f32 %v6442_v21, %v4343_v19 }
 0xd51   : > { %v8591_v4 = vmul.f32 0.5, %v8472_v54  ;;  %v4383_v40 = vsub.f32 0.0, %v8517_v10  ;;  %v4534_v28 = vsub.f32 1.0, %v4502_v46  ;;  %v4158_v8 = vmul.f32 %v8551_v50, %v4126_v59 }
 0xd52   : > { %v4095_v39 = vmul.f32 1.0614054, %v8580_v11  ;;  %v4536_v58 = vsub.f32 1.0, %v8575_v6  ;;  %v8600_v45 = vmul.f32 %v6448_v15, %v4345_v48  ;;  %v4347_v63 = vmul.f32 %v8521_v55, %v4315_v35 }
 0xd53   : > { %v4285_v54 = vmul.f32 %v8535_v52, %v4253_v23  ;;  %v6454_v33 = vpop.eup %6453  ;;  %v4506_v25 = vmul.f32 %v6450_v42, %v4346_v24  ;;  %v4348_v21 = vmul.f32 %v8530_v38, %v4316_v62  ;;  %v4190_v22 = vadd.f32 1.4214138, %v4158_v8  ;;  %v3813_v23 = vpop.f32.mrf.mxu0 }
 0xd54   : > { %v4127_v36 = vadd.f32 -1.4531521, %v4095_v39  ;;  %v6456_v46 = vpop.eup %6455  ;;  %6459 = vpow2.f32 %v4454_v17  ;;  %v8606_v41 = vadd.f32 %v3807_v34, %v8392_v53  ;;  %v8609_v6 = vadd.f32 %v3809_v20, %v8396_v61 }
 0xd55   : > { %v4317_v19 = vadd.f32 0.2548296, %v4285_v54  ;;  %v4598_v15 = vsub.f32 0.0, %v4534_v28  ;;  %v4222_v55 = vmul.f32 %v8551_v50, %v4190_v22  ;;  %v4415_v38 = vmul.f32 %v4383_v40, %v8517_v10 }
 0xd56   : > { %v4159_v42 = vmul.f32 %v8580_v11, %v4127_v36  ;;  %v4535_v48 = vsub.f32 1.0, %v8594_v26  ;;  %v4600_v35 = vsub.f32 0.0, %v4536_v58  ;;  %v4537_v51 = vsub.f32 1.0, %v8600_v45  ;;  %v3815_v36 = vpop.f32.mrf.mxu0 }
 0xd57   : > { %v4507_v34 = vmul.f32 %v6454_v33, %v4347_v63  ;;  %v4538_v59 = vsub.f32 1.0, %v4506_v25  ;;  %v4508_v24 = vmul.f32 %v6456_v46, %v4348_v21  ;;  %v4254_v17 = vadd.f32 -0.28449672, %v4222_v55 }
 0xd58   : > { %v4191_v62 = vadd.f32 1.4214138, %v4159_v42  ;;  %v4349_v8 = vmul.f32 %v8535_v52, %v4317_v19  ;;  %v8621_v39 = vmul.f32 0.5, %v8497_v30  ;;  %v8624_v10 = vmul.f32 0.70710677, %v8606_v41 }
 0xd59   : > { %v8627_v40 = vmul.f32 0.70710677, %v8609_v6  ;;  %v6458_v26 = vpop.eup %6457  ;;  %v4630_v20 = vsel %vm4566_vm1, %v4534_v28, %v4598_v15  ;;  %v4286_v45 = vmul.f32 %v8551_v50, %v4254_v17  ;;  %v4456_v52 = vmul.f32 1.442695, %v4415_v38 }
 0xd5a   : > { %v4223_v63 = vmul.f32 %v8580_v11, %v4191_v62  ;;  %v4599_v54 = vsub.f32 0.0, %v4535_v48  ;;  %v4632_v30 = vsel %vm4568_vm2, %v4536_v58, %v4600_v35  ;;  %v4539_v33 = vsub.f32 1.0, %v4507_v34 }
 0xd5b   : > { %v8638_v25 = vand.u32 2147483647, %v8624_v10  ;;  %v4601_v21 = vsub.f32 0.0, %v4537_v51  ;;  %v4602_v29 = vsub.f32 0.0, %v4538_v59  ;;  %v4540_v28 = vsub.f32 1.0, %v4508_v24 }
 0xd5c   : > { %v4255_v22 = vadd.f32 -0.28449672, %v4223_v63  ;;  %v4509_v46 = vmul.f32 %v6458_v26, %v4349_v8  ;;  %v4318_v19 = vadd.f32 0.2548296, %v4286_v45  ;;  %v8642_v55 = vand.u32 2147483647, %v8627_v40 }
 0xd5d   : > { %v3968_v15 = vmul.f32 0.3275911, %v8638_v25  ;;  %v4662_v7 = vadd.f32 1.0, %v4630_v20  ;;  %v4664_v58 = vadd.f32 1.0, %v4632_v30  ;;  %6461 = vpow2.f32 %v4456_v52 }
 0xd5e   : > { %v8645_v42 = vadd.f32 %v3813_v23, %v8392_v53  ;;  %v4631_v38 = vsel %vm4567_vm3, %v4535_v48, %v4599_v54  ;;  %v4603_v35 = vsub.f32 0.0, %v4539_v33  ;;  %v3969_v24 = vmul.f32 0.3275911, %v8642_v55  ;;  %v3817_v23 = vpop.f32.mrf.mxu0 }
 0xd5f   : > { %v4000_v34 = vadd.f32 1.0, %v3968_v15  ;;  %v4633_v17 = vsel %vm4569_vm4, %v4537_v51, %v4601_v21  ;;  %v4634_v62 = vsel %vm4570_vm5, %v4538_v59, %v4602_v29  ;;  %v4604_v8 = vsub.f32 0.0, %v4540_v28 }
 0xd60   : > { %v4287_v26 = vmul.f32 %v8580_v11, %v4255_v22  ;;  %v4541_v20 = vsub.f32 1.0, %v4509_v46  ;;  %v4350_v31 = vmul.f32 %v8551_v50, %v4318_v19  ;;  %v4001_v48 = vadd.f32 1.0, %v3969_v24 }
 0xd61   : > { %6463 = vrcp.f32 %v4000_v34  ;;  %v6460_v45 = vpop.eup %6459  ;;  %v8658_v63 = vmul.f32 %v4662_v7, %v8545_v60  ;;  %v4663_v13 = vadd.f32 1.0, %v4631_v38  ;;  %v8661_v51 = vmul.f32 %v4664_v58, %v8560_v57  ;;  %v3819_v57 = vpop.f32.mrf.mxu0 }
 0xd62   : > { %v8664_v37 = vmul.f32 0.70710677, %v8645_v42  ;;  %v4665_v59 = vadd.f32 1.0, %v4633_v17  ;;  %v4666_v52 = vadd.f32 1.0, %v4634_v62  ;;  %v4635_v54 = vsel %vm4571_vm6, %v4539_v33, %v4603_v35 }
 0xd63   : > { %v8669_v50 = vadd.f32 %v3815_v36, %v8396_v61  ;;  %v4636_v30 = vsel %vm4572_vm7, %v4540_v28, %v4604_v8  ;;  %v4319_v60 = vadd.f32 0.2548296, %v4287_v26  ;;  %6465 = vrcp.f32 %v4001_v48  ;;  %v3823_v24 = vpop.f32.mrf.mxu0 }
 0xd64   : > { %v8674_v21 = vand.u32 2147483647, %v8664_v37  ;;  %v4605_v29 = vsub.f32 0.0, %v4541_v20  ;;  %v4510_v22 = vmul.f32 %v6460_v45, %v4350_v31  ;;  %v8680_v18 = vadd.f32 %v3817_v23, %v8392_v53 }
 0xd65   : > { %v8677_v46 = vmul.f32 0.70710677, %v8669_v50  ;;  %v8683_v33 = vmul.f32 %v4663_v13, %v8557_v1  ;;  %v4384_v28 = vsub.f32 0.0, %v8638_v25  ;;  %v8690_v19 = vmul.f32 %v4665_v59, %v8563_v14  ;;  %v3825_v59 = vpop.f32.mrf.mxu0 }
 0xd66   : > { %v3970_v36 = vmul.f32 0.3275911, %v8674_v21  ;;  %v4668_v15 = vadd.f32 1.0, %v4636_v30  ;;  %v8693_v7 = vmul.f32 0.5, %v8606_v41  ;;  %v8699_v1 = vmul.f32 %v4666_v52, %v8567_v43 }
 0xd67   : > { %v8696_v58 = vand.u32 2147483647, %v8677_v46  ;;  %v4667_v38 = vadd.f32 1.0, %v4635_v54  ;;  %v4351_v35 = vmul.f32 %v8580_v11, %v4319_v60  ;;  %v4637_v14 = vsel %vm4573_vm8, %v4541_v20, %v4605_v29 }
 0xd68   : > { %v4002_v34 = vadd.f32 1.0, %v3970_v36  ;;  %v4542_v17 = vsub.f32 1.0, %v4510_v22  ;;  %v8707_v62 = vmul.f32 0.70710677, %v8680_v18  ;;  %v4416_v8 = vmul.f32 %v4384_v28, %v8638_v25 }
 0xd69   : > { %v3971_v41 = vmul.f32 0.3275911, %v8696_v58  ;;  %v4385_v43 = vsub.f32 0.0, %v8642_v55  ;;  %v8712_v26 = vadd.f32 %v3819_v57, %v8396_v61  ;;  %v8715_v23 = vmul.f32 %v4668_v15, %v8584_v56 }
 0xd6a   : > { %6467 = vrcp.f32 %v4002_v34  ;;  %v6462_v11 = vpop.eup %6461  ;;  %v8718_v0 = vmul.f32 0.5, %v8609_v6  ;;  %v3940_v31 = vand.u32 2147483647, %v8707_v62  ;;  %v8722_v48 = vmul.f32 %v4667_v38, %v8571_v47 }
 0xd6b   : > { %v4003_v20 = vadd.f32 1.0, %v3971_v41  ;;  %v4669_v25 = vadd.f32 1.0, %v4637_v14  ;;  %v4511_v45 = vmul.f32 %v6462_v11, %v4351_v35  ;;  %v8725_v13 = vmul.f32 0.70710677, %v8712_v26 }
 0xd6c   : > { %v4606_v52 = vsub.f32 0.0, %v4542_v17  ;;  %v8728_v54 = vmul.f32 0.5, %v8645_v42  ;;  %v3972_v56 = vmul.f32 0.3275911, %v3940_v31  ;;  %v4458_v30 = vmul.f32 1.442695, %v4416_v8 }
 0xd6d   : > { %6469 = vrcp.f32 %v4003_v20  ;;  %v4417_v60 = vmul.f32 %v4385_v43, %v8642_v55  ;;  %v8734_v47 = vand.u32 2147483647, %v8725_v13  ;;  %v8737_v57 = vadd.f32 %v3823_v24, %v8392_v53 }
 0xd6e   : > { %v8730_v6 = vpop.eup %6463  ;;  %v4004_v22 = vadd.f32 1.0, %v3972_v56  ;;  %v8744_v28 = vadd.f32 %v3825_v59, %v8396_v61  ;;  %v8747_v36 = vmul.f32 %v4669_v25, %v8587_v2  ;;  %v4543_v55 = vsub.f32 1.0, %v4511_v45 }
 0xd6f   : > { %v4096_v42 = vmul.f32 1.0614054, %v8730_v6  ;;  %v4386_v15 = vsub.f32 0.0, %v8674_v21  ;;  %v3973_v38 = vmul.f32 0.3275911, %v8734_v47  ;;  %v4638_v34 = vsel %vm4574_vm9, %v4542_v17, %v4606_v52  ;;  %v3827_v17 = vpop.f32.mrf.mxu0 }
 0xd70   : > { %v8751_v35 = vpop.eup %6465  ;;  %6471 = vrcp.f32 %v4004_v22  ;;  %v8756_v14 = vmul.f32 0.70710677, %v8737_v57  ;;  %v4460_v2 = vmul.f32 1.442695, %v4417_v60  ;;  %v8761_v11 = vmul.f32 0.5, %v8669_v50 }
 0xd71   : > { %v4128_v24 = vadd.f32 -1.4531521, %v4096_v42  ;;  %6473 = vpow2.f32 %v4458_v30  ;;  %v4097_v41 = vmul.f32 1.0614054, %v8751_v35  ;;  %v4005_v8 = vadd.f32 1.0, %v3973_v38 }
 0xd72   : > { %v8764_v20 = vand.u32 2147483647, %v8756_v14  ;;  %v8767_v16 = vmul.f32 0.70710677, %v8744_v28  ;;  %v4670_v25 = vadd.f32 1.0, %v4638_v34  ;;  %v4607_v45 = vsub.f32 0.0, %v4543_v55 }
 0xd73   : > { %v4160_v43 = vmul.f32 %v8730_v6, %v4128_v24  ;;  %v4129_v59 = vadd.f32 -1.4531521, %v4097_v41  ;;  %v4418_v52 = vmul.f32 %v4386_v15, %v8674_v21  ;;  %v4388_v30 = vsub.f32 0.0, %v3940_v31 }
 0xd74   : > { %6475 = vrcp.f32 %v4005_v8  ;;  %v3974_v60 = vmul.f32 0.3275911, %v8764_v20  ;;  %v8773_v42 = vand.u32 2147483647, %v8767_v16  ;;  %v8776_v22 = vadd.f32 %v3827_v17, %v8392_v53 }
 0xd75   : > { %v4192_v56 = vadd.f32 1.4214138, %v4160_v43  ;;  %v4161_v50 = vmul.f32 %v8751_v35, %v4129_v59  ;;  %6477 = vpow2.f32 %v4460_v2  ;;  %v4387_v21 = vsub.f32 0.0, %v8696_v58 }
 0xd76   : > { %v8783_v15 = vmul.f32 0.5, %v8680_v18  ;;  %v4006_v24 = vadd.f32 1.0, %v3974_v60  ;;  %v4639_v41 = vsel %vm4575_vm10, %v4543_v55, %v4607_v45  ;;  %v3975_v43 = vmul.f32 0.3275911, %v8773_v42 }
 0xd77   : > { %v8778_v38 = vpop.eup %6467  ;;  %v4224_v34 = vmul.f32 %v8730_v6, %v4192_v56  ;;  %v4193_v2 = vadd.f32 1.4214138, %v4161_v50  ;;  %v4462_v59 = vmul.f32 1.442695, %v4418_v52  ;;  %v4420_v29 = vmul.f32 %v4388_v30, %v3940_v31 }
 0xd78   : > { %v4098_v8 = vmul.f32 1.0614054, %v8778_v38  ;;  %6479 = vrcp.f32 %v4006_v24  ;;  %v4007_v18 = vadd.f32 1.0, %v3975_v43  ;;  %v8793_v60 = vmul.f32 0.70710677, %v8776_v22 }
 0xd79   : > { %v4256_v17 = vadd.f32 -0.28449672, %v4224_v34  ;;  %v4225_v56 = vmul.f32 %v8751_v35, %v4193_v2  ;;  %v4419_v45 = vmul.f32 %v4387_v21, %v8696_v58  ;;  %v4389_v50 = vsub.f32 0.0, %v8734_v47 }
 0xd7a   : > { %v8789_v44 = vpop.eup %6469  ;;  %v4130_v32 = vadd.f32 -1.4531521, %v4098_v8  ;;  %6481 = vrcp.f32 %v4007_v18  ;;  %v3944_v30 = vand.u32 2147483647, %v8793_v60  ;;  %v8802_v34 = vmul.f32 %v4670_v25, %v8591_v4 }
 0xd7b   : > { %v4288_v9 = vmul.f32 %v8730_v6, %v4256_v17  ;;  %v4099_v55 = vmul.f32 1.0614054, %v8789_v44  ;;  %v4257_v52 = vadd.f32 -0.28449672, %v4225_v56  ;;  %v4671_v24 = vadd.f32 1.0, %v4639_v41 }
 0xd7c   : > { %v4162_v31 = vmul.f32 %v8778_v38, %v4130_v32  ;;  %v4466_v8 = vmul.f32 1.442695, %v4420_v29  ;;  %6483 = vpow2.f32 %v4462_v59  ;;  %v3976_v58 = vmul.f32 0.3275911, %v3944_v30 }
 0xd7d   : > { %v4131_v2 = vadd.f32 -1.4531521, %v4099_v55  ;;  %v8804_v43 = vpop.eup %6471  ;;  %v4320_v17 = vadd.f32 0.2548296, %v4288_v9  ;;  %v4289_v56 = vmul.f32 %v8751_v35, %v4257_v52  ;;  %v4464_v18 = vmul.f32 1.442695, %v4419_v45 }
 0xd7e   : > { %v4194_v49 = vadd.f32 1.4214138, %v4162_v31  ;;  %v6474_v21 = vpop.eup %6473  ;;  %v4100_v27 = vmul.f32 1.0614054, %v8804_v43  ;;  %v4421_v25 = vmul.f32 %v4389_v50, %v8734_v47  ;;  %v4390_v29 = vsub.f32 0.0, %v8764_v20 }
 0xd7f   : > { %v4163_v32 = vmul.f32 %v8789_v44, %v4131_v2  ;;  %v4008_v41 = vadd.f32 1.0, %v3976_v58  ;;  %6485 = vpow2.f32 %v4466_v8  ;;  %v8813_v59 = vmul.f32 0.5, %v8712_v26 }
 0xd80   : > { %v4226_v4 = vmul.f32 %v8778_v38, %v4194_v49  ;;  %v4132_v9 = vadd.f32 -1.4531521, %v4100_v27  ;;  %v8818_v52 = vmul.f32 %v4671_v24, %v8621_v39  ;;  %v4352_v45 = vmul.f32 %v8730_v6, %v4320_v17 }
 0xd81   : > { %v4195_v55 = vadd.f32 1.4214138, %v4163_v32  ;;  %v8815_v31 = vpop.eup %6475  ;;  %6487 = vrcp.f32 %v4008_v41  ;;  %v4321_v47 = vadd.f32 0.2548296, %v4289_v56  ;;  %v4468_v26 = vmul.f32 1.442695, %v4421_v25 }
 0xd82   : > { %v4258_v2 = vadd.f32 -0.28449672, %v4226_v4  ;;  %v6478_v49 = vpop.eup %6477  ;;  %v4164_v58 = vmul.f32 %v8804_v43, %v4132_v9  ;;  %v4101_v27 = vmul.f32 1.0614054, %v8815_v31  ;;  %6489 = vpow2.f32 %v4464_v18 }
 0xd83   : > { %v4227_v50 = vmul.f32 %v8789_v44, %v4195_v55  ;;  %v4422_v8 = vmul.f32 %v4390_v29, %v8764_v20  ;;  %v4391_v32 = vsub.f32 0.0, %v8773_v42  ;;  %v4392_v17 = vsub.f32 0.0, %v3944_v30 }
 0xd84   : > { %v4290_v39 = vmul.f32 %v8778_v38, %v4258_v2  ;;  %v4196_v6 = vadd.f32 1.4214138, %v4164_v58  ;;  %v8829_v56 = vmul.f32 %v6474_v21, %v4352_v45  ;;  %v4133_v41 = vadd.f32 -1.4531521, %v4101_v27  ;;  %v3829_v2 = vpop.f32.mrf.mxu0 }
 0xd85   : > { %v4259_v24 = vadd.f32 -0.28449672, %v4227_v50  ;;  %v8827_v4 = vpop.eup %6479  ;;  %v8832_v55 = vmul.f32 0.5, %v8737_v57  ;;  %v8835_v18 = vmul.f32 0.5, %v8744_v28  ;;  %v4353_v20 = vmul.f32 %v8751_v35, %v4321_v47 }
 0xd86   : > { %v4228_v29 = vmul.f32 %v8804_v43, %v4196_v6  ;;  %v4102_v9 = vmul.f32 1.0614054, %v8827_v4  ;;  %v4165_v50 = vmul.f32 %v8815_v31, %v4133_v41  ;;  %6491 = vpow2.f32 %v4468_v26 }
 0xd87   : > { %v4291_v25 = vmul.f32 %v8789_v44, %v4259_v24  ;;  %v4470_v21 = vmul.f32 1.442695, %v4422_v8  ;;  %v4423_v45 = vmul.f32 %v4391_v32, %v8773_v42  ;;  %v8843_v57 = vpop.eup %6481  ;;  %v4322_v58 = vadd.f32 0.2548296, %v4290_v39  ;;  %v3833_v39 = vpop.f32.mrf.mxu0 }
 0xd88   : > { %v4260_v28 = vadd.f32 -0.28449672, %v4228_v29  ;;  %v4134_v27 = vadd.f32 -1.4531521, %v4102_v9  ;;  %v4424_v5 = vmul.f32 %v4392_v17, %v3944_v30  ;;  %v4544_v35 = vsub.f32 1.0, %v8829_v56 }
 0xd89   : > { %vm4576_vm11 = vcmp.ge.f32.partialorder %v8624_v10, 0.0  ;;  %v4197_v47 = vadd.f32 1.4214138, %v4165_v50  ;;  %v8848_v24 = vmul.f32 0.5, %v8776_v22  ;;  %v3830_v6 = vadd.f32 %v3829_v2, %v8396_v61  ;;  %v6484_v26 = vpop.eup %6483 }
 0xd8a   : > { %v4513_v8 = vmul.f32 %v6478_v49, %v4353_v20  ;;  %v4323_v41 = vadd.f32 0.2548296, %v4291_v25  ;;  %v4292_v42 = vmul.f32 %v8804_v43, %v4260_v28  ;;  %v4166_v32 = vmul.f32 %v8827_v4, %v4134_v27 }
 0xd8b   : > { %v4229_v30 = vmul.f32 %v8815_v31, %v4197_v47  ;;  %6493 = vpow2.f32 %v4470_v21  ;;  %v4103_v17 = vmul.f32 1.0614054, %v8843_v57  ;;  %v4472_v56 = vmul.f32 1.442695, %v4423_v45 }
 0xd8c   : > { %v4354_v29 = vmul.f32 %v8778_v38, %v4322_v58  ;;  %v4324_v22 = vadd.f32 0.2548296, %v4292_v42  ;;  %v4198_v9 = vadd.f32 1.4214138, %v4166_v32  ;;  %v4474_v50 = vmul.f32 1.442695, %v4424_v5  ;;  %v6486_v2 = vpop.eup %6485 }
 0xd8d   : > { %v4608_v3 = vsub.f32 0.0, %v4544_v35  ;;  %vm4577_vm12 = vcmp.ge.f32.partialorder %v8627_v40, 0.0  ;;  %v4261_v49 = vadd.f32 -0.28449672, %v4229_v30  ;;  %v4135_v20 = vadd.f32 -1.4531521, %v4103_v17 }
 0xd8e   : > { %v3834_v25 = vadd.f32 %v3833_v39, %v8392_v53  ;;  %v8858_v28 = vpop.eup %6487  ;;  %v4545_v27 = vsub.f32 1.0, %v4513_v8  ;;  %v4355_v21 = vmul.f32 %v8789_v44, %v4323_v41  ;;  %v4356_v45 = vmul.f32 %v8804_v43, %v4324_v22 }
 0xd8f   : > { %v4230_v38 = vmul.f32 %v8827_v4, %v4198_v9  ;;  %v4293_v58 = vmul.f32 %v8815_v31, %v4261_v49  ;;  %v4167_v5 = vmul.f32 %v8843_v57, %v4135_v20  ;;  %6495 = vpow2.f32 %v4472_v56  ;;  %v6490_v42 = vpop.eup %6489 }
 0xd90   : > { %v4104_v47 = vmul.f32 1.0614054, %v8858_v28  ;;  %v8866_v32 = vmul.f32 %v6484_v26, %v4354_v29  ;;  %v4516_v39 = vmul.f32 %v6486_v2, %v4356_v45  ;;  %v8868_v17 = vmul.f32 0.70710677, %v3830_v6 }
 0xd91   : > { %v4262_v30 = vadd.f32 -0.28449672, %v4230_v38  ;;  %v4325_v8 = vadd.f32 0.2548296, %v4293_v58  ;;  %v4199_v44 = vadd.f32 1.4214138, %v4167_v5  ;;  %6497 = vpow2.f32 %v4474_v50 }
 0xd92   : > { %v4136_v41 = vadd.f32 -1.4531521, %v4104_v47  ;;  %v4640_v43 = vsel %vm4576_vm11, %v4544_v35, %v4608_v3  ;;  %v4609_v22 = vsub.f32 0.0, %v4545_v27  ;;  %v8872_v9 = vmul.f32 %v6490_v42, %v4355_v21  ;;  %v3835_v21 = vpop.f32.mrf.mxu0 }
 0xd93   : > { %vm4580_vm13 = vcmp.ge.f32.partialorder %v8707_v62, 0.0  ;;  %v4294_v56 = vmul.f32 %v8827_v4, %v4262_v30  ;;  %v4548_v26 = vsub.f32 1.0, %v4516_v39  ;;  %v4357_v29 = vmul.f32 %v8815_v31, %v4325_v8  ;;  %v6492_v20 = vpop.eup %6491 }
 0xd94   : > { %v4231_v2 = vmul.f32 %v8843_v57, %v4199_v44  ;;  %v4168_v49 = vmul.f32 %v8858_v28, %v4136_v41  ;;  %v4546_v50 = vsub.f32 1.0, %v8866_v32  ;;  %vm4578_vm14 = vcmp.ge.f32.partialorder %v8664_v37, 0.0 }
 0xd95   : > { %v4326_v3 = vadd.f32 0.2548296, %v4294_v56  ;;  %v8881_v10 = vmul.f32 0.5, %v3830_v6  ;;  %v3945_v35 = vand.u32 2147483647, %v8868_v17  ;;  %v4517_v45 = vmul.f32 %v6492_v20, %v4357_v29 }
 0xd96   : > { %v4263_v38 = vadd.f32 -0.28449672, %v4231_v2  ;;  %v4200_v58 = vadd.f32 1.4214138, %v4168_v49  ;;  %v8884_v5 = vmul.f32 0.5, %v3834_v25  ;;  %v4672_v31 = vadd.f32 1.0, %v4640_v43 }
 0xd97   : > { %v4641_v47 = vsel %vm4577_vm12, %v4545_v27, %v4609_v22  ;;  %vm4579_vm15 = vcmp.ge.f32.partialorder %v8677_v46, 0.0  ;;  %v4358_v42 = vmul.f32 %v8827_v4, %v4326_v3  ;;  %v3977_v32 = vmul.f32 0.3275911, %v3945_v35  ;;  %v3837_v27 = vpop.f32.mrf.mxu0 }
 0xd98   : > { %v4547_v6 = vsub.f32 1.0, %v8872_v9  ;;  %v4612_v39 = vsub.f32 0.0, %v4548_v26  ;;  %vm4581_vm0 = vcmp.ge.f32.partialorder %v8725_v13, 0.0  ;;  %v4295_v30 = vmul.f32 %v8843_v57, %v4263_v38  ;;  %v6494_v44 = vpop.eup %6493 }
 0xd99   : > { %v4232_v8 = vmul.f32 %v8858_v28, %v4200_v58  ;;  %v4610_v41 = vsub.f32 0.0, %v4546_v50  ;;  %v4549_v43 = vsub.f32 1.0, %v4517_v45  ;;  %v4009_v56 = vadd.f32 1.0, %v3977_v32 }
 0xd9a   : > { %v8894_v40 = vmul.f32 0.70710677, %v3834_v25  ;;  %v4518_v22 = vmul.f32 %v6494_v44, %v4358_v42  ;;  %v4327_v29 = vadd.f32 0.2548296, %v4295_v30  ;;  %v4393_v2 = vsub.f32 0.0, %v3945_v35  ;;  %v3839_v30 = vpop.f32.mrf.mxu0 }
 0xd9b   : > { %v4264_v4 = vadd.f32 -0.28449672, %v4232_v8  ;;  %v8897_v9 = vmul.f32 %v4672_v31, %v8693_v7  ;;  %6499 = vrcp.f32 %v4009_v56  ;;  %v3836_v20 = vadd.f32 %v3835_v21, %v8396_v61 }
 0xd9c   : > { %v8900_v49 = vand.u32 2147483647, %v8894_v40  ;;  %v4611_v3 = vsub.f32 0.0, %v4547_v6  ;;  %v4644_v45 = vsel %vm4580_vm13, %v4548_v26, %v4612_v39  ;;  %v4359_v25 = vmul.f32 %v8843_v57, %v4327_v29  ;;  %v6496_v58 = vpop.eup %6495  ;;  %v3843_v13 = vpop.f32.mrf.mxu0 }
 0xd9d   : > { %v4296_v38 = vmul.f32 %v8858_v28, %v4264_v4  ;;  %v4673_v42 = vadd.f32 1.0, %v4641_v47  ;;  %v4613_v32 = vsub.f32 0.0, %v4549_v43  ;;  %vm4582_vm1 = vcmp.ge.f32.partialorder %v8756_v14, 0.0 }
 0xd9e   : > { %v3978_v7 = vmul.f32 0.3275911, %v8900_v49  ;;  %v8910_v31 = vadd.f32 %v3837_v27, %v8392_v53  ;;  %v4642_v21 = vsel %vm4578_vm14, %v4546_v50, %v4610_v41  ;;  %v4550_v62 = vsub.f32 1.0, %v4518_v22  ;;  %v6498_v57 = vpop.eup %6497 }
 0xd9f   : > { %v4328_v26 = vadd.f32 0.2548296, %v4296_v38  ;;  %v4425_v39 = vmul.f32 %v4393_v2, %v3945_v35  ;;  %v4730_v8 = vpack.c.bf16 %v8897_v9, %v8802_v34  ;;  %v4676_v47 = vadd.f32 1.0, %v4644_v45 }
 0xda0   : > { %v4010_v44 = vadd.f32 1.0, %v3978_v7  ;;  %v8916_v56 = vmul.f32 0.70710677, %v3836_v20  ;;  %v4643_v29 = vsel %vm4579_vm15, %v4547_v6, %v4611_v3  ;;  %v4519_v27 = vmul.f32 %v6496_v58, %v4359_v25 }
 0xda1   : > { %v4360_v4 = vmul.f32 %v8858_v28, %v4328_v26  ;;  %v3840_v37 = vadd.f32 %v3839_v30, %v8396_v61  ;;  %v4674_v50 = vadd.f32 1.0, %v4642_v21  ;;  %v4645_v35 = vsel %vm4581_vm0, %v4549_v43, %v4613_v32 }
 0xda2   : > { %6501 = vrcp.f32 %v4010_v44  ;;  %v3947_v41 = vand.u32 2147483647, %v8916_v56  ;;  %v8926_v22 = vmul.f32 %v4673_v42, %v8718_v0  ;;  %v4614_v2 = vsub.f32 0.0, %v4550_v62 }
 0xda3   : > { %v4520_v45 = vmul.f32 %v6498_v57, %v4360_v4  ;;  %v4476_v38 = vmul.f32 1.442695, %v4425_v39  ;;  %v4675_v46 = vadd.f32 1.0, %v4643_v29  ;;  %v8929_v6 = vmul.f32 %v4676_v47, %v8783_v15  ;;  %v3845_v57 = vpop.f32.mrf.mxu0 }
 0xda4   : > { %vm4583_vm2 = vcmp.ge.f32.partialorder %v8767_v16, 0.0  ;;  %v3979_v28 = vmul.f32 0.3275911, %v3947_v41  ;;  %v8933_v3 = vmul.f32 0.70710677, %v8910_v31  ;;  %v4677_v43 = vadd.f32 1.0, %v4645_v35 }
 0xda5   : > { %v4551_v25 = vsub.f32 1.0, %v4519_v27  ;;  %v8935_v58 = vmul.f32 0.5, %v3836_v20  ;;  %v8937_v0 = vmul.f32 0.70710677, %v3840_v37  ;;  %v8940_v42 = vmul.f32 %v4674_v50, %v8728_v54 }
 0xda6   : > { %vm4584_vm3 = vcmp.ge.f32.partialorder %v8793_v60, 0.0  ;;  %v4394_v15 = vsub.f32 0.0, %v8900_v49  ;;  %v4011_v32 = vadd.f32 1.0, %v3979_v28  ;;  %v3948_v7 = vand.u32 2147483647, %v8933_v3 }
 0xda7   : > { %v4646_v30 = vsel %vm4582_vm1, %v4550_v62, %v4614_v2  ;;  %v4552_v21 = vsub.f32 1.0, %v4520_v45  ;;  %6503 = vpow2.f32 %v4476_v38  ;;  %v3949_v20 = vand.u32 2147483647, %v8937_v0 }
 0xda8   : > { %v8949_v26 = vmul.f32 %v4675_v46, %v8761_v11  ;;  %v4732_v54 = vpack.c.bf16 %v8929_v6, %v8940_v42  ;;  %6505 = vrcp.f32 %v4011_v32  ;;  %v3980_v39 = vmul.f32 0.3275911, %v3948_v7  ;;  %v8953_v47 = vpop.eup %6499 }
 0xda9   : > { %v8956_v44 = vmul.f32 %v4677_v43, %v8813_v59  ;;  %v4615_v14 = vsub.f32 0.0, %v4551_v25  ;;  %v4395_v62 = vsub.f32 0.0, %v3947_v41  ;;  %v3981_v29 = vmul.f32 0.3275911, %v3949_v20  ;;  %v3847_v43 = vpop.f32.mrf.mxu0 }
 0xdaa   : > { %v4678_v27 = vadd.f32 1.0, %v4646_v30  ;;  %v4105_v4 = vmul.f32 1.0614054, %v8953_v47  ;;  %v4426_v11 = vmul.f32 %v4394_v15, %v8900_v49  ;;  %v4012_v50 = vadd.f32 1.0, %v3980_v39 }
 0xdab   : > { %v4616_v35 = vsub.f32 0.0, %v4552_v21  ;;  %v4396_v2 = vsub.f32 0.0, %v3948_v7  ;;  %v4013_v45 = vadd.f32 1.0, %v3981_v29  ;;  %v4727_v38 = vpack.c.bf16 %v8690_v19, %v8683_v33 }
 0xdac   : > { %v4137_v46 = vadd.f32 -1.4531521, %v4105_v4  ;;  %6507 = vrcp.f32 %v4012_v50  ;;  %v4397_v28 = vsub.f32 0.0, %v3949_v20  ;;  %v4729_v59 = vpack.c.bf16 %v8747_v36, %v8722_v48 }
 0xdad   : > { %v4647_v32 = vsel %vm4583_vm2, %v4551_v25, %v4615_v14  ;;  %v4427_v30 = vmul.f32 %v4395_v62, %v3947_v41  ;;  %v8967_v49 = vmul.f32 0.5, %v8910_v31  ;;  %6509 = vrcp.f32 %v4013_v45  ;;  %4909 = vmatprep.mubr.bf16.mxu1 %v4727_v38  ;;  %v3849_v38 = vpop.f32.mrf.mxu0 }
 0xdae   : > { %v4169_v15 = vmul.f32 %v8953_v47, %v4137_v46  ;;  %v4478_v39 = vmul.f32 1.442695, %v4426_v11  ;;  %v8970_v33 = vmul.f32 0.5, %v3840_v37  ;;  %v9404_v19 = vpack.c.bf16 %v8661_v51, %v8658_v63 }
 0xdaf   : > { %v8976_v48 = vadd.f32 %v3843_v13, %v8392_v53  ;;  %v8978_v36 = vpop.eup %6501  ;;  %v4648_v16 = vsel %vm4584_vm3, %v4552_v21, %v4616_v35  ;;  %v4428_v31 = vmul.f32 %v4396_v2, %v3948_v7  ;;  %v8983_v41 = vadd.f32 %v3845_v57, %v8396_v61  ;;  %v3853_v34 = vpop.f32.mrf.mxu0 }
 0xdb0   : > { %4910 = vmatmul.mubr.bf16.vlgmr.msra.gmra.mxu1 %v9404_v19  ;;  %v8986_v37 = vadd.f32 %v3847_v43, %v8392_v53  ;;  %v4679_v25 = vadd.f32 1.0, %v4647_v32  ;;  %v4201_v14 = vadd.f32 1.4214138, %v4169_v15  ;;  %v4106_v63 = vmul.f32 1.0614054, %v8978_v36 }
 0xdb1   : > { %4917 = vmatprep.mubr.bf16.mxu1 %v4729_v59  ;;  %v4429_v51 = vmul.f32 %v4397_v28, %v3949_v20  ;;  %v8990_v13 = vmul.f32 %v4678_v27, %v8832_v55  ;;  %v4480_v62 = vmul.f32 1.442695, %v4427_v30  ;;  %v8993_v60 = vmul.f32 0.70710677, %v8976_v48 }
 0xdb2   : > { %v8996_v7 = vmul.f32 0.70710677, %v8983_v41  ;;  %v4680_v21 = vadd.f32 1.0, %v4648_v16  ;;  %v4233_v57 = vmul.f32 %v8953_v47, %v4201_v14  ;;  %v4138_v29 = vadd.f32 -1.4531521, %v4106_v63 }
 0xdb3   : > { %v9000_v4 = vmul.f32 0.70710677, %v8986_v37  ;;  %v4482_v11 = vmul.f32 1.442695, %v4428_v31  ;;  %v4731_v20 = vpack.c.bf16 %v8926_v22, %v8818_v52  ;;  %v3950_v55 = vand.u32 2147483647, %v8993_v60 }
 0xdb4   : > { %v3951_v27 = vand.u32 2147483647, %v8996_v7  ;;  %v6504_v50 = vpop.eup %6503  ;;  %v4265_v35 = vadd.f32 -0.28449672, %v4233_v57  ;;  %v4170_v2 = vmul.f32 %v8978_v36, %v4138_v29  ;;  %6511 = vpow2.f32 %v4478_v39 }
 0xdb5   : > { %v4484_v45 = vmul.f32 1.442695, %v4429_v51  ;;  %v9007_v46 = vpop.eup %6505  ;;  %v9010_v28 = vmul.f32 %v4679_v25, %v8835_v18  ;;  %v3982_v59 = vmul.f32 0.3275911, %v3950_v55  ;;  %v9013_v52 = vand.u32 2147483647, %v9000_v4 }
 0xdb6   : > { %v3983_v43 = vmul.f32 0.3275911, %v3951_v27  ;;  %v4297_v22 = vmul.f32 %v8953_v47, %v4265_v35  ;;  %v4202_v32 = vadd.f32 1.4214138, %v4170_v2  ;;  %v4107_v30 = vmul.f32 1.0614054, %v9007_v46 }
 0xdb7   : > { %6513 = vpow2.f32 %v4480_v62  ;;  %v9405_v15 = vpack.c.bf16 %v8715_v23, %v8699_v1  ;;  %v9021_v39 = vmul.f32 %v4680_v21, %v8848_v24  ;;  %v4014_v18 = vadd.f32 1.0, %v3982_v59 }
 0xdb8   : > { %6515 = vpow2.f32 %v4482_v11  ;;  %v9024_v19 = vadd.f32 %v3849_v38, %v8396_v61  ;;  %v4329_v16 = vadd.f32 0.2548296, %v4297_v22  ;;  %v4234_v31 = vmul.f32 %v8978_v36, %v4202_v32 }
 0xdb9   : > { %4918 = vmatmul.mubr.bf16.gmra.mxu1 %v9405_v15  ;;  %v4139_v25 = vadd.f32 -1.4531521, %v4107_v30  ;;  %6517 = vpow2.f32 %v4484_v45  ;;  %v9027_v14 = vpop.eup %6507  ;;  %vm4585_vm4 = vcmp.ge.f32.partialorder %v8868_v17, 0.0  ;;  %v4733_v1 = vpack.c.bf16 %v8956_v44, %v8949_v26 }
 0xdba   : > { %4925 = vmatprep.mubr.bf16.mxu1 %v4731_v20  ;;  %6519 = vrcp.f32 %v4014_v18  ;;  %v4015_v23 = vadd.f32 1.0, %v3983_v43  ;;  %v3984_v24 = vmul.f32 0.3275911, %v9013_v52  ;;  %v9033_v63 = vpop.eup %6509  ;;  %v4361_v51 = vmul.f32 %v8953_v47, %v4329_v16 }
 0xdbb   : > { %v4266_v62 = vadd.f32 -0.28449672, %v4234_v31  ;;  %v4171_v21 = vmul.f32 %v9007_v46, %v4139_v25  ;;  %v4108_v57 = vmul.f32 1.0614054, %v9027_v14  ;;  %v4109_v29 = vmul.f32 1.0614054, %v9033_v63 }
 0xdbc   : > { %v4398_v11 = vsub.f32 0.0, %v3950_v55  ;;  %v4399_v20 = vsub.f32 0.0, %v3951_v27  ;;  %v9040_v35 = vmul.f32 0.70710677, %v9024_v19  ;;  %v4521_v26 = vmul.f32 %v6504_v50, %v4361_v51 }
 0xdbd   : > { %v4298_v44 = vmul.f32 %v8978_v36, %v4266_v62  ;;  %v4203_v2 = vadd.f32 1.4214138, %v4171_v21  ;;  %v4140_v45 = vadd.f32 -1.4531521, %v4108_v57  ;;  %v4141_v38 = vadd.f32 -1.4531521, %v4109_v29 }
 0xdbe   : > { %6521 = vrcp.f32 %v4015_v23  ;;  %v4016_v47 = vadd.f32 1.0, %v3984_v24  ;;  %v9044_v59 = vand.u32 2147483647, %v9040_v35  ;;  %v4553_v43 = vsub.f32 1.0, %v4521_v26 }
 0xdbf   : > { %v4330_v22 = vadd.f32 0.2548296, %v4298_v44  ;;  %v4235_v32 = vmul.f32 %v9007_v46, %v4203_v2  ;;  %v4172_v30 = vmul.f32 %v9027_v14, %v4140_v45  ;;  %v4173_v50 = vmul.f32 %v9033_v63, %v4141_v38 }
 0xdc0   : > { %v4430_v15 = vmul.f32 %v4398_v11, %v3950_v55  ;;  %v4431_v18 = vmul.f32 %v4399_v20, %v3951_v27  ;;  %v3985_v16 = vmul.f32 0.3275911, %v9044_v59  ;;  %v4617_v31 = vsub.f32 0.0, %v4553_v43 }
 0xdc1   : > { %4926 = vmatmul.mubr.bf16.gmra.mxu1 %v4730_v8  ;;  %v4362_v25 = vmul.f32 %v8978_v36, %v4330_v22  ;;  %v4267_v23 = vadd.f32 -0.28449672, %v4235_v32  ;;  %v4204_v24 = vadd.f32 1.4214138, %v4172_v30  ;;  %v6512_v51 = vpop.eup %6511  ;;  %v4205_v62 = vadd.f32 1.4214138, %v4173_v50  ;;  %v3855_v32 = vpop.f32.mrf.mxu0 }
 0xdc2   : > { %4933 = vmatprep.mubr.bf16.mxu1 %v4733_v1  ;;  %6523 = vrcp.f32 %v4016_v47  ;;  %v4400_v21 = vsub.f32 0.0, %v9013_v52  ;;  %v4017_v57 = vadd.f32 1.0, %v3985_v16  ;;  %v4649_v9 = vsel %vm4585_vm4, %v4553_v43, %v4617_v31 }
 0xdc3   : > { %v4522_v8 = vmul.f32 %v6512_v51, %v4362_v25  ;;  %vm4586_vm5 = vcmp.ge.f32.partialorder %v8894_v40, 0.0  ;;  %v4299_v55 = vmul.f32 %v9007_v46, %v4267_v23  ;;  %v4236_v27 = vmul.f32 %v9027_v14, %v4204_v24 }
 0xdc4   : > { %v6514_v36 = vpop.eup %6513  ;;  %v4734_v1 = vpack.c.bf16 %v9021_v39, %v8990_v13  ;;  %v4681_v29 = vadd.f32 1.0, %v4649_v9  ;;  %v4237_v11 = vmul.f32 %v9033_v63, %v4205_v62  ;;  %v4486_v20 = vmul.f32 1.442695, %v4430_v15 }
 0xdc5   : > { %v6516_v26 = vpop.eup %6515  ;;  %v4554_v44 = vsub.f32 1.0, %v4522_v8  ;;  %v4331_v2 = vadd.f32 0.2548296, %v4299_v55  ;;  %v4268_v17 = vadd.f32 -0.28449672, %v4236_v27  ;;  %6525 = vrcp.f32 %v4017_v57 }
 0xdc6   : > { %v6518_v45 = vpop.eup %6517  ;;  %v4713_v38 = vmul.f32 %v4681_v29, %v8881_v10  ;;  %vm4587_vm6 = vcmp.ge.f32.partialorder %v8916_v56, 0.0  ;;  %v4269_v47 = vadd.f32 -0.28449672, %v4237_v11  ;;  %v4488_v43 = vmul.f32 1.442695, %v4431_v18 }
 0xdc7   : > { %v4432_v22 = vmul.f32 %v4400_v21, %v9013_v52  ;;  %v9066_v13 = vpop.eup %6519  ;;  %v4363_v39 = vmul.f32 %v9007_v46, %v4331_v2  ;;  %v4300_v30 = vmul.f32 %v9027_v14, %v4268_v17  ;;  %v4401_v50 = vsub.f32 0.0, %v9044_v59 }
 0xdc8   : > { %v9075_v10 = vadd.f32 %v3853_v34, %v8392_v53  ;;  %v4618_v15 = vsub.f32 0.0, %v4554_v44  ;;  %v4301_v18 = vmul.f32 %v9033_v63, %v4269_v47  ;;  %v4735_v52 = vpack.c.bf16 %v4713_v38, %v9010_v28 }
 0xdc9   : > { %4934 = vmatmul.mubr.bf16.gmra.mxu1 %v4732_v54  ;;  %v4110_v16 = vmul.f32 1.0614054, %v9066_v13  ;;  %v4523_v31 = vmul.f32 %v6514_v36, %v4363_v39  ;;  %v4332_v46 = vadd.f32 0.2548296, %v4300_v30  ;;  %6527 = vpow2.f32 %v4486_v20 }
 0xdca   : > { %v9081_v25 = vadd.f32 %v3855_v32, %v8396_v61  ;;  %vm4588_vm7 = vcmp.ge.f32.partialorder %v8933_v3, 0.0  ;;  %v4333_v6 = vadd.f32 0.2548296, %v4301_v18  ;;  %4941 = vmatprep.mubr.bf16.mxu1 %v4735_v52  ;;  %6529 = vpow2.f32 %v4488_v43 }
 0xdcb   : > { %v4142_v42 = vadd.f32 -1.4531521, %v4110_v16  ;;  %v4490_v54 = vmul.f32 1.442695, %v4432_v22  ;;  %v9084_v23 = vpop.eup %6521  ;;  %v4555_v24 = vsub.f32 1.0, %v4523_v31  ;;  %v4364_v28 = vmul.f32 %v9027_v14, %v4332_v46 }
 0xdcc   : > { %vm4589_vm8 = vcmp.ge.f32.partialorder %v8937_v0, 0.0  ;;  %v4433_v51 = vmul.f32 %v4401_v50, %v9044_v59  ;;  %v9090_v62 = vmul.f32 0.70710677, %v9075_v10  ;;  %v4650_v21 = vsel %vm4586_vm5, %v4554_v44, %v4618_v15 }
 0xdcd   : > { %v4365_v57 = vmul.f32 %v9033_v63, %v4333_v6  ;;  %v4174_v34 = vmul.f32 %v9066_v13, %v4142_v42  ;;  %v4111_v9 = vmul.f32 1.0614054, %v9084_v23  ;;  %v4619_v8 = vsub.f32 0.0, %v4555_v24 }
 0xdce   : > { %v4524_v55 = vmul.f32 %v6516_v26, %v4364_v28  ;;  %v9098_v14 = vand.u32 2147483647, %v9090_v62  ;;  %v9101_v27 = vmul.f32 0.70710677, %v9081_v25  ;;  %6531 = vpow2.f32 %v4490_v54 }
 0xdcf   : > { %v4525_v59 = vmul.f32 %v6518_v45, %v4365_v57  ;;  %v4206_v36 = vadd.f32 1.4214138, %v4174_v34  ;;  %v4143_v29 = vadd.f32 -1.4531521, %v4111_v9  ;;  %v9103_v40 = vpop.eup %6523  ;;  %v4651_v63 = vsel %vm4587_vm6, %v4555_v24, %v4619_v8  ;;  %v3857_v24 = vpop.f32.mrf.mxu0 }
 0xdd0   : > { %v4556_v11 = vsub.f32 1.0, %v4524_v55  ;;  %v4492_v20 = vmul.f32 1.442695, %v4433_v51  ;;  %v3986_v26 = vmul.f32 0.3275911, %v9098_v14  ;;  %v4682_v44 = vadd.f32 1.0, %v4650_v21 }
 0xdd1   : > { %4942 = vmatmul.mubr.bf16.gmra.mxu1 %v4734_v1  ;;  %v4557_v2 = vsub.f32 1.0, %v4525_v59  ;;  %v4238_v17 = vmul.f32 %v9066_v13, %v4206_v36  ;;  %v4175_v38 = vmul.f32 %v9084_v23, %v4143_v29  ;;  %v4112_v47 = vmul.f32 1.0614054, %v9103_v40 }
 0xdd2   : > { %v4620_v45 = vsub.f32 0.0, %v4556_v11  ;;  %v4018_v43 = vadd.f32 1.0, %v3986_v26  ;;  %v9112_v22 = vand.u32 2147483647, %v9101_v27  ;;  %v9114_v56 = vpop.eup %6525  ;;  %v4683_v32 = vadd.f32 1.0, %v4651_v63  ;;  %v3859_v26 = vpop.f32.mrf.mxu0 }
 0xdd3   : > { %v4621_v1 = vsub.f32 0.0, %v4557_v2  ;;  %v4270_v39 = vadd.f32 -0.28449672, %v4238_v17  ;;  %v4207_v30 = vadd.f32 1.4214138, %v4175_v38  ;;  %v4714_v59 = vmul.f32 %v4682_v44, %v8884_v5 }
 0xdd4   : > { %v4652_v50 = vsel %vm4588_vm7, %v4556_v11, %v4620_v45  ;;  %v4144_v15 = vadd.f32 -1.4531521, %v4112_v47  ;;  %v4113_v18 = vmul.f32 1.0614054, %v9114_v56  ;;  %6533 = vrcp.f32 %v4018_v43 }
 0xdd5   : > { %v4684_v52 = vadd.f32 1.0, %v4652_v50  ;;  %v4653_v16 = vsel %vm4589_vm8, %v4557_v2, %v4621_v1  ;;  %v4302_v31 = vmul.f32 %v9066_v13, %v4270_v39  ;;  %v4239_v46 = vmul.f32 %v9084_v23, %v4207_v30 }
 0xdd6   : > { %v4685_v6 = vadd.f32 1.0, %v4653_v16  ;;  %v4176_v42 = vmul.f32 %v9103_v40, %v4144_v15  ;;  %v4145_v54 = vadd.f32 -1.4531521, %v4113_v18  ;;  %6535 = vpow2.f32 %v4492_v20  ;;  %v6528_v3 = vpop.eup %6527 }
 0xdd7   : > { %v4716_v28 = vmul.f32 %v4684_v52, %v8967_v49  ;;  %v4334_v51 = vadd.f32 0.2548296, %v4302_v31  ;;  %v4271_v21 = vadd.f32 -0.28449672, %v4239_v46  ;;  %v3987_v57 = vmul.f32 0.3275911, %v9112_v22  ;;  %v6530_v34 = vpop.eup %6529 }
 0xdd8   : > { %v4715_v0 = vmul.f32 %v4683_v32, %v8935_v58  ;;  %v4717_v9 = vmul.f32 %v4685_v6, %v8970_v33  ;;  %v4208_v8 = vadd.f32 1.4214138, %v4176_v42  ;;  %v4177_v55 = vmul.f32 %v9114_v56, %v4145_v54 }
 0xdd9   : > { %v4366_v36 = vmul.f32 %v9066_v13, %v4334_v51  ;;  %v4303_v29 = vmul.f32 %v9084_v23, %v4271_v21  ;;  %v4019_v63 = vadd.f32 1.0, %v3987_v57  ;;  %v4736_v2 = vpack.c.bf16 %v4716_v28, %v4714_v59 }
 0xdda   : > { %v4737_v49 = vpack.c.bf16 %v4717_v9, %v4715_v0  ;;  %v4240_v11 = vmul.f32 %v9103_v40, %v4208_v8  ;;  %v4209_v20 = vadd.f32 1.4214138, %v4177_v55  ;;  %v9135_v5 = vadd.f32 %v3857_v24, %v8392_v53 }
 0xddb   : > { %v4335_v17 = vadd.f32 0.2548296, %v4303_v29  ;;  %6537 = vrcp.f32 %v4019_v63  ;;  %v6532_v58 = vpop.eup %6531  ;;  %v4526_v13 = vmul.f32 %v6528_v3, %v4366_v36  ;;  %v9139_v45 = vadd.f32 %v3859_v26, %v8396_v61 }
 0xddc   : > { %4949 = vmatprep.mubr.bf16.mxu1 %v4737_v49  ;;  %v4272_v33 = vadd.f32 -0.28449672, %v4240_v11  ;;  %v4241_v38 = vmul.f32 %v9114_v56, %v4209_v20  ;;  %v9143_v1 = vmul.f32 0.70710677, %v9135_v5  ;;  %v3887_v46 = vmul.f32 0.5, %v8983_v41 }
 0xddd   : > { %4950 = vmatmul.mubr.bf16.gmra.mxu1 %v4736_v2  ;;  %v4367_v44 = vmul.f32 %v9084_v23, %v4335_v17  ;;  %v9147_v53 = vmul.f32 0.70710677, %v9139_v45  ;;  %v4558_v15 = vsub.f32 1.0, %v4526_v13  ;;  %vm4590_vm9 = vcmp.ge.f32.partialorder %v8993_v60, 0.0 }
 0xdde   : > { %v4304_v47 = vmul.f32 %v9103_v40, %v4272_v33  ;;  %v4273_v43 = vadd.f32 -0.28449672, %v4241_v38  ;;  %v3956_v61 = vand.u32 2147483647, %v9143_v1  ;;  %v4403_v9 = vsub.f32 0.0, %v9112_v22 }
 0xddf   : > { %v4527_v32 = vmul.f32 %v6530_v34, %v4367_v44  ;;  %v3957_v42 = vand.u32 2147483647, %v9147_v53  ;;  %v4622_v51 = vsub.f32 0.0, %v4558_v15  ;;  %vm4591_vm10 = vcmp.ge.f32.partialorder %v8996_v7, 0.0 }
 0xde0   : > { %v4336_v39 = vadd.f32 0.2548296, %v4304_v47  ;;  %v4305_v30 = vmul.f32 %v9114_v56, %v4273_v43  ;;  %v3988_v6 = vmul.f32 0.3275911, %v3956_v61  ;;  %v4402_v41 = vsub.f32 0.0, %v9098_v14 }
 0xde1   : > { %v9149_v50 = vpop.eup %6533  ;;  %v4559_v23 = vsub.f32 1.0, %v4527_v32  ;;  %v3989_v57 = vmul.f32 0.3275911, %v3957_v42  ;;  %vm4592_vm11 = vcmp.ge.f32.partialorder %v9000_v4, 0.0  ;;  %v4654_v29 = vsel %vm4590_vm9, %v4558_v15, %v4622_v51 }
 0xde2   : > { %v4368_v18 = vmul.f32 %v9103_v40, %v4336_v39  ;;  %v4337_v52 = vadd.f32 0.2548296, %v4305_v30  ;;  %v4114_v16 = vmul.f32 1.0614054, %v9149_v50  ;;  %v4020_v21 = vadd.f32 1.0, %v3988_v6 }
 0xde3   : > { %v6536_v31 = vpop.eup %6535  ;;  %v4623_v54 = vsub.f32 0.0, %v4559_v23  ;;  %v4021_v8 = vadd.f32 1.0, %v3989_v57  ;;  %vm4593_vm12 = vcmp.ge.f32.partialorder %v9040_v35, 0.0  ;;  %v4435_v7 = vmul.f32 %v4403_v9, %v9112_v22 }
 0xde4   : > { %v4528_v24 = vmul.f32 %v6532_v58, %v4368_v18  ;;  %v4369_v3 = vmul.f32 %v9114_v56, %v4337_v52  ;;  %v4146_v28 = vadd.f32 -1.4531521, %v4114_v16  ;;  %6539 = vrcp.f32 %v4020_v21 }
 0xde5   : > { %v4655_v56 = vsel %vm4591_vm10, %v4559_v23, %v4623_v54  ;;  %6541 = vrcp.f32 %v4021_v8  ;;  %v4434_v17 = vmul.f32 %v4402_v41, %v9098_v14  ;;  %v4686_v4 = vadd.f32 1.0, %v4654_v29 }
 0xde6   : > { %v4560_v40 = vsub.f32 1.0, %v4528_v24  ;;  %v4529_v34 = vmul.f32 %v6536_v31, %v4369_v3  ;;  %v4178_v0 = vmul.f32 %v9149_v50, %v4146_v28  ;;  %v4687_v26 = vadd.f32 1.0, %v4655_v56 }
 0xde7   : > { %v3888_v33 = vmul.f32 0.5, %v8986_v37  ;;  %v3889_v60 = vmul.f32 0.5, %v9024_v19  ;;  %v4404_v47 = vsub.f32 0.0, %v3956_v61  ;;  %v3886_v43 = vmul.f32 0.5, %v8976_v48 }
 0xde8   : > { %v6538_v55 = vpop.eup %6537  ;;  %v4624_v59 = vsub.f32 0.0, %v4560_v40  ;;  %v4561_v36 = vsub.f32 1.0, %v4529_v34  ;;  %v4210_v63 = vadd.f32 1.4214138, %v4178_v0  ;;  %v4496_v32 = vmul.f32 1.442695, %v4435_v7 }
 0xde9   : > { %v4115_v49 = vmul.f32 1.0614054, %v6538_v55  ;;  %v4719_v39 = vmul.f32 %v4687_v26, %v3887_v46  ;;  %v4494_v15 = vmul.f32 1.442695, %v4434_v17  ;;  %v4718_v23 = vmul.f32 %v4686_v4, %v3886_v43 }
 0xdea   : > { %v4656_v11 = vsel %vm4592_vm11, %v4560_v40, %v4624_v59  ;;  %v4625_v20 = vsub.f32 0.0, %v4561_v36  ;;  %v4242_v35 = vmul.f32 %v9149_v50, %v4210_v63  ;;  %v4405_v18 = vsub.f32 0.0, %v3957_v42 }
 0xdeb   : > { %v4688_v2 = vadd.f32 1.0, %v4656_v11  ;;  %v4147_v58 = vadd.f32 -1.4531521, %v4115_v49  ;;  %v4436_v16 = vmul.f32 %v4404_v47, %v3956_v61  ;;  %6543 = vpow2.f32 %v4496_v32 }
 0xdec   : > { %v4657_v38 = vsel %vm4593_vm12, %v4561_v36, %v4625_v20  ;;  %v4274_v52 = vadd.f32 -0.28449672, %v4242_v35  ;;  %6545 = vpow2.f32 %v4494_v15  ;;  %v4437_v24 = vmul.f32 %v4405_v18, %v3957_v42 }
 0xded   : > { %v4689_v13 = vadd.f32 1.0, %v4657_v38  ;;  %v4179_v44 = vmul.f32 %v6538_v55, %v4147_v58  ;;  %v4720_v22 = vmul.f32 %v4688_v2, %v3888_v33  ;;  %v4498_v28 = vmul.f32 1.442695, %v4436_v16 }
 0xdee   : > { %v4306_v48 = vmul.f32 %v9149_v50, %v4274_v52  ;;  %v4500_v34 = vmul.f32 1.442695, %v4437_v24  ;;  %vm4595_vm13 = vcmp.ge.f32.partialorder %v9101_v27, 0.0  ;;  %vm4594_vm14 = vcmp.ge.f32.partialorder %v9090_v62, 0.0 }
 0xdef   : > { %v4721_v30 = vmul.f32 %v4689_v13, %v3889_v60  ;;  %v4211_v14 = vadd.f32 1.4214138, %v4179_v44  ;;  %v4738_v31 = vpack.c.bf16 %v4720_v22, %v4718_v23  ;;  %6547 = vpow2.f32 %v4498_v28 }
 0xdf0   : > { %v4338_v61 = vadd.f32 0.2548296, %v4306_v48  ;;  %6549 = vpow2.f32 %v4500_v34  ;;  %vm4596_vm15 = vcmp.ge.f32.partialorder %v9143_v1, 0.0  ;;  %vm4597_vm0 = vcmp.ge.f32.partialorder %v9147_v53, 0.0 }
 0xdf1   : > { %v4243_v37 = vmul.f32 %v6538_v55, %v4211_v14  ;;  %v4739_v19 = vpack.c.bf16 %v4721_v30, %v4719_v39  ;;  %v6540_v54 = vpop.eup %6539  ;;  %v3892_v16 = vmul.f32 0.5, %v9135_v5  ;;  %v3893_v62 = vmul.f32 0.5, %v9139_v45 }
 0xdf2   : > { %v4116_v3 = vmul.f32 1.0614054, %v6540_v54  ;;  %v6542_v51 = vpop.eup %6541  ;;  %v4370_v42 = vmul.f32 %v9149_v50, %v4338_v61  ;;  %v3890_v1 = vmul.f32 0.5, %v9075_v10 }
 0xdf3   : > { %v4275_v6 = vadd.f32 -0.28449672, %v4243_v37  ;;  %4957 = vmatprep.mubr.bf16.mxu1 %v4739_v19  ;;  %v4117_v40 = vmul.f32 1.0614054, %v6542_v51  ;;  %v3891_v19 = vmul.f32 0.5, %v9081_v25 }
 0xdf4   : > { %4958 = vmatmul.mubr.bf16.gmra.mxu1 %v4738_v31  ;;  %v4148_v21 = vadd.f32 -1.4531521, %v4116_v3  ;;  %v9187_v25 = vld [vmem:[%s9263_s8] ss:$0 sm:$0xff] }
 0xdf5   : > { %v4307_v46 = vmul.f32 %v6538_v55, %v4275_v6  ;;  %v4149_v9 = vadd.f32 -1.4531521, %v4117_v40 }
 0xdf6   : > { %v4180_v0 = vmul.f32 %v6540_v54, %v4148_v21 }
 0xdf7   : > { %v4339_v57 = vadd.f32 0.2548296, %v4307_v46  ;;  %v4181_v56 = vmul.f32 %v6542_v51, %v4149_v9 }
 0xdf8   : > { %v4212_v41 = vadd.f32 1.4214138, %v4180_v0  ;;  %v6544_v29 = vpop.eup %6543  ;;  %v9406_v0 = vld [vmem:[#allocation29_spill] sm:$0xff] }
 0xdf9   : > { %v4371_v8 = vmul.f32 %v6538_v55, %v4339_v57  ;;  %v4213_v36 = vadd.f32 1.4214138, %v4181_v56  ;;  %v6546_v49 = vpop.eup %6545 }
 0xdfa   : > { %v4244_v59 = vmul.f32 %v6540_v54, %v4212_v41  ;;  %v4530_v7 = vmul.f32 %v6546_v49, %v4370_v42 }
 0xdfb   : > { %v4531_v11 = vmul.f32 %v6544_v29, %v4371_v8  ;;  %v4245_v20 = vmul.f32 %v6542_v51, %v4213_v36 }
 0xdfc   : > { %v4276_v63 = vadd.f32 -0.28449672, %v4244_v59  ;;  %v4562_v33 = vsub.f32 1.0, %v4530_v7  ;;  %v6548_v55 = vpop.eup %6547  ;;  %v9407_v59 = vld [vmem:[#allocation27_spill] sm:$0xff] }
 0xdfd   : > { %v4277_v2 = vadd.f32 -0.28449672, %v4245_v20  ;;  %v4563_v58 = vsub.f32 1.0, %v4531_v11  ;;  %v6550_v44 = vpop.eup %6549  ;;  %v9408_v11 = vld [vmem:[#allocation32_spill] sm:$0xff] }
 0xdfe   : > { %v4308_v26 = vmul.f32 %v6540_v54, %v4276_v63  ;;  %v4626_v47 = vsub.f32 0.0, %v4562_v33 }
 0xdff   : > { %v4309_v4 = vmul.f32 %v6542_v51, %v4277_v2  ;;  %v4627_v35 = vsub.f32 0.0, %v4563_v58 }
 0xe00   : > { %v4340_v17 = vadd.f32 0.2548296, %v4308_v26  ;;  %v4658_v15 = vsel %vm4594_vm14, %v4562_v33, %v4626_v47 }
 0xe01   : > { %v4341_v38 = vadd.f32 0.2548296, %v4309_v4  ;;  %v4659_v39 = vsel %vm4595_vm13, %v4563_v58, %v4627_v35  ;;  %v4690_v37 = vadd.f32 1.0, %v4658_v15  ;;  %v9409_v58 = vld [vmem:[#allocation34_spill] sm:$0xff] }
 0xe02   : > { %v4372_v60 = vmul.f32 %v6540_v54, %v4340_v17  ;;  %v4691_v52 = vadd.f32 1.0, %v4659_v39 }
 0xe03   : > { %v4373_v50 = vmul.f32 %v6542_v51, %v4341_v38  ;;  %v4722_v48 = vmul.f32 %v4690_v37, %v3890_v1 }
 0xe04   : > { %v4532_v13 = vmul.f32 %v6548_v55, %v4372_v60  ;;  %v4723_v54 = vmul.f32 %v4691_v52, %v3891_v19  ;;  %v9413_v19 = vld [vmem:[#allocation36_spill] sm:$0xff] }
 0xe05   : > { %v4533_v22 = vmul.f32 %v6550_v44, %v4373_v50 }
 0xe06   : > { %v4564_v43 = vsub.f32 1.0, %v4532_v13  ;;  %v9410_v13 = vld [vmem:[#allocation31_spill] sm:$0xff] }
 0xe07   : > { %v4565_v30 = vsub.f32 1.0, %v4533_v22  ;;  %v9411_v22 = vld [vmem:[#allocation38_spill] sm:$0xff] }
 0xe08   : > { %v4628_v32 = vsub.f32 0.0, %v4564_v43 }
 0xe09   : > { %v4629_v18 = vsub.f32 0.0, %v4565_v30 }
 0xe0a   : > { %v4660_v14 = vsel %vm4596_vm15, %v4564_v43, %v4628_v32 }
 0xe0b   : > { %v4692_v23 = vadd.f32 1.0, %v4660_v14  ;;  %v4661_v27 = vsel %vm4597_vm0, %v4565_v30, %v4629_v18 }
 0xe0c   : > { %v4693_v31 = vadd.f32 1.0, %v4661_v27 }
 0xe0d   : > { %v4724_v6 = vmul.f32 %v4692_v23, %v3892_v16  ;;  %v9412_v23 = vld [vmem:[#allocation33_spill] sm:$0xff] }
 0xe0e   : > { %v4725_v24 = vmul.f32 %v4693_v31, %v3893_v62 }
 0xe0f   : > { %v4740_v3 = vpack.c.bf16 %v4724_v6, %v4722_v48  ;;  %v9414_v6 = vld [vmem:[#allocation37_spill] sm:$0xff] }
 0xe10   : > { %v4741_v46 = vpack.c.bf16 %v4725_v24, %v4723_v54 }
 0xe12   : > { %4965 = vmatprep.mubr.bf16.mxu1 %v4741_v46 }
 0xe13   : > { %4966 = vmatmul.mubr.bf16.gmra.mxu1 %v4740_v3 }
 0xe70   : > { %v5475_v53 = vpop.f32.mrf.mxu1 }
 0xe72   : > { %v5476_v5 = vpop.f32.mrf.mxu1 }
 0xe73   : > { %v5477_v45 = vadd.f32 %v5476_v5, %v5475_v53 }
 0xe74   : > { %v5478_v10 = vpop.f32.mrf.mxu1 }
 0xe75   : > { %v4912_v28 = vadd.f32 %v5477_v45, %v9187_v25  ;;  %v9415_v45 = vld [vmem:[#allocation35_spill] sm:$0xff] }
 0xe76   : > { %v5479_v51 = vpop.f32.mrf.mxu1 }
 0xe77   : > { %v4974_v21 = vadd.f32 %v4912_v28, %v8196_v12  ;;  %v5480_v57 = vadd.f32 %v5479_v51, %v5478_v10 }
 0xe79   : > { %v5481_v40 = vpop.f32.mrf.mxu1  ;;  %4990 = vst [vmem:[%s9193_s24] sm:$0xff] %v4974_v21  ;;  %v4915_v34 = vadd.f32 %v5480_v57, %v9187_v25  ;;  %v9416_v21 = vld [vmem:[#allocation22_spill] sm:$0xff] }
 0xe7b   : > { %v5482_v61 = vpop.f32.mrf.mxu1  ;;  %v4975_v9 = vadd.f32 %v4915_v34, %v9406_v0 }
 0xe7c   : > { %v5483_v41 = vadd.f32 %v5482_v61, %v5481_v40 }
 0xe7d   : > { %v5484_v8 = vpop.f32.mrf.mxu1  ;;  %4991 = vst [vmem:[%s9193_s24 + $0x8] sm:$0xff] %v4975_v9 }
 0xe7e   : > { %v4920_v56 = vadd.f32 %v5483_v41, %v9187_v25 }
 0xe7f   : > { %v5485_v42 = vpop.f32.mrf.mxu1 }
 0xe80   : > { %v4976_v36 = vadd.f32 %v4920_v56, %v9407_v59  ;;  %v5486_v29 = vadd.f32 %v5485_v42, %v5484_v8  ;;  %v9417_v8 = vld [vmem:[#allocation17_spill] sm:$0xff] }
 0xe81   : > { %v5487_v12 = vpop.f32.mrf.mxu1 }
 0xe82   : > { %4992 = vst [vmem:[%s9193_s24 + $0x10] sm:$0xff] %v4976_v36  ;;  %v4923_v63 = vadd.f32 %v5486_v29, %v9187_v25  ;;  %v9418_v36 = vld [vmem:[#allocation18_spill] sm:$0xff] }
 0xe83   : > { %v5488_v49 = vpop.f32.mrf.mxu1 }
 0xe84   : > { %v4977_v20 = vadd.f32 %v4923_v63, %v9408_v11  ;;  %v5489_v7 = vadd.f32 %v5488_v49, %v5487_v12 }
 0xe85   : > { %v5490_v26 = vpop.f32.mrf.mxu1 }
 0xe86   : > { %4993 = vst [vmem:[%s9193_s24 + $0x18] sm:$0xff] %v4977_v20  ;;  %v4928_v2 = vadd.f32 %v5489_v7, %v9187_v25 }
 0xe87   : > { %v5491_v17 = vpop.f32.mrf.mxu1 }
 0xe88   : > { %v4978_v4 = vadd.f32 %v4928_v2, %v9409_v58  ;;  %v5492_v33 = vadd.f32 %v5491_v17, %v5490_v26  ;;  %v9419_v26 = vld [vmem:[#allocation19_spill] sm:$0xff] }
 0xe89   : > { %v5493_v60 = vpop.f32.mrf.mxu1 }
 0xe8a   : > { %4994 = vst [vmem:[%s9193_s24 + $0x20] sm:$0xff] %v4978_v4  ;;  %v4931_v55 = vadd.f32 %v5492_v33, %v9187_v25  ;;  %v9420_v4 = vld [vmem:[#allocation21_spill] sm:$0xff] }
 0xe8b   : > { %v5494_v38 = vpop.f32.mrf.mxu1 }
 0xe8c   : > { %v4979_v35 = vadd.f32 %v4931_v55, %v9410_v13  ;;  %v5495_v50 = vadd.f32 %v5494_v38, %v5493_v60 }
 0xe8d   : > { %v5496_v44 = vpop.f32.mrf.mxu1 }
 0xe8e   : > { %4995 = vst [vmem:[%s9193_s24 + $0x28] sm:$0xff] %v4979_v35  ;;  %v4936_v47 = vadd.f32 %v5495_v50, %v9187_v25 }
 0xe8f   : > { %v5497_v43 = vpop.f32.mrf.mxu1 }
 0xe90   : > { %v4980_v32 = vadd.f32 %v4936_v47, %v9411_v22  ;;  %v5498_v39 = vadd.f32 %v5497_v43, %v5496_v44 }
 0xe91   : > { %v5499_v30 = vpop.f32.mrf.mxu1 }
 0xe92   : > { %4996 = vst [vmem:[%s9193_s24 + $0x30] sm:$0xff] %v4980_v32  ;;  %v4939_v15 = vadd.f32 %v5498_v39, %v9187_v25 }
 0xe93   : > { %v5500_v14 = vpop.f32.mrf.mxu1 }
 0xe94   : > { %v4981_v18 = vadd.f32 %v4939_v15, %v9412_v23  ;;  %v5501_v52 = vadd.f32 %v5500_v14, %v5499_v30 }
 0xe95   : > { %v5502_v37 = vpop.f32.mrf.mxu1 }
 0xe96   : > { %4997 = vst [vmem:[%s9193_s24 + $0x38] sm:$0xff] %v4981_v18  ;;  %v4944_v16 = vadd.f32 %v5501_v52, %v9187_v25 }
 0xe97   : > { %v5503_v27 = vpop.f32.mrf.mxu1 }
 0xe98   : > { %v4982_v62 = vadd.f32 %v4944_v16, %v9413_v19  ;;  %v5504_v31 = vadd.f32 %v5503_v27, %v5502_v37 }
 0xe9a   : > { %4998 = vst [vmem:[%s9193_s24 + $0x40] sm:$0xff] %v4982_v62  ;;  %v4947_v1 = vadd.f32 %v5504_v31, %v9187_v25 }
 0xe9c   : > { %v4983_v54 = vadd.f32 %v4947_v1, %v9414_v6 }
 0xe9d   : > { %v5505_v24 = vpop.f32.mrf.mxu1 }
 0xe9e   : > { %4999 = vst [vmem:[%s9193_s24 + $0x48] sm:$0xff] %v4983_v54 }
 0xe9f   : > { %v5506_v48 = vpop.f32.mrf.mxu1 }
 0xea0   : > { %v5507_v46 = vadd.f32 %v5506_v48, %v5505_v24 }
 0xea1   : > { %v5508_v3 = vpop.f32.mrf.mxu1 }
 0xea2   : > { %v4952_v53 = vadd.f32 %v5507_v46, %v9187_v25 }
 0xea3   : > { %v5509_v5 = vpop.f32.mrf.mxu1 }
 0xea4   : > { %v4984_v10 = vadd.f32 %v4952_v53, %v9415_v45  ;;  %v5510_v28 = vadd.f32 %v5509_v5, %v5508_v3 }
 0xea6   : > { %5000 = vst [vmem:[%s9193_s24 + $0x50] sm:$0xff] %v4984_v10  ;;  %v4955_v51 = vadd.f32 %v5510_v28, %v9187_v25 }
 0xea8   : > { %v4985_v57 = vadd.f32 %v4955_v51, %v9416_v21 }
 0xeaa   : > { %5001 = vst [vmem:[%s9193_s24 + $0x58] sm:$0xff] %v4985_v57 }
 0xeb4   : > { %v5511_v40 = vpop.f32.mrf.mxu1 }
 0xeb6   : > { %v5512_v34 = vpop.f32.mrf.mxu1 }
 0xeb7   : > { %v5513_v61 = vadd.f32 %v5512_v34, %v5511_v40 }
 0xeb8   : > { %v5514_v0 = vpop.f32.mrf.mxu1 }
 0xeb9   : > { %v4960_v9 = vadd.f32 %v5513_v61, %v9187_v25 }
 0xeba   : > { %v5515_v41 = vpop.f32.mrf.mxu1 }
 0xebb   : > { %v4986_v56 = vadd.f32 %v4960_v9, %v9417_v8  ;;  %v5516_v42 = vadd.f32 %v5515_v41, %v5514_v0 }
 0xebd   : > { %5002 = vst [vmem:[%s9193_s24 + $0x60] sm:$0xff] %v4986_v56  ;;  %v4963_v59 = vadd.f32 %v5516_v42, %v9187_v25 }
 0xebf   : > { %v4987_v29 = vadd.f32 %v4963_v59, %v9418_v36 }
 0xec1   : > { %5003 = vst [vmem:[%s9193_s24 + $0x68] sm:$0xff] %v4987_v29 }
 0xed3   : > { %v5517_v12 = vpop.f32.mrf.mxu1 }
 0xed5   : > { %v5518_v63 = vpop.f32.mrf.mxu1 }
 0xed6   : > { %v5519_v49 = vadd.f32 %v5518_v63, %v5517_v12 }
 0xed7   : > { %v5520_v11 = vpop.f32.mrf.mxu1 }
 0xed8   : > { %v4968_v20 = vadd.f32 %v5519_v49, %v9187_v25 }
 0xed9   : > { %v5521_v7 = vpop.f32.mrf.mxu1 }
 0xeda   : > { %v4988_v2 = vadd.f32 %v4968_v20, %v9419_v26  ;;  %v5522_v17 = vadd.f32 %v5521_v7, %v5520_v11 }
 0xedc   : > { %5004 = vst [vmem:[%s9193_s24 + $0x70] sm:$0xff] %v4988_v2  ;;  %v4971_v58 = vadd.f32 %v5522_v17, %v9187_v25 }
 0xede   : > { %v4989_v33 = vadd.f32 %v4971_v58, %v9420_v4 }
 0xee0   : > { %5005 = vst [vmem:[%s9193_s24 + $0x78] sm:$0xff] %v4989_v33 }
 0xee1 PF: > { %p22_p11 = scmp.ge.s32.totalorder %s6938_s19, 4   ;;  %s9421_s30 = smov %s6763_s10 }
 0xee2   : > { %s9422_s10 = smov %s6767_s11  ;;  %s9423_s11 = smov %s6949_s28 }
 0xee3   : > { %s9424_s12 = smov %s6938_s19  ;;  %24 = sbr.rel (!%p22_p11) target bundleno = 6 (0x6), region = 116 }
 0xee8   :  { %5027 = vsyncpa [#allocation3], 1 }
 0xee9   :  { %5029 = vsyncpa [#allocation3 + $0x1], 1 }
 0xeea   :  { %5030 = vsyncpa [#allocation5], 1 }
 0xeeb   :  { %5031 = vsyncpa [#allocation8], 1 }
 0xeec   :  { %5032 = vsyncpa [#allocation11], 1 }

// kernel: transformer_block_forward.3
= control target key start
LH: loop header
LB: loop body
LE: loop exit
PB: predicated region body
PF: predicated region fallthrough
CT: control target
= control target key end

     0   :  { %14 = vsyncpa [#allocation3], 0  ;;  %s9014_s0 = inlined_call_operand.vmem [shape: f32[2,128,128], index: 0, kind: input, shape index: {}]   ;;  %s9015_s1 = inlined_call_operand.vmem [shape: bf16[128,384], index: 1, kind: input, shape index: {}]   ;;  %s9016_s2 = inlined_call_operand.vmem [shape: f32[1,384], index: 2, kind: input, shape index: {}]   ;;  %s9017_s3 = inlined_call_operand.vmem [shape: bf16[128,128], index: 3, kind: input, shape index: {}]   ;;  %s9018_s4 = inlined_call_operand.vmem [shape: f32[1,128], index: 4, kind: input, shape index: {}]   ;;  %s9019_s5 = inlined_call_operand.vmem [shape: bf16[128,256], index: 5, kind: input, shape index: {}]   ;;  %s9020_s6 = inlined_call_operand.vmem [shape: f32[1,256], index: 6, kind: input, shape index: {}]   ;;  %s9021_s7 = inlined_call_operand.vmem [shape: bf16[256,128], index: 7, kind: input, shape index: {}]   ;;  %s9022_s8 = inlined_call_operand.vmem [shape: f32[1,128], index: 8, kind: input, shape index: {}]   ;;  %s9023_s9 = inlined_call_operand.hbm [shape: f32[2,128,128], index: 9, kind: output, shape index: {}]  }
   0x1   :  { %16 = vsyncpa [#allocation3 + $0x1], 0  ;;  %s6489_s30 = smov 0   ;;  %s6491_s10 = smov 0  }
   0x2   :  { %s6493_s11 = smov 0   ;;  %s6495_s12 = smov 0  }
   0x3 LB: > { %s6510_s13 = sadd.s32 4294967295, %s6430_s12   ;;  %s4989_s14 = sadd.s32 4294967294, %s6430_s12   ;;  %s6430_s12 = sphi %s6495_s12, %s9166_s12   ;;  %s6426_s11 = sphi %s6493_s11, %s9165_s11   ;;  %s6422_s10 = sphi %s6491_s10, %s9164_s10   ;;  %s6418_s30 = sphi %s6489_s30, %s9163_s30  }
   0x4   : > { %s6514_s15 = sadd.s32 1, %s6430_s12   ;;  %s223_s16 = sadd.s32 1, %s6426_s11 }
   0x5   : > { %s220_s17 = ssub.s32 %s6430_s12, %s6514_s15  ;;  %p233_p0 = scmp.ne.s32.totalorder %s6426_s11, %s6422_s10 }
   0x6   : > { %p221_p1 = scmp.eq.s32.totalorder %s220_s17, 0  ;;  %p234_p2 = scmp.eq.s32.totalorder %s6510_s13, 1 }
   0x7   : > { %p239_p3 = scmp.ne.s32.totalorder %s6422_s10, %s6418_s30  ;;  %p240_p4 = scmp.eq.s32.totalorder %s4989_s14, 1 }
   0x8   : > { %s6525_s18 = scalar_select %p221_p1, %s6426_s11, %s223_s16  }
   0x9   : > { %p6527_p5 = por %p234_p2, %p233_p0  ;;  %p6531_p6 = por %p240_p4, %p239_p3 }
   0xa   : > { %p4992_p7 = scmp.ge.s32.totalorder %s6430_s12, 1  ;;  %p290_p8 = scmp.lt.s32.totalorder %s6430_s12, 3 }
   0xc   : > { %p291_p9 = pnand %p4992_p7, %p290_p8 }
   0xe   : > { %294 = sbr.rel (%p291_p9) target bundleno = 3719 (0xe87), region = 56 }
  0x13   : > { %p326_p10 = scmp.lt.s32.totalorder %s6510_s13, 1  ;;  %v5826_v16 = vld [vmem:[%s9015_s1 + $0xac] ss:$12 sps:$4 sm:$0xff]   ;;  %v5828_v17 = vld [vmem:[%s9015_s1 + $0xa8] ss:$12 sps:$4 sm:$0xff]   ;;  %vm960_vm0 = vcmask 261120  }
  0x14   : > { %v5829_v18 = vld [vmem:[%s9015_s1 + $0x94] ss:$12 sps:$4 sm:$0xff]   ;;  %v5831_v19 = vld [vmem:[%s9015_s1 + $0xb0] ss:$12 sps:$4 sm:$0xff]   ;;  %710 = vmatprep.subr.bf16.mxu0 %v5826_v16  ;;  %v5835_v57 = vld [vmem:[%s9015_s1 + $0x98] ss:$12 sps:$4 sm:$0xff]  }
  0x15   : > { %s327_s21 = scalar_select %p326_p10, %s6510_s13, 1  ;;  %711 = vmatpush1.bf16.msra.mxu0 %v5828_v17  ;;  %5381 = vmatprep.subr.bf16.mxu1 %v5831_v19  ;;  %v5832_v20 = vld [vmem:[%s9015_s1 + $0x90] ss:$12 sps:$4 sm:$0xff]   ;;  %v5836_v58 = vld [vmem:[%s9015_s1 + $0x78] ss:$12 sps:$4 sm:$0xff]  }
  0x16   : > { %712 = vmatprep.subr.bf16.mxu0 %v5829_v18  ;;  %5382 = vmatpush3.bf16.msra.mxu1 %v5831_v19  ;;  %v5833_v56 = vld [vmem:[%s9015_s1 + $0x7c] ss:$12 sps:$4 sm:$0xff]   ;;  %s6433_s17 = smov 96   ;;  %s6435_s27 = smov 32  }
  0x17   : > { %s5131_s22 = sshll.u32 %s327_s21, 7  ;;  %5383 = vmatprep.subr.bf16.mxu1 %v5835_v57  ;;  %s6434_s21 = smov 64  }
  0x18   : > { %s6542_s25 = scalar_lea.vmem %s9014_s0, %s5131_s22  ;;  %s323_s24 = sand.u32 1, %s6422_s10  }
  0x19   : > { %v332_v0 = vld [vmem:[%s6542_s25] sm:$0xff]  ;;  %v334_v1 = vld [vmem:[%s6542_s25 + $0x10] sm:$0xff]  ;;  %v333_v2 = vld [vmem:[%s6542_s25 + $0x8] sm:$0xff]  ;;  %713 = vmatpush1.bf16.msra.mxu0 %v5832_v20  ;;  %s4993_s28 = sshll.u32 %s323_s24, 7  ;;  %s5132_s14 = sshll.u32 %s6510_s13, 11 }
  0x1a   : > { %348 = vadd.xlane.f32.xlu0 %v332_v0  ;;  %352 = vadd.xlane.f32.xlu1 %v334_v1  ;;  %v335_v3 = vld [vmem:[%s6542_s25 + $0x18] sm:$0xff]  ;;  %v336_v4 = vld [vmem:[%s6542_s25 + $0x20] sm:$0xff]  ;;  %v337_v5 = vld [vmem:[%s6542_s25 + $0x28] sm:$0xff]  ;;  %s8915_s29 = scalar_lea.vmem [#allocation2], %s4993_s28  ;;  %s8974_s22 = scalar_lea.sflag [#allocation3], %s323_s24 }
  0x1b   : > { %v6551_v6 = vld [vmem:[%s6542_s25 + $0x30] sm:$0xff]  ;;  %v6554_v7 = vld [vmem:[%s6542_s25 + $0x38] sm:$0xff]  ;;  %v6557_v8 = vld [vmem:[%s6542_s25 + $0x40] sm:$0xff]  ;;  %714 = vmatprep.subr.bf16.mxu0 %v5833_v56  ;;  %5384 = vmatpush3.bf16.msra.mxu1 %v5835_v57  ;;  %s6436_s23 = smov [#allocation2]  }
  0x1c   : > { %v6560_v9 = vld [vmem:[%s6542_s25 + $0x48] sm:$0xff]  ;;  %v6565_v10 = vld [vmem:[%s6542_s25 + $0x50] sm:$0xff]  ;;  %v6568_v11 = vld [vmem:[%s6542_s25 + $0x58] sm:$0xff]  ;;  %s6374_s26 = sshll.u32 %s6436_s23, 4  ;;  %s6375_s26 = int_to_ptr.vmem [resolvable:$false] %s6374_s26 }
  0x1d   : > { %v6573_v12 = vld [vmem:[%s6542_s25 + $0x60] sm:$0xff]  ;;  %v6576_v13 = vld [vmem:[%s6542_s25 + $0x68] sm:$0xff]  ;;  %v6581_v14 = vld [vmem:[%s6542_s25 + $0x70] sm:$0xff]  ;;  %715 = vmatpush1.bf16.msra.mxu0 %v5836_v58 }
  0x1e   : > { %350 = vadd.xlane.f32.xlu0 %v333_v2  ;;  %354 = vadd.xlane.f32.xlu1 %v335_v3  ;;  %v6584_v15 = vld [vmem:[%s6542_s25 + $0x78] sm:$0xff] }
  0x22   : > { %356 = vadd.xlane.f32.xlu0 %v336_v4  ;;  %358 = vadd.xlane.f32.xlu1 %v337_v5 }
  0x26   : > { %360 = vadd.xlane.f32.xlu0 %v6551_v6  ;;  %362 = vadd.xlane.f32.xlu1 %v6554_v7 }
  0x2a   : > { %364 = vadd.xlane.f32.xlu0 %v6557_v8  ;;  %366 = vadd.xlane.f32.xlu1 %v6560_v9 }
  0x2e   : > { %368 = vadd.xlane.f32.xlu0 %v6565_v10  ;;  %370 = vadd.xlane.f32.xlu1 %v6568_v11 }
  0x32   : > { %372 = vadd.xlane.f32.xlu0 %v6573_v12  ;;  %374 = vadd.xlane.f32.xlu1 %v6576_v13 }
  0x36   : > { %376 = vadd.xlane.f32.xlu0 %v6581_v14  ;;  %378 = vadd.xlane.f32.xlu1 %v6584_v15 }
  0xa3   : > { %v349_v21 = vpop.xlane.xlu0 %348  ;;  %v353_v22 = vpop.xlane.xlu1 %352 }
  0xa4   : > { %v381_v23 = vmul.f32 0.0078125, %v349_v21  ;;  %v383_v24 = vmul.f32 0.0078125, %v353_v22 }
  0xa6   : > { %v6605_v25 = vsub.f32 %v332_v0, %v381_v23  ;;  %v6607_v26 = vsub.f32 %v334_v1, %v383_v24  ;;  %v5844_v23 = vld [vmem:[%s9015_s1 + $0x48] ss:$12 sps:$4 sm:$0xff]  }
  0xa7   : > { %v351_v27 = vpop.xlane.xlu0 %350  ;;  %v355_v28 = vpop.xlane.xlu1 %354 }
  0xa8   : > { %v382_v29 = vmul.f32 0.0078125, %v351_v27  ;;  %v413_v30 = vmul.f32 %v6605_v25, %v6605_v25  ;;  %v384_v31 = vmul.f32 0.0078125, %v355_v28  ;;  %v415_v32 = vmul.f32 %v6607_v26, %v6607_v26 }
  0xaa   : > { %429 = vadd.xlane.f32.xlu0 %v413_v30  ;;  %v6613_v33 = vsub.f32 %v333_v2, %v382_v29  ;;  %v6615_v34 = vsub.f32 %v335_v3, %v384_v31  ;;  %v5837_v3 = vld [vmem:[%s9015_s1 + $0x64] ss:$12 sps:$4 sm:$0xff]  }
  0xab   : > { %v357_v35 = vpop.xlane.xlu0 %356  ;;  %v359_v36 = vpop.xlane.xlu1 %358  ;;  %716 = vmatprep.subr.bf16.mxu0 %v5837_v3 }
  0xac   : > { %v385_v37 = vmul.f32 0.0078125, %v357_v35  ;;  %v414_v38 = vmul.f32 %v6613_v33, %v6613_v33  ;;  %v386_v39 = vmul.f32 0.0078125, %v359_v36  ;;  %v416_v40 = vmul.f32 %v6615_v34, %v6615_v34  ;;  %v5848_v36 = vld [vmem:[%s9015_s1 + $0x30] ss:$12 sps:$4 sm:$0xff]  }
  0xae   : > { %433 = vadd.xlane.f32.xlu0 %v415_v32  ;;  %431 = vadd.xlane.f32.xlu1 %v414_v38  ;;  %v6621_v41 = vsub.f32 %v336_v4, %v385_v37  ;;  %v6623_v42 = vsub.f32 %v337_v5, %v386_v39  ;;  %v5839_v4 = vld [vmem:[%s9015_s1 + $0x80] ss:$12 sps:$4 sm:$0xff]   ;;  %v5849_v38 = vld [vmem:[%s9015_s1 + $0x1c] ss:$12 sps:$4 sm:$0xff]   ;;  %v5852_v39 = vld [vmem:[%s9015_s1 + $0x18] ss:$12 sps:$4 sm:$0xff]  }
  0xaf   : > { %v361_v43 = vpop.xlane.xlu0 %360  ;;  %v363_v44 = vpop.xlane.xlu1 %362  ;;  %5385 = vmatprep.subr.bf16.mxu1 %v5839_v4 }
  0xb0   : > { %v387_v45 = vmul.f32 0.0078125, %v361_v43  ;;  %v417_v46 = vmul.f32 %v6621_v41, %v6621_v41  ;;  %v388_v47 = vmul.f32 0.0078125, %v363_v44  ;;  %v418_v48 = vmul.f32 %v6623_v42, %v6623_v42  ;;  %5386 = vmatpush3.bf16.msra.mxu1 %v5839_v4  ;;  %v5855_v43 = vld [vmem:[%s9015_s1 + $0x20] ss:$12 sps:$4 sm:$0xff]  }
  0xb1   : > { %v5856_v44 = vld [vmem:[%s9015_s1] ss:$12 sps:$4 sm:$0xff]  }
  0xb2   : > { %435 = vadd.xlane.f32.xlu1 %v416_v40  ;;  %437 = vadd.xlane.f32.xlu0 %v417_v46  ;;  %v6630_v49 = vsub.f32 %v6551_v6, %v387_v45  ;;  %v6633_v50 = vsub.f32 %v6554_v7, %v388_v47  ;;  %v5853_v40 = vld [vmem:[%s9015_s1 + $0x4] ss:$12 sps:$4 sm:$0xff]   ;;  %v5857_v45 = vld [vmem:[%s9015_s1 + $0x8] ss:$12 sps:$4 sm:$0xff]   ;;  %v9026_v46 = vmov 0  }
  0xb3   : > { %v365_v51 = vpop.xlane.xlu0 %364  ;;  %v367_v52 = vpop.xlane.xlu1 %366  ;;  %742 = vmatprep.mubr.bf16.mxu0 %v9026_v46 }
  0xb4   : > { %v389_v53 = vmul.f32 0.0078125, %v365_v51  ;;  %v419_v54 = vmul.f32 %v6630_v49, %v6630_v49  ;;  %v390_v55 = vmul.f32 0.0078125, %v367_v52  ;;  %v420_v59 = vmul.f32 %v6633_v50, %v6633_v50 }
  0xb6   : > { %439 = vadd.xlane.f32.xlu1 %v418_v48  ;;  %441 = vadd.xlane.f32.xlu0 %v419_v54  ;;  %v6649_v60 = vsub.f32 %v6557_v8, %v389_v53  ;;  %v6652_v61 = vsub.f32 %v6560_v9, %v390_v55  ;;  %v5840_v8 = vld [vmem:[%s9015_s1 + $0x60] ss:$12 sps:$4 sm:$0xff]  }
  0xb7   : > { %v369_v62 = vpop.xlane.xlu0 %368  ;;  %v371_v63 = vpop.xlane.xlu1 %370  ;;  %717 = vmatpush1.bf16.msra.mxu0 %v5840_v8 }
  0xb8   : > { %v391_v0 = vmul.f32 0.0078125, %v369_v62  ;;  %v421_v1 = vmul.f32 %v6649_v60, %v6649_v60  ;;  %v392_v2 = vmul.f32 0.0078125, %v371_v63  ;;  %v422_v5 = vmul.f32 %v6652_v61, %v6652_v61 }
  0xba   : > { %443 = vadd.xlane.f32.xlu1 %v420_v59  ;;  %445 = vadd.xlane.f32.xlu0 %v421_v1  ;;  %v6665_v6 = vsub.f32 %v6565_v10, %v391_v0  ;;  %v6668_v7 = vsub.f32 %v6568_v11, %v392_v2  ;;  %v5841_v10 = vld [vmem:[%s9015_s1 + $0x4c] ss:$12 sps:$4 sm:$0xff]   ;;  %v5843_v11 = vld [vmem:[%s9015_s1 + $0x68] ss:$12 sps:$4 sm:$0xff]  }
  0xbb   : > { %v373_v9 = vpop.xlane.xlu0 %372  ;;  %v375_v16 = vpop.xlane.xlu1 %374  ;;  %718 = vmatprep.subr.bf16.mxu0 %v5841_v10  ;;  %5387 = vmatprep.subr.bf16.mxu1 %v5843_v11 }
  0xbc   : > { %v393_v17 = vmul.f32 0.0078125, %v373_v9  ;;  %v423_v18 = vmul.f32 %v6665_v6, %v6665_v6  ;;  %v394_v19 = vmul.f32 0.0078125, %v375_v16  ;;  %v424_v20 = vmul.f32 %v6668_v7, %v6668_v7  ;;  %719 = vmatpush1.bf16.msra.mxu0 %v5844_v23  ;;  %5388 = vmatpush3.bf16.msra.mxu1 %v5843_v11 }
  0xbe   : > { %447 = vadd.xlane.f32.xlu1 %v422_v5  ;;  %449 = vadd.xlane.f32.xlu0 %v423_v18  ;;  %v6684_v21 = vsub.f32 %v6573_v12, %v393_v17  ;;  %v6687_v22 = vsub.f32 %v6576_v13, %v394_v19  ;;  %v5845_v12 = vld [vmem:[%s9015_s1 + $0x34] ss:$12 sps:$4 sm:$0xff]   ;;  %v5847_v13 = vld [vmem:[%s9015_s1 + $0x50] ss:$12 sps:$4 sm:$0xff]  }
  0xbf   : > { %v377_v24 = vpop.xlane.xlu0 %376  ;;  %v379_v27 = vpop.xlane.xlu1 %378  ;;  %720 = vmatprep.subr.bf16.mxu0 %v5845_v12  ;;  %5389 = vmatprep.subr.bf16.mxu1 %v5847_v13 }
  0xc0   : > { %v395_v28 = vmul.f32 0.0078125, %v377_v24  ;;  %v425_v29 = vmul.f32 %v6684_v21, %v6684_v21  ;;  %v396_v30 = vmul.f32 0.0078125, %v379_v27  ;;  %v426_v31 = vmul.f32 %v6687_v22, %v6687_v22  ;;  %721 = vmatpush1.bf16.msra.mxu0 %v5848_v36  ;;  %5390 = vmatpush3.bf16.msra.mxu1 %v5847_v13 }
  0xc1   : > { %722 = vmatprep.subr.bf16.mxu0 %v5849_v38 }
  0xc2   : > { %451 = vadd.xlane.f32.xlu1 %v424_v20  ;;  %453 = vadd.xlane.f32.xlu0 %v425_v29  ;;  %v6703_v32 = vsub.f32 %v6581_v14, %v395_v28  ;;  %v6706_v35 = vsub.f32 %v6584_v15, %v396_v30  ;;  %v5851_v14 = vld [vmem:[%s9015_s1 + $0x38] ss:$12 sps:$4 sm:$0xff]  }
  0xc3   : > { %5391 = vmatprep.subr.bf16.mxu1 %v5851_v14 }
  0xc4   : > { %v427_v37 = vmul.f32 %v6703_v32, %v6703_v32  ;;  %v428_v15 = vmul.f32 %v6706_v35, %v6706_v35  ;;  %723 = vmatpush1.bf16.msra.mxu0 %v5852_v39  ;;  %5392 = vmatpush3.bf16.msra.mxu1 %v5851_v14 }
  0xc5   : > { %724 = vmatprep.subr.bf16.mxu0 %v5853_v40  ;;  %5393 = vmatprep.subr.bf16.mxu1 %v5855_v43 }
  0xc6   : > { %455 = vadd.xlane.f32.xlu1 %v426_v31  ;;  %457 = vadd.xlane.f32.xlu0 %v427_v37 }
  0xc8   : > { %725 = vmatpush1.bf16.msra.mxu0 %v5856_v44  ;;  %5394 = vmatpush3.bf16.msra.mxu1 %v5855_v43 }
  0xc9   : > { %5395 = vmatprep.subr.bf16.mxu1 %v5857_v45 }
  0xca   : > { %459 = vadd.xlane.f32.xlu1 %v428_v15 }
  0xcc   : > { %5396 = vmatpush3.bf16.msra.mxu1 %v5857_v45 }
 0x133   : > { %v430_v47 = vpop.xlane.xlu0 %429 }
 0x134   : > { %v461_v48 = vmul.f32 0.0078125, %v430_v47 }
 0x136   : > { %v477_v51 = vadd.f32 1e-05, %v461_v48 }
 0x137   : > { %v432_v52 = vpop.xlane.xlu1 %431  ;;  %v434_v53 = vpop.xlane.xlu0 %433 }
 0x138   : > { %v462_v54 = vmul.f32 0.0078125, %v432_v52  ;;  %v463_v55 = vmul.f32 0.0078125, %v434_v53  ;;  %5906 = vrsqrt.f32 %v477_v51 }
 0x13a   : > { %v478_v56 = vadd.f32 1e-05, %v462_v54  ;;  %v479_v57 = vadd.f32 1e-05, %v463_v55 }
 0x13b   : > { %v436_v58 = vpop.xlane.xlu1 %435  ;;  %v438_v59 = vpop.xlane.xlu0 %437 }
 0x13c   : > { %5908 = vrsqrt.f32 %v478_v56  ;;  %v464_v62 = vmul.f32 0.0078125, %v436_v58  ;;  %v465_v63 = vmul.f32 0.0078125, %v438_v59 }
 0x13d   : > { %5910 = vrsqrt.f32 %v479_v57 }
 0x13e   : > { %v480_v0 = vadd.f32 1e-05, %v464_v62  ;;  %v481_v1 = vadd.f32 1e-05, %v465_v63 }
 0x13f   : > { %v440_v2 = vpop.xlane.xlu1 %439  ;;  %v442_v3 = vpop.xlane.xlu0 %441 }
 0x140   : > { %5912 = vrsqrt.f32 %v480_v0  ;;  %v466_v4 = vmul.f32 0.0078125, %v440_v2  ;;  %v467_v5 = vmul.f32 0.0078125, %v442_v3 }
 0x141   : > { %5914 = vrsqrt.f32 %v481_v1 }
 0x142   : > { %v482_v8 = vadd.f32 1e-05, %v466_v4  ;;  %v483_v9 = vadd.f32 1e-05, %v467_v5 }
 0x143   : > { %v444_v16 = vpop.xlane.xlu1 %443  ;;  %v446_v17 = vpop.xlane.xlu0 %445 }
 0x144   : > { %5916 = vrsqrt.f32 %v482_v8  ;;  %v468_v18 = vmul.f32 0.0078125, %v444_v16  ;;  %v469_v19 = vmul.f32 0.0078125, %v446_v17 }
 0x145   : > { %v5907_v10 = vpop.eup %5906  ;;  %5918 = vrsqrt.f32 %v483_v9 }
 0x146   : > { %v484_v11 = vadd.f32 1e-05, %v468_v18  ;;  %v485_v20 = vadd.f32 1e-05, %v469_v19  ;;  %v509_v30 = vmul.f32 %v5907_v10, %v6605_v25 }
 0x147   : > { %v448_v23 = vpop.xlane.xlu1 %447  ;;  %v450_v24 = vpop.xlane.xlu0 %449 }
 0x148   : > { %5920 = vrsqrt.f32 %v484_v11  ;;  %v470_v27 = vmul.f32 0.0078125, %v448_v23  ;;  %v471_v28 = vmul.f32 0.0078125, %v450_v24  ;;  %v565_v24 = vld [vmem:[%s9016_s2] sm:$0x7] }
 0x149   : > { %v5909_v29 = vpop.eup %5908  ;;  %5922 = vrsqrt.f32 %v485_v20 }
 0x14a   : > { %v5911_v12 = vpop.eup %5910  ;;  %v486_v13 = vadd.f32 1e-05, %v470_v27  ;;  %v487_v31 = vadd.f32 1e-05, %v471_v28  ;;  %v510_v36 = vmul.f32 %v5909_v29, %v6613_v33 }
 0x14b   : > { %v452_v37 = vpop.xlane.xlu1 %451  ;;  %v454_v38 = vpop.xlane.xlu0 %453  ;;  %v511_v43 = vmul.f32 %v5911_v12, %v6607_v26 }
 0x14c   : > { %5924 = vrsqrt.f32 %v486_v13  ;;  %v472_v14 = vmul.f32 0.0078125, %v452_v37  ;;  %v473_v15 = vmul.f32 0.0078125, %v454_v38  ;;  %v525_v39 = vpack.c.bf16 %v510_v36, %v509_v30 }
 0x14d   : > { %v5913_v40 = vpop.eup %5912  ;;  %5926 = vrsqrt.f32 %v487_v31 }
 0x14e   : > { %v5915_v44 = vpop.eup %5914  ;;  %v488_v45 = vadd.f32 1e-05, %v472_v14  ;;  %v489_v47 = vadd.f32 1e-05, %v473_v15  ;;  %743 = vmatmul.mubr.bf16.vlgmr.msra.gmra.mxu0 %v525_v39  ;;  %5397 = vmatprep.mubr.bf16.mxu1 %v525_v39  ;;  %v512_v25 = vmul.f32 %v5913_v40, %v6615_v34 }
 0x14f   : > { %v456_v48 = vpop.xlane.xlu1 %455  ;;  %v458_v51 = vpop.xlane.xlu0 %457  ;;  %752 = vmatprep.mubr.bf16.mxu0 %v9026_v46  ;;  %v513_v55 = vmul.f32 %v5915_v44, %v6621_v41 }
 0x150   : > { %5928 = vrsqrt.f32 %v488_v45  ;;  %v474_v33 = vmul.f32 0.0078125, %v456_v48  ;;  %v475_v52 = vmul.f32 0.0078125, %v458_v51  ;;  %v526_v53 = vpack.c.bf16 %v512_v25, %v511_v43 }
 0x151   : > { %v5917_v54 = vpop.eup %5916  ;;  %5930 = vrsqrt.f32 %v489_v47 }
 0x152   : > { %v490_v26 = vadd.f32 1e-05, %v474_v33  ;;  %v491_v56 = vadd.f32 1e-05, %v475_v52  ;;  %5398 = vmatmul.mubr.bf16.vlgmr.msra.gmra.mxu1 %v526_v53  ;;  %v514_v57 = vmul.f32 %v5917_v54, %v6623_v42  ;;  %v5919_v58 = vpop.eup %5918 }
 0x153   : > { %v460_v59 = vpop.xlane.xlu1 %459  ;;  %v515_v1 = vmul.f32 %v5919_v58, %v6630_v49 }
 0x154   : > { %5932 = vrsqrt.f32 %v490_v26  ;;  %v476_v34 = vmul.f32 0.0078125, %v460_v59  ;;  %v527_v62 = vpack.c.bf16 %v514_v57, %v513_v55 }
 0x155   : > { %v5921_v63 = vpop.eup %5920  ;;  %5934 = vrsqrt.f32 %v491_v56 }
 0x156   : > { %v492_v0 = vadd.f32 1e-05, %v476_v34  ;;  %753 = vmatmul.mubr.bf16.gmra.mxu0 %v526_v53  ;;  %5401 = vmatprep.mubr.bf16.mxu1 %v527_v62  ;;  %v516_v41 = vmul.f32 %v5921_v63, %v6633_v50  ;;  %v5923_v2 = vpop.eup %5922 }
 0x157   : > { %762 = vmatprep.mubr.bf16.mxu0 %v9026_v46  ;;  %v517_v4 = vmul.f32 %v5923_v2, %v6649_v60 }
 0x158   : > { %5936 = vrsqrt.f32 %v492_v0  ;;  %v528_v3 = vpack.c.bf16 %v516_v41, %v515_v1 }
 0x159   : > { %v5925_v42 = vpop.eup %5924 }
 0x15a   : > { %5402 = vmatmul.mubr.bf16.gmra.mxu1 %v528_v3  ;;  %v518_v5 = vmul.f32 %v5925_v42, %v6652_v61  ;;  %v5927_v8 = vpop.eup %5926 }
 0x15b   : > { %v519_v49 = vmul.f32 %v5927_v8, %v6665_v6 }
 0x15c   : > { %v529_v9 = vpack.c.bf16 %v518_v5, %v517_v4 }
 0x15d   : > { %v5929_v16 = vpop.eup %5928 }
 0x15e   : > { %763 = vmatmul.mubr.bf16.gmra.mxu0 %v527_v62  ;;  %5405 = vmatprep.mubr.bf16.mxu1 %v529_v9  ;;  %v520_v50 = vmul.f32 %v5929_v16, %v6668_v7  ;;  %v5931_v17 = vpop.eup %5930 }
 0x15f   : > { %772 = vmatprep.mubr.bf16.mxu0 %v9026_v46  ;;  %v521_v10 = vmul.f32 %v5931_v17, %v6684_v21  ;;  %v567_v21 = vlaneseq }
 0x160   : > { %v530_v18 = vpack.c.bf16 %v520_v50, %v519_v49 }
 0x161   : > { %v5933_v19 = vpop.eup %5932 }
 0x162   : > { %5406 = vmatmul.mubr.bf16.gmra.mxu1 %v530_v18  ;;  %v522_v60 = vmul.f32 %v5933_v19, %v6687_v22  ;;  %v5935_v61 = vpop.eup %5934  ;;  %v6760_v22 = vshrl.u32 %v567_v21, 7 }
 0x163   : > { %v523_v23 = vmul.f32 %v5935_v61, %v6703_v32 }
 0x164   : > { %v531_v11 = vpack.c.bf16 %v522_v60, %v521_v10  ;;  %9059 = vst [vmem:[#allocation5_spill] sm:$0xff] %v6760_v22  ;;  %v9024_v32 = vsub.s32 1, %v6760_v22  ;;  %v577_v5 = vsub.s32 2, %v6760_v22 }
 0x165   : > { %v5937_v20 = vpop.eup %5936 }
 0x166   : > { %773 = vmatmul.mubr.bf16.gmra.mxu0 %v528_v3  ;;  %5409 = vmatprep.mubr.bf16.mxu1 %v531_v11  ;;  %v524_v6 = vmul.f32 %v5937_v20, %v6706_v35  ;;  %v9025_v35 = vsub.s32 0, %v6760_v22  ;;  %v6769_v27 = vrot.slane %v565_v24, %v9024_v32  ;;  %v6820_v17 = vrot.slane %v565_v24, %v577_v5 }
 0x167   : > { %782 = vmatprep.mubr.bf16.mxu0 %v9026_v46 }
 0x168   : > { %v532_v7 = vpack.c.bf16 %v524_v6, %v523_v23  ;;  %v6773_v29 = vrot.slane %v565_v24, %v9025_v35 }
 0x16a   : > { %5410 = vmatmul.mubr.bf16.gmra.mxu1 %v532_v7 }
 0x16e   : > { %783 = vmatmul.mubr.bf16.gmra.mxu0 %v529_v9 }
 0x16f   : > { %792 = vmatprep.mubr.bf16.mxu0 %v9026_v46 }
 0x176   : > { %793 = vmatmul.mubr.bf16.gmra.mxu0 %v530_v18 }
 0x177   : > { %802 = vmatprep.mubr.bf16.mxu0 %v9026_v46 }
 0x17e   : > { %803 = vmatmul.mubr.bf16.gmra.mxu0 %v531_v11 }
 0x17f   : > { %812 = vmatprep.mubr.bf16.mxu0 %v9026_v46 }
 0x186   : > { %813 = vmatmul.mubr.bf16.gmra.mxu0 %v532_v7 }
 0x20e   : > { %v744_v28 = vpop.f32.mrf.mxu0 }
 0x20f   : > { %v745_v36 = vadd.f32 %v744_v28, %v6773_v29 }
 0x210   : > { %v746_v30 = vpop.f32.mrf.mxu0 }
 0x211   : > { %v747_v12 = vadd.f32 %v746_v30, %v6769_v27 }
 0x212   : > { %v748_v13 = vpop.f32.mrf.mxu0  ;;  %v6776_v31 = vpop.f32.mrf.mxu1 }
 0x213   : > { %v749_v37 = vadd.f32 %v748_v13, %v6773_v29 }
 0x214   : > { %v750_v38 = vpop.f32.mrf.mxu0  ;;  %v6780_v14 = vpop.f32.mrf.mxu1 }
 0x215   : > { %v6782_v15 = vpack.c.bf16 %v749_v37, %v745_v36  ;;  %v751_v39 = vadd.f32 %v750_v38, %v6769_v27 }
 0x216   : > { %v754_v40 = vpop.f32.mrf.mxu0  ;;  %v6785_v43 = vpop.f32.mrf.mxu1 }
 0x217   : > { %v6787_v44 = vpack.c.bf16 %v751_v39, %v747_v12  ;;  %v755_v45 = vadd.f32 %v754_v40, %v6773_v29  ;;  %5429 = vmatprep.mubr.msk.bf16.mxu0 %vm960_vm0, %v6782_v15 }
 0x218   : > { %v6792_v47 = vpop.f32.mrf.mxu0  ;;  %v6794_v25 = vpop.f32.mrf.mxu1 }
 0x21a   : > { %v758_v48 = vpop.f32.mrf.mxu0  ;;  %v6796_v51 = vpop.f32.mrf.mxu1 }
 0x21b   : > { %v759_v33 = vadd.f32 %v758_v48, %v6773_v29 }
 0x21c   : > { %v6799_v52 = vpop.f32.mrf.mxu0  ;;  %v6801_v53 = vpop.f32.mrf.mxu1 }
 0x21d   : > { %v6803_v54 = vpack.c.bf16 %v759_v33, %v755_v45 }
 0x21e   : > { %v764_v55 = vpop.f32.mrf.mxu0  ;;  %v5404_v26 = vpop.f32.mrf.mxu1 }
 0x21f   : > { %v765_v56 = vadd.f32 %v764_v55, %v6773_v29 }
 0x220   : > { %v6806_v57 = vpop.f32.mrf.mxu0  ;;  %v876_v58 = vpop.f32.mrf.mxu1 }
 0x221   : > { %v877_v5 = vadd.f32 %v876_v58, %v6820_v17  ;;  %v869_v58 = vadd.f32 %v6785_v43, %v6820_v17 }
 0x222   : > { %v768_v59 = vpop.f32.mrf.mxu0  ;;  %v5407_v34 = vpop.f32.mrf.mxu1 }
 0x223   : > { %v769_v62 = vadd.f32 %v768_v59, %v6773_v29  ;;  %v898_v36 = vadd.f32 %v5407_v34, %v6820_v17 }
 0x224   : > { %v6809_v63 = vpop.f32.mrf.mxu0  ;;  %v889_v0 = vpop.f32.mrf.mxu1 }
 0x225   : > { %v6811_v1 = vpack.c.bf16 %v769_v62, %v765_v56  ;;  %v890_v33 = vadd.f32 %v889_v0, %v6820_v17  ;;  %v885_v56 = vadd.f32 %v5404_v26, %v6820_v17 }
 0x226   : > { %v774_v41 = vpop.f32.mrf.mxu0  ;;  %v5408_v2 = vpop.f32.mrf.mxu1 }
 0x227   : > { %v775_v3 = vadd.f32 %v774_v41, %v6773_v29  ;;  %v901_v28 = vadd.f32 %v5408_v2, %v6820_v17  ;;  %v882_v41 = vadd.f32 %v6796_v51, %v6820_v17  ;;  %v874_v51 = vadd.f32 %v6801_v53, %v6820_v17 }
 0x228   : > { %v6814_v42 = vpop.f32.mrf.mxu0  ;;  %v892_v4 = vpop.f32.mrf.mxu1  ;;  %v866_v53 = vadd.f32 %v6776_v31, %v6820_v17  ;;  %v858_v31 = vadd.f32 %v6780_v14, %v6820_v17 }
 0x229   : > { %v6845_v39 = vpack.c.bf16 %v901_v28, %v898_v36  ;;  %v893_v40 = vadd.f32 %v892_v4, %v6820_v17  ;;  %v6864_v26 = vpack.c.bf16 %v885_v56, %v882_v41 }
 0x22a   : > { %v778_v8 = vpop.f32.mrf.mxu0  ;;  %v5411_v9 = vpop.f32.mrf.mxu1  ;;  %v6889_v43 = vpack.c.bf16 %v869_v58, %v866_v53 }
 0x22b   : > { %v779_v16 = vadd.f32 %v778_v8, %v6773_v29  ;;  %v914_v60 = vadd.f32 %v5411_v9, %v6820_v17  ;;  %9061 = vst [vmem:[#allocation7_spill] sm:$0xff] %v6845_v39  ;;  %v6853_v59 = vpack.c.bf16 %v893_v40, %v890_v33  ;;  %9062 = vst [vmem:[#allocation8_spill] sm:$0xff] %v6864_v26 }
 0x22c   : > { %v6818_v49 = vpop.f32.mrf.mxu0  ;;  %v905_v50 = vpop.f32.mrf.mxu1  ;;  %9064 = vst [vmem:[#allocation10_spill] sm:$0xff] %v6889_v43 }
 0x22d   : > { %v6822_v18 = vpack.c.bf16 %v779_v16, %v775_v3  ;;  %v906_v6 = vadd.f32 %v905_v50, %v6820_v17  ;;  %v781_v41 = vadd.f32 %v6818_v49, %v6769_v27  ;;  %v761_v49 = vadd.f32 %v6799_v52, %v6769_v27 }
 0x22e   : > { %v784_v19 = vpop.f32.mrf.mxu0  ;;  %v5412_v10 = vpop.f32.mrf.mxu1  ;;  %v986_v52 = vsel %vm960_vm0, %v6787_v44, 0 }
 0x22f   : > { %v785_v61 = vadd.f32 %v784_v19, %v6773_v29  ;;  %v917_v11 = vadd.f32 %v5412_v10, %v6820_v17  ;;  %v6878_v19 = vpack.c.bf16 %v877_v5, %v874_v51 }
 0x230   : > { %v6827_v20 = vpop.f32.mrf.mxu0  ;;  %v908_v23 = vpop.f32.mrf.mxu1 }
 0x231   : > { %v6830_v7 = vpack.c.bf16 %v917_v11, %v914_v60  ;;  %v909_v21 = vadd.f32 %v908_v23, %v6820_v17  ;;  %9063 = vst [vmem:[#allocation9_spill] sm:$0xff] %v6878_v19  ;;  %v787_v56 = vadd.f32 %v6827_v20, %v6769_v27 }
 0x232   : > { %v788_v24 = vpop.f32.mrf.mxu0 }
 0x233   : > { %9060 = vst [vmem:[#allocation6_spill] sm:$0xff] %v6830_v7  ;;  %v6834_v30 = vpack.c.bf16 %v909_v21, %v906_v6  ;;  %v789_v12 = vadd.f32 %v788_v24, %v6773_v29  ;;  %5445 = vmatprep.subr.bf16.mxu1 %v6830_v7  ;;  %v861_v21 = vadd.f32 %v6794_v25, %v6820_v17 }
 0x234   : > { %v6838_v13 = vpop.f32.mrf.mxu0  ;;  %5446 = vmatpush3.bf16.msra.mxu1 %v6830_v7 }
 0x235   : > { %v6842_v37 = vpack.c.bf16 %v789_v12, %v785_v61  ;;  %5447 = vmatprep.subr.bf16.mxu1 %v6834_v30 }
 0x236   : > { %v794_v38 = vpop.f32.mrf.mxu0 }
 0x237   : > { %v795_v45 = vadd.f32 %v794_v38, %v6773_v29  ;;  %v6902_v38 = vpack.c.bf16 %v861_v21, %v858_v31 }
 0x238   : > { %v796_v48 = vpop.f32.mrf.mxu0  ;;  %5448 = vmatpush3.bf16.msra.mxu1 %v6834_v30 }
 0x239   : > { %5449 = vmatprep.subr.bf16.mxu1 %v6845_v39  ;;  %v797_v2 = vadd.f32 %v796_v48, %v6769_v27  ;;  %9065 = vst [vmem:[#allocation11_spill] sm:$0xff] %v6902_v38 }
 0x23a   : > { %v798_v55 = vpop.f32.mrf.mxu0 }
 0x23b   : > { %v799_v34 = vadd.f32 %v798_v55, %v6773_v29  ;;  %v791_v55 = vadd.f32 %v6838_v13, %v6769_v27  ;;  %v771_v13 = vadd.f32 %v6809_v63, %v6769_v27 }
 0x23c   : > { %v800_v62 = vpop.f32.mrf.mxu0  ;;  %5450 = vmatpush3.bf16.msra.mxu1 %v6845_v39 }
 0x23d   : > { %v6860_v3 = vpack.c.bf16 %v799_v34, %v795_v45  ;;  %v801_v0 = vadd.f32 %v800_v62, %v6769_v27  ;;  %5451 = vmatprep.subr.bf16.mxu1 %v6853_v59  ;;  %v6930_v34 = vpack.c.bf16 %v791_v55, %v787_v56 }
 0x23e   : > { %v804_v4 = vpop.f32.mrf.mxu0 }
 0x23f   : > { %v6867_v8 = vpack.c.bf16 %v801_v0, %v797_v2  ;;  %v805_v9 = vadd.f32 %v804_v4, %v6773_v29  ;;  %v777_v2 = vadd.f32 %v6814_v42, %v6769_v27  ;;  %v998_v20 = vsel %vm960_vm0, %v6930_v34, 0 }
 0x240   : > { %v806_v16 = vpop.f32.mrf.mxu0  ;;  %5452 = vmatpush3.bf16.msra.mxu1 %v6853_v59  ;;  %v767_v4 = vadd.f32 %v6806_v57, %v6769_v27 }
 0x241   : > { %1405 = vrot.lane.b32.xlu0 %v6867_v8, %s6433_s17  ;;  %5453 = vmatprep.subr.bf16.mxu1 %v6864_v26  ;;  %v807_v61 = vadd.f32 %v806_v16, %v6769_v27  ;;  %v1001_v62 = vsel %vm960_vm0, %v6867_v8, 0  ;;  %v6940_v0 = vpack.c.bf16 %v781_v41, %v777_v2 }
 0x242   : > { %v808_v50 = vpop.f32.mrf.mxu0  ;;  %v6950_v5 = vpack.c.bf16 %v771_v13, %v767_v4 }
 0x243   : > { %v809_v10 = vadd.f32 %v808_v50, %v6773_v29  ;;  %v995_v42 = vsel %vm960_vm0, %v6940_v0, 0 }
 0x244   : > { %v810_v60 = vpop.f32.mrf.mxu0  ;;  %5454 = vmatpush3.bf16.msra.mxu1 %v6864_v26  ;;  %v992_v57 = vsel %vm960_vm0, %v6950_v5, 0 }
 0x245   : > { %v6885_v11 = vpack.c.bf16 %v809_v10, %v805_v9  ;;  %v811_v23 = vadd.f32 %v810_v60, %v6769_v27  ;;  %5455 = vmatprep.subr.bf16.mxu1 %v6878_v19  ;;  %v757_v9 = vadd.f32 %v6792_v47, %v6769_v27 }
 0x246   : > { %v814_v6 = vpop.f32.mrf.mxu0 }
 0x247   : > { %v6893_v24 = vpack.c.bf16 %v811_v23, %v807_v61  ;;  %v815_v28 = vadd.f32 %v814_v6, %v6773_v29  ;;  %v6960_v16 = vpack.c.bf16 %v761_v49, %v757_v9 }
 0x248   : > { %v816_v12 = vpop.f32.mrf.mxu0  ;;  %5456 = vmatpush3.bf16.msra.mxu1 %v6878_v19 }
 0x249   : > { %1407 = vrot.lane.b32.xlu1 %v6893_v24, %s6433_s17  ;;  %5457 = vmatprep.subr.bf16.mxu1 %v6889_v43  ;;  %v817_v45 = vadd.f32 %v816_v12, %v6769_v27  ;;  %v1004_v17 = vsel %vm960_vm0, %v6893_v24, 0  ;;  %v989_v63 = vsel %vm960_vm0, %v6960_v16, 0 }
 0x24a   : > { %v818_v36 = vpop.f32.mrf.mxu0 }
 0x24b   : > { %v819_v25 = vadd.f32 %v818_v36, %v6773_v29 }
 0x24c   : > { %v820_v40 = vpop.f32.mrf.mxu0  ;;  %5458 = vmatpush3.bf16.msra.mxu1 %v6889_v43 }
 0x24d   : > { %v6907_v48 = vpack.c.bf16 %v819_v25, %v815_v28  ;;  %v821_v33 = vadd.f32 %v820_v40, %v6769_v27  ;;  %5459 = vmatprep.subr.bf16.mxu1 %v6902_v38 }
 0x24f   : > { %v6911_v14 = vpack.c.bf16 %v821_v33, %v817_v45 }
 0x250   : > { %5460 = vmatpush3.bf16.msra.mxu1 %v6902_v38 }
 0x251   : > { %1409 = vrot.lane.b32.xlu0 %v6911_v14, %s6433_s17  ;;  %5749 = vmatprep.subr.msk.bf16.mxu0 %vm960_vm0, %v6911_v14  ;;  %v1007_v29 = vsel %vm960_vm0, %v6911_v14, 0 }
 0x252   : > { %5414 = vmatpush3.bf16.xpose.msra.mxu0 %v1007_v29 }
 0x253   : > { %5750 = vmatprep.subr.msk.bf16.mxu0 %vm960_vm0, %v6893_v24 }
 0x25a   : > { %5416 = vmatpush3.bf16.xpose.msra.mxu0 %v1004_v17 }
 0x25b   : > { %5751 = vmatprep.subr.msk.bf16.mxu0 %vm960_vm0, %v6867_v8 }
 0x262   : > { %5418 = vmatpush3.bf16.xpose.msra.mxu0 %v1001_v62 }
 0x263   : > { %5752 = vmatprep.subr.msk.bf16.mxu0 %vm960_vm0, %v6930_v34 }
 0x26a   : > { %5420 = vmatpush3.bf16.xpose.msra.mxu0 %v998_v20 }
 0x26b   : > { %5753 = vmatprep.subr.msk.bf16.mxu0 %vm960_vm0, %v6940_v0 }
 0x272   : > { %5422 = vmatpush3.bf16.xpose.msra.mxu0 %v995_v42 }
 0x273   : > { %5754 = vmatprep.subr.msk.bf16.mxu0 %vm960_vm0, %v6950_v5 }
 0x27a   : > { %5424 = vmatpush3.bf16.xpose.msra.mxu0 %v992_v57 }
 0x27b   : > { %5755 = vmatprep.subr.msk.bf16.mxu0 %vm960_vm0, %v6960_v16 }
 0x282   : > { %5426 = vmatpush3.bf16.xpose.msra.mxu0 %v989_v63 }
 0x283   : > { %5756 = vmatprep.subr.msk.bf16.mxu0 %vm960_vm0, %v6787_v44 }
 0x28a   : > { %5428 = vmatpush3.bf16.xpose.msra.mxu0 %v986_v52 }
 0x291   : > { %5430 = vmatmul.mubr.msk.bf16.vlgmr.msra.gmra.mxu0 %vm960_vm0, %v6803_v54 }
 0x292   : > { %5433 = vmatprep.mubr.msk.bf16.mxu0 %vm960_vm0, %v6811_v1 }
 0x299   : > { %5434 = vmatmul.mubr.msk.bf16.gmra.mxu0 %vm960_vm0, %v6822_v18 }
 0x29a   : > { %5437 = vmatprep.mubr.msk.bf16.mxu0 %vm960_vm0, %v6842_v37 }
 0x2a1   : > { %5438 = vmatmul.mubr.msk.bf16.gmra.mxu0 %vm960_vm0, %v6860_v3 }
 0x2a2   : > { %5441 = vmatprep.mubr.msk.bf16.mxu0 %vm960_vm0, %v6885_v11 }
 0x2a9   : > { %5442 = vmatmul.mubr.msk.bf16.gmra.mxu0 %vm960_vm0, %v6907_v48 }
 0x2b3   : > { %v6986_v27 = vpop.permute.xlu0 %1405 }
 0x2bb   : > { %v1408_v45 = vpop.permute.xlu1 %1407 }
 0x2c3   : > { %v6988_v47 = vpop.permute.xlu0 %1409 }
 0x2c4   : > { %5757 = vmatprep.subr.msk.bf16.mxu1 %vm960_vm0, %v6988_v47 }
 0x351   : > { %v5431_v51 = vpop.f32.mrf.mxu0 }
 0x352   : > { %1110 = vmax.xlane.f32.xlu0 %v5431_v51 }
 0x353   : > { %v1043_v50 = vpop.f32.mrf.mxu0 }
 0x355   : > { %v5432_v58 = vpop.f32.mrf.mxu0 }
 0x356   : > { %1106 = vmax.xlane.f32.xlu0 %v1043_v50  ;;  %1112 = vmax.xlane.f32.xlu1 %v5432_v58 }
 0x357   : > { %v1046_v10 = vpop.f32.mrf.mxu0 }
 0x359   : > { %v6992_v60 = vpop.f32.mrf.mxu0 }
 0x35a   : > { %1108 = vmax.xlane.f32.xlu1 %v1046_v10 }
 0x35b   : > { %v6994_v53 = vpop.f32.mrf.mxu0 }
 0x35d   : > { %v6996_v61 = vpop.f32.mrf.mxu0 }
 0x35e   : > { %1118 = vmax.xlane.f32.xlu1 %v6992_v60 }
 0x35f   : > { %v6999_v23 = vpop.f32.mrf.mxu0 }
 0x361   : > { %v7001_v6 = vpop.f32.mrf.mxu0 }
 0x362   : > { %1114 = vmax.xlane.f32.xlu1 %v6994_v53 }
 0x363   : > { %v7004_v21 = vpop.f32.mrf.mxu0 }
 0x365   : > { %v7007_v28 = vpop.f32.mrf.mxu0 }
 0x366   : > { %1120 = vmax.xlane.f32.xlu1 %v6996_v61 }
 0x367   : > { %v7012_v12 = vpop.f32.mrf.mxu0 }
 0x369   : > { %v7015_v31 = vpop.f32.mrf.mxu0 }
 0x36a   : > { %1116 = vmax.xlane.f32.xlu1 %v6999_v23 }
 0x36b   : > { %v7018_v36 = vpop.f32.mrf.mxu0 }
 0x36c   : > { %1403 = vrot.lane.b32.xlu0 %v6930_v34, %s6433_s17 }
 0x36d   : > { %v7021_v25 = vpop.f32.mrf.mxu0 }
 0x36e   : > { %1124 = vmax.xlane.f32.xlu1 %v7012_v12 }
 0x36f   : > { %v7024_v40 = vpop.f32.mrf.mxu0 }
 0x372   : > { %1134 = vmax.xlane.f32.xlu1 %v7015_v31 }
 0x376   : > { %1130 = vmax.xlane.f32.xlu1 %v7018_v36 }
 0x37a   : > { %1136 = vmax.xlane.f32.xlu1 %v7021_v25 }
 0x37e   : > { %1132 = vmax.xlane.f32.xlu1 %v7024_v40 }
 0x38b   : > { %1126 = vmax.xlane.f32.xlu0 %v7001_v6 }
 0x38f   : > { %1122 = vmax.xlane.f32.xlu0 %v7004_v21  ;;  %1401 = vrot.lane.b32.xlu1 %v6940_v0, %s6433_s17 }
 0x393   : > { %1128 = vmax.xlane.f32.xlu0 %v7007_v28  ;;  %1373 = vrot.lane.b32.xlu1 %v6803_v54, %s6433_s17 }
 0x397   : > { %1377 = vrot.lane.b32.xlu1 %v6822_v18, %s6433_s17 }
 0x39b   : > { %1381 = vrot.lane.b32.xlu1 %v6860_v3, %s6433_s17 }
 0x39f   : > { %1385 = vrot.lane.b32.xlu1 %v6907_v48, %s6433_s17 }
 0x3a3   : > { %1712 = vrot.lane.b32.xlu1 %v6834_v30, %s6433_s17 }
 0x3a7   : > { %1710 = vrot.lane.b32.xlu1 %v6845_v39, %s6433_s17 }
 0x3a9   : > { %1399 = vrot.lane.b32.xlu0 %v6950_v5, %s6433_s17 }
 0x3ab   : > { %1708 = vrot.lane.b32.xlu1 %v6853_v59, %s6433_s17 }
 0x3ad   : > { %1397 = vrot.lane.b32.xlu0 %v6960_v16, %s6433_s17 }
 0x3af   : > { %1704 = vrot.lane.b32.xlu1 %v6878_v19, %s6433_s17 }
 0x3b1   : > { %1395 = vrot.lane.b32.xlu0 %v6787_v44, %s6433_s17 }
 0x3b5   : > { %1371 = vrot.lane.b32.xlu0 %v6782_v15, %s6433_s17 }
 0x3b9   : > { %1375 = vrot.lane.b32.xlu0 %v6811_v1, %s6433_s17 }
 0x3bd   : > { %1379 = vrot.lane.b32.xlu0 %v6842_v37, %s6433_s17 }
 0x3c1   : > { %1383 = vrot.lane.b32.xlu0 %v6885_v11, %s6433_s17 }
 0x3c5   : > { %1714 = vrot.lane.b32.xlu0 %v6830_v7, %s6433_s17 }
 0x3c9   : > { %1706 = vrot.lane.b32.xlu0 %v6864_v26, %s6433_s17 }
 0x3db   : > { %v1111_v33 = vpop.xlane.xlu0 %1110 }
 0x3dc   : > { %v1140_v62 = vsub.f32 %v5431_v51, %v1111_v33 }
 0x3de   : > { %v1158_v4 = vmul.f32 1.442695, %v1140_v62 }
 0x3df   : > { %v1113_v29 = vpop.xlane.xlu1 %1112  ;;  %v1107_v17 = vpop.xlane.xlu0 %1106 }
 0x3e0   : > { %v1141_v55 = vsub.f32 %v5432_v58, %v1113_v29  ;;  %v1138_v56 = vsub.f32 %v1043_v50, %v1107_v17 }
 0x3e2   : > { %v1160_v41 = vmul.f32 1.442695, %v1141_v55  ;;  %v1154_v2 = vmul.f32 1.442695, %v1138_v56 }
 0x3e3   : > { %v1109_v20 = vpop.xlane.xlu1 %1108 }
 0x3e4   : > { %v1139_v13 = vsub.f32 %v1046_v10, %v1109_v20  ;;  %5938 = vpow2.f32 %v1160_v41 }
 0x3e5   : > { %5940 = vpow2.f32 %v1154_v2 }
 0x3e6   : > { %v1156_v42 = vmul.f32 1.442695, %v1139_v13  ;;  %v1454_v13 = vsel %vm960_vm0, %v1408_v45, 0 }
 0x3e7   : > { %v1119_v49 = vpop.xlane.xlu1 %1118 }
 0x3e8   : > { %5942 = vpow2.f32 %v1156_v42  ;;  %v1144_v50 = vsub.f32 %v6992_v60, %v1119_v49 }
 0x3e9   : > { %5944 = vpow2.f32 %v1158_v4 }
 0x3ea   : > { %v1166_v56 = vmul.f32 1.442695, %v1144_v50 }
 0x3eb   : > { %v1115_v9 = vpop.xlane.xlu1 %1114 }
 0x3ec   : > { %v1142_v57 = vsub.f32 %v6994_v53, %v1115_v9 }
 0x3ee   : > { %v1162_v51 = vmul.f32 1.442695, %v1142_v57 }
 0x3ef   : > { %v1121_v63 = vpop.xlane.xlu1 %1120 }
 0x3f0   : > { %v1145_v52 = vsub.f32 %v6996_v61, %v1121_v63  ;;  %5946 = vpow2.f32 %v1162_v51 }
 0x3f1   : > { %v7069_v58 = vpop.eup %5938 }
 0x3f2   : > { %v1168_v33 = vmul.f32 1.442695, %v1145_v52  ;;  %v7071_v29 = vpop.eup %5940  ;;  %v1404_v52 = vpop.permute.xlu0 %1403 }
 0x3f3   : > { %v1117_v10 = vpop.xlane.xlu1 %1116  ;;  %v1448_v51 = vsel %vm960_vm0, %v1404_v52, 0 }
 0x3f4   : > { %v1143_v17 = vsub.f32 %v6999_v23, %v1117_v10  ;;  %5948 = vpow2.f32 %v1168_v33  ;;  %v1457_v23 = vsel %vm960_vm0, %v6988_v47, 0 }
 0x3f5   : > { %v7074_v55 = vpop.eup %5942 }
 0x3f6   : > { %v7076_v62 = vpop.eup %5944  ;;  %v1164_v53 = vmul.f32 1.442695, %v1143_v17  ;;  %v1234_v61 = vpack.c.bf16 %v7074_v55, %v7071_v29 }
 0x3f7   : > { %v1125_v60 = vpop.xlane.xlu1 %1124  ;;  %v1235_v41 = vpack.c.bf16 %v7069_v58, %v7076_v62 }
 0x3f8   : > { %5950 = vpow2.f32 %v1164_v53  ;;  %5461 = vmatprep.mubr.bf16.mxu1 %v1234_v61  ;;  %v1147_v10 = vsub.f32 %v7012_v12, %v1125_v60 }
 0x3f9   : > { %5952 = vpow2.f32 %v1166_v56  ;;  %5462 = vmatmul.mubr.bf16.vlgmr.msra.gmra.mxu1 %v1235_v41 }
 0x3fa   : > { %5478 = vmatpush3.bf16.xpose.msra.mxu1 %v1457_v23  ;;  %v1172_v53 = vmul.f32 1.442695, %v1147_v10 }
 0x3fb   : > { %5758 = vmatprep.subr.msk.bf16.mxu1 %vm960_vm0, %v1408_v45  ;;  %v1135_v2 = vpop.xlane.xlu1 %1134  ;;  %v1451_v45 = vsel %vm960_vm0, %v6986_v27, 0 }
 0x3fc   : > { %5954 = vpow2.f32 %v1172_v53 }
 0x3fd   : > { %v7086_v4 = vpop.eup %5946 }
 0x3ff   : > { %v1131_v20 = vpop.xlane.xlu1 %1130 }
 0x401   : > { %v7090_v42 = vpop.eup %5948 }
 0x402   : > { %5480 = vmatpush3.bf16.xpose.msra.mxu1 %v1454_v13  ;;  %v1150_v13 = vsub.f32 %v7018_v36, %v1131_v20 }
 0x403   : > { %5759 = vmatprep.subr.msk.bf16.mxu1 %vm960_vm0, %v6986_v27  ;;  %v1137_v47 = vpop.xlane.xlu1 %1136 }
 0x404   : > { %v1153_v60 = vsub.f32 %v7021_v25, %v1137_v47 }
 0x405   : > { %v7092_v49 = vpop.eup %5950 }
 0x406   : > { %v7094_v9 = vpop.eup %5952  ;;  %v1236_v57 = vpack.c.bf16 %v7092_v49, %v7086_v4 }
 0x407   : > { %v1237_v63 = vpack.c.bf16 %v7090_v42, %v7094_v9  ;;  %v1133_v50 = vpop.xlane.xlu1 %1132 }
 0x408   : > { %5465 = vmatprep.mubr.bf16.mxu1 %v1236_v57  ;;  %v1151_v56 = vsub.f32 %v7024_v40, %v1133_v50  ;;  %v1178_v40 = vmul.f32 1.442695, %v1150_v13  ;;  %v1152_v50 = vsub.f32 %v7015_v31, %v1135_v2 }
 0x409   : > { %5466 = vmatmul.mubr.bf16.gmra.mxu1 %v1237_v63  ;;  %v7117_v10 = vpop.eup %5954 }
 0x40a   : > { %5482 = vmatpush3.bf16.xpose.msra.mxu1 %v1451_v45  ;;  %v1180_v57 = vmul.f32 1.442695, %v1151_v56 }
 0x40b   : > { %5760 = vmatprep.subr.msk.bf16.mxu1 %vm960_vm0, %v1404_v52  ;;  %v1402_v33 = vpop.permute.xlu1 %1401 }
 0x40c   : > { %v1445_v23 = vsel %vm960_vm0, %v1402_v33, 0 }
 0x40f   : > { %v1374_v20 = vpop.permute.xlu1 %1373 }
 0x412   : > { %5484 = vmatpush3.bf16.xpose.msra.mxu1 %v1448_v51  ;;  %v1184_v51 = vmul.f32 1.442695, %v1153_v60 }
 0x413   : > { %5761 = vmatprep.subr.msk.bf16.mxu1 %vm960_vm0, %v1402_v33  ;;  %v1378_v25 = vpop.permute.xlu1 %1377 }
 0x414   : > { %v1127_v17 = vpop.xlane.xlu0 %1126 }
 0x415   : > { %v1148_v61 = vsub.f32 %v7001_v6, %v1127_v17 }
 0x417   : > { %v1174_v45 = vmul.f32 1.442695, %v1148_v61 }
 0x418   : > { %v1123_v27 = vpop.xlane.xlu0 %1122 }
 0x419   : > { %v1146_v41 = vsub.f32 %v7004_v21, %v1123_v27 }
 0x41a   : > { %5486 = vmatpush3.bf16.xpose.msra.mxu1 %v1445_v23 }
 0x41b   : > { %v1170_v63 = vmul.f32 1.442695, %v1146_v41  ;;  %v1382_v41 = vpop.permute.xlu1 %1381 }
 0x41c   : > { %v1129_v52 = vpop.xlane.xlu0 %1128 }
 0x41d   : > { %5956 = vpow2.f32 %v1170_v63  ;;  %v1149_v12 = vsub.f32 %v7007_v28, %v1129_v52  ;;  %v1182_v28 = vmul.f32 1.442695, %v1152_v50 }
 0x41e   : > { %5958 = vpow2.f32 %v1180_v57 }
 0x41f   : > { %v1176_v6 = vmul.f32 1.442695, %v1149_v12  ;;  %5960 = vpow2.f32 %v1174_v45  ;;  %v1386_v12 = vpop.permute.xlu1 %1385 }
 0x420   : > { %v1400_v21 = vpop.permute.xlu0 %1399 }
 0x421   : > { %5962 = vpow2.f32 %v1176_v6  ;;  %5762 = vmatprep.subr.msk.bf16.mxu1 %vm960_vm0, %v1400_v21  ;;  %v1442_v36 = vsel %vm960_vm0, %v1400_v21, 0 }
 0x422   : > { %5964 = vpow2.f32 %v1178_v40  ;;  %5488 = vmatpush3.bf16.xpose.msra.mxu1 %v1442_v36 }
 0x423   : > { %5966 = vpow2.f32 %v1184_v51  ;;  %v1713_v50 = vpop.permute.xlu1 %1712 }
 0x424   : > { %v1398_v33 = vpop.permute.xlu0 %1397  ;;  %5968 = vpow2.f32 %v1182_v28 }
 0x425   : > { %5763 = vmatprep.subr.msk.bf16.mxu1 %vm960_vm0, %v1398_v33  ;;  %v1439_v31 = vsel %vm960_vm0, %v1398_v33, 0 }
 0x427   : > { %v1711_v51 = vpop.permute.xlu1 %1710 }
 0x428   : > { %v1396_v47 = vpop.permute.xlu0 %1395 }
 0x429   : > { %v1436_v45 = vsel %vm960_vm0, %v1396_v47, 0 }
 0x42a   : > { %v7120_v2 = vpop.eup %5956  ;;  %5490 = vmatpush3.bf16.xpose.msra.mxu1 %v1439_v31 }
 0x42b   : > { %5764 = vmatprep.subr.msk.bf16.mxu1 %vm960_vm0, %v1396_v47  ;;  %v1238_v17 = vpack.c.bf16 %v7117_v10, %v7120_v2  ;;  %v7125_v56 = vpop.eup %5958  ;;  %v1709_v33 = vpop.permute.xlu1 %1708 }
 0x42c   : > { %v1372_v53 = vpop.permute.xlu0 %1371  ;;  %v7127_v61 = vpop.eup %5960 }
 0x42d   : > { %5469 = vmatprep.mubr.bf16.mxu1 %v1238_v17 }
 0x42e   : > { %v7129_v27 = vpop.eup %5962 }
 0x42f   : > { %v7131_v23 = vpop.eup %5964  ;;  %v1239_v13 = vpack.c.bf16 %v7129_v27, %v7127_v61  ;;  %v1705_v47 = vpop.permute.xlu1 %1704 }
 0x430   : > { %v1376_v57 = vpop.permute.xlu0 %1375  ;;  %v1240_v63 = vpack.c.bf16 %v7125_v56, %v7131_v23  ;;  %v7138_v52 = vpop.eup %5966 }
 0x431   : > { %5470 = vmatmul.mubr.bf16.gmra.mxu1 %v1239_v13  ;;  %v7140_v60 = vpop.eup %5968 }
 0x432   : > { %5473 = vmatprep.mubr.bf16.mxu1 %v1240_v63  ;;  %5492 = vmatpush3.bf16.xpose.msra.mxu1 %v1436_v45  ;;  %v1241_v6 = vpack.c.bf16 %v7138_v52, %v7140_v60 }
 0x434   : > { %v1380_v40 = vpop.permute.xlu0 %1379 }
 0x438   : > { %v1384_v21 = vpop.permute.xlu0 %1383 }
 0x439   : > { %5474 = vmatmul.mubr.bf16.gmra.mxu1 %v1241_v6 }
 0x43a   : > { %5493 = vmatprep.mubr.msk.bf16.mxu1 %vm960_vm0, %v1372_v53 }
 0x43c   : > { %v1715_v36 = vpop.permute.xlu0 %1714 }
 0x43d   : > { %5509 = vmatprep.subr.bf16.mxu0 %v1715_v36 }
 0x43e   : > { %5510 = vmatpush3.bf16.msra.mxu0 %v1715_v36 }
 0x43f   : > { %5511 = vmatprep.subr.bf16.mxu0 %v1713_v50 }
 0x440   : > { %v1707_v28 = vpop.permute.xlu0 %1706 }
 0x441   : > { %5494 = vmatmul.mubr.msk.bf16.vlgmr.msra.gmra.mxu1 %vm960_vm0, %v1374_v20 }
 0x442   : > { %5497 = vmatprep.mubr.msk.bf16.mxu1 %vm960_vm0, %v1376_v57  ;;  %5512 = vmatpush3.bf16.msra.mxu0 %v1713_v50 }
 0x443   : > { %5513 = vmatprep.subr.bf16.mxu0 %v1711_v51 }
 0x446   : > { %5514 = vmatpush3.bf16.msra.mxu0 %v1711_v51 }
 0x447   : > { %5515 = vmatprep.subr.bf16.mxu0 %v1709_v33 }
 0x449   : > { %5498 = vmatmul.mubr.msk.bf16.gmra.mxu1 %vm960_vm0, %v1378_v25 }
 0x44a   : > { %5501 = vmatprep.mubr.msk.bf16.mxu1 %vm960_vm0, %v1380_v40  ;;  %5516 = vmatpush3.bf16.msra.mxu0 %v1709_v33 }
 0x44b   : > { %5517 = vmatprep.subr.bf16.mxu0 %v1707_v28 }
 0x44e   : > { %5518 = vmatpush3.bf16.msra.mxu0 %v1707_v28 }
 0x44f   : > { %5519 = vmatprep.subr.bf16.mxu0 %v1705_v47 }
 0x451   : > { %5502 = vmatmul.mubr.msk.bf16.gmra.mxu1 %vm960_vm0, %v1382_v41 }
 0x452   : > { %5505 = vmatprep.mubr.msk.bf16.mxu1 %vm960_vm0, %v1384_v21  ;;  %5520 = vmatpush3.bf16.msra.mxu0 %v1705_v47 }
 0x459   : > { %5506 = vmatmul.mubr.msk.bf16.gmra.mxu1 %vm960_vm0, %v1386_v12 }
 0x4b9   : > { %v7152_v20 = vpop.f32.mrf.mxu1 }
 0x4ba   : > { %9066 = vst [vmem:[#allocation12_spill] sm:$0xff] %v7152_v20 }
 0x4bb   : > { %v7154_v31 = vpop.f32.mrf.mxu1 }
 0x4bc   : > { %9067 = vst [vmem:[#allocation13_spill] sm:$0xff] %v7154_v31 }
 0x4bd   : > { %v7156_v25 = vpop.f32.mrf.mxu1 }
 0x4be   : > { %9068 = vst [vmem:[#allocation14_spill] sm:$0xff] %v7156_v25 }
 0x4bf   : > { %v7158_v17 = vpop.f32.mrf.mxu1 }
 0x4c0   : > { %9069 = vst [vmem:[#allocation15_spill] sm:$0xff] %v7158_v17 }
 0x4c9   : > { %v7160_v53 = vpop.f32.mrf.mxu1 }
 0x4ca   : > { %9070 = vst [vmem:[#allocation16_spill] sm:$0xff] %v7160_v53 }
 0x4cb   : > { %v7162_v13 = vpop.f32.mrf.mxu1 }
 0x4cc   : > { %9071 = vst [vmem:[#allocation17_spill] sm:$0xff] %v7162_v13 }
 0x4cd   : > { %v7164_v57 = vpop.f32.mrf.mxu1 }
 0x4ce   : > { %9072 = vst [vmem:[#allocation18_spill] sm:$0xff] %v7164_v57 }
 0x4cf   : > { %v7166_v41 = vpop.f32.mrf.mxu1 }
 0x4d0   : > { %9073 = vst [vmem:[#allocation19_spill] sm:$0xff] %v7166_v41 }
 0x4f1   : > { %v7168_v63 = vpop.f32.mrf.mxu1 }
 0x4f2   : > { %9074 = vst [vmem:[#allocation20_spill] sm:$0xff] %v7168_v63 }
 0x4f3   : > { %v7170_v45 = vpop.f32.mrf.mxu1 }
 0x4f4   : > { %9075 = vst [vmem:[#allocation21_spill] sm:$0xff] %v7170_v45 }
 0x4f5   : > { %v7172_v12 = vpop.f32.mrf.mxu1 }
 0x4f6   : > { %9076 = vst [vmem:[#allocation22_spill] sm:$0xff] %v7172_v12 }
 0x4f7   : > { %v7174_v40 = vpop.f32.mrf.mxu1 }
 0x4f8   : > { %9077 = vst [vmem:[#allocation23_spill] sm:$0xff] %v7174_v40 }
 0x4f9   : > { %v7176_v6 = vpop.f32.mrf.mxu1 }
 0x4fa   : > { %9078 = vst [vmem:[#allocation24_spill] sm:$0xff] %v7176_v6 }
 0x4fb   : > { %v7178_v21 = vpop.f32.mrf.mxu1 }
 0x4fc   : > { %9079 = vst [vmem:[#allocation25_spill] sm:$0xff] %v7178_v21 }
 0x4fd   : > { %v7180_v50 = vpop.f32.mrf.mxu1 }
 0x4fe   : > { %9080 = vst [vmem:[#allocation26_spill] sm:$0xff] %v7180_v50 }
 0x4ff   : > { %v7182_v36 = vpop.f32.mrf.mxu1 }
 0x500   : > { %9081 = vst [vmem:[#allocation27_spill] sm:$0xff] %v7182_v36 }
 0x501   : > { %v5495_v51 = vpop.f32.mrf.mxu1 }
 0x502   : > { %1560 = vmax.xlane.f32.xlu0 %v5495_v51 }
 0x503   : > { %v1493_v33 = vpop.f32.mrf.mxu1 }
 0x505   : > { %v5496_v28 = vpop.f32.mrf.mxu1 }
 0x506   : > { %1556 = vmax.xlane.f32.xlu0 %v1493_v33 }
 0x507   : > { %v1496_v47 = vpop.f32.mrf.mxu1 }
 0x508   : > { %1558 = vmax.xlane.f32.xlu1 %v1496_v47 }
 0x509   : > { %v7186_v32 = vpop.f32.mrf.mxu1 }
 0x50a   : > { %1562 = vmax.xlane.f32.xlu0 %v5496_v28 }
 0x50b   : > { %v7188_v35 = vpop.f32.mrf.mxu1 }
 0x50d   : > { %v7192_v46 = vpop.f32.mrf.mxu1 }
 0x50f   : > { %v7194_v22 = vpop.f32.mrf.mxu1 }
 0x511   : > { %v7196_v50 = vpop.f32.mrf.mxu1 }
 0x513   : > { %v7198_v6 = vpop.f32.mrf.mxu1 }
 0x515   : > { %v7200_v21 = vpop.f32.mrf.mxu1 }
 0x517   : > { %v7202_v12 = vpop.f32.mrf.mxu1 }
 0x519   : > { %1700 = vrot.lane.b32.xlu1 %v6902_v38, %s6433_s17  ;;  %v7204_v38 = vpop.f32.mrf.mxu1 }
 0x51b   : > { %v7208_v63 = vpop.f32.mrf.mxu1 }
 0x51d   : > { %v7212_v36 = vpop.f32.mrf.mxu1 }
 0x51f   : > { %v7216_v40 = vpop.f32.mrf.mxu1 }
 0x520   : > { %1702 = vrot.lane.b32.xlu0 %v6889_v43, %s6433_s17 }
 0x53d   : > { %1566 = vmax.xlane.f32.xlu1 %v7194_v22 }
 0x53f   : > { %1564 = vmax.xlane.f32.xlu0 %v7188_v35 }
 0x541   : > { %1574 = vmax.xlane.f32.xlu1 %v7202_v12 }
 0x543   : > { %1568 = vmax.xlane.f32.xlu0 %v7186_v32 }
 0x545   : > { %1578 = vmax.xlane.f32.xlu1 %v7200_v21 }
 0x547   : > { %1570 = vmax.xlane.f32.xlu0 %v7192_v46 }
 0x549   : > { %1582 = vmax.xlane.f32.xlu1 %v7216_v40 }
 0x54b   : > { %1572 = vmax.xlane.f32.xlu0 %v7198_v6 }
 0x54d   : > { %1586 = vmax.xlane.f32.xlu1 %v7212_v36 }
 0x54f   : > { %1576 = vmax.xlane.f32.xlu0 %v7196_v50 }
 0x553   : > { %1580 = vmax.xlane.f32.xlu0 %v7208_v63 }
 0x557   : > { %1584 = vmax.xlane.f32.xlu0 %v7204_v38 }
 0x55e   : > { %2139 = vrot.lane.b32.xlu1 %v6893_v24, %s6434_s21 }
 0x562   : > { %2135 = vrot.lane.b32.xlu1 %v6930_v34, %s6434_s21 }
 0x56d   : > { %2141 = vrot.lane.b32.xlu0 %v6911_v14, %s6434_s21 }
 0x571   : > { %2137 = vrot.lane.b32.xlu0 %v6867_v8, %s6434_s21 }
 0x575   : > { %2133 = vrot.lane.b32.xlu0 %v6940_v0, %s6434_s21 }
 0x58b   : > { %v1561_v45 = vpop.xlane.xlu0 %1560 }
 0x58c   : > { %v1590_v57 = vsub.f32 %v5495_v51, %v1561_v45 }
 0x58e   : > { %v1608_v53 = vmul.f32 1.442695, %v1590_v57 }
 0x58f   : > { %v1557_v19 = vpop.xlane.xlu0 %1556 }
 0x590   : > { %5970 = vpow2.f32 %v1608_v53  ;;  %v1588_v41 = vsub.f32 %v1493_v33, %v1557_v19  ;;  %v5858_v53 = vld [vmem:[%s9017_s3 + $0x18] sm:$0xff]  }
 0x591   : > { %v1559_v13 = vpop.xlane.xlu1 %1558 }
 0x592   : > { %v1604_v39 = vmul.f32 1.442695, %v1588_v41  ;;  %v1589_v7 = vsub.f32 %v1496_v47, %v1559_v13 }
 0x593   : > { %v1563_v25 = vpop.xlane.xlu0 %1562 }
 0x594   : > { %5972 = vpow2.f32 %v1604_v39  ;;  %v1606_v20 = vmul.f32 1.442695, %v1589_v7  ;;  %v1591_v17 = vsub.f32 %v5496_v28, %v1563_v25 }
 0x595   : > { %v1701_v26 = vpop.permute.xlu1 %1700 }
 0x596   : > { %5974 = vpow2.f32 %v1606_v20  ;;  %v1610_v31 = vmul.f32 1.442695, %v1591_v17 }
 0x597   : > { %v1703_v43 = vpop.permute.xlu0 %1702 }
 0x598   : > { %5976 = vpow2.f32 %v1610_v31  ;;  %5521 = vmatprep.subr.bf16.mxu0 %v1703_v43 }
 0x599   : > { %5522 = vmatpush3.bf16.msra.mxu0 %v1703_v43  ;;  %v5859_v43 = vld [vmem:[%s9017_s3 + $0x10] sm:$0xff]  }
 0x59a   : > { %5523 = vmatprep.subr.bf16.mxu0 %v1701_v26 }
 0x59d   : > { %v5971_v19 = vpop.eup %5970  ;;  %5524 = vmatpush3.bf16.msra.mxu0 %v1701_v26 }
 0x59e   : > { %1640 = vadd.xlane.f32.xlu0 %v5971_v19  ;;  %5541 = vmatprep.subr.bf16.mxu0 %v5858_v53 }
 0x5a1   : > { %v5973_v13 = vpop.eup %5972 }
 0x5a2   : > { %1636 = vadd.xlane.f32.xlu0 %v5973_v13 }
 0x5a3   : > { %v5975_v7 = vpop.eup %5974 }
 0x5a4   : > { %v1684_v39 = vpack.c.bf16 %v5975_v7, %v5973_v13 }
 0x5a5   : > { %v5977_v20 = vpop.eup %5976 }
 0x5a6   : > { %5525 = vmatprep.mubr.bf16.mxu0 %v1684_v39  ;;  %1642 = vadd.xlane.f32.xlu1 %v5977_v20  ;;  %v1685_v31 = vpack.c.bf16 %v5977_v20, %v5971_v19 }
 0x5a8   : > { %5526 = vmatmul.mubr.bf16.vlgmr.msra.gmra.mxu0 %v1685_v31 }
 0x5a9   : > { %5542 = vmatpush3.bf16.msra.mxu0 %v5858_v53 }
 0x5aa   : > { %1638 = vadd.xlane.f32.xlu1 %v5975_v7  ;;  %5543 = vmatprep.subr.bf16.mxu0 %v5859_v43 }
 0x5ad   : > { %5544 = vmatpush3.bf16.msra.mxu0 %v5859_v43 }
 0x5b8   : > { %2129 = vrot.lane.b32.xlu0 %v6960_v16, %s6434_s21 }
 0x5bb   : > { %2131 = vrot.lane.b32.xlu1 %v6950_v5, %s6434_s21 }
 0x5c6   : > { %v1567_v26 = vpop.xlane.xlu1 %1566 }
 0x5c7   : > { %v1593_v25 = vsub.f32 %v7194_v22, %v1567_v26 }
 0x5c8   : > { %v1565_v17 = vpop.xlane.xlu0 %1564 }
 0x5c9   : > { %v1614_v57 = vmul.f32 1.442695, %v1593_v25  ;;  %v1592_v41 = vsub.f32 %v7188_v35, %v1565_v17 }
 0x5ca   : > { %v1575_v45 = vpop.xlane.xlu1 %1574 }
 0x5cb   : > { %v1612_v51 = vmul.f32 1.442695, %v1592_v41  ;;  %5978 = vpow2.f32 %v1614_v57  ;;  %v1597_v19 = vsub.f32 %v7202_v12, %v1575_v45 }
 0x5cc   : > { %v1569_v33 = vpop.xlane.xlu0 %1568 }
 0x5cd   : > { %5980 = vpow2.f32 %v1612_v51  ;;  %v1594_v28 = vsub.f32 %v7186_v32, %v1569_v33  ;;  %v1622_v20 = vmul.f32 1.442695, %v1597_v19 }
 0x5ce   : > { %v1579_v47 = vpop.xlane.xlu1 %1578 }
 0x5cf   : > { %v1616_v53 = vmul.f32 1.442695, %v1594_v28  ;;  %v1599_v35 = vsub.f32 %v7200_v21, %v1579_v47 }
 0x5d0   : > { %v1571_v13 = vpop.xlane.xlu0 %1570 }
 0x5d1   : > { %5982 = vpow2.f32 %v1616_v53  ;;  %v1595_v7 = vsub.f32 %v7192_v46, %v1571_v13  ;;  %v1626_v32 = vmul.f32 1.442695, %v1599_v35 }
 0x5d2   : > { %v1583_v39 = vpop.xlane.xlu1 %1582 }
 0x5d3   : > { %v1618_v22 = vmul.f32 1.442695, %v1595_v7  ;;  %v1601_v25 = vsub.f32 %v7216_v40, %v1583_v39 }
 0x5d4   : > { %v1573_v31 = vpop.xlane.xlu0 %1572 }
 0x5d5   : > { %5984 = vpow2.f32 %v1618_v22  ;;  %v1596_v43 = vsub.f32 %v7198_v6, %v1573_v31  ;;  %v1630_v21 = vmul.f32 1.442695, %v1601_v25 }
 0x5d6   : > { %5986 = vpow2.f32 %v1622_v20  ;;  %v1587_v57 = vpop.xlane.xlu1 %1586 }
 0x5d7   : > { %v1620_v26 = vmul.f32 1.442695, %v1596_v43  ;;  %v1603_v33 = vsub.f32 %v7212_v36, %v1587_v57 }
 0x5d8   : > { %v1577_v17 = vpop.xlane.xlu0 %1576  ;;  %v5979_v12 = vpop.eup %5978 }
 0x5d9   : > { %5988 = vpow2.f32 %v1620_v26  ;;  %v1598_v46 = vsub.f32 %v7196_v50, %v1577_v17  ;;  %v1634_v53 = vmul.f32 1.442695, %v1603_v33 }
 0x5da   : > { %v5981_v41 = vpop.eup %5980  ;;  %5990 = vpow2.f32 %v1626_v32 }
 0x5db   : > { %v1624_v45 = vmul.f32 1.442695, %v1598_v46  ;;  %v1686_v51 = vpack.c.bf16 %v5979_v12, %v5981_v41 }
 0x5dc   : > { %v1581_v28 = vpop.xlane.xlu0 %1580 }
 0x5dd   : > { %5992 = vpow2.f32 %v1624_v45  ;;  %v1600_v6 = vsub.f32 %v7208_v63, %v1581_v28  ;;  %5529 = vmatprep.mubr.bf16.mxu0 %v1686_v51 }
 0x5de   : > { %v5983_v47 = vpop.eup %5982  ;;  %5994 = vpow2.f32 %v1630_v21 }
 0x5df   : > { %v1628_v40 = vmul.f32 1.442695, %v1600_v6  ;;  %1644 = vadd.xlane.f32.xlu1 %v5981_v41  ;;  %1648 = vadd.xlane.f32.xlu0 %v5983_v47 }
 0x5e0   : > { %v1585_v19 = vpop.xlane.xlu0 %1584 }
 0x5e1   : > { %5996 = vpow2.f32 %v1628_v40  ;;  %v1602_v50 = vsub.f32 %v7204_v38, %v1585_v19 }
 0x5e2   : > { %v5985_v13 = vpop.eup %5984  ;;  %5998 = vpow2.f32 %v1634_v53 }
 0x5e3   : > { %v1632_v7 = vmul.f32 1.442695, %v1602_v50  ;;  %1646 = vadd.xlane.f32.xlu0 %v5979_v12  ;;  %1650 = vadd.xlane.f32.xlu1 %v5985_v13  ;;  %v1687_v36 = vpack.c.bf16 %v5985_v13, %v5983_v47  ;;  %v5987_v63 = vpop.eup %5986 }
 0x5e4   : > { %v7256_v22 = vpop.permute.xlu0 %2141 }
 0x5e5   : > { %6000 = vpow2.f32 %v1632_v7  ;;  %5530 = vmatmul.mubr.bf16.gmra.mxu0 %v1687_v36  ;;  %5765 = vmatprep.subr.msk.bf16.mxu0 %vm960_vm0, %v7256_v22  ;;  %v2189_v40 = vsel %vm960_vm0, %v7256_v22, 0 }
 0x5e6   : > { %v5989_v39 = vpop.eup %5988 }
 0x5e7   : > { %v1688_v20 = vpack.c.bf16 %v5987_v63, %v5989_v39  ;;  %v5991_v35 = vpop.eup %5990 }
 0x5e8   : > { %v2138_v57 = vpop.permute.xlu0 %2137 }
 0x5e9   : > { %5533 = vmatprep.mubr.bf16.mxu0 %v1688_v20  ;;  %v2183_v22 = vsel %vm960_vm0, %v2138_v57, 0 }
 0x5ea   : > { %v5993_v31 = vpop.eup %5992 }
 0x5eb   : > { %1656 = vadd.xlane.f32.xlu1 %v5993_v31  ;;  %v1689_v38 = vpack.c.bf16 %v5991_v35, %v5993_v31  ;;  %v5995_v43 = vpop.eup %5994 }
 0x5ed   : > { %5534 = vmatmul.mubr.bf16.gmra.mxu0 %v1689_v38 }
 0x5ee   : > { %v5997_v26 = vpop.eup %5996 }
 0x5ef   : > { %1652 = vadd.xlane.f32.xlu1 %v5989_v39  ;;  %v1690_v32 = vpack.c.bf16 %v5995_v43, %v5997_v26  ;;  %v5999_v25 = vpop.eup %5998 }
 0x5f1   : > { %5537 = vmatprep.mubr.bf16.mxu0 %v1690_v32 }
 0x5f2   : > { %v6001_v17 = vpop.eup %6000 }
 0x5f3   : > { %1658 = vadd.xlane.f32.xlu1 %v5991_v35  ;;  %1664 = vadd.xlane.f32.xlu0 %v6001_v17  ;;  %v1691_v12 = vpack.c.bf16 %v5999_v25, %v6001_v17 }
 0x5f5   : > { %5538 = vmatmul.mubr.bf16.gmra.mxu0 %v1691_v12 }
 0x5f7   : > { %1654 = vadd.xlane.f32.xlu1 %v5987_v63  ;;  %1660 = vadd.xlane.f32.xlu0 %v5997_v26 }
 0x5fb   : > { %1662 = vadd.xlane.f32.xlu1 %v5995_v43  ;;  %1666 = vadd.xlane.f32.xlu0 %v5999_v25 }
 0x60c   : > { %2127 = vrot.lane.b32.xlu1 %v6787_v44, %s6434_s21 }
 0x610   : > { %2113 = vrot.lane.b32.xlu1 %v6803_v54, %s6434_s21 }
 0x611   : > { %2111 = vrot.lane.b32.xlu0 %v6782_v15, %s6434_s21 }
 0x614   : > { %2117 = vrot.lane.b32.xlu1 %v6822_v18, %s6434_s21 }
 0x615   : > { %2115 = vrot.lane.b32.xlu0 %v6811_v1, %s6434_s21 }
 0x618   : > { %2121 = vrot.lane.b32.xlu1 %v6860_v3, %s6434_s21 }
 0x619   : > { %2119 = vrot.lane.b32.xlu0 %v6842_v37, %s6434_s21 }
 0x61c   : > { %2125 = vrot.lane.b32.xlu1 %v6907_v48, %s6434_s21 }
 0x61d   : > { %2123 = vrot.lane.b32.xlu0 %v6885_v11, %s6434_s21 }
 0x620   : > { %2746 = vrot.lane.b32.xlu1 %v6893_v24, %s6435_s27  ;;  %v2140_v24 = vpop.permute.xlu1 %2139 }
 0x621   : > { %2748 = vrot.lane.b32.xlu0 %v6911_v14, %s6435_s27  ;;  %v7295_v14 = vpop.permute.xlu0 %2133  ;;  %v2186_v13 = vsel %vm960_vm0, %v2140_v24, 0 }
 0x622   : > { %v2177_v43 = vsel %vm960_vm0, %v7295_v14, 0 }
 0x624   : > { %2742 = vrot.lane.b32.xlu1 %v6930_v34, %s6435_s27 }
 0x625   : > { %2744 = vrot.lane.b32.xlu0 %v6867_v8, %s6435_s27  ;;  %v2136_v8 = vpop.permute.xlu1 %2135 }
 0x626   : > { %v2180_v35 = vsel %vm960_vm0, %v2136_v8, 0 }
 0x627   : > { %v1641_v34 = vpop.xlane.xlu0 %1640 }
 0x628   : > { %2738 = vrot.lane.b32.xlu1 %v6950_v5, %s6435_s27 }
 0x629   : > { %2740 = vrot.lane.b32.xlu0 %v6940_v0, %s6435_s27 }
 0x62b   : > { %v1637_v0 = vpop.xlane.xlu0 %1636 }
 0x62c   : > { %6002 = vrcp.f32 %v1637_v0 }
 0x62d   : > { %2736 = vrot.lane.b32.xlu0 %v6960_v16, %s6435_s27 }
 0x62f   : > { %v1643_v5 = vpop.xlane.xlu1 %1642  ;;  %v2130_v53 = vpop.permute.xlu0 %2129 }
 0x630   : > { %6004 = vrcp.f32 %v1643_v5 }
 0x633   : > { %v1639_v16 = vpop.xlane.xlu1 %1638 }
 0x634   : > { %6006 = vrcp.f32 %v1639_v16 }
 0x635   : > { %6008 = vrcp.f32 %v1641_v34 }
 0x637   : > { %v2132_v19 = vpop.permute.xlu1 %2131 }
 0x64c   : > { %1186 = vadd.xlane.f32.xlu1 %v7071_v29  ;;  %1188 = vadd.xlane.f32.xlu0 %v7074_v55  ;;  %v5860_v29 = vld [vmem:[%s9017_s3 + $0x8] sm:$0xff]  }
 0x64d   : > { %5561 = vmatprep.subr.bf16.mxu1 %v5860_v29 }
 0x64e   : > { %5562 = vmatpush3.bf16.msra.mxu1 %v5860_v29 }
 0x650   : > { %1190 = vadd.xlane.f32.xlu0 %v7076_v62  ;;  %v5861_v62 = vld [vmem:[%s9017_s3] sm:$0xff]  }
 0x651   : > { %5563 = vmatprep.subr.bf16.mxu1 %v5861_v62 }
 0x652   : > { %5564 = vmatpush3.bf16.msra.mxu1 %v5861_v62 }
 0x654   : > { %1192 = vadd.xlane.f32.xlu0 %v7069_v58 }
 0x658   : > { %1194 = vadd.xlane.f32.xlu0 %v7086_v4  ;;  %v6003_v4 = vpop.eup %6002 }
 0x65c   : > { %1196 = vadd.xlane.f32.xlu0 %v7092_v49 }
 0x65d   : > { %2734 = vrot.lane.b32.xlu1 %v6787_v44, %s6435_s27  ;;  %v6005_v44 = vpop.eup %6004 }
 0x65e   : > { %v6007_v46 = vpop.eup %6006 }
 0x65f   : > { %v6009_v51 = vpop.eup %6008 }
 0x668   : > { %v5527_v58 = vpop.f32.mrf.mxu0  ;;  %v1649_v50 = vpop.xlane.xlu0 %1648 }
 0x669   : > { %v1823_v28 = vmul.f32 %v6009_v51, %v5527_v58  ;;  %v1645_v7 = vpop.xlane.xlu1 %1644 }
 0x66a   : > { %v1758_v55 = vpop.f32.mrf.mxu0  ;;  %6010 = vrcp.f32 %v1645_v7 }
 0x66b   : > { %v1821_v21 = vmul.f32 %v6003_v4, %v1758_v55 }
 0x66c   : > { %v5528_v49 = vpop.f32.mrf.mxu0 }
 0x66d   : > { %v1824_v41 = vmul.f32 %v6005_v44, %v5528_v49  ;;  %v1651_v36 = vpop.xlane.xlu1 %1650 }
 0x66e   : > { %v1761_v45 = vpop.f32.mrf.mxu0  ;;  %6012 = vrcp.f32 %v1651_v36 }
 0x66f   : > { %v1822_v33 = vmul.f32 %v6007_v46, %v1761_v45  ;;  %v1838_v47 = vpack.c.bf16 %v1824_v41, %v1823_v28 }
 0x671   : > { %v1837_v6 = vpack.c.bf16 %v1822_v33, %v1821_v21 }
 0x672   : > { %2718 = vrot.lane.b32.xlu0 %v6782_v15, %s6435_s27  ;;  %v1647_v15 = vpop.xlane.xlu0 %1646 }
 0x673   : > { %5545 = vmatprep.mubr.msk.bf16.mxu0 %vm960_vm0, %v1837_v6  ;;  %6014 = vrcp.f32 %v1647_v15 }
 0x674   : > { %5546 = vmatmul.mubr.msk.bf16.vlgmr.msra.gmra.mxu0 %vm960_vm0, %v1838_v47  ;;  %v1657_v39 = vpop.xlane.xlu1 %1656  ;;  %6016 = vrcp.f32 %v1649_v50 }
 0x675   : > { %5582 = vmatpush3.bf16.xpose.msra.mxu0 %v2189_v40 }
 0x676   : > { %5766 = vmatprep.subr.msk.bf16.mxu0 %vm960_vm0, %v2140_v24 }
 0x677   : > { %v6011_v24 = vpop.eup %6010 }
 0x678   : > { %v1653_v31 = vpop.xlane.xlu1 %1652 }
 0x679   : > { %6018 = vrcp.f32 %v1653_v31 }
 0x67c   : > { %v7318_v63 = vpop.xlane.xlu0 %1664 }
 0x67d   : > { %5584 = vmatpush3.bf16.xpose.msra.mxu0 %v2186_v13 }
 0x67e   : > { %5767 = vmatprep.subr.msk.bf16.mxu0 %vm960_vm0, %v2138_v57 }
 0x680   : > { %v1661_v20 = vpop.xlane.xlu0 %1660 }
 0x681   : > { %1198 = vadd.xlane.f32.xlu1 %v7094_v9  ;;  %v1659_v9 = vpop.xlane.xlu1 %1658 }
 0x682   : > { %6020 = vrcp.f32 %v1659_v9 }
 0x684   : > { %v1667_v38 = vpop.xlane.xlu0 %1666 }
 0x685   : > { %5586 = vmatpush3.bf16.xpose.msra.mxu0 %v2183_v22  ;;  %v1655_v32 = vpop.xlane.xlu1 %1654 }
 0x686   : > { %5768 = vmatprep.subr.msk.bf16.mxu0 %vm960_vm0, %v2136_v8  ;;  %6022 = vrcp.f32 %v1655_v32  ;;  %v6013_v8 = vpop.eup %6012 }
 0x687   : > { %6024 = vrcp.f32 %v1657_v39 }
 0x688   : > { %v7330_v26 = vpop.permute.xlu0 %2111  ;;  %6026 = vrcp.f32 %v1661_v20 }
 0x689   : > { %6028 = vrcp.f32 %v1667_v38 }
 0x68c   : > { %v7335_v25 = vpop.permute.xlu0 %2115 }
 0x68d   : > { %5588 = vmatpush3.bf16.xpose.msra.mxu0 %v2180_v35 }
 0x68e   : > { %5769 = vmatprep.subr.msk.bf16.mxu0 %vm960_vm0, %v7295_v14 }
 0x691   : > { %1200 = vadd.xlane.f32.xlu0 %v7090_v42  ;;  %v2174_v42 = vsel %vm960_vm0, %v2132_v19, 0 }
 0x692   : > { %2720 = vrot.lane.b32.xlu1 %v6803_v54, %s6435_s27  ;;  %v1663_v54 = vpop.xlane.xlu1 %1662 }
 0x693   : > { %6030 = vrcp.f32 %v1663_v54 }
 0x694   : > { %6032 = vrcp.f32 %v7318_v63 }
 0x695   : > { %5590 = vmatpush3.bf16.xpose.msra.mxu0 %v2177_v43  ;;  %1202 = vadd.xlane.f32.xlu0 %v7120_v2  ;;  %v7340_v2 = vpop.permute.xlu0 %2119 }
 0x696   : > { %5770 = vmatprep.subr.msk.bf16.mxu0 %vm960_vm0, %v2132_v19  ;;  %v2128_v17 = vpop.permute.xlu1 %2127 }
 0x699   : > { %1204 = vadd.xlane.f32.xlu0 %v7117_v10  ;;  %v2171_v10 = vsel %vm960_vm0, %v2130_v53, 0 }
 0x69a   : > { %v2114_v16 = vpop.permute.xlu1 %2113 }
 0x69d   : > { %5592 = vmatpush3.bf16.xpose.msra.mxu0 %v2174_v42  ;;  %1208 = vadd.xlane.f32.xlu0 %v7129_v27  ;;  %v7346_v27 = vpop.permute.xlu0 %2123 }
 0x69e   : > { %5771 = vmatprep.subr.msk.bf16.mxu0 %vm960_vm0, %v2130_v53  ;;  %v2118_v33 = vpop.permute.xlu1 %2117 }
 0x6a1   : > { %1210 = vadd.xlane.f32.xlu0 %v7131_v23  ;;  %v6015_v23 = vpop.eup %6014  ;;  %v2749_v55 = vpop.permute.xlu0 %2748 }
 0x6a2   : > { %v6017_v0 = vpop.eup %6016  ;;  %v2122_v63 = vpop.permute.xlu1 %2121 }
 0x6a3   : > { %v6019_v41 = vpop.eup %6018 }
 0x6a4   : > { %v6021_v51 = vpop.eup %6020 }
 0x6a5   : > { %5594 = vmatpush3.bf16.xpose.msra.mxu0 %v2171_v10  ;;  %v5531_v12 = vpop.f32.mrf.mxu0  ;;  %1212 = vadd.xlane.f32.xlu0 %v7125_v56  ;;  %v2168_v56 = vsel %vm960_vm0, %v2128_v17, 0  ;;  %v6023_v21 = vpop.eup %6022 }
 0x6a6   : > { %5772 = vmatprep.subr.msk.bf16.mxu0 %vm960_vm0, %v2128_v17  ;;  %v1827_v62 = vmul.f32 %v6017_v0, %v5531_v12  ;;  %v6025_v47 = vpop.eup %6024  ;;  %v2126_v42 = vpop.permute.xlu1 %2125  ;;  %v9084_v0 = vld [vmem:[#allocation13_spill] sm:$0xff] }
 0x6a7   : > { %v1774_v57 = vpop.f32.mrf.mxu0  ;;  %v6027_v36 = vpop.eup %6026 }
 0x6a8   : > { %v1825_v29 = vmul.f32 %v6011_v24, %v1774_v57  ;;  %v6029_v39 = vpop.eup %6028  ;;  %v2745_v10 = vpop.permute.xlu0 %2744 }
 0x6a9   : > { %v5532_v14 = vpop.f32.mrf.mxu0  ;;  %v6031_v20 = vpop.eup %6030 }
 0x6aa   : > { %v1828_v34 = vmul.f32 %v6013_v8, %v5532_v14  ;;  %v6033_v38 = vpop.eup %6032  ;;  %v2790_v14 = vsel %vm960_vm0, %v2745_v10, 0 }
 0x6ab   : > { %v1777_v5 = vpop.f32.mrf.mxu0 }
 0x6ac   : > { %v1826_v58 = vmul.f32 %v6015_v23, %v1777_v5  ;;  %v1840_v44 = vpack.c.bf16 %v1828_v34, %v1827_v62  ;;  %v2741_v12 = vpop.permute.xlu0 %2740  ;;  %v9083_v23 = vld [vmem:[#allocation10_spill] sm:$0xff] }
 0x6ad   : > { %5596 = vmatpush3.bf16.xpose.msra.mxu0 %v2168_v56  ;;  %v5535_v4 = vpop.f32.mrf.mxu0 }
 0x6ae   : > { %v1839_v49 = vpack.c.bf16 %v1826_v58, %v1825_v29  ;;  %5773 = vmatprep.subr.msk.bf16.mxu0 %vm960_vm0, %v2749_v55  ;;  %v1831_v19 = vmul.f32 %v6025_v47, %v5535_v4  ;;  %v9085_v58 = vld [vmem:[#allocation15_spill] sm:$0xff]  ;;  %v2784_v4 = vsel %vm960_vm0, %v2741_v12, 0 }
 0x6af   : > { %v1790_v46 = vpop.f32.mrf.mxu0 }
 0x6b0   : > { %5549 = vmatprep.mubr.msk.bf16.mxu0 %vm960_vm0, %v1839_v49  ;;  %v1829_v40 = vmul.f32 %v6019_v41, %v1790_v46  ;;  %v2737_v57 = vpop.permute.xlu0 %2736  ;;  %v9086_v46 = vld [vmem:[#allocation12_spill] sm:$0xff] }
 0x6b1   : > { %v5536_v45 = vpop.f32.mrf.mxu0  ;;  %5550 = vmatmul.mubr.msk.bf16.gmra.mxu0 %vm960_vm0, %v1840_v44 }
 0x6b2   : > { %v1832_v28 = vmul.f32 %v6021_v51, %v5536_v45  ;;  %v9087_v45 = vld [vmem:[#allocation14_spill] sm:$0xff] }
 0x6b3   : > { %v1793_v6 = vpop.f32.mrf.mxu0 }
 0x6b4   : > { %v1830_v53 = vmul.f32 %v6023_v21, %v1793_v6  ;;  %v1842_v7 = vpack.c.bf16 %v1832_v28, %v1831_v19 }
 0x6b5   : > { %v5539_v50 = vpop.f32.mrf.mxu0 }
 0x6b6   : > { %v1841_v13 = vpack.c.bf16 %v1830_v53, %v1829_v40  ;;  %1206 = vadd.xlane.f32.xlu1 %v7127_v61  ;;  %v1835_v43 = vmul.f32 %v6033_v38, %v5539_v50  ;;  %v9089_v40 = vld [vmem:[#allocation7_spill] sm:$0xff]  ;;  %v9090_v53 = vld [vmem:[#allocation17_spill] sm:$0xff] }
 0x6b7   : > { %v1806_v15 = vpop.f32.mrf.mxu0  ;;  %v9091_v50 = vld [vmem:[#allocation19_spill] sm:$0xff] }
 0x6b8   : > { %5553 = vmatprep.mubr.msk.bf16.mxu0 %vm960_vm0, %v1841_v13  ;;  %v1833_v61 = vmul.f32 %v6027_v36, %v1806_v15  ;;  %v2778_v15 = vsel %vm960_vm0, %v2737_v57, 0 }
 0x6b9   : > { %v5540_v22 = vpop.f32.mrf.mxu0  ;;  %5554 = vmatmul.mubr.msk.bf16.gmra.mxu0 %vm960_vm0, %v1842_v7 }
 0x6ba   : > { %1214 = vadd.xlane.f32.xlu1 %v7140_v60  ;;  %v1836_v35 = vmul.f32 %v6029_v39, %v5540_v22  ;;  %v2747_v60 = vpop.permute.xlu1 %2746 }
 0x6bb   : > { %2722 = vrot.lane.b32.xlu0 %v6811_v1, %s6435_s27  ;;  %v1809_v31 = vpop.f32.mrf.mxu0  ;;  %v2796_v1 = vsel %vm960_vm0, %v2749_v55, 0  ;;  %v2793_v24 = vsel %vm960_vm0, %v2747_v60, 0 }
 0x6bc   : > { %v1834_v9 = vmul.f32 %v6031_v20, %v1809_v31  ;;  %v1844_v54 = vpack.c.bf16 %v1836_v35, %v1835_v43  ;;  %v9093_v43 = vld [vmem:[#allocation16_spill] sm:$0xff] }
 0x6be   : > { %v1843_v32 = vpack.c.bf16 %v1834_v9, %v1833_v61  ;;  %v2743_v17 = vpop.permute.xlu1 %2742 }
 0x6bf   : > { %v2787_v34 = vsel %vm960_vm0, %v2743_v17, 0 }
 0x6c0   : > { %5557 = vmatprep.mubr.msk.bf16.mxu0 %vm960_vm0, %v1843_v32 }
 0x6c1   : > { %5558 = vmatmul.mubr.msk.bf16.gmra.mxu0 %vm960_vm0, %v1844_v54 }
 0x6c2   : > { %5597 = vmatprep.mubr.msk.bf16.mxu0 %vm960_vm0, %v7330_v26  ;;  %v2739_v26 = vpop.permute.xlu1 %2738 }
 0x6c3   : > { %v2781_v6 = vsel %vm960_vm0, %v2739_v26, 0 }
 0x6c9   : > { %5598 = vmatmul.mubr.msk.bf16.vlgmr.msra.gmra.mxu0 %vm960_vm0, %v2114_v16 }
 0x6ca   : > { %5666 = vmatpush3.bf16.xpose.msra.mxu0 %v2796_v1  ;;  %5601 = vmatprep.mubr.msk.bf16.mxu0 %vm960_vm0, %v7335_v25 }
 0x6cb   : > { %5774 = vmatprep.subr.msk.bf16.mxu0 %vm960_vm0, %v2747_v60  ;;  %2724 = vrot.lane.b32.xlu1 %v6822_v18, %s6435_s27 }
 0x6cf   : > { %2436 = vrot.lane.b32.xlu1 %v6834_v30, %s6434_s21 }
 0x6d1   : > { %5602 = vmatmul.mubr.msk.bf16.gmra.mxu0 %vm960_vm0, %v2118_v33  ;;  %v9088_v33 = vld [vmem:[#allocation6_spill] sm:$0xff] }
 0x6d2   : > { %5668 = vmatpush3.bf16.xpose.msra.mxu0 %v2793_v24  ;;  %5605 = vmatprep.mubr.msk.bf16.mxu0 %vm960_vm0, %v7340_v2  ;;  %v9096_v24 = vld [vmem:[#allocation23_spill] sm:$0xff] }
 0x6d3   : > { %5775 = vmatprep.subr.msk.bf16.mxu0 %vm960_vm0, %v2745_v10  ;;  %2726 = vrot.lane.b32.xlu1 %v6842_v37, %s6435_s27  ;;  %v9082_v37 = vld [vmem:[#allocation8_spill] sm:$0xff] }
 0x6d5   : > { %v1187_v25 = vpop.xlane.xlu1 %1186  ;;  %v1189_v18 = vpop.xlane.xlu0 %1188 }
 0x6d6   : > { %6034 = vrcp.f32 %v1187_v25 }
 0x6d7   : > { %6036 = vrcp.f32 %v1189_v18  ;;  %2432 = vrot.lane.b32.xlu1 %v6853_v59, %s6434_s21 }
 0x6d9   : > { %5606 = vmatmul.mubr.msk.bf16.gmra.mxu0 %vm960_vm0, %v2122_v63  ;;  %v1191_v8 = vpop.xlane.xlu0 %1190  ;;  %v2735_v36 = vpop.permute.xlu1 %2734  ;;  %v9092_v63 = vld [vmem:[#allocation9_spill] sm:$0xff] }
 0x6da   : > { %5670 = vmatpush3.bf16.xpose.msra.mxu0 %v2790_v14  ;;  %1216 = vadd.xlane.f32.xlu0 %v7138_v52  ;;  %6038 = vrcp.f32 %v1191_v8  ;;  %v2775_v22 = vsel %vm960_vm0, %v2735_v36, 0 }
 0x6db   : > { %5609 = vmatprep.mubr.msk.bf16.mxu0 %vm960_vm0, %v7346_v27  ;;  %5776 = vmatprep.subr.msk.bf16.mxu0 %vm960_vm0, %v2743_v17 }
 0x6dc   : > { %2430 = vrot.lane.b32.xlu1 %v9082_v37, %s6434_s21 }
 0x6dd   : > { %v1193_v2 = vpop.xlane.xlu0 %1192 }
 0x6de   : > { %6040 = vrcp.f32 %v1193_v2 }
 0x6e0   : > { %2426 = vrot.lane.b32.xlu1 %v9083_v23, %s6434_s21 }
 0x6e1   : > { %5610 = vmatmul.mubr.msk.bf16.gmra.mxu0 %vm960_vm0, %v2126_v42  ;;  %v1195_v5 = vpop.xlane.xlu0 %1194  ;;  %v9094_v42 = vld [vmem:[#allocation18_spill] sm:$0xff] }
 0x6e2   : > { %5672 = vmatpush3.bf16.xpose.msra.mxu0 %v2787_v34  ;;  %6042 = vrcp.f32 %v1195_v5 }
 0x6e3   : > { %v6035_v52 = vpop.eup %6034  ;;  %5777 = vmatprep.subr.msk.bf16.mxu0 %vm960_vm0, %v2741_v12 }
 0x6e4   : > { %v6037_v27 = vpop.eup %6036  ;;  %v1339_v16 = vmul.f32 %v6035_v52, %v9084_v0 }
 0x6e5   : > { %v1197_v29 = vpop.xlane.xlu0 %1196  ;;  %v1340_v56 = vmul.f32 %v6037_v27, %v9085_v58 }
 0x6e6   : > { %6044 = vrcp.f32 %v1197_v29  ;;  %v9097_v29 = vld [vmem:[#allocation27_spill] sm:$0xff] }
 0x6e7   : > { %v1355_v55 = vpack.c.bf16 %v1340_v56, %v1339_v16  ;;  %v6039_v62 = vpop.eup %6038  ;;  %v9098_v56 = vld [vmem:[#allocation20_spill] sm:$0xff] }
 0x6e8   : > { %v1341_v41 = vmul.f32 %v6039_v62, %v9086_v46  ;;  %v9099_v62 = vld [vmem:[#allocation22_spill] sm:$0xff] }
 0x6e9   : > { %5565 = vmatprep.mubr.msk.bf16.mxu1 %vm960_vm0, %v1355_v55  ;;  %v2719_v49 = vpop.permute.xlu0 %2718 }
 0x6ea   : > { %5674 = vmatpush3.bf16.xpose.msra.mxu0 %v2784_v4  ;;  %5681 = vmatprep.mubr.msk.bf16.mxu0 %vm960_vm0, %v2719_v49 }
 0x6eb   : > { %v6041_v44 = vpop.eup %6040  ;;  %5778 = vmatprep.subr.msk.bf16.mxu0 %vm960_vm0, %v2739_v26  ;;  %v9095_v26 = vld [vmem:[#allocation21_spill] sm:$0xff] }
 0x6ec   : > { %v1342_v51 = vmul.f32 %v6041_v44, %v9087_v45  ;;  %v9100_v44 = vld [vmem:[#allocation25_spill] sm:$0xff] }
 0x6ee   : > { %v1356_v21 = vpack.c.bf16 %v1342_v51, %v1341_v41 }
 0x6ef   : > { %v6043_v28 = vpop.eup %6042 }
 0x6f0   : > { %2438 = vrot.lane.b32.xlu0 %v9088_v33, %s6434_s21  ;;  %5566 = vmatmul.mubr.msk.bf16.vlgmr.msra.gmra.mxu1 %vm960_vm0, %v1356_v21  ;;  %v1343_v19 = vmul.f32 %v6043_v28, %v9090_v53 }
 0x6f2   : > { %5676 = vmatpush3.bf16.xpose.msra.mxu0 %v2781_v6 }
 0x6f3   : > { %v6045_v47 = vpop.eup %6044  ;;  %5779 = vmatprep.subr.msk.bf16.mxu0 %vm960_vm0, %v2737_v57 }
 0x6f4   : > { %2434 = vrot.lane.b32.xlu0 %v9089_v40, %s6434_s21  ;;  %v1344_v13 = vmul.f32 %v6045_v47, %v9091_v50 }
 0x6f6   : > { %v1357_v7 = vpack.c.bf16 %v1344_v13, %v1343_v19 }
 0x6f8   : > { %2728 = vrot.lane.b32.xlu0 %v6860_v3, %s6435_s27  ;;  %5569 = vmatprep.mubr.msk.bf16.mxu1 %vm960_vm0, %v1357_v7 }
 0x6fa   : > { %5678 = vmatpush3.bf16.xpose.msra.mxu0 %v2778_v15 }
 0x6fb   : > { %5780 = vmatprep.subr.msk.bf16.mxu0 %vm960_vm0, %v2735_v36 }
 0x6fc   : > { %2428 = vrot.lane.b32.xlu0 %v9092_v63, %s6434_s21 }
 0x702   : > { %5680 = vmatpush3.bf16.xpose.msra.mxu0 %v2775_v22  ;;  %v9101_v22 = vld [vmem:[#allocation24_spill] sm:$0xff] }
 0x70a   : > { %v1199_v39 = vpop.xlane.xlu1 %1198 }
 0x70b   : > { %6046 = vrcp.f32 %v1199_v39 }
 0x70e   : > { %v2721_v20 = vpop.permute.xlu1 %2720 }
 0x70f   : > { %5682 = vmatmul.mubr.msk.bf16.vlgmr.msra.gmra.mxu0 %vm960_vm0, %v2721_v20  ;;  %v9102_v20 = vld [vmem:[#allocation26_spill] sm:$0xff] }
 0x718   : > { %v6047_v38 = vpop.eup %6046 }
 0x719   : > { %v1345_v32 = vmul.f32 %v6047_v38, %v9093_v43 }
 0x71a   : > { %v1201_v3 = vpop.xlane.xlu0 %1200 }
 0x71b   : > { %6048 = vrcp.f32 %v1201_v3 }
 0x71e   : > { %v1203_v35 = vpop.xlane.xlu0 %1202 }
 0x71f   : > { %6050 = vrcp.f32 %v1203_v35 }
 0x722   : > { %v1205_v31 = vpop.xlane.xlu0 %1204 }
 0x723   : > { %6052 = vrcp.f32 %v1205_v31 }
 0x726   : > { %v1209_v61 = vpop.xlane.xlu0 %1208 }
 0x728   : > { %v6049_v9 = vpop.eup %6048 }
 0x729   : > { %v1346_v54 = vmul.f32 %v6049_v9, %v9094_v42 }
 0x72a   : > { %v1211_v60 = vpop.xlane.xlu0 %1210 }
 0x72b   : > { %v1358_v10 = vpack.c.bf16 %v1346_v54, %v1345_v32 }
 0x72c   : > { %v6051_v1 = vpop.eup %6050 }
 0x72d   : > { %5570 = vmatmul.mubr.msk.bf16.gmra.mxu1 %vm960_vm0, %v1358_v10  ;;  %v1347_v57 = vmul.f32 %v6051_v1, %v9095_v26 }
 0x72e   : > { %v1213_v17 = vpop.xlane.xlu0 %1212 }
 0x72f   : > { %6054 = vrcp.f32 %v1213_v17 }
 0x730   : > { %v6053_v12 = vpop.eup %6052  ;;  %6056 = vrcp.f32 %v1209_v61 }
 0x731   : > { %v1348_v25 = vmul.f32 %v6053_v12, %v9096_v24  ;;  %6058 = vrcp.f32 %v1211_v60 }
 0x732   : > { %v2723_v18 = vpop.permute.xlu0 %2722 }
 0x733   : > { %5685 = vmatprep.mubr.msk.bf16.mxu0 %vm960_vm0, %v2723_v18  ;;  %v1359_v14 = vpack.c.bf16 %v1348_v25, %v1347_v57 }
 0x734   : > { %v7435_v51 = vpop.f32.mrf.mxu0 }
 0x735   : > { %5573 = vmatprep.mubr.msk.bf16.mxu1 %vm960_vm0, %v1359_v14 }
 0x736   : > { %v7437_v28 = vpop.f32.mrf.mxu0 }
 0x738   : > { %v7439_v47 = vpop.f32.mrf.mxu0 }
 0x73a   : > { %v7441_v19 = vpop.f32.mrf.mxu0 }
 0x73c   : > { %v6055_v5 = vpop.eup %6054 }
 0x73d   : > { %v6057_v52 = vpop.eup %6056  ;;  %v1352_v58 = vmul.f32 %v6055_v5, %v9097_v29 }
 0x73e   : > { %v6059_v0 = vpop.eup %6058  ;;  %v1350_v4 = vmul.f32 %v6057_v52, %v9099_v62 }
 0x73f   : > { %v1207_v8 = vpop.xlane.xlu1 %1206  ;;  %v1351_v46 = vmul.f32 %v6059_v0, %v9100_v44 }
 0x740   : > { %6060 = vrcp.f32 %v1207_v8 }
 0x741   : > { %v1361_v45 = vpack.c.bf16 %v1352_v58, %v1351_v46 }
 0x743   : > { %v1215_v2 = vpop.xlane.xlu1 %1214 }
 0x744   : > { %6062 = vrcp.f32 %v1215_v2 }
 0x747   : > { %v2725_v34 = vpop.permute.xlu1 %2724 }
 0x748   : > { %5686 = vmatmul.mubr.msk.bf16.gmra.mxu0 %vm960_vm0, %v2725_v34 }
 0x74b   : > { %v2437_v27 = vpop.permute.xlu1 %2436 }
 0x74d   : > { %v6061_v16 = vpop.eup %6060 }
 0x74e   : > { %v1349_v55 = vmul.f32 %v6061_v16, %v9098_v56 }
 0x74f   : > { %v2727_v49 = vpop.permute.xlu1 %2726 }
 0x750   : > { %5689 = vmatprep.mubr.msk.bf16.mxu0 %vm960_vm0, %v2727_v49  ;;  %v1360_v41 = vpack.c.bf16 %v1350_v4, %v1349_v55  ;;  %v9109_v55 = vld [vmem:[#allocation11_spill] sm:$0xff] }
 0x751   : > { %v6063_v50 = vpop.eup %6062 }
 0x752   : > { %5574 = vmatmul.mubr.msk.bf16.gmra.mxu1 %vm960_vm0, %v1360_v41  ;;  %v1353_v39 = vmul.f32 %v6063_v50, %v9101_v22 }
 0x753   : > { %5577 = vmatprep.mubr.msk.bf16.mxu1 %vm960_vm0, %v1361_v45  ;;  %v2433_v13 = vpop.permute.xlu1 %2432 }
 0x757   : > { %v2431_v38 = vpop.permute.xlu1 %2430 }
 0x75b   : > { %v2427_v54 = vpop.permute.xlu1 %2426 }
 0x763   : > { %v1217_v21 = vpop.xlane.xlu0 %1216 }
 0x764   : > { %6064 = vrcp.f32 %v1217_v21 }
 0x767   : > { %v2439_v6 = vpop.permute.xlu0 %2438 }
 0x768   : > { %5613 = vmatprep.subr.bf16.mxu1 %v2439_v6 }
 0x769   : > { %5614 = vmatpush3.bf16.msra.mxu1 %v2439_v6 }
 0x76a   : > { %5615 = vmatprep.subr.bf16.mxu1 %v2437_v27 }
 0x76b   : > { %v2435_v53 = vpop.permute.xlu0 %2434 }
 0x76d   : > { %5616 = vmatpush3.bf16.msra.mxu1 %v2437_v27 }
 0x76e   : > { %5617 = vmatprep.subr.bf16.mxu1 %v2435_v53 }
 0x76f   : > { %v2729_v7 = vpop.permute.xlu0 %2728 }
 0x770   : > { %5690 = vmatmul.mubr.msk.bf16.gmra.mxu0 %vm960_vm0, %v2729_v7 }
 0x771   : > { %v6065_v15 = vpop.eup %6064  ;;  %v7444_v36 = vpop.f32.mrf.mxu0  ;;  %5618 = vmatpush3.bf16.msra.mxu1 %v2435_v53 }
 0x772   : > { %5619 = vmatprep.subr.bf16.mxu1 %v2433_v13  ;;  %v1354_v3 = vmul.f32 %v6065_v15, %v9102_v20 }
 0x773   : > { %v7448_v35 = vpop.f32.mrf.mxu0  ;;  %v2429_v43 = vpop.permute.xlu0 %2428 }
 0x774   : > { %v1362_v31 = vpack.c.bf16 %v1354_v3, %v1353_v39 }
 0x775   : > { %v7450_v61 = vpop.f32.mrf.mxu0  ;;  %5620 = vmatpush3.bf16.msra.mxu1 %v2433_v13 }
 0x776   : > { %5578 = vmatmul.mubr.msk.bf16.gmra.mxu1 %vm960_vm0, %v1362_v31  ;;  %5621 = vmatprep.subr.bf16.mxu1 %v2431_v38 }
 0x777   : > { %v7453_v9 = vpop.f32.mrf.mxu0 }
 0x779   : > { %v7455_v32 = vpop.f32.mrf.mxu0  ;;  %5622 = vmatpush3.bf16.msra.mxu1 %v2431_v38 }
 0x77a   : > { %5623 = vmatprep.subr.bf16.mxu1 %v2429_v43 }
 0x77b   : > { %v7457_v42 = vpop.f32.mrf.mxu0 }
 0x77d   : > { %v7459_v60 = vpop.f32.mrf.mxu0  ;;  %5624 = vmatpush3.bf16.msra.mxu1 %v2429_v43 }
 0x77e   : > { %9103 = vst [vmem:[#allocation8_spill] sm:$0xff] %v7459_v60  ;;  %5625 = vmatprep.subr.bf16.mxu1 %v2427_v54 }
 0x77f   : > { %v7461_v10 = vpop.f32.mrf.mxu0 }
 0x780   : > { %9104 = vst [vmem:[#allocation10_spill] sm:$0xff] %v7461_v10 }
 0x781   : > { %v7463_v1 = vpop.f32.mrf.mxu0  ;;  %5626 = vmatpush3.bf16.msra.mxu1 %v2427_v54 }
 0x782   : > { %9105 = vst [vmem:[#allocation13_spill] sm:$0xff] %v7463_v1 }
 0x783   : > { %v7465_v17 = vpop.f32.mrf.mxu0 }
 0x784   : > { %9106 = vst [vmem:[#allocation15_spill] sm:$0xff] %v7465_v17 }
 0x785   : > { %v7467_v12 = vpop.f32.mrf.mxu0 }
 0x786   : > { %9107 = vst [vmem:[#allocation12_spill] sm:$0xff] %v7467_v12 }
 0x787   : > { %v7469_v26 = vpop.f32.mrf.mxu0 }
 0x788   : > { %9108 = vst [vmem:[#allocation14_spill] sm:$0xff] %v7469_v26 }
 0x789   : > { %v5599_v57 = vpop.f32.mrf.mxu0 }
 0x78a   : > { %2292 = vmax.xlane.f32.xlu0 %v5599_v57 }
 0x78b   : > { %v2225_v24 = vpop.f32.mrf.mxu0 }
 0x78c   : > { %2288 = vmax.xlane.f32.xlu1 %v2225_v24 }
 0x78d   : > { %v5600_v25 = vpop.f32.mrf.mxu0 }
 0x78e   : > { %2294 = vmax.xlane.f32.xlu0 %v5600_v25 }
 0x78f   : > { %v7471_v18 = vpop.f32.mrf.mxu0 }
 0x791   : > { %v7473_v14 = vpop.f32.mrf.mxu0 }
 0x792   : > { %2290 = vmax.xlane.f32.xlu0 %v7471_v18 }
 0x793   : > { %v7476_v8 = vpop.f32.mrf.mxu0 }
 0x795   : > { %v7478_v2 = vpop.f32.mrf.mxu0 }
 0x796   : > { %2300 = vmax.xlane.f32.xlu0 %v7473_v14 }
 0x797   : > { %v7481_v34 = vpop.f32.mrf.mxu0 }
 0x798   : > { %2298 = vmax.xlane.f32.xlu1 %v7481_v34 }
 0x799   : > { %v7484_v5 = vpop.f32.mrf.mxu0 }
 0x79a   : > { %2296 = vmax.xlane.f32.xlu0 %v7476_v8 }
 0x79b   : > { %v7487_v52 = vpop.f32.mrf.mxu0 }
 0x79d   : > { %v7489_v27 = vpop.f32.mrf.mxu0 }
 0x79e   : > { %2302 = vmax.xlane.f32.xlu0 %v7478_v2 }
 0x79f   : > { %v7492_v0 = vpop.f32.mrf.mxu0 }
 0x7a0   : > { %2306 = vmax.xlane.f32.xlu1 %v7492_v0 }
 0x7a1   : > { %v7496_v16 = vpop.f32.mrf.mxu0 }
 0x7a2   : > { %2308 = vmax.xlane.f32.xlu0 %v7484_v5 }
 0x7a3   : > { %v7500_v29 = vpop.f32.mrf.mxu0 }
 0x7a4   : > { %2316 = vmax.xlane.f32.xlu1 %v7496_v16 }
 0x7a5   : > { %v7504_v58 = vpop.f32.mrf.mxu0 }
 0x7a6   : > { %2304 = vmax.xlane.f32.xlu0 %v7487_v52 }
 0x7a7   : > { %v7507_v56 = vpop.f32.mrf.mxu0 }
 0x7a8   : > { %2312 = vmax.xlane.f32.xlu1 %v7500_v29 }
 0x7aa   : > { %2310 = vmax.xlane.f32.xlu0 %v7489_v27 }
 0x7ae   : > { %2318 = vmax.xlane.f32.xlu0 %v7504_v58 }
 0x7b2   : > { %2314 = vmax.xlane.f32.xlu0 %v7507_v56 }
 0x7b9   : > { %2732 = vrot.lane.b32.xlu1 %v6907_v48, %s6435_s27 }
 0x7bd   : > { %2424 = vrot.lane.b32.xlu1 %v9109_v55, %s6434_s21  ;;  %s8966_s21 = scalar_lea.hbm %s9023_s9, %s5132_s14 }
 0x7c1   : > { %3045 = vrot.lane.b32.xlu1 %v9088_v33, %s6435_s27 }
 0x7c5   : > { %3041 = vrot.lane.b32.xlu1 %v9089_v40, %s6435_s27 }
 0x7c8   : > { %2730 = vrot.lane.b32.xlu0 %v6885_v11, %s6435_s27 }
 0x7c9   : > { %3039 = vrot.lane.b32.xlu1 %v6853_v59, %s6435_s27 }
 0x7cc   : > { %3043 = vrot.lane.b32.xlu0 %v6834_v30, %s6435_s27 }
 0x7cd   : > { %3037 = vrot.lane.b32.xlu1 %v9082_v37, %s6435_s27 }
 0x7cf   : > { %v7526_v48 = vpop.f32.mrf.mxu0 }
 0x7d1   : > { %v7528_v62 = vpop.f32.mrf.mxu0 }
 0x7d3   : > { %v7530_v33 = vpop.f32.mrf.mxu0 }
 0x7d5   : > { %v7533_v40 = vpop.f32.mrf.mxu0 }
 0x7eb   : > { %2901 = vmax.xlane.f32.xlu0 %v7530_v33 }
 0x7ef   : > { %2897 = vmax.xlane.f32.xlu0 %v7533_v40 }
 0x7f1   : > { %2899 = vmax.xlane.f32.xlu1 %v7526_v48 }
 0x7f5   : > { %2895 = vmax.xlane.f32.xlu1 %v7528_v62 }
 0x808   : > { %v7538_v30 = vpop.f32.mrf.mxu0 }
 0x809   : > { %2907 = vmax.xlane.f32.xlu0 %v7538_v30 }
 0x80a   : > { %v7541_v59 = vpop.f32.mrf.mxu0 }
 0x80c   : > { %v7543_v11 = vpop.f32.mrf.mxu0 }
 0x80d   : > { %2903 = vmax.xlane.f32.xlu0 %v7541_v59 }
 0x80e   : > { %v7546_v37 = vpop.f32.mrf.mxu0 }
 0x80f   : > { %2905 = vmax.xlane.f32.xlu1 %v7546_v37 }
 0x811   : > { %2909 = vmax.xlane.f32.xlu0 %v7543_v11 }
 0x813   : > { %v2293_v4 = vpop.xlane.xlu0 %2292 }
 0x814   : > { %v2322_v49 = vsub.f32 %v5599_v57, %v2293_v4 }
 0x815   : > { %v2289_v44 = vpop.xlane.xlu1 %2288 }
 0x816   : > { %v2340_v46 = vmul.f32 1.442695, %v2322_v49  ;;  %v2320_v41 = vsub.f32 %v2225_v24, %v2289_v44 }
 0x817   : > { %v2295_v45 = vpop.xlane.xlu0 %2294 }
 0x818   : > { %6066 = vpow2.f32 %v2340_v46  ;;  %v2336_v21 = vmul.f32 1.442695, %v2320_v41  ;;  %v2323_v6 = vsub.f32 %v5600_v25, %v2295_v45 }
 0x81a   : > { %v2342_v53 = vmul.f32 1.442695, %v2323_v6  ;;  %6068 = vpow2.f32 %v2336_v21 }
 0x81b   : > { %v2291_v50 = vpop.xlane.xlu0 %2290 }
 0x81c   : > { %v2321_v13 = vsub.f32 %v7471_v18, %v2291_v50  ;;  %6070 = vpow2.f32 %v2342_v53 }
 0x81e   : > { %v2338_v7 = vmul.f32 1.442695, %v2321_v13 }
 0x81f   : > { %v2301_v15 = vpop.xlane.xlu0 %2300 }
 0x820   : > { %6072 = vpow2.f32 %v2338_v7  ;;  %v2326_v22 = vsub.f32 %v7473_v14, %v2301_v15 }
 0x821   : > { %v2299_v3 = vpop.xlane.xlu1 %2298 }
 0x822   : > { %v2348_v39 = vmul.f32 1.442695, %v2326_v22  ;;  %v2325_v54 = vsub.f32 %v7481_v34, %v2299_v3 }
 0x823   : > { %v2297_v20 = vpop.xlane.xlu0 %2296 }
 0x824   : > { %6074 = vpow2.f32 %v2348_v39  ;;  %v2324_v31 = vsub.f32 %v7476_v8, %v2297_v20  ;;  %v2346_v4 = vmul.f32 1.442695, %v2325_v54 }
 0x825   : > { %v7553_v38 = vpop.eup %6066 }
 0x826   : > { %v2344_v43 = vmul.f32 1.442695, %v2324_v31  ;;  %2372 = vadd.xlane.f32.xlu0 %v7553_v38 }
 0x827   : > { %v2303_v57 = vpop.xlane.xlu0 %2302  ;;  %v6069_v25 = vpop.eup %6068 }
 0x828   : > { %6076 = vpow2.f32 %v2344_v43  ;;  %v2327_v24 = vsub.f32 %v7478_v2, %v2303_v57  ;;  %v5862_v43 = vld [vmem:[%s9017_s3 + $0x28] sm:$0xff]  }
 0x829   : > { %v2307_v18 = vpop.xlane.xlu1 %2306  ;;  %v6071_v44 = vpop.eup %6070 }
 0x82a   : > { %v2350_v14 = vmul.f32 1.442695, %v2327_v24  ;;  %2368 = vadd.xlane.f32.xlu0 %v6069_v25  ;;  %v2329_v21 = vsub.f32 %v7492_v0, %v2307_v18 }
 0x82b   : > { %v2309_v49 = vpop.xlane.xlu0 %2308 }
 0x82c   : > { %6078 = vpow2.f32 %v2350_v14  ;;  %v2330_v8 = vsub.f32 %v7484_v5, %v2309_v49  ;;  %v2354_v5 = vmul.f32 1.442695, %v2329_v21  ;;  %v2417_v14 = vpack.c.bf16 %v6071_v44, %v7553_v38  ;;  %v5863_v49 = vld [vmem:[%s9017_s3 + $0x20] sm:$0xff]  }
 0x82d   : > { %v6073_v46 = vpop.eup %6072  ;;  %v2317_v41 = vpop.xlane.xlu1 %2316  ;;  %6080 = vpow2.f32 %v2346_v4  ;;  %v9110_v38 = vmov 0  }
 0x82e   : > { %v2356_v45 = vmul.f32 1.442695, %v2330_v8  ;;  %2374 = vadd.xlane.f32.xlu0 %v6071_v44  ;;  %2370 = vadd.xlane.f32.xlu1 %v6073_v46  ;;  %v2416_v34 = vpack.c.bf16 %v6073_v46, %v6069_v25  ;;  %v2334_v50 = vsub.f32 %v7496_v16, %v2317_v41 }
 0x82f   : > { %v2305_v2 = vpop.xlane.xlu0 %2304 }
 0x830   : > { %6082 = vpow2.f32 %v2356_v45  ;;  %v2328_v6 = vsub.f32 %v7487_v52, %v2305_v2  ;;  %5629 = vmatprep.mubr.bf16.mxu1 %v2416_v34  ;;  %v2364_v20 = vmul.f32 1.442695, %v2334_v50 }
 0x831   : > { %v6075_v53 = vpop.eup %6074  ;;  %v2313_v13 = vpop.xlane.xlu1 %2312 }
 0x832   : > { %v2352_v7 = vmul.f32 1.442695, %v2328_v6  ;;  %2380 = vadd.xlane.f32.xlu1 %v6075_v53  ;;  %v2332_v0 = vsub.f32 %v7500_v29, %v2313_v13 }
 0x833   : > { %v2311_v15 = vpop.xlane.xlu0 %2310 }
 0x834   : > { %6084 = vpow2.f32 %v2352_v7  ;;  %v2331_v22 = vsub.f32 %v7489_v27, %v2311_v15  ;;  %v2360_v57 = vmul.f32 1.442695, %v2332_v0  ;;  %v7585_v15 = vpop.f32.mrf.mxu0 }
 0x835   : > { %v6077_v39 = vpop.eup %6076  ;;  %v2733_v3 = vpop.permute.xlu1 %2732  ;;  %6086 = vpow2.f32 %v2354_v5 }
 0x836   : > { %v2358_v31 = vmul.f32 1.442695, %v2331_v22  ;;  %2376 = vadd.xlane.f32.xlu1 %v6077_v39  ;;  %v7587_v22 = vpop.f32.mrf.mxu0 }
 0x837   : > { %v2319_v52 = vpop.xlane.xlu0 %2318 }
 0x838   : > { %6088 = vpow2.f32 %v2358_v31  ;;  %v2335_v16 = vsub.f32 %v7504_v58, %v2319_v52 }
 0x839   : > { %v6079_v54 = vpop.eup %6078  ;;  %6090 = vpow2.f32 %v2364_v20  ;;  %v2425_v27 = vpop.permute.xlu1 %2424 }
 0x83a   : > { %5627 = vmatprep.subr.bf16.mxu1 %v2425_v27  ;;  %2382 = vadd.xlane.f32.xlu0 %v6079_v54  ;;  %v2366_v24 = vmul.f32 1.442695, %v2335_v16  ;;  %v6081_v25 = vpop.eup %6080  ;;  %6092 = vpow2.f32 %v2360_v57  ;;  %v2419_v45 = vpack.c.bf16 %v6079_v54, %v6075_v53 }
 0x83b   : > { %5628 = vmatpush3.bf16.msra.mxu1 %v2425_v27  ;;  %v2315_v29 = vpop.xlane.xlu0 %2314  ;;  %v2418_v4 = vpack.c.bf16 %v6081_v25, %v6077_v39  ;;  %v7589_v39 = vpop.f32.mrf.mxu0 }
 0x83c   : > { %v2333_v18 = vsub.f32 %v7507_v56, %v2315_v29  ;;  %5645 = vmatprep.subr.bf16.mxu1 %v5862_v43  ;;  %6094 = vpow2.f32 %v2366_v24 }
 0x83d   : > { %v6083_v58 = vpop.eup %6082  ;;  %v7576_v41 = vpop.permute.xlu1 %3045 }
 0x83e   : > { %v2362_v8 = vmul.f32 1.442695, %v2333_v18  ;;  %5630 = vmatmul.mubr.bf16.vlgmr.msra.gmra.mxu1 %v2417_v14  ;;  %2378 = vadd.xlane.f32.xlu0 %v6081_v25  ;;  %v7591_v20 = vpop.f32.mrf.mxu0 }
 0x83f   : > { %2388 = vadd.xlane.f32.xlu1 %v6083_v58  ;;  %5633 = vmatprep.mubr.bf16.mxu1 %v2418_v4  ;;  %v2731_v46 = vpop.permute.xlu0 %2730 }
 0x840   : > { %6096 = vpow2.f32 %v2362_v8  ;;  %5646 = vmatpush3.bf16.msra.mxu1 %v5862_v43  ;;  %5693 = vmatprep.mubr.msk.bf16.mxu0 %vm960_vm0, %v2731_v46 }
 0x841   : > { %v6085_v56 = vpop.eup %6084  ;;  %5694 = vmatmul.mubr.msk.bf16.gmra.mxu0 %vm960_vm0, %v2733_v3  ;;  %5647 = vmatprep.subr.bf16.mxu1 %v5863_v49  ;;  %v7603_v3 = vpop.f32.mrf.mxu1 }
 0x842   : > { %3688 = vmatprep.mubr.bf16.mxu0 %v9110_v38  ;;  %v6087_v44 = vpop.eup %6086 }
 0x843   : > { %2384 = vadd.xlane.f32.xlu1 %v6085_v56  ;;  %v2420_v21 = vpack.c.bf16 %v6087_v44, %v6085_v56  ;;  %v7607_v16 = vpop.f32.mrf.mxu1 }
 0x844   : > { %5648 = vmatpush3.bf16.msra.mxu1 %v5863_v49 }
 0x845   : > { %v6089_v34 = vpop.eup %6088  ;;  %5697 = vmatprep.subr.bf16.mxu1 %v7576_v41  ;;  %v7611_v57 = vpop.f32.mrf.mxu1 }
 0x846   : > { %v6091_v2 = vpop.eup %6090  ;;  %5634 = vmatmul.mubr.bf16.gmra.mxu1 %v2419_v45  ;;  %2390 = vadd.xlane.f32.xlu0 %v6089_v34  ;;  %v2421_v13 = vpack.c.bf16 %v6089_v34, %v6083_v58 }
 0x847   : > { %2396 = vadd.xlane.f32.xlu1 %v6091_v2  ;;  %5637 = vmatprep.mubr.bf16.mxu1 %v2420_v21  ;;  %v6093_v6 = vpop.eup %6092  ;;  %v7613_v24 = vpop.f32.mrf.mxu1 }
 0x849   : > { %v6095_v50 = vpop.eup %6094  ;;  %v7615_v25 = vpop.f32.mrf.mxu1 }
 0x84a   : > { %2386 = vadd.xlane.f32.xlu0 %v6087_v44  ;;  %v2423_v53 = vpack.c.bf16 %v6095_v50, %v6091_v2 }
 0x84b   : > { %2392 = vadd.xlane.f32.xlu1 %v6093_v6  ;;  %v7621_v58 = vpop.f32.mrf.mxu1 }
 0x84d   : > { %v6097_v7 = vpop.eup %6096  ;;  %v7623_v8 = vpop.f32.mrf.mxu1 }
 0x84e   : > { %5638 = vmatmul.mubr.bf16.gmra.mxu1 %v2421_v13  ;;  %2398 = vadd.xlane.f32.xlu0 %v6095_v50  ;;  %v2422_v5 = vpack.c.bf16 %v6097_v7, %v6093_v6 }
 0x84f   : > { %v7625_v46 = vpop.f32.mrf.mxu1 }
 0x850   : > { %5641 = vmatprep.mubr.bf16.mxu1 %v2422_v5 }
 0x851   : > { %v7627_v45 = vpop.f32.mrf.mxu1 }
 0x852   : > { %2394 = vadd.xlane.f32.xlu0 %v6097_v7 }
 0x853   : > { %v7629_v34 = vpop.f32.mrf.mxu1 }
 0x854   : > { %9111 = vst [vmem:[#allocation6_spill] sm:$0xff] %v7629_v34 }
 0x855   : > { %v7631_v6 = vpop.f32.mrf.mxu1 }
 0x856   : > { %5642 = vmatmul.mubr.bf16.gmra.mxu1 %v2423_v53  ;;  %9112 = vst [vmem:[#allocation7_spill] sm:$0xff] %v7631_v6 }
 0x857   : > { %v7635_v7 = vpop.f32.mrf.mxu1 }
 0x858   : > { %9113 = vst [vmem:[#allocation17_spill] sm:$0xff] %v7635_v7 }
 0x859   : > { %v7637_v5 = vpop.f32.mrf.mxu1 }
 0x85a   : > { %9114 = vst [vmem:[#allocation19_spill] sm:$0xff] %v7637_v5 }
 0x85b   : > { %v7639_v26 = vpop.f32.mrf.mxu1 }
 0x85c   : > { %3033 = vrot.lane.b32.xlu1 %v9083_v23, %s6435_s27  ;;  %v7597_v23 = vpop.permute.xlu0 %3043  ;;  %9115 = vst [vmem:[#allocation9_spill] sm:$0xff] %v7639_v26 }
 0x85d   : > { %v7644_v10 = vpop.f32.mrf.mxu1 }
 0x85f   : > { %v7649_v26 = vpop.f32.mrf.mxu1 }
 0x860   : > { %3031 = vrot.lane.b32.xlu1 %v9109_v55, %s6435_s27  ;;  %v7599_v55 = vpop.permute.xlu1 %3041 }
 0x864   : > { %v7601_v0 = vpop.permute.xlu1 %3039 }
 0x868   : > { %3035 = vrot.lane.b32.xlu0 %v9092_v63, %s6435_s27  ;;  %v7605_v52 = vpop.permute.xlu1 %3037  ;;  %s6376_s27 = scalar_lea.vmem %s6375_s26, 4096 }
 0x874   : > { %v2902_v63 = vpop.xlane.xlu0 %2901 }
 0x875   : > { %v2930_v7 = vsub.f32 %v7530_v33, %v2902_v63 }
 0x878   : > { %v2898_v31 = vpop.xlane.xlu0 %2897 }
 0x879   : > { %v2928_v34 = vsub.f32 %v7533_v40, %v2898_v31 }
 0x87a   : > { %v2900_v54 = vpop.xlane.xlu1 %2899 }
 0x87b   : > { %v2929_v5 = vsub.f32 %v7526_v48, %v2900_v54 }
 0x87e   : > { %v2896_v29 = vpop.xlane.xlu1 %2895 }
 0x87f   : > { %v2927_v12 = vsub.f32 %v7528_v62, %v2896_v29  ;;  %v2949_v29 = vmul.f32 1.442695, %v2930_v7 }
 0x881   : > { %v2943_v6 = vmul.f32 1.442695, %v2927_v12 }
 0x884   : > { %2913 = vmax.xlane.f32.xlu1 %v7591_v20 }
 0x887   : > { %2911 = vmax.xlane.f32.xlu0 %v7587_v22 }
 0x88b   : > { %2915 = vmax.xlane.f32.xlu0 %v7585_v15 }
 0x88f   : > { %2917 = vmax.xlane.f32.xlu0 %v7589_v39 }
 0x892   : > { %v7609_v43 = vpop.xlane.xlu0 %2907 }
 0x896   : > { %v2904_v27 = vpop.xlane.xlu0 %2903 }
 0x897   : > { %v2931_v62 = vsub.f32 %v7541_v59, %v2904_v27  ;;  %v2933_v59 = vsub.f32 %v7538_v30, %v7609_v43 }
 0x898   : > { %v7619_v14 = vpop.xlane.xlu1 %2905 }
 0x899   : > { %v2951_v33 = vmul.f32 1.442695, %v2931_v62 }
 0x89a   : > { %v7617_v18 = vpop.xlane.xlu0 %2909 }
 0x8af   : > { %v2373_v4 = vpop.xlane.xlu0 %2372 }
 0x8b3   : > { %v2369_v56 = vpop.xlane.xlu0 %2368 }
 0x8b4   : > { %6098 = vrcp.f32 %v2369_v56  ;;  %v2947_v56 = vmul.f32 1.442695, %v2929_v5 }
 0x8b7   : > { %v2371_v49 = vpop.xlane.xlu1 %2370  ;;  %v2375_v21 = vpop.xlane.xlu0 %2374 }
 0x8b8   : > { %6100 = vrcp.f32 %v2375_v21  ;;  %v2932_v21 = vsub.f32 %v7546_v37, %v7619_v14  ;;  %v2955_v37 = vmul.f32 1.442695, %v2933_v59 }
 0x8b9   : > { %6102 = vrcp.f32 %v2371_v49 }
 0x8ba   : > { %6104 = vrcp.f32 %v2373_v4  ;;  %v2945_v4 = vmul.f32 1.442695, %v2928_v34 }
 0x8bb   : > { %v2381_v44 = vpop.xlane.xlu1 %2380  ;;  %6106 = vpow2.f32 %v2943_v6  ;;  %v2934_v6 = vsub.f32 %v7543_v11, %v7617_v18 }
 0x8bd   : > { %v2957_v11 = vmul.f32 1.442695, %v2934_v6 }
 0x8bf   : > { %v2377_v2 = vpop.xlane.xlu1 %2376 }
 0x8c0   : > { %6108 = vrcp.f32 %v2377_v2 }
 0x8c1   : > { %v6099_v31 = vpop.eup %6098 }
 0x8c3   : > { %v2383_v50 = vpop.xlane.xlu0 %2382 }
 0x8c4   : > { %6110 = vrcp.f32 %v2383_v50 }
 0x8c5   : > { %v6101_v27 = vpop.eup %6100 }
 0x8c7   : > { %v2379_v53 = vpop.xlane.xlu0 %2378 }
 0x8c8   : > { %v7633_v13 = vpop.xlane.xlu1 %2388  ;;  %6112 = vrcp.f32 %v2379_v53 }
 0x8c9   : > { %6114 = vrcp.f32 %v2381_v44  ;;  %v6103_v44 = vpop.eup %6102 }
 0x8ca   : > { %6116 = vpow2.f32 %v2949_v29  ;;  %v6105_v30 = vpop.eup %6104 }
 0x8cb   : > { %6118 = vpow2.f32 %v2947_v56  ;;  %v2953_v56 = vmul.f32 1.442695, %v2932_v21 }
 0x8cc   : > { %v2385_v38 = vpop.xlane.xlu1 %2384  ;;  %6120 = vpow2.f32 %v2945_v4 }
 0x8cd   : > { %6122 = vpow2.f32 %v2951_v33 }
 0x8ce   : > { %6124 = vrcp.f32 %v2385_v38  ;;  %v7674_v38 = vpop.eup %6106 }
 0x8cf   : > { %v2391_v17 = vpop.xlane.xlu0 %2390 }
 0x8d0   : > { %v7642_v1 = vpop.xlane.xlu1 %2396  ;;  %6126 = vrcp.f32 %v2391_v17 }
 0x8d3   : > { %v2387_v60 = vpop.xlane.xlu0 %2386 }
 0x8d4   : > { %v7652_v49 = vpop.xlane.xlu1 %2392  ;;  %6128 = vrcp.f32 %v2387_v60 }
 0x8d5   : > { %6130 = vrcp.f32 %v7633_v13 }
 0x8d6   : > { %6132 = vpow2.f32 %v2955_v37 }
 0x8d7   : > { %v2399_v48 = vpop.xlane.xlu0 %2398  ;;  %6134 = vpow2.f32 %v2953_v56 }
 0x8d8   : > { %v7660_v34 = vpop.permute.xlu1 %3033  ;;  %6136 = vpow2.f32 %v2957_v11 }
 0x8d9   : > { %6138 = vrcp.f32 %v7652_v49 }
 0x8db   : > { %v2395_v14 = vpop.xlane.xlu0 %2394 }
 0x8dc   : > { %v7676_v17 = vpop.permute.xlu1 %3031 }
 0x8fe   : > { %v5631_v12 = vpop.f32.mrf.mxu1 }
 0x8ff   : > { %v2547_v62 = vmul.f32 %v6105_v30, %v5631_v12  ;;  %v6109_v12 = vpop.eup %6108  ;;  %6140 = vrcp.f32 %v2399_v48 }
 0x900   : > { %v2482_v63 = vpop.f32.mrf.mxu1 }
 0x901   : > { %v7654_v40 = vpop.f32.mrf.mxu0  ;;  %v2545_v43 = vmul.f32 %v6099_v31, %v2482_v63  ;;  %v6111_v63 = vpop.eup %6110  ;;  %6142 = vrcp.f32 %v2395_v14 }
 0x902   : > { %v5632_v54 = vpop.f32.mrf.mxu1  ;;  %v6113_v13 = vpop.eup %6112  ;;  %6144 = vrcp.f32 %v7642_v1 }
 0x903   : > { %v7662_v2 = vpop.f32.mrf.mxu0  ;;  %v2548_v50 = vmul.f32 %v6101_v27, %v5632_v54  ;;  %v7681_v31 = vpop.permute.xlu0 %3035 }
 0x904   : > { %v2485_v7 = vpop.f32.mrf.mxu1  ;;  %2919 = vmax.xlane.f32.xlu1 %v7662_v2  ;;  %v6115_v21 = vpop.eup %6114 }
 0x905   : > { %v2546_v5 = vmul.f32 %v6103_v44, %v2485_v7  ;;  %v7667_v53 = vpop.f32.mrf.mxu0  ;;  %v2562_v18 = vpack.c.bf16 %v2548_v50, %v2547_v62  ;;  %v7687_v7 = vpop.eup %6116 }
 0x906   : > { %v5635_v29 = vpop.f32.mrf.mxu1 }
 0x907   : > { %v2561_v4 = vpack.c.bf16 %v2546_v5, %v2545_v43  ;;  %v7669_v33 = vpop.f32.mrf.mxu0  ;;  %v7690_v5 = vpop.eup %6118 }
 0x908   : > { %v2498_v54 = vpop.f32.mrf.mxu1  ;;  %2923 = vmax.xlane.f32.xlu1 %v7654_v40  ;;  %2921 = vmax.xlane.f32.xlu0 %v7669_v33  ;;  %v7693_v62 = vpop.eup %6120 }
 0x909   : > { %5649 = vmatprep.mubr.msk.bf16.mxu1 %vm960_vm0, %v2561_v4  ;;  %v2549_v44 = vmul.f32 %v6109_v12, %v2498_v54 }
 0x90a   : > { %v5636_v60 = vpop.f32.mrf.mxu1  ;;  %5650 = vmatmul.mubr.msk.bf16.vlgmr.msra.gmra.mxu1 %vm960_vm0, %v2562_v18 }
 0x90b   : > { %5698 = vmatpush3.bf16.msra.mxu1 %v7576_v41  ;;  %v2552_v59 = vmul.f32 %v6111_v63, %v5636_v60  ;;  %v2551_v41 = vmul.f32 %v6115_v21, %v5635_v29 }
 0x90c   : > { %5699 = vmatprep.subr.bf16.mxu1 %v7597_v23  ;;  %v2501_v27 = vpop.f32.mrf.mxu1  ;;  %2975 = vadd.xlane.f32.xlu1 %v7674_v38 }
 0x90d   : > { %v2550_v6 = vmul.f32 %v6113_v13, %v2501_v27  ;;  %v2914_v50 = vpop.xlane.xlu1 %2913  ;;  %2925 = vmax.xlane.f32.xlu0 %v7667_v53  ;;  %v2564_v49 = vpack.c.bf16 %v2552_v59, %v2551_v41 }
 0x90e   : > { %v2936_v30 = vsub.f32 %v7591_v20, %v2914_v50  ;;  %v5639_v43 = vpop.f32.mrf.mxu1  ;;  %v7698_v20 = vpop.eup %6122 }
 0x90f   : > { %v2563_v37 = vpack.c.bf16 %v2550_v6, %v2549_v44  ;;  %5700 = vmatpush3.bf16.msra.mxu1 %v7597_v23  ;;  %v6125_v23 = vpop.eup %6124 }
 0x910   : > { %v2961_v56 = vmul.f32 1.442695, %v2936_v30  ;;  %5701 = vmatprep.subr.bf16.mxu1 %v7599_v55  ;;  %v2514_v4 = vpop.f32.mrf.mxu1  ;;  %2979 = vadd.xlane.f32.xlu1 %v7690_v5  ;;  %v2912_v48 = vpop.xlane.xlu0 %2911 }
 0x911   : > { %2977 = vadd.xlane.f32.xlu0 %v7693_v62  ;;  %v2935_v14 = vsub.f32 %v7587_v22, %v2912_v48  ;;  %5653 = vmatprep.mubr.msk.bf16.mxu1 %vm960_vm0, %v2563_v37  ;;  %v6127_v1 = vpop.eup %6126  ;;  %v2553_v63 = vmul.f32 %v6125_v23, %v2514_v4 }
 0x912   : > { %6146 = vpow2.f32 %v2961_v56  ;;  %v5640_v29 = vpop.f32.mrf.mxu1  ;;  %5654 = vmatmul.mubr.msk.bf16.gmra.mxu1 %vm960_vm0, %v2564_v49  ;;  %v6129_v18 = vpop.eup %6128 }
 0x913   : > { %v2959_v11 = vmul.f32 1.442695, %v2935_v14  ;;  %5702 = vmatpush3.bf16.msra.mxu1 %v7599_v55  ;;  %v2556_v54 = vmul.f32 %v6127_v1, %v5640_v29  ;;  %v6131_v22 = vpop.eup %6130 }
 0x914   : > { %5703 = vmatprep.subr.bf16.mxu1 %v7601_v0  ;;  %v2517_v12 = vpop.f32.mrf.mxu1  ;;  %2983 = vadd.xlane.f32.xlu1 %v7698_v20  ;;  %v2916_v60 = vpop.xlane.xlu0 %2915  ;;  %v2555_v27 = vmul.f32 %v6131_v22, %v5639_v43 }
 0x915   : > { %6148 = vpow2.f32 %v2959_v11  ;;  %v2554_v13 = vmul.f32 %v6129_v18, %v2517_v12  ;;  %2981 = vadd.xlane.f32.xlu0 %v7687_v7  ;;  %v2937_v59 = vsub.f32 %v7585_v15, %v2916_v60  ;;  %v6133_v44 = vpop.eup %6132 }
 0x916   : > { %v5643_v21 = vpop.f32.mrf.mxu1  ;;  %v6135_v50 = vpop.eup %6134  ;;  %v2566_v41 = vpack.c.bf16 %v2556_v54, %v2555_v27 }
 0x917   : > { %v2565_v55 = vpack.c.bf16 %v2554_v13, %v2553_v63  ;;  %v2963_v6 = vmul.f32 1.442695, %v2937_v59  ;;  %5704 = vmatpush3.bf16.msra.mxu1 %v7601_v0  ;;  %v6137_v49 = vpop.eup %6136  ;;  %v3025_v63 = vpack.c.bf16 %v6135_v50, %v7698_v20 }
 0x918   : > { %5705 = vmatprep.subr.bf16.mxu1 %v7605_v52  ;;  %v2530_v30 = vpop.f32.mrf.mxu1  ;;  %2987 = vadd.xlane.f32.xlu1 %v6133_v44  ;;  %v2918_v37 = vpop.xlane.xlu0 %2917 }
 0x919   : > { %6150 = vpow2.f32 %v2963_v6  ;;  %2985 = vadd.xlane.f32.xlu0 %v6135_v50  ;;  %v2938_v56 = vsub.f32 %v7589_v39, %v2918_v37  ;;  %5657 = vmatprep.mubr.msk.bf16.mxu1 %vm960_vm0, %v2565_v55  ;;  %v6139_v15 = vpop.eup %6138 }
 0x91a   : > { %v5644_v43 = vpop.f32.mrf.mxu1  ;;  %5658 = vmatmul.mubr.msk.bf16.gmra.mxu1 %vm960_vm0, %v2566_v41  ;;  %v6141_v4 = vpop.eup %6140  ;;  %v2557_v1 = vmul.f32 %v6139_v15, %v2530_v30 }
 0x91b   : > { %v2965_v0 = vmul.f32 1.442695, %v2938_v56  ;;  %5706 = vmatpush3.bf16.msra.mxu1 %v7605_v52  ;;  %v6143_v48 = vpop.eup %6142  ;;  %v2560_v14 = vmul.f32 %v6141_v4, %v5644_v43  ;;  %v3023_v52 = vpack.c.bf16 %v7693_v62, %v7674_v38  ;;  %v3026_v38 = vpack.c.bf16 %v6137_v49, %v6133_v44 }
 0x91c   : > { %5707 = vmatprep.subr.bf16.mxu1 %v7681_v31  ;;  %v2533_v23 = vpop.f32.mrf.mxu1  ;;  %v6145_v29 = vpop.eup %6144  ;;  %v2057_v43 = vadd.f32 %v7603_v3, %v7435_v51  ;;  %v2073_v51 = vadd.f32 %v7615_v25, %v7444_v36  ;;  %v2068_v36 = vadd.f32 %v7625_v46, %v7453_v9 }
 0x91d   : > { %6152 = vpow2.f32 %v2965_v0  ;;  %v2558_v11 = vmul.f32 %v6143_v48, %v2533_v23  ;;  %2989 = vadd.xlane.f32.xlu0 %v6137_v49  ;;  %v2559_v39 = vmul.f32 %v6145_v29, %v5643_v21 }
 0x91f   : > { %v6147_v18 = vpop.eup %6146  ;;  %v2567_v54 = vpack.c.bf16 %v2558_v11, %v2557_v1  ;;  %5708 = vmatpush3.bf16.msra.mxu1 %v7681_v31  ;;  %v2568_v12 = vpack.c.bf16 %v2560_v14, %v2559_v39  ;;  %v3024_v31 = vpack.c.bf16 %v7687_v7, %v7690_v5  ;;  %v5865_v7 = vld [vmem:[%s9017_s3 + $0x30] sm:$0xff]   ;;  %v2060_v14 = vadd.f32 %v7611_v57, %v7439_v47 }
 0x920   : > { %5709 = vmatprep.subr.bf16.mxu1 %v7660_v34  ;;  %v2052_v1 = vadd.f32 %v7613_v24, %v7441_v19 }
 0x921   : > { %2993 = vadd.xlane.f32.xlu0 %v6147_v18  ;;  %5661 = vmatprep.mubr.msk.bf16.mxu1 %vm960_vm0, %v2567_v54  ;;  %v2076_v54 = vadd.f32 %v7623_v8, %v7450_v61 }
 0x922   : > { %v6149_v60 = vpop.eup %6148  ;;  %5662 = vmatmul.mubr.msk.bf16.gmra.mxu1 %vm960_vm0, %v2568_v12 }
 0x923   : > { %5710 = vmatpush3.bf16.msra.mxu1 %v7660_v34  ;;  %5713 = vmatprep.mubr.bf16.mxu1 %v3023_v52  ;;  %v3027_v62 = vpack.c.bf16 %v6147_v18, %v6149_v60 }
 0x924   : > { %5711 = vmatprep.subr.bf16.mxu1 %v7676_v17  ;;  %2991 = vadd.xlane.f32.xlu1 %v6149_v60 }
 0x926   : > { %v6151_v22 = vpop.eup %6150 }
 0x927   : > { %5712 = vmatpush3.bf16.msra.mxu1 %v7676_v17  ;;  %v5864_v17 = vld [vmem:[%s9017_s3 + $0x38] sm:$0xff]  }
 0x928   : > { %2995 = vadd.xlane.f32.xlu1 %v6151_v22  ;;  %5729 = vmatprep.subr.bf16.mxu1 %v5864_v17 }
 0x92a   : > { %v6153_v13 = vpop.eup %6152  ;;  %5714 = vmatmul.mubr.bf16.vlgmr.msra.gmra.mxu1 %v3024_v31  ;;  %v9116_v31 = vld [vmem:[#allocation6_spill] sm:$0xff] }
 0x92b   : > { %5717 = vmatprep.mubr.bf16.mxu1 %v3025_v63  ;;  %2997 = vadd.xlane.f32.xlu0 %v6153_v13  ;;  %v3028_v34 = vpack.c.bf16 %v6153_v13, %v6151_v22  ;;  %v2081_v61 = vadd.f32 %v9116_v31, %v7457_v42 }
 0x92c   : > { %5730 = vmatpush3.bf16.msra.mxu1 %v5864_v17  ;;  %v9119_v17 = vld [vmem:[#allocation10_spill] sm:$0xff] }
 0x92d   : > { %5731 = vmatprep.subr.bf16.mxu1 %v5865_v7 }
 0x930   : > { %5732 = vmatpush3.bf16.msra.mxu1 %v5865_v7  ;;  %v9120_v7 = vld [vmem:[#allocation17_spill] sm:$0xff] }
 0x932   : > { %5718 = vmatmul.mubr.bf16.gmra.mxu1 %v3026_v38  ;;  %v9117_v38 = vld [vmem:[#allocation8_spill] sm:$0xff] }
 0x933   : > { %5721 = vmatprep.mubr.bf16.mxu1 %v3027_v62  ;;  %v9118_v62 = vld [vmem:[#allocation7_spill] sm:$0xff] }
 0x934   : > { %v2092_v9 = vadd.f32 %v9118_v62, %v9117_v38 }
 0x93a   : > { %5722 = vmatmul.mubr.bf16.gmra.mxu1 %v3028_v34 }
 0x98d   : > { %v2920_v5 = vpop.xlane.xlu1 %2919 }
 0x98e   : > { %v2939_v20 = vsub.f32 %v7662_v2, %v2920_v5 }
 0x990   : > { %v2967_v59 = vmul.f32 1.442695, %v2939_v20 }
 0x991   : > { %v2924_v27 = vpop.xlane.xlu1 %2923  ;;  %v2922_v21 = vpop.xlane.xlu0 %2921 }
 0x992   : > { %6154 = vpow2.f32 %v2967_v59  ;;  %v2941_v44 = vsub.f32 %v7654_v40, %v2924_v27  ;;  %v2940_v55 = vsub.f32 %v7669_v33, %v2922_v21  ;;  %v9121_v59 = vld [vmem:[#allocation13_spill] sm:$0xff]  ;;  %v9122_v27 = vld [vmem:[#allocation19_spill] sm:$0xff] }
 0x993   : > { %v2105_v42 = vadd.f32 %v9122_v27, %v9121_v59 }
 0x994   : > { %v2971_v6 = vmul.f32 1.442695, %v2941_v44  ;;  %v2969_v50 = vmul.f32 1.442695, %v2940_v55 }
 0x995   : > { %v2976_v19 = vpop.xlane.xlu1 %2975 }
 0x996   : > { %6156 = vpow2.f32 %v2971_v6  ;;  %v2926_v41 = vpop.xlane.xlu0 %2925  ;;  %v9123_v6 = vld [vmem:[#allocation15_spill] sm:$0xff] }
 0x997   : > { %6158 = vpow2.f32 %v2969_v50  ;;  %v2942_v30 = vsub.f32 %v7667_v53, %v2926_v41  ;;  %v2049_v53 = vadd.f32 %v7607_v16, %v7437_v28  ;;  %v2065_v16 = vadd.f32 %v7621_v58, %v7448_v35  ;;  %v9124_v50 = vld [vmem:[#allocation9_spill] sm:$0xff] }
 0x998   : > { %v2089_v35 = vadd.f32 %v7627_v45, %v7455_v32  ;;  %v2084_v32 = vadd.f32 %v9120_v7, %v9119_v17  ;;  %v2097_v41 = vadd.f32 %v9124_v50, %v9123_v6 }
 0x999   : > { %v2973_v37 = vmul.f32 1.442695, %v2942_v30  ;;  %v2980_v8 = vpop.xlane.xlu1 %2979 }
 0x99a   : > { %v2978_v18 = vpop.xlane.xlu0 %2977 }
 0x99b   : > { %6160 = vpow2.f32 %v2973_v37 }
 0x99c   : > { %6162 = vrcp.f32 %v2976_v19 }
 0x99d   : > { %v2984_v21 = vpop.xlane.xlu1 %2983 }
 0x99e   : > { %v2982_v58 = vpop.xlane.xlu0 %2981 }
 0x99f   : > { %v6155_v49 = vpop.eup %6154  ;;  %6164 = vrcp.f32 %v2982_v58 }
 0x9a0   : > { %2999 = vadd.xlane.f32.xlu1 %v6155_v49  ;;  %6166 = vrcp.f32 %v2978_v18 }
 0x9a1   : > { %6168 = vrcp.f32 %v2980_v8 }
 0x9a2   : > { %v2986_v45 = vpop.xlane.xlu0 %2985  ;;  %6170 = vrcp.f32 %v2984_v21 }
 0x9a3   : > { %v6157_v2 = vpop.eup %6156 }
 0x9a4   : > { %v6159_v56 = vpop.eup %6158  ;;  %3003 = vadd.xlane.f32.xlu1 %v6157_v2 }
 0x9a5   : > { %3001 = vadd.xlane.f32.xlu0 %v6159_v56  ;;  %v3029_v15 = vpack.c.bf16 %v6159_v56, %v6155_v49  ;;  %v9125_v49 = vld [vmem:[#allocation12_spill] sm:$0xff] }
 0x9a6   : > { %v2990_v56 = vpop.xlane.xlu0 %2989 }
 0x9a7   : > { %5725 = vmatprep.mubr.bf16.mxu1 %v3029_v15  ;;  %6172 = vrcp.f32 %v2990_v56 }
 0x9a8   : > { %v6161_v40 = vpop.eup %6160  ;;  %6174 = vrcp.f32 %v2986_v45 }
 0x9a9   : > { %3005 = vadd.xlane.f32.xlu0 %v6161_v40  ;;  %v3030_v33 = vpack.c.bf16 %v6161_v40, %v6157_v2  ;;  %v2108_v2 = vadd.f32 %v7644_v10, %v9125_v49 }
 0x9ab   : > { %5726 = vmatmul.mubr.bf16.gmra.mxu1 %v3030_v33  ;;  %v2988_v33 = vpop.xlane.xlu1 %2987 }
 0x9ac   : > { %6176 = vrcp.f32 %v2988_v33 }
 0x9ca   : > { %v5651_v4 = vpop.f32.mrf.mxu1 }
 0x9cb   : > { %v7742_v0 = vadd.f32 %v5651_v4, %v2057_v43 }
 0x9cc   : > { %v2639_v48 = vpop.f32.mrf.mxu1 }
 0x9cd   : > { %v7746_v23 = vadd.f32 %v2639_v48, %v2049_v53  ;;  %v2994_v48 = vpop.xlane.xlu0 %2993 }
 0x9ce   : > { %v5652_v29 = vpop.f32.mrf.mxu1  ;;  %6178 = vrcp.f32 %v2994_v48 }
 0x9cf   : > { %v7750_v11 = vadd.f32 %v5652_v29, %v2060_v14  ;;  %v2992_v14 = vpop.xlane.xlu1 %2991 }
 0x9d0   : > { %v2642_v39 = vpop.f32.mrf.mxu1 }
 0x9d1   : > { %v7754_v3 = vadd.f32 %v2642_v39, %v2052_v1  ;;  %v6163_v1 = vpop.eup %6162 }
 0x9d2   : > { %v5655_v28 = vpop.f32.mrf.mxu1  ;;  %v6165_v10 = vpop.eup %6164 }
 0x9d3   : > { %v7758_v47 = vadd.f32 %v5655_v28, %v2073_v51  ;;  %v2998_v51 = vpop.xlane.xlu0 %2997  ;;  %v6167_v28 = vpop.eup %6166 }
 0x9d4   : > { %v2655_v57 = vpop.f32.mrf.mxu1  ;;  %6180 = vrcp.f32 %v2998_v51 }
 0x9d5   : > { %v7762_v24 = vadd.f32 %v2655_v57, %v2065_v16  ;;  %v6169_v57 = vpop.eup %6168  ;;  %6182 = vrcp.f32 %v2992_v14 }
 0x9d6   : > { %v5656_v12 = vpop.f32.mrf.mxu1  ;;  %v6171_v31 = vpop.eup %6170 }
 0x9d7   : > { %v7766_v25 = vadd.f32 %v5656_v12, %v2076_v54  ;;  %v2996_v54 = vpop.xlane.xlu1 %2995  ;;  %v6173_v8 = vpop.eup %6172 }
 0x9d8   : > { %v2658_v52 = vpop.f32.mrf.mxu1  ;;  %6184 = vrcp.f32 %v2996_v54 }
 0x9d9   : > { %v7770_v60 = vadd.f32 %v2658_v52, %v2068_v36 }
 0x9da   : > { %v5659_v22 = vpop.f32.mrf.mxu1 }
 0x9db   : > { %v7774_v63 = vadd.f32 %v5659_v22, %v2089_v35 }
 0x9dc   : > { %v2671_v13 = vpop.f32.mrf.mxu1 }
 0x9dd   : > { %v7778_v46 = vadd.f32 %v2671_v13, %v2081_v61  ;;  %v6175_v13 = vpop.eup %6174 }
 0x9de   : > { %v5660_v34 = vpop.f32.mrf.mxu1 }
 0x9df   : > { %v7782_v5 = vadd.f32 %v5660_v34, %v2092_v9  ;;  %v6177_v9 = vpop.eup %6176 }
 0x9e0   : > { %v2674_v20 = vpop.f32.mrf.mxu1  ;;  %v6179_v27 = vpop.eup %6178 }
 0x9e1   : > { %v7786_v44 = vadd.f32 %v2674_v20, %v2084_v32  ;;  %v6181_v21 = vpop.eup %6180 }
 0x9e2   : > { %v5663_v55 = vpop.f32.mrf.mxu1 }
 0x9e3   : > { %v7790_v30 = vadd.f32 %v5663_v55, %v2105_v42  ;;  %v6183_v55 = vpop.eup %6182 }
 0x9e4   : > { %v2687_v37 = vpop.f32.mrf.mxu1 }
 0x9e5   : > { %v7794_v15 = vadd.f32 %v2687_v37, %v2097_v41  ;;  %v6185_v41 = vpop.eup %6184 }
 0x9e6   : > { %v5664_v40 = vpop.f32.mrf.mxu1 }
 0x9e7   : > { %v7796_v43 = vadd.f32 %v5664_v40, %v2108_v2 }
 0x9e8   : > { %v7798_v4 = vpop.f32.mrf.mxu1 }
 0x9ea   : > { %v5715_v53 = vpop.f32.mrf.mxu1 }
 0x9eb   : > { %v3154_v36 = vmul.f32 %v6169_v57, %v5715_v53 }
 0x9ec   : > { %v3089_v29 = vpop.f32.mrf.mxu1 }
 0x9ed   : > { %v3152_v19 = vmul.f32 %v6163_v1, %v3089_v29 }
 0x9ee   : > { %v5716_v39 = vpop.f32.mrf.mxu1 }
 0x9ef   : > { %v3155_v16 = vmul.f32 %v6165_v10, %v5716_v39 }
 0x9f0   : > { %v3092_v18 = vpop.f32.mrf.mxu1 }
 0x9f1   : > { %v3153_v12 = vmul.f32 %v6167_v28, %v3092_v18  ;;  %v3169_v58 = vpack.c.bf16 %v3155_v16, %v3154_v36 }
 0x9f2   : > { %v5719_v52 = vpop.f32.mrf.mxu1 }
 0x9f3   : > { %v3168_v35 = vpack.c.bf16 %v3153_v12, %v3152_v19  ;;  %v3158_v7 = vmul.f32 %v6177_v9, %v5719_v52 }
 0x9f4   : > { %v3105_v22 = vpop.f32.mrf.mxu1 }
 0x9f5   : > { %5733 = vmatprep.mubr.msk.bf16.mxu1 %vm960_vm0, %v3168_v35  ;;  %v3156_v34 = vmul.f32 %v6171_v31, %v3105_v22 }
 0x9f6   : > { %v5720_v61 = vpop.f32.mrf.mxu1  ;;  %5734 = vmatmul.mubr.msk.bf16.vlgmr.msra.gmra.mxu1 %vm960_vm0, %v3169_v58 }
 0x9f7   : > { %v3159_v38 = vmul.f32 %v6173_v8, %v5720_v61  ;;  %v6354_v8 = vld [vmem:[%s6542_s25] sm:$0xff] }
 0x9f8   : > { %v3108_v62 = vpop.f32.mrf.mxu1 }
 0x9f9   : > { %v3157_v17 = vmul.f32 %v6175_v13, %v3108_v62  ;;  %v3171_v20 = vpack.c.bf16 %v3159_v38, %v3158_v7  ;;  %v6355_v38 = vld [vmem:[%s6542_s25 + $0x10] sm:$0xff] }
 0x9fa   : > { %v5723_v32 = vpop.f32.mrf.mxu1 }
 0x9fb   : > { %v3170_v45 = vpack.c.bf16 %v3157_v17, %v3156_v34  ;;  %v3162_v2 = vmul.f32 %v6185_v41, %v5723_v32  ;;  %v7815_v34 = vld [vmem:[%s9018_s4] ss:$0 sm:$0xff]  ;;  %v6356_v32 = vld [vmem:[%s6542_s25 + $0x8] sm:$0xff] }
 0x9fc   : > { %v3121_v59 = vpop.f32.mrf.mxu1 }
 0x9fd   : > { %5737 = vmatprep.mubr.msk.bf16.mxu1 %vm960_vm0, %v3170_v45  ;;  %v3160_v37 = vmul.f32 %v6183_v55, %v3121_v59 }
 0x9fe   : > { %v5724_v42 = vpop.f32.mrf.mxu1  ;;  %5738 = vmatmul.mubr.msk.bf16.gmra.mxu1 %vm960_vm0, %v3171_v20 }
 0x9ff   : > { %v3163_v6 = vmul.f32 %v6181_v21, %v5724_v42 }
 0xa00   : > { %v3124_v50 = vpop.f32.mrf.mxu1 }
 0xa01   : > { %v3161_v49 = vmul.f32 %v6179_v27, %v3124_v50  ;;  %v3173_v40 = vpack.c.bf16 %v3163_v6, %v3162_v2  ;;  %v6357_v27 = vld [vmem:[%s6542_s25 + $0x18] sm:$0xff]  ;;  %v6358_v6 = vld [vmem:[%s6542_s25 + $0x20] sm:$0xff] }
 0xa03   : > { %v3172_v56 = vpack.c.bf16 %v3161_v49, %v3160_v37  ;;  %v6359_v49 = vld [vmem:[%s6542_s25 + $0x30] sm:$0xff] }
 0xa05   : > { %5741 = vmatprep.mubr.msk.bf16.mxu1 %vm960_vm0, %v3172_v56 }
 0xa06   : > { %5742 = vmatmul.mubr.msk.bf16.gmra.mxu1 %vm960_vm0, %v3173_v40 }
 0xa29   : > { %v3000_v53 = vpop.xlane.xlu1 %2999 }
 0xa2a   : > { %6186 = vrcp.f32 %v3000_v53 }
 0xa2d   : > { %v3004_v14 = vpop.xlane.xlu1 %3003 }
 0xa2e   : > { %v3002_v33 = vpop.xlane.xlu0 %3001 }
 0xa32   : > { %v3006_v48 = vpop.xlane.xlu0 %3005 }
 0xa33   : > { %6188 = vrcp.f32 %v3006_v48 }
 0xa34   : > { %6190 = vrcp.f32 %v3002_v33  ;;  %v6360_v33 = vld [vmem:[%s6542_s25 + $0x28] sm:$0xff] }
 0xa35   : > { %6192 = vrcp.f32 %v3004_v14 }
 0xa37   : > { %v6187_v39 = vpop.eup %6186 }
 0xa40   : > { %v6189_v51 = vpop.eup %6188 }
 0xa41   : > { %v6191_v28 = vpop.eup %6190 }
 0xa42   : > { %v6193_v57 = vpop.eup %6192 }
 0xa6b   : > { %v5727_v29 = vpop.f32.mrf.mxu1 }
 0xa6c   : > { %v3166_v12 = vmul.f32 %v6193_v57, %v5727_v29 }
 0xa6d   : > { %v3137_v1 = vpop.f32.mrf.mxu1 }
 0xa6e   : > { %v3164_v54 = vmul.f32 %v6187_v39, %v3137_v1 }
 0xa6f   : > { %v5728_v10 = vpop.f32.mrf.mxu1 }
 0xa70   : > { %v3167_v16 = vmul.f32 %v6189_v51, %v5728_v10  ;;  %v6362_v51 = vld [vmem:[%s6542_s25 + $0x40] sm:$0xff] }
 0xa71   : > { %v3140_v18 = vpop.f32.mrf.mxu1 }
 0xa72   : > { %v3165_v19 = vmul.f32 %v6191_v28, %v3140_v18  ;;  %v3175_v52 = vpack.c.bf16 %v3167_v16, %v3166_v12  ;;  %v6363_v18 = vld [vmem:[%s6542_s25 + $0x50] sm:$0xff]  ;;  %v6364_v12 = vld [vmem:[%s6542_s25 + $0x48] sm:$0xff] }
 0xa74   : > { %v3174_v36 = vpack.c.bf16 %v3165_v19, %v3164_v54 }
 0xa76   : > { %5745 = vmatprep.mubr.msk.bf16.mxu1 %vm960_vm0, %v3174_v36 }
 0xa77   : > { %5746 = vmatmul.mubr.msk.bf16.gmra.mxu1 %vm960_vm0, %v3175_v52  ;;  %v6365_v52 = vld [vmem:[%s6542_s25 + $0x58] sm:$0xff] }
 0xab6   : > { %v5735_v35 = vpop.f32.mrf.mxu1 }
 0xab7   : > { %v3311_v58 = vadd.f32 %v5735_v35, %v7742_v0 }
 0xab8   : > { %v3246_v22 = vpop.f32.mrf.mxu1 }
 0xab9   : > { %v3309_v31 = vadd.f32 %v3246_v22, %v7746_v23  ;;  %v3327_v62 = vadd.f32 %v6355_v38, %v3311_v58 }
 0xaba   : > { %v5736_v61 = vpop.f32.mrf.mxu1 }
 0xabb   : > { %v3325_v13 = vadd.f32 %v6354_v8, %v3309_v31  ;;  %v3312_v17 = vadd.f32 %v5736_v61, %v7750_v11  ;;  %v7825_v59 = vadd.f32 %v7815_v34, %v3327_v62  ;;  %v9137_v61 = vld [vmem:[#allocation14_spill] sm:$0xff] }
 0xabc   : > { %v3249_v9 = vpop.f32.mrf.mxu1  ;;  %v2100_v8 = vadd.f32 %v7649_v26, %v9137_v61  ;;  %v6368_v26 = vld [vmem:[%s6542_s25 + $0x68] sm:$0xff] }
 0xabd   : > { %v3310_v0 = vadd.f32 %v3249_v9, %v7754_v3  ;;  %v7820_v7 = vadd.f32 %v7815_v34, %v3325_v13  ;;  %9126 = vst [vmem:[#allocation16_spill] sm:$0xff] %v7825_v59  ;;  %v3328_v42 = vadd.f32 %v6357_v27, %v3312_v17  ;;  %v6366_v17 = vld [vmem:[%s6542_s25 + $0x60] sm:$0xff] }
 0xabe   : > { %v5739_v23 = vpop.f32.mrf.mxu1  ;;  %v2715_v9 = vadd.f32 %v7798_v4, %v2100_v8 }
 0xabf   : > { %v3326_v45 = vadd.f32 %v6356_v32, %v3310_v0  ;;  %3364 = vadd.xlane.f32.xlu1 %v7820_v7  ;;  %v3315_v21 = vadd.f32 %v5739_v23, %v7758_v47  ;;  %v6367_v32 = vld [vmem:[%s6542_s25 + $0x70] sm:$0xff] }
 0xac0   : > { %v3262_v20 = vpop.f32.mrf.mxu1 }
 0xac1   : > { %v3313_v11 = vadd.f32 %v3262_v20, %v7762_v24  ;;  %v7831_v3 = vadd.f32 %v7815_v34, %v3326_v45  ;;  %v3331_v2 = vadd.f32 %v6359_v49, %v3315_v21  ;;  %v7840_v24 = vadd.f32 %v7815_v34, %v3328_v42 }
 0xac2   : > { %v5740_v55 = vpop.f32.mrf.mxu1 }
 0xac3   : > { %9127 = vst [vmem:[#allocation18_spill] sm:$0xff] %v7831_v3  ;;  %v3329_v50 = vadd.f32 %v6358_v6, %v3313_v11  ;;  %3368 = vadd.xlane.f32.xlu1 %v7825_v59  ;;  %3366 = vadd.xlane.f32.xlu0 %v7831_v3  ;;  %v3316_v41 = vadd.f32 %v5740_v55, %v7766_v25  ;;  %9128 = vst [vmem:[#allocation21_spill] sm:$0xff] %v7840_v24  ;;  %v6361_v25 = vld [vmem:[%s6542_s25 + $0x38] sm:$0xff] }
 0xac4   : > { %v3265_v37 = vpop.f32.mrf.mxu1  ;;  %v7852_v1 = vadd.f32 %v7815_v34, %v3331_v2 }
 0xac5   : > { %v3314_v47 = vadd.f32 %v3265_v37, %v7770_v60  ;;  %v7843_v56 = vadd.f32 %v7815_v34, %v3329_v50  ;;  %v3332_v48 = vadd.f32 %v6361_v25, %v3316_v41 }
 0xac6   : > { %v5743_v40 = vpop.f32.mrf.mxu1  ;;  %9130 = vst [vmem:[#allocation27_spill] sm:$0xff] %v7852_v1 }
 0xac7   : > { %9129 = vst [vmem:[#allocation23_spill] sm:$0xff] %v7843_v56  ;;  %v3330_v53 = vadd.f32 %v6360_v33, %v3314_v47  ;;  %3370 = vadd.xlane.f32.xlu0 %v7840_v24  ;;  %3372 = vadd.xlane.f32.xlu1 %v7843_v56  ;;  %v3319_v60 = vadd.f32 %v5743_v40, %v7774_v63 }
 0xac8   : > { %v3278_v14 = vpop.f32.mrf.mxu1  ;;  %v7861_v63 = vadd.f32 %v7815_v34, %v3332_v48 }
 0xac9   : > { %v3317_v29 = vadd.f32 %v3278_v14, %v7778_v46  ;;  %v7855_v39 = vadd.f32 %v7815_v34, %v3330_v53  ;;  %v3335_v46 = vadd.f32 %v6363_v18, %v3319_v60  ;;  %v5866_v18 = vld [vmem:[%s9019_s5 + $0x70] ss:$8 sps:$4 sm:$0xff]  }
 0xaca   : > { %v5744_v10 = vpop.f32.mrf.mxu1  ;;  %9132 = vst [vmem:[#allocation22_spill] sm:$0xff] %v7861_v63 }
 0xacb   : > { %9131 = vst [vmem:[#allocation20_spill] sm:$0xff] %v7855_v39  ;;  %v3333_v28 = vadd.f32 %v6362_v51, %v3317_v29  ;;  %3376 = vadd.xlane.f32.xlu1 %v7852_v1  ;;  %3374 = vadd.xlane.f32.xlu0 %v7855_v39  ;;  %v3320_v57 = vadd.f32 %v5744_v10, %v7782_v5  ;;  %v5868_v51 = vld [vmem:[%s9019_s5 + $0x74] ss:$8 sps:$4 sm:$0xff]  }
 0xacc   : > { %v3281_v16 = vpop.f32.mrf.mxu1  ;;  %v7874_v58 = vadd.f32 %v7815_v34, %v3335_v46  ;;  %v5871_v46 = vld [vmem:[%s9019_s5 + $0x64] ss:$8 sps:$4 sm:$0xff]   ;;  %3656 = vmatprep.subr.bf16.mxu0 %v5868_v51  ;;  %v5884_v51 = vld [vmem:[%s9019_s5 + $0x10] ss:$8 sps:$4 sm:$0xff]  }
 0xacd   : > { %v3318_v54 = vadd.f32 %v3281_v16, %v7786_v44  ;;  %v7867_v19 = vadd.f32 %v7815_v34, %v3333_v28  ;;  %v3336_v35 = vadd.f32 %v6365_v52, %v3320_v57  ;;  %3657 = vmatpush1.bf16.msra.mxu0 %v5866_v18  ;;  %v5869_v52 = vld [vmem:[%s9019_s5 + $0x60] ss:$8 sps:$4 sm:$0xff]  }
 0xace   : > { %9134 = vst [vmem:[#allocation24_spill] sm:$0xff] %v7874_v58  ;;  %3658 = vmatprep.subr.bf16.mxu0 %v5871_v46 }
 0xacf   : > { %9133 = vst [vmem:[#allocation25_spill] sm:$0xff] %v7867_v19  ;;  %v3334_v36 = vadd.f32 %v6364_v12, %v3318_v54  ;;  %3378 = vadd.xlane.f32.xlu0 %v7861_v63  ;;  %3380 = vadd.xlane.f32.xlu1 %v7867_v19  ;;  %v7882_v44 = vadd.f32 %v7815_v34, %v3336_v35 }
 0xad1   : > { %v7877_v5 = vadd.f32 %v7815_v34, %v3334_v36  ;;  %9136 = vst [vmem:[#allocation11_spill] sm:$0xff] %v7882_v44  ;;  %3659 = vmatpush1.bf16.msra.mxu0 %v5869_v52 }
 0xad3   : > { %9135 = vst [vmem:[#allocation26_spill] sm:$0xff] %v7877_v5  ;;  %3384 = vadd.xlane.f32.xlu1 %v7874_v58  ;;  %3382 = vadd.xlane.f32.xlu0 %v7877_v5 }
 0xad7   : > { %3386 = vadd.xlane.f32.xlu0 %v7882_v44 }
 0xb37   : > { %v5747_v22 = vpop.f32.mrf.mxu1 }
 0xb38   : > { %v3323_v13 = vadd.f32 %v5747_v22, %v7790_v30  ;;  %v6369_v30 = vld [vmem:[%s6542_s25 + $0x78] sm:$0xff]  ;;  %s4927_s25 = sshll.u32 %s8915_s29, 4  ;;  %s8968_s25 = int_to_ptr.vmem [resolvable:$true] %s4927_s25 }
 0xb39   : > { %v3294_v31 = vpop.f32.mrf.mxu1  ;;  %s6370_s13 = scalar_lea.vmem %s8968_s25, 2048  ;;  %p6377_p0 = scmp.lt.s32.totalorder %s8968_s25, %s6375_s26 }
 0xb3a   : > { %v3321_v38 = vadd.f32 %v3294_v31, %v7794_v15  ;;  %v3339_v45 = vadd.f32 %v6367_v32, %v3323_v13  ;;  %p6371_p11 = scmp.ne.s32.totalorder %s8968_s25, %s6370_s13  ;;  %p6378_p1 = scmp.lt.s32.totalorder %s6376_s27, %s6370_s13 }
 0xb3b   : > { %v5748_v62 = vpop.f32.mrf.mxu1 }
 0xb3c   : > { %v3337_v0 = vadd.f32 %v6366_v17, %v3321_v38  ;;  %v3324_v20 = vadd.f32 %v5748_v62, %v7796_v43  ;;  %v7900_v11 = vadd.f32 %v7815_v34, %v3339_v45  ;;  %v5872_v45 = vld [vmem:[%s9019_s5 + $0x50] ss:$8 sps:$4 sm:$0xff]   ;;  %p6372_p12 = pnand %p6371_p11, %p6527_p5  ;;  %p6379_p2 = por %p6378_p1, %p6377_p0 }
 0xb3d   : > { %v3297_v23 = vpop.f32.mrf.mxu1 }
 0xb3e   : > { %v3322_v27 = vadd.f32 %v3297_v23, %v2715_v9  ;;  %v7894_v42 = vadd.f32 %v7815_v34, %v3337_v0  ;;  %v3340_v15 = vadd.f32 %v6369_v30, %v3324_v20  ;;  %9139 = vst [vmem:[#allocation8_spill] sm:$0xff] %v7900_v11  ;;  %v5874_v0 = vld [vmem:[%s9019_s5 + $0x54] ss:$8 sps:$4 sm:$0xff]   ;;  %p6373_p13 = pneg %p6372_p12 }
 0xb3f   : > { %3660 = vmatprep.subr.bf16.mxu0 %v5874_v0 }
 0xb40   : > { %9138 = vst [vmem:[#allocation6_spill] sm:$0xff] %v7894_v42  ;;  %v3338_v21 = vadd.f32 %v6368_v26, %v3322_v27  ;;  %3388 = vadd.xlane.f32.xlu1 %v7894_v42  ;;  %v7908_v43 = vadd.f32 %v7815_v34, %v3340_v15  ;;  %3661 = vmatpush1.bf16.msra.mxu0 %v5872_v45  ;;  %p6380_p3 = pnand %p6379_p2, %p6373_p13 }
 0xb42   : > { %v7903_v4 = vadd.f32 %v7815_v34, %v3338_v21  ;;  %9141 = vst [vmem:[#allocation10_spill] sm:$0xff] %v7908_v43 }
 0xb44   : > { %9140 = vst [vmem:[#allocation7_spill] sm:$0xff] %v7903_v4  ;;  %3392 = vadd.xlane.f32.xlu1 %v7900_v11  ;;  %3390 = vadd.xlane.f32.xlu0 %v7903_v4 }
 0xb48   : > { %3394 = vadd.xlane.f32.xlu0 %v7908_v43  ;;  %v3365_v55 = vpop.xlane.xlu1 %3364 }
 0xb49   : > { %v3396_v6 = vmul.f32 0.0078125, %v3365_v55  ;;  %v5877_v55 = vld [vmem:[%s9019_s5 + $0x44] ss:$8 sps:$4 sm:$0xff]  }
 0xb4a   : > { %3662 = vmatprep.subr.bf16.mxu0 %v5877_v55 }
 0xb4b   : > { %v7912_v50 = vsub.f32 %v7820_v7, %v3396_v6 }
 0xb4c   : > { %v3369_v41 = vpop.xlane.xlu1 %3368  ;;  %v3367_v37 = vpop.xlane.xlu0 %3366 }
 0xb4d   : > { %v3398_v49 = vmul.f32 0.0078125, %v3369_v41  ;;  %v3397_v2 = vmul.f32 0.0078125, %v3367_v37  ;;  %v3428_v47 = vmul.f32 %v7912_v50, %v7912_v50  ;;  %v5875_v41 = vld [vmem:[%s9019_s5 + $0x40] ss:$8 sps:$4 sm:$0xff]  }
 0xb4e   : > { %3663 = vmatpush1.bf16.msra.mxu0 %v5875_v41 }
 0xb4f   : > { %v7917_v40 = vsub.f32 %v7825_v59, %v3398_v49  ;;  %v7920_v34 = vsub.f32 %v7831_v3, %v3397_v2  ;;  %3444 = vadd.xlane.f32.xlu1 %v3428_v47 }
 0xb50   : > { %v3373_v33 = vpop.xlane.xlu1 %3372  ;;  %v3371_v53 = vpop.xlane.xlu0 %3370 }
 0xb51   : > { %v3400_v25 = vmul.f32 0.0078125, %v3373_v33  ;;  %v3399_v48 = vmul.f32 0.0078125, %v3371_v53  ;;  %v3430_v14 = vmul.f32 %v7917_v40, %v7917_v40  ;;  %v3429_v60 = vmul.f32 %v7920_v34, %v7920_v34  ;;  %v5880_v33 = vld [vmem:[%s9019_s5 + $0x34] ss:$8 sps:$4 sm:$0xff]   ;;  %v5878_v53 = vld [vmem:[%s9019_s5 + $0x30] ss:$8 sps:$4 sm:$0xff]  }
 0xb52   : > { %3664 = vmatprep.subr.bf16.mxu0 %v5880_v33 }
 0xb53   : > { %v7927_v29 = vsub.f32 %v7843_v56, %v3400_v25  ;;  %v7930_v10 = vsub.f32 %v7840_v24, %v3399_v48  ;;  %3448 = vadd.xlane.f32.xlu1 %v3430_v14  ;;  %3446 = vadd.xlane.f32.xlu0 %v3429_v60  ;;  %v5883_v48 = vld [vmem:[%s9019_s5 + $0x24] ss:$8 sps:$4 sm:$0xff]   ;;  %v5881_v14 = vld [vmem:[%s9019_s5 + $0x20] ss:$8 sps:$4 sm:$0xff]   ;;  %v5886_v60 = vld [vmem:[%s9019_s5 + $0x14] ss:$8 sps:$4 sm:$0xff]  }
 0xb54   : > { %v3377_v28 = vpop.xlane.xlu1 %3376  ;;  %v3375_v16 = vpop.xlane.xlu0 %3374  ;;  %3665 = vmatpush1.bf16.msra.mxu0 %v5878_v53 }
 0xb55   : > { %v3402_v57 = vmul.f32 0.0078125, %v3377_v28  ;;  %v3401_v54 = vmul.f32 0.0078125, %v3375_v16  ;;  %v3432_v12 = vmul.f32 %v7927_v29, %v7927_v29  ;;  %v3431_v36 = vmul.f32 %v7930_v10, %v7930_v10  ;;  %3666 = vmatprep.subr.bf16.mxu0 %v5883_v48  ;;  %v5889_v28 = vld [vmem:[%s9019_s5 + $0x4] ss:$8 sps:$4 sm:$0xff]   ;;  %v5887_v16 = vld [vmem:[%s9019_s5] ss:$8 sps:$4 sm:$0xff]  }
 0xb57   : > { %v7949_v35 = vsub.f32 %v7852_v1, %v3402_v57  ;;  %v7952_v22 = vsub.f32 %v7855_v39, %v3401_v54  ;;  %3452 = vadd.xlane.f32.xlu1 %v3432_v12  ;;  %3450 = vadd.xlane.f32.xlu0 %v3431_v36 }
 0xb58   : > { %v3381_v31 = vpop.xlane.xlu1 %3380  ;;  %v3379_v61 = vpop.xlane.xlu0 %3378  ;;  %3667 = vmatpush1.bf16.msra.mxu0 %v5881_v14 }
 0xb59   : > { %v3404_v8 = vmul.f32 0.0078125, %v3381_v31  ;;  %v3403_v13 = vmul.f32 0.0078125, %v3379_v61  ;;  %v3434_v38 = vmul.f32 %v7949_v35, %v7949_v35  ;;  %v3433_v62 = vmul.f32 %v7952_v22, %v7952_v22  ;;  %3668 = vmatprep.subr.bf16.mxu0 %v5886_v60 }
 0xb5b   : > { %v7959_v9 = vsub.f32 %v7867_v19, %v3404_v8  ;;  %v7962_v17 = vsub.f32 %v7861_v63, %v3403_v13  ;;  %3456 = vadd.xlane.f32.xlu1 %v3434_v38  ;;  %3454 = vadd.xlane.f32.xlu0 %v3433_v62 }
 0xb5c   : > { %v3385_v23 = vpop.xlane.xlu1 %3384  ;;  %v3383_v32 = vpop.xlane.xlu0 %3382  ;;  %3669 = vmatpush1.bf16.msra.mxu0 %v5884_v51 }
 0xb5d   : > { %v3406_v20 = vmul.f32 0.0078125, %v3385_v23  ;;  %v3405_v27 = vmul.f32 0.0078125, %v3383_v32  ;;  %v3436_v26 = vmul.f32 %v7959_v9, %v7959_v9  ;;  %v3435_v21 = vmul.f32 %v7962_v17, %v7962_v17  ;;  %3670 = vmatprep.subr.bf16.mxu0 %v5889_v28 }
 0xb5f   : > { %v7975_v30 = vsub.f32 %v7874_v58, %v3406_v20  ;;  %v7978_v15 = vsub.f32 %v7877_v5, %v3405_v27  ;;  %3460 = vadd.xlane.f32.xlu1 %v3436_v26  ;;  %3458 = vadd.xlane.f32.xlu0 %v3435_v21 }
 0xb60   : > { %v3387_v6 = vpop.xlane.xlu0 %3386  ;;  %3671 = vmatpush1.bf16.msra.mxu0 %v5887_v16 }
 0xb61   : > { %v3407_v37 = vmul.f32 0.0078125, %v3387_v6  ;;  %v3438_v49 = vmul.f32 %v7975_v30, %v7975_v30  ;;  %v3437_v2 = vmul.f32 %v7978_v15, %v7978_v15 }
 0xb63   : > { %v7991_v47 = vsub.f32 %v7882_v44, %v3407_v37  ;;  %3464 = vadd.xlane.f32.xlu1 %v3438_v49  ;;  %3462 = vadd.xlane.f32.xlu0 %v3437_v2 }
 0xb65   : > { %v3439_v25 = vmul.f32 %v7991_v47, %v7991_v47 }
 0xb67   : > { %3466 = vadd.xlane.f32.xlu0 %v3439_v25 }
 0xbc9   : > { %v3389_v18 = vpop.xlane.xlu1 %3388 }
 0xbca   : > { %v3408_v46 = vmul.f32 0.0078125, %v3389_v18 }
 0xbcc   : > { %v8020_v57 = vsub.f32 %v7894_v42, %v3408_v46 }
 0xbcd   : > { %v3393_v54 = vpop.xlane.xlu1 %3392  ;;  %v3391_v12 = vpop.xlane.xlu0 %3390 }
 0xbce   : > { %v3410_v36 = vmul.f32 0.0078125, %v3393_v54  ;;  %v3409_v52 = vmul.f32 0.0078125, %v3391_v12  ;;  %v3440_v31 = vmul.f32 %v8020_v57, %v8020_v57 }
 0xbd0   : > { %v8025_v61 = vsub.f32 %v7900_v11, %v3410_v36  ;;  %v8028_v8 = vsub.f32 %v7903_v4, %v3409_v52  ;;  %3468 = vadd.xlane.f32.xlu1 %v3440_v31 }
 0xbd1   : > { %v3395_v13 = vpop.xlane.xlu0 %3394 }
 0xbd2   : > { %v3411_v38 = vmul.f32 0.0078125, %v3395_v13  ;;  %v3442_v62 = vmul.f32 %v8025_v61, %v8025_v61  ;;  %v3441_v0 = vmul.f32 %v8028_v8, %v8028_v8 }
 0xbd4   : > { %v8035_v23 = vsub.f32 %v7908_v43, %v3411_v38  ;;  %3472 = vadd.xlane.f32.xlu1 %v3442_v62  ;;  %3470 = vadd.xlane.f32.xlu0 %v3441_v0 }
 0xbd6   : > { %v3443_v32 = vmul.f32 %v8035_v23, %v8035_v23 }
 0xbd8   : > { %3474 = vadd.xlane.f32.xlu0 %v3443_v32  ;;  %v3445_v45 = vpop.xlane.xlu1 %3444 }
 0xbd9   : > { %v3476_v20 = vmul.f32 0.0078125, %v3445_v45 }
 0xbdb   : > { %v3492_v27 = vadd.f32 1e-05, %v3476_v20  ;;  %v9142_v20 = vmov 0  }
 0xbdc   : > { %v3447_v26 = vpop.xlane.xlu0 %3446  ;;  %v3449_v21 = vpop.xlane.xlu1 %3448 }
 0xbdd   : > { %v3477_v55 = vmul.f32 0.0078125, %v3447_v26  ;;  %6194 = vrsqrt.f32 %v3492_v27  ;;  %v3478_v41 = vmul.f32 0.0078125, %v3449_v21 }
 0xbdf   : > { %v3493_v6 = vadd.f32 1e-05, %v3477_v55  ;;  %v3494_v33 = vadd.f32 1e-05, %v3478_v41 }
 0xbe0   : > { %v3451_v37 = vpop.xlane.xlu0 %3450  ;;  %v3453_v25 = vpop.xlane.xlu1 %3452 }
 0xbe1   : > { %v3479_v49 = vmul.f32 0.0078125, %v3451_v37  ;;  %6196 = vrsqrt.f32 %v3493_v6  ;;  %v3480_v14 = vmul.f32 0.0078125, %v3453_v25 }
 0xbe3   : > { %v3495_v2 = vadd.f32 1e-05, %v3479_v49  ;;  %v3496_v28 = vadd.f32 1e-05, %v3480_v14 }
 0xbe4   : > { %v3455_v53 = vpop.xlane.xlu0 %3454  ;;  %v3457_v18 = vpop.xlane.xlu1 %3456 }
 0xbe5   : > { %6198 = vrsqrt.f32 %v3495_v2  ;;  %v3481_v48 = vmul.f32 0.0078125, %v3455_v53  ;;  %v3482_v52 = vmul.f32 0.0078125, %v3457_v18 }
 0xbe6   : > { %6200 = vrsqrt.f32 %v3494_v33 }
 0xbe7   : > { %v3497_v60 = vadd.f32 1e-05, %v3481_v48  ;;  %v3498_v0 = vadd.f32 1e-05, %v3482_v52 }
 0xbe8   : > { %v3459_v51 = vpop.xlane.xlu0 %3458  ;;  %v3461_v45 = vpop.xlane.xlu1 %3460 }
 0xbe9   : > { %6202 = vrsqrt.f32 %v3497_v60  ;;  %v3483_v46 = vmul.f32 0.0078125, %v3459_v51 }
 0xbea   : > { %v6195_v16 = vpop.eup %6194  ;;  %6204 = vrsqrt.f32 %v3496_v28 }
 0xbeb   : > { %v3524_v12 = vmul.f32 %v6195_v16, %v7912_v50  ;;  %v3499_v31 = vadd.f32 1e-05, %v3483_v46  ;;  %v3484_v50 = vmul.f32 0.0078125, %v3461_v45 }
 0xbec   : > { %v3463_v62 = vpop.xlane.xlu0 %3462  ;;  %v3465_v2 = vpop.xlane.xlu1 %3464 }
 0xbed   : > { %6206 = vrsqrt.f32 %v3499_v31  ;;  %v3485_v27 = vmul.f32 0.0078125, %v3463_v62  ;;  %v3500_v37 = vadd.f32 1e-05, %v3484_v50 }
 0xbee   : > { %v6197_v54 = vpop.eup %6196  ;;  %6208 = vrsqrt.f32 %v3498_v0 }
 0xbef   : > { %v3525_v36 = vmul.f32 %v6197_v54, %v7920_v34  ;;  %v3501_v21 = vadd.f32 1e-05, %v3485_v27 }
 0xbf0   : > { %v3467_v41 = vpop.xlane.xlu0 %3466 }
 0xbf1   : > { %v3540_v13 = vpack.c.bf16 %v3525_v36, %v3524_v12  ;;  %6210 = vrsqrt.f32 %v3501_v21  ;;  %v3487_v33 = vmul.f32 0.0078125, %v3467_v41 }
 0xbf2   : > { %v6199_v38 = vpop.eup %6198  ;;  %6212 = vrsqrt.f32 %v3500_v37 }
 0xbf3   : > { %3689 = vmatmul.mubr.bf16.vlgmr.msra.gmra.mxu0 %v3540_v13  ;;  %v6201_v32 = vpop.eup %6200  ;;  %v3527_v26 = vmul.f32 %v6199_v38, %v7930_v10  ;;  %v3486_v10 = vmul.f32 0.0078125, %v3465_v2  ;;  %v3503_v48 = vadd.f32 1e-05, %v3487_v33 }
 0xbf4   : > { %3698 = vmatprep.mubr.bf16.mxu0 %v9142_v20  ;;  %v3526_v34 = vmul.f32 %v6201_v32, %v7917_v40 }
 0xbf5   : > { %v3502_v60 = vadd.f32 1e-05, %v3486_v10  ;;  %6214 = vrsqrt.f32 %v3503_v48  ;;  %v9143_v10 = vld [vmem:[#allocation5_spill] sm:$0xff] }
 0xbf6   : > { %v3541_v55 = vpack.c.bf16 %v3527_v26, %v3526_v34  ;;  %v6203_v6 = vpop.eup %6202 }
 0xbf7   : > { %v6205_v49 = vpop.eup %6204  ;;  %v3529_v53 = vmul.f32 %v6203_v6, %v7952_v22  ;;  %6216 = vrsqrt.f32 %v3502_v60 }
 0xbf8   : > { %v3528_v25 = vmul.f32 %v6205_v49, %v7927_v29 }
 0xbfa   : > { %v3542_v40 = vpack.c.bf16 %v3529_v53, %v3528_v25  ;;  %v6207_v14 = vpop.eup %6206  ;;  %v5890_v53 = vld [vmem:[%s9021_s7 + $0x78] sm:$0xff]   ;;  %v9144_v25 = vsub.s32 0, %v9143_v10 }
 0xbfb   : > { %3699 = vmatmul.mubr.bf16.gmra.mxu0 %v3541_v55  ;;  %v6209_v51 = vpop.eup %6208  ;;  %v3531_v28 = vmul.f32 %v6207_v14, %v7962_v17  ;;  %5317 = vmatprep.subr.bf16.mxu1 %v5890_v53  ;;  %v5901_v53 = vld [vmem:[%s9021_s7 + $0x10] sm:$0xff]  }
 0xbfc   : > { %3708 = vmatprep.mubr.bf16.mxu0 %v9142_v20  ;;  %v3530_v16 = vmul.f32 %v6209_v51, %v7949_v35  ;;  %v5895_v51 = vld [vmem:[%s9021_s7 + $0x28] sm:$0xff]  }
 0xbfe   : > { %v3543_v18 = vpack.c.bf16 %v3531_v28, %v3530_v16  ;;  %v6211_v22 = vpop.eup %6210 }
 0xbff   : > { %v6213_v46 = vpop.eup %6212  ;;  %v3533_v29 = vmul.f32 %v6211_v22, %v7978_v15 }
 0xc00   : > { %v3532_v54 = vmul.f32 %v6213_v46, %v7959_v9 }
 0xc02   : > { %v3544_v12 = vpack.c.bf16 %v3533_v29, %v3532_v54  ;;  %v6215_v36 = vpop.eup %6214  ;;  %v5896_v29 = vld [vmem:[%s9021_s7 + $0x60] sm:$0xff]  }
 0xc03   : > { %3709 = vmatmul.mubr.bf16.gmra.mxu0 %v3542_v40  ;;  %v3535_v17 = vmul.f32 %v6215_v36, %v7991_v47  ;;  %v9145_v40 = vsub.s32 1, %v9143_v10 }
 0xc04   : > { %3718 = vmatprep.mubr.bf16.mxu0 %v9142_v20  ;;  %v6217_v52 = vpop.eup %6216 }
 0xc05   : > { %v3534_v35 = vmul.f32 %v6217_v52, %v7975_v30 }
 0xc07   : > { %v3545_v31 = vpack.c.bf16 %v3535_v17, %v3534_v35 }
 0xc0b   : > { %3719 = vmatmul.mubr.bf16.gmra.mxu0 %v3543_v18 }
 0xc0c   : > { %3728 = vmatprep.mubr.bf16.mxu0 %v9142_v20 }
 0xc13   : > { %3729 = vmatmul.mubr.bf16.gmra.mxu0 %v3544_v12 }
 0xc14   : > { %3738 = vmatprep.mubr.bf16.mxu0 %v9142_v20 }
 0xc1b   : > { %3739 = vmatmul.mubr.bf16.gmra.mxu0 %v3545_v31 }
 0xc1c   : > { %3748 = vmatprep.mubr.bf16.mxu0 %v9142_v20 }
 0xc59   : > { %v3469_v13 = vpop.xlane.xlu1 %3468 }
 0xc5a   : > { %v3488_v38 = vmul.f32 0.0078125, %v3469_v13 }
 0xc5c   : > { %v3504_v62 = vadd.f32 1e-05, %v3488_v38 }
 0xc5d   : > { %v3471_v15 = vpop.xlane.xlu0 %3470  ;;  %v3473_v0 = vpop.xlane.xlu1 %3472 }
 0xc5e   : > { %v3489_v9 = vmul.f32 0.0078125, %v3471_v15  ;;  %6218 = vrsqrt.f32 %v3504_v62  ;;  %v3490_v45 = vmul.f32 0.0078125, %v3473_v0  ;;  %v5897_v62 = vld [vmem:[%s9021_s7 + $0x20] sm:$0xff]  }
 0xc60   : > { %v3505_v32 = vadd.f32 1e-05, %v3489_v9  ;;  %v3506_v47 = vadd.f32 1e-05, %v3490_v45 }
 0xc61   : > { %v3475_v27 = vpop.xlane.xlu0 %3474 }
 0xc62   : > { %v3491_v26 = vmul.f32 0.0078125, %v3475_v27  ;;  %6220 = vrsqrt.f32 %v3505_v32 }
 0xc64   : > { %v3507_v50 = vadd.f32 1e-05, %v3491_v26  ;;  %v5898_v26 = vld [vmem:[%s9021_s7 + $0x58] sm:$0xff]  }
 0xc66   : > { %6222 = vrsqrt.f32 %v3507_v50 }
 0xc67   : > { %6224 = vrsqrt.f32 %v3506_v47 }
 0xc6b   : > { %v6219_v30 = vpop.eup %6218 }
 0xc6c   : > { %v3536_v21 = vmul.f32 %v6219_v30, %v8020_v57  ;;  %v5891_v57 = vld [vmem:[%s9021_s7 + $0x38] sm:$0xff]  }
 0xc6d   : > { %5318 = vmatpush3.bf16.msra.mxu1 %v5891_v57 }
 0xc6f   : > { %v6221_v34 = vpop.eup %6220 }
 0xc70   : > { %v3537_v55 = vmul.f32 %v6221_v34, %v8028_v8  ;;  %v5892_v8 = vld [vmem:[%s9021_s7 + $0x70] sm:$0xff]  }
 0xc71   : > { %5319 = vmatprep.subr.bf16.mxu1 %v5892_v8 }
 0xc72   : > { %v3546_v6 = vpack.c.bf16 %v3537_v55, %v3536_v21  ;;  %v5899_v55 = vld [vmem:[%s9021_s7 + $0x18] sm:$0xff]  }
 0xc73   : > { %v6223_v41 = vpop.eup %6222 }
 0xc74   : > { %3749 = vmatmul.mubr.bf16.gmra.mxu0 %v3546_v6  ;;  %v6225_v37 = vpop.eup %6224  ;;  %v3539_v49 = vmul.f32 %v6223_v41, %v8035_v23  ;;  %v5894_v23 = vld [vmem:[%s9021_s7 + $0x68] sm:$0xff]  }
 0xc75   : > { %3758 = vmatprep.mubr.bf16.mxu0 %v9142_v20  ;;  %v3538_v2 = vmul.f32 %v6225_v37, %v8025_v61  ;;  %v5893_v61 = vld [vmem:[%s9021_s7 + $0x30] sm:$0xff]   ;;  %v3564_v20 = vld [vmem:[%s9020_s6] sm:$0x3] }
 0xc76   : > { %5320 = vmatpush3.bf16.msra.mxu1 %v5893_v61  ;;  %v8082_v48 = vrot.slane %v3564_v20, %v9144_v25  ;;  %v8086_v14 = vrot.slane %v3564_v20, %v9145_v40  ;;  %v5902_v40 = vld [vmem:[%s9021_s7 + $0x48] sm:$0xff]  }
 0xc77   : > { %v3547_v33 = vpack.c.bf16 %v3539_v49, %v3538_v2  ;;  %5321 = vmatprep.subr.bf16.mxu1 %v5894_v23  ;;  %v5900_v49 = vld [vmem:[%s9021_s7 + $0x50] sm:$0xff]  }
 0xc7a   : > { %5322 = vmatpush3.bf16.msra.mxu1 %v5895_v51 }
 0xc7b   : > { %5323 = vmatprep.subr.bf16.mxu1 %v5896_v29  ;;  %v5903_v29 = vld [vmem:[%s9021_s7 + $0x8] sm:$0xff]  }
 0xc7c   : > { %3759 = vmatmul.mubr.bf16.gmra.mxu0 %v3547_v33 }
 0xc7e   : > { %5324 = vmatpush3.bf16.msra.mxu1 %v5897_v62 }
 0xc7f   : > { %5325 = vmatprep.subr.bf16.mxu1 %v5898_v26 }
 0xc82   : > { %5326 = vmatpush3.bf16.msra.mxu1 %v5899_v55 }
 0xc83   : > { %5327 = vmatprep.subr.bf16.mxu1 %v5900_v49 }
 0xc86   : > { %5328 = vmatpush3.bf16.msra.mxu1 %v5901_v53 }
 0xc87   : > { %5329 = vmatprep.subr.bf16.mxu1 %v5902_v40 }
 0xc8a   : > { %5330 = vmatpush3.bf16.msra.mxu1 %v5903_v29 }
 0xcb3   : > { %v3690_v60 = vpop.f32.mrf.mxu0 }
 0xcb4   : > { %v8092_v28 = vadd.f32 %v3690_v60, %v8082_v48 }
 0xcb5   : > { %v3692_v16 = vpop.f32.mrf.mxu0 }
 0xcb6   : > { %v8095_v18 = vmul.f32 0.70710677, %v8092_v28  ;;  %v8098_v22 = vadd.f32 %v3692_v16, %v8086_v14 }
 0xcb7   : > { %v3694_v46 = vpop.f32.mrf.mxu0 }
 0xcb8   : > { %v3833_v54 = vand.u32 2147483647, %v8095_v18  ;;  %v8105_v12 = vmul.f32 0.70710677, %v8098_v22  ;;  %v8108_v36 = vadd.f32 %v3694_v46, %v8082_v48  ;;  %vm4473_vm1 = vcmp.ge.f32.partialorder %v8095_v18, 0.0 }
 0xcb9   : > { %v3696_v52 = vpop.f32.mrf.mxu0 }
 0xcba   : > { %v3865_v17 = vmul.f32 0.3275911, %v3833_v54  ;;  %v3834_v35 = vand.u32 2147483647, %v8105_v12  ;;  %v8112_v31 = vmul.f32 0.70710677, %v8108_v36  ;;  %v8115_v13 = vadd.f32 %v3696_v52, %v8086_v14 }
 0xcbb   : > { %v3700_v38 = vpop.f32.mrf.mxu0  ;;  %v4281_v61 = vsub.f32 0.0, %v3833_v54  ;;  %vm4474_vm3 = vcmp.ge.f32.partialorder %v8105_v12, 0.0 }
 0xcbc   : > { %v3897_v15 = vadd.f32 1.0, %v3865_v17  ;;  %v3866_v0 = vmul.f32 0.3275911, %v3834_v35  ;;  %v8121_v9 = vand.u32 2147483647, %v8112_v31  ;;  %v8134_v34 = vadd.f32 %v3700_v38, %v8082_v48 }
 0xcbd   : > { %v8124_v32 = vmul.f32 0.70710677, %v8115_v13  ;;  %v3702_v45 = vpop.f32.mrf.mxu0  ;;  %v4282_v20 = vsub.f32 0.0, %v3834_v35  ;;  %v4313_v52 = vmul.f32 %v4281_v61, %v3833_v54  ;;  %vm4475_vm2 = vcmp.ge.f32.partialorder %v8112_v31, 0.0 }
 0xcbe   : > { %6226 = vrcp.f32 %v3897_v15  ;;  %v3898_v27 = vadd.f32 1.0, %v3866_v0  ;;  %v3867_v50 = vmul.f32 0.3275911, %v8121_v9  ;;  %v8137_v21 = vadd.f32 %v3702_v45, %v8086_v14  ;;  %v5904_v45 = vld [vmem:[%s9021_s7 + $0x40] sm:$0xff]  }
 0xcbf   : > { %v8131_v47 = vand.u32 2147483647, %v8124_v32  ;;  %v3704_v30 = vpop.f32.mrf.mxu0  ;;  %v8144_v37 = vmul.f32 0.70710677, %v8134_v34  ;;  %v4314_v62 = vmul.f32 %v4282_v20, %v3834_v35  ;;  %v4283_v15 = vsub.f32 0.0, %v8121_v9  ;;  %v5905_v35 = vld [vmem:[%s9021_s7] sm:$0xff]   ;;  %5331 = vmatprep.subr.bf16.mxu1 %v5904_v45 }
 0xcc0   : > { %6228 = vrcp.f32 %v3898_v27  ;;  %v3899_v6 = vadd.f32 1.0, %v3867_v50  ;;  %v8156_v8 = vmul.f32 0.70710677, %v8137_v21  ;;  %v8159_v23 = vadd.f32 %v3704_v30, %v8082_v48  ;;  %5332 = vmatpush3.bf16.msra.mxu1 %v5905_v35 }
 0xcc1   : > { %v3868_v41 = vmul.f32 0.3275911, %v8131_v47  ;;  %v3706_v33 = vpop.f32.mrf.mxu0  ;;  %v8153_v57 = vand.u32 2147483647, %v8144_v37  ;;  %v4284_v55 = vsub.f32 0.0, %v8131_v47  ;;  %v4315_v61 = vmul.f32 %v4283_v15, %v8121_v9 }
 0xcc2   : > { %6230 = vrcp.f32 %v3899_v6  ;;  %v8163_v25 = vadd.f32 %v3706_v33, %v8086_v14  ;;  %v8169_v60 = vand.u32 2147483647, %v8156_v8  ;;  %v8172_v51 = vmul.f32 0.70710677, %v8159_v23 }
 0xcc3   : > { %v3900_v2 = vadd.f32 1.0, %v3868_v41  ;;  %v3869_v10 = vmul.f32 0.3275911, %v8153_v57  ;;  %v3710_v46 = vpop.f32.mrf.mxu0  ;;  %v4345_v41 = vmul.f32 1.442695, %v4313_v52  ;;  %v4285_v40 = vsub.f32 0.0, %v8153_v57 }
 0xcc4   : > { %v3870_v17 = vmul.f32 0.3275911, %v8169_v60  ;;  %v8179_v38 = vand.u32 2147483647, %v8172_v51  ;;  %v8183_v0 = vmul.f32 0.70710677, %v8163_v25  ;;  %v8192_v50 = vadd.f32 %v3710_v46, %v8082_v48 }
 0xcc5   : > { %6232 = vrcp.f32 %v3900_v2  ;;  %v3901_v16 = vadd.f32 1.0, %v3869_v10  ;;  %v4347_v53 = vmul.f32 1.442695, %v4314_v62  ;;  %v3712_v46 = vpop.f32.mrf.mxu0  ;;  %v4286_v11 = vsub.f32 0.0, %v8169_v60 }
 0xcc6   : > { %v3902_v54 = vadd.f32 1.0, %v3870_v17  ;;  %v3871_v26 = vmul.f32 0.3275911, %v8179_v38  ;;  %v8200_v6 = vand.u32 2147483647, %v8183_v0  ;;  %v4316_v17 = vmul.f32 %v4284_v55, %v8131_v47 }
 0xcc7   : > { %6234 = vrcp.f32 %v3901_v16  ;;  %v8209_v16 = vmul.f32 0.70710677, %v8192_v50  ;;  %v8220_v35 = vadd.f32 %v3712_v46, %v8086_v14  ;;  %v4317_v47 = vmul.f32 %v4285_v40, %v8153_v57 }
 0xcc8   : > { %6236 = vrcp.f32 %v3902_v54  ;;  %v3903_v49 = vadd.f32 1.0, %v3871_v26  ;;  %v3872_v20 = vmul.f32 0.3275911, %v8200_v6  ;;  %v4349_v26 = vmul.f32 1.442695, %v4315_v61 }
 0xcc9   : > { %v8217_v45 = vand.u32 2147483647, %v8209_v16  ;;  %vm4476_vm4 = vcmp.ge.f32.partialorder %v8124_v32, 0.0  ;;  %vm4477_vm5 = vcmp.ge.f32.partialorder %v8144_v37, 0.0  ;;  %vm4478_vm6 = vcmp.ge.f32.partialorder %v8156_v8, 0.0 }
 0xcca   : > { %6238 = vrcp.f32 %v3903_v49  ;;  %v3904_v62 = vadd.f32 1.0, %v3872_v20  ;;  %v4351_v20 = vmul.f32 1.442695, %v4316_v17  ;;  %vm4479_vm7 = vcmp.ge.f32.partialorder %v8172_v51, 0.0 }
 0xccb   : > { %v8188_v27 = vpop.eup %6226  ;;  %v3873_v55 = vmul.f32 0.3275911, %v8217_v45  ;;  %vm4480_vm8 = vcmp.ge.f32.partialorder %v8183_v0, 0.0  ;;  %vm4481_vm9 = vcmp.ge.f32.partialorder %v8209_v16, 0.0 }
 0xccc   : > { %v3993_v30 = vmul.f32 1.0614054, %v8188_v27  ;;  %6240 = vrcp.f32 %v3904_v62 }
 0xccd   : > { %v8202_v2 = vpop.eup %6228  ;;  %6242 = vpow2.f32 %v4345_v41  ;;  %v3905_v46 = vadd.f32 1.0, %v3873_v55  ;;  %v4353_v41 = vmul.f32 1.442695, %v4317_v47  ;;  %v4318_v47 = vmul.f32 %v4286_v11, %v8169_v60 }
 0xcce   : > { %v4025_v33 = vadd.f32 -1.4531521, %v3993_v30  ;;  %v3994_v10 = vmul.f32 1.0614054, %v8202_v2  ;;  %6244 = vpow2.f32 %v4347_v53 }
 0xccf   : > { %v8211_v29 = vpop.eup %6230  ;;  %6246 = vpow2.f32 %v4349_v26 }
 0xcd0   : > { %v4057_v52 = vmul.f32 %v8188_v27, %v4025_v33  ;;  %v4026_v9 = vadd.f32 -1.4531521, %v3994_v10  ;;  %v3995_v15 = vmul.f32 1.0614054, %v8211_v29  ;;  %6248 = vrcp.f32 %v3905_v46 }
 0xcd1   : > { %6250 = vpow2.f32 %v4351_v20  ;;  %v4288_v46 = vsub.f32 0.0, %v8200_v6 }
 0xcd2   : > { %v4089_v54 = vadd.f32 1.4214138, %v4057_v52  ;;  %v8222_v30 = vpop.eup %6232  ;;  %v4058_v33 = vmul.f32 %v8202_v2, %v4026_v9  ;;  %v4027_v43 = vadd.f32 -1.4531521, %v3995_v15  ;;  %v8232_v9 = vmul.f32 0.70710677, %v8220_v35 }
 0xcd3   : > { %v3996_v49 = vmul.f32 1.0614054, %v8222_v30  ;;  %6252 = vpow2.f32 %v4353_v41 }
 0xcd4   : > { %v4121_v10 = vmul.f32 %v8188_v27, %v4089_v54  ;;  %v4090_v61 = vadd.f32 1.4214138, %v4058_v33  ;;  %v4059_v52 = vmul.f32 %v8211_v29, %v4027_v43  ;;  %v8234_v57 = vpop.eup %6234  ;;  %v4287_v54 = vsub.f32 0.0, %v8179_v38 }
 0xcd5   : > { %v4028_v62 = vadd.f32 -1.4531521, %v3996_v49  ;;  %v3997_v15 = vmul.f32 1.0614054, %v8234_v57  ;;  %v8240_v43 = vand.u32 2147483647, %v8232_v9  ;;  %v8244_v49 = vpop.eup %6236 }
 0xcd6   : > { %v4091_v40 = vadd.f32 1.4214138, %v4059_v52  ;;  %v4153_v53 = vadd.f32 -0.28449672, %v4121_v10  ;;  %v4122_v33 = vmul.f32 %v8202_v2, %v4090_v61  ;;  %v3998_v4 = vmul.f32 1.0614054, %v8244_v49 }
 0xcd7   : > { %v4060_v17 = vmul.f32 %v8222_v30, %v4028_v62  ;;  %v4029_v26 = vadd.f32 -1.4531521, %v3997_v15  ;;  %v3874_v42 = vmul.f32 0.3275911, %v8240_v43  ;;  %v8253_v44 = vpop.eup %6238  ;;  %vm4482_vm10 = vcmp.ge.f32.partialorder %v8232_v9, 0.0 }
 0xcd8   : > { %v4123_v55 = vmul.f32 %v8211_v29, %v4091_v40  ;;  %v4319_v40 = vmul.f32 %v4287_v54, %v8179_v38  ;;  %v4185_v20 = vmul.f32 %v8188_v27, %v4153_v53  ;;  %v4030_v11 = vadd.f32 -1.4531521, %v3998_v4 }
 0xcd9   : > { %v4092_v52 = vadd.f32 1.4214138, %v4060_v17  ;;  %v4061_v61 = vmul.f32 %v8234_v57, %v4029_v26  ;;  %v4154_v17 = vadd.f32 -0.28449672, %v4122_v33  ;;  %v3906_v60 = vadd.f32 1.0, %v3874_v42 }
 0xcda   : > { %v4155_v62 = vadd.f32 -0.28449672, %v4123_v55  ;;  %v3999_v58 = vmul.f32 1.0614054, %v8253_v44  ;;  %v4062_v26 = vmul.f32 %v8244_v49, %v4030_v11  ;;  %v4355_v38 = vmul.f32 1.442695, %v4318_v47 }
 0xcdb   : > { %v4124_v10 = vmul.f32 %v8222_v30, %v4092_v52  ;;  %v4093_v55 = vadd.f32 1.4214138, %v4061_v61  ;;  %v8258_v52 = vpop.eup %6240  ;;  %6254 = vrcp.f32 %v3906_v60  ;;  %v4357_v19 = vmul.f32 1.442695, %v4319_v40 }
 0xcdc   : > { %v4187_v41 = vmul.f32 %v8211_v29, %v4155_v62  ;;  %v4031_v5 = vadd.f32 -1.4531521, %v3999_v58  ;;  %v4320_v53 = vmul.f32 %v4288_v46, %v8200_v6  ;;  %v6243_v4 = vpop.eup %6242  ;;  %v4217_v42 = vadd.f32 0.2548296, %v4185_v20 }
 0xcdd   : > { %v4156_v15 = vadd.f32 -0.28449672, %v4124_v10  ;;  %v4125_v54 = vmul.f32 %v8234_v57, %v4093_v55  ;;  %v4186_v33 = vmul.f32 %v8202_v2, %v4154_v17  ;;  %v4094_v62 = vadd.f32 1.4214138, %v4062_v26  ;;  %v6245_v11 = vpop.eup %6244 }
 0xcde   : > { %v4000_v10 = vmul.f32 1.0614054, %v8258_v52  ;;  %v4219_v61 = vadd.f32 0.2548296, %v4187_v41  ;;  %v4063_v47 = vmul.f32 %v8253_v44, %v4031_v5  ;;  %v8268_v60 = vmul.f32 0.5, %v8092_v28  ;;  %v6247_v40 = vpop.eup %6246 }
 0xcdf   : > { %v4188_v63 = vmul.f32 %v8222_v30, %v4156_v15  ;;  %v4157_v1 = vadd.f32 -0.28449672, %v4125_v54  ;;  %v4126_v58 = vmul.f32 %v8244_v49, %v4094_v62  ;;  %6256 = vpow2.f32 %v4355_v38  ;;  %v8274_v26 = vpop.eup %6248 }
 0xce0   : > { %v4032_v6 = vadd.f32 -1.4531521, %v4000_v10  ;;  %v4095_v20 = vadd.f32 1.4214138, %v4063_v47  ;;  %6258 = vpow2.f32 %v4357_v19  ;;  %v4289_v17 = vsub.f32 0.0, %v8217_v45  ;;  %v6251_v10 = vpop.eup %6250 }
 0xce1   : > { %v4189_v46 = vmul.f32 %v8234_v57, %v4157_v1  ;;  %v4249_v41 = vmul.f32 %v8188_v27, %v4217_v42  ;;  %v4218_v15 = vadd.f32 0.2548296, %v4186_v33  ;;  %v4158_v55 = vadd.f32 -0.28449672, %v4126_v58  ;;  %v6253_v42 = vpop.eup %6252 }
 0xce2   : > { %v4359_v5 = vmul.f32 1.442695, %v4320_v53  ;;  %v4251_v28 = vmul.f32 %v8211_v29, %v4219_v61  ;;  %v4220_v54 = vadd.f32 0.2548296, %v4188_v63  ;;  %v4127_v38 = vmul.f32 %v8253_v44, %v4095_v20 }
 0xce3   : > { %v4064_v62 = vmul.f32 %v8258_v52, %v4032_v6  ;;  %v8280_v1 = vmul.f32 0.5, %v8098_v22  ;;  %v8283_v19 = vmul.f32 0.5, %v8108_v36  ;;  %v8286_v27 = vmul.f32 0.5, %v8115_v13 }
 0xce4   : > { %v4190_v53 = vmul.f32 %v8244_v49, %v4158_v55  ;;  %v8290_v29 = vmul.f32 0.5, %v8134_v34  ;;  %v4221_v63 = vadd.f32 0.2548296, %v4189_v46  ;;  %v4159_v33 = vadd.f32 -0.28449672, %v4127_v38  ;;  %v3714_v34 = vpop.f32.mrf.mxu0 }
 0xce5   : > { %v4321_v61 = vmul.f32 %v4289_v17, %v8217_v45  ;;  %v8294_v47 = vmul.f32 0.5, %v8137_v21  ;;  %v4096_v22 = vadd.f32 1.4214138, %v4064_v62  ;;  %6260 = vpow2.f32 %v4359_v5 }
 0xce6   : > { %v4001_v36 = vmul.f32 1.0614054, %v8274_v26  ;;  %v4409_v58 = vmul.f32 %v6243_v4, %v4249_v41  ;;  %v4250_v13 = vmul.f32 %v8202_v2, %v4218_v15  ;;  %v8298_v6 = vmul.f32 %v6247_v40, %v4251_v28 }
 0xce7   : > { %v4252_v20 = vmul.f32 %v8222_v30, %v4220_v54  ;;  %v4222_v55 = vadd.f32 0.2548296, %v4190_v53  ;;  %v4191_v46 = vmul.f32 %v8253_v44, %v4159_v33  ;;  %v4128_v45 = vmul.f32 %v8258_v52, %v4096_v22 }
 0xce8   : > { %v4033_v17 = vadd.f32 -1.4531521, %v4001_v36  ;;  %v8303_v21 = vpop.eup %6254  ;;  %v4253_v5 = vmul.f32 %v8234_v57, %v4221_v63  ;;  %v8307_v38 = vmul.f32 0.5, %v8159_v23  ;;  %v8310_v2 = vmul.f32 0.5, %v8163_v25  ;;  %v3716_v57 = vpop.f32.mrf.mxu0 }
 0xce9   : > { %v4361_v4 = vmul.f32 1.442695, %v4321_v61  ;;  %v4223_v30 = vadd.f32 0.2548296, %v4191_v46  ;;  %v4160_v40 = vadd.f32 -0.28449672, %v4128_v45  ;;  %v8317_v54 = vmul.f32 %v6245_v11, %v4250_v13 }
 0xcea   : > { %v8314_v41 = vmul.f32 0.5, %v8192_v50  ;;  %v4290_v15 = vsub.f32 0.0, %v8240_v43  ;;  %v4441_v28 = vsub.f32 1.0, %v4409_v58  ;;  %v4065_v23 = vmul.f32 %v8274_v26, %v4033_v17 }
 0xceb   : > { %v4002_v25 = vmul.f32 1.0614054, %v8303_v21  ;;  %v4443_v62 = vsub.f32 1.0, %v8298_v6  ;;  %v8323_v53 = vmul.f32 %v6251_v10, %v4252_v20  ;;  %v4254_v63 = vmul.f32 %v8244_v49, %v4222_v55 }
 0xcec   : > { %v4192_v50 = vmul.f32 %v8258_v52, %v4160_v40  ;;  %v6257_v33 = vpop.eup %6256  ;;  %v4413_v61 = vmul.f32 %v6253_v42, %v4253_v5  ;;  %v4255_v11 = vmul.f32 %v8253_v44, %v4223_v30  ;;  %v4097_v22 = vadd.f32 1.4214138, %v4065_v23  ;;  %v3720_v40 = vpop.f32.mrf.mxu0 }
 0xced   : > { %v4034_v36 = vadd.f32 -1.4531521, %v4002_v25  ;;  %v6259_v58 = vpop.eup %6258  ;;  %6262 = vpow2.f32 %v4361_v4  ;;  %v8329_v46 = vadd.f32 %v3714_v34, %v8082_v48  ;;  %v8332_v6 = vadd.f32 %v3716_v57, %v8086_v14 }
 0xcee   : > { %v4224_v13 = vadd.f32 0.2548296, %v4192_v50  ;;  %v4505_v10 = vsub.f32 0.0, %v4441_v28  ;;  %v4129_v49 = vmul.f32 %v8274_v26, %v4097_v22  ;;  %v4322_v44 = vmul.f32 %v4290_v15, %v8240_v43 }
 0xcef   : > { %v4066_v42 = vmul.f32 %v8303_v21, %v4034_v36  ;;  %v4442_v20 = vsub.f32 1.0, %v8317_v54  ;;  %v4507_v55 = vsub.f32 0.0, %v4443_v62  ;;  %v4444_v45 = vsub.f32 1.0, %v8323_v53  ;;  %v3722_v36 = vpop.f32.mrf.mxu0 }
 0xcf0   : > { %v4414_v34 = vmul.f32 %v6257_v33, %v4254_v63  ;;  %v4445_v17 = vsub.f32 1.0, %v4413_v61  ;;  %v4415_v5 = vmul.f32 %v6259_v58, %v4255_v11  ;;  %v4161_v4 = vadd.f32 -0.28449672, %v4129_v49 }
 0xcf1   : > { %v4098_v30 = vadd.f32 1.4214138, %v4066_v42  ;;  %v4256_v23 = vmul.f32 %v8258_v52, %v4224_v13  ;;  %v8344_v25 = vmul.f32 0.5, %v8220_v35  ;;  %v8347_v43 = vmul.f32 0.70710677, %v8329_v46 }
 0xcf2   : > { %v8350_v15 = vmul.f32 0.70710677, %v8332_v6  ;;  %v6261_v54 = vpop.eup %6260  ;;  %v4537_v57 = vsel %vm4473_vm1, %v4441_v28, %v4505_v10  ;;  %v4193_v53 = vmul.f32 %v8274_v26, %v4161_v4  ;;  %v4363_v52 = vmul.f32 1.442695, %v4322_v44 }
 0xcf3   : > { %v4130_v63 = vmul.f32 %v8303_v21, %v4098_v30  ;;  %v4506_v50 = vsub.f32 0.0, %v4442_v20  ;;  %v4539_v35 = vsel %vm4475_vm2, %v4443_v62, %v4507_v55  ;;  %v4446_v33 = vsub.f32 1.0, %v4414_v34 }
 0xcf4   : > { %v8361_v61 = vand.u32 2147483647, %v8347_v43  ;;  %v4508_v11 = vsub.f32 0.0, %v4444_v45  ;;  %v4509_v18 = vsub.f32 0.0, %v4445_v17  ;;  %v4447_v28 = vsub.f32 1.0, %v4415_v5 }
 0xcf5   : > { %v4162_v22 = vadd.f32 -0.28449672, %v4130_v63  ;;  %v4416_v58 = vmul.f32 %v6261_v54, %v4256_v23  ;;  %v4225_v13 = vadd.f32 0.2548296, %v4193_v53  ;;  %v8365_v49 = vand.u32 2147483647, %v8350_v15 }
 0xcf6   : > { %v3875_v10 = vmul.f32 0.3275911, %v8361_v61  ;;  %v4569_v31 = vadd.f32 1.0, %v4537_v57  ;;  %v4571_v62 = vadd.f32 1.0, %v4539_v35  ;;  %6264 = vpow2.f32 %v4363_v52 }
 0xcf7   : > { %v8368_v42 = vadd.f32 %v3720_v40, %v8082_v48  ;;  %v4538_v44 = vsel %vm4474_vm3, %v4442_v20, %v4506_v50  ;;  %v4510_v55 = vsub.f32 0.0, %v4446_v33  ;;  %v3876_v5 = vmul.f32 0.3275911, %v8365_v49  ;;  %v3724_v40 = vpop.f32.mrf.mxu0 }
 0xcf8   : > { %v3907_v34 = vadd.f32 1.0, %v3875_v10  ;;  %v4540_v4 = vsel %vm4476_vm4, %v4444_v45, %v4508_v11  ;;  %v4541_v30 = vsel %vm4477_vm5, %v4445_v17, %v4509_v18  ;;  %v4511_v23 = vsub.f32 0.0, %v4447_v28 }
 0xcf9   : > { %v4194_v54 = vmul.f32 %v8303_v21, %v4162_v22  ;;  %v4448_v57 = vsub.f32 1.0, %v4416_v58  ;;  %v4257_v12 = vmul.f32 %v8274_v26, %v4225_v13  ;;  %v3908_v20 = vadd.f32 1.0, %v3876_v5 }
 0xcfa   : > { %6266 = vrcp.f32 %v3907_v34  ;;  %v6263_v53 = vpop.eup %6262  ;;  %v8381_v63 = vmul.f32 %v4569_v31, %v8268_v60  ;;  %v4570_v32 = vadd.f32 1.0, %v4538_v44  ;;  %v8384_v45 = vmul.f32 %v4571_v62, %v8283_v19  ;;  %v3726_v19 = vpop.f32.mrf.mxu0 }
 0xcfb   : > { %v8387_v37 = vmul.f32 0.70710677, %v8368_v42  ;;  %v4572_v17 = vadd.f32 1.0, %v4540_v4  ;;  %v4573_v52 = vadd.f32 1.0, %v4541_v30  ;;  %v4542_v50 = vsel %vm4478_vm6, %v4446_v33, %v4510_v55 }
 0xcfc   : > { %v8392_v26 = vadd.f32 %v3722_v36, %v8086_v14  ;;  %v4543_v35 = vsel %vm4479_vm7, %v4447_v28, %v4511_v23  ;;  %v4226_v60 = vadd.f32 0.2548296, %v4194_v54  ;;  %6268 = vrcp.f32 %v3908_v20  ;;  %v3730_v5 = vpop.f32.mrf.mxu0 }
 0xcfd   : > { %v8397_v11 = vand.u32 2147483647, %v8387_v37  ;;  %v4512_v18 = vsub.f32 0.0, %v4448_v57  ;;  %v4417_v22 = vmul.f32 %v6263_v53, %v4257_v12  ;;  %v8403_v8 = vadd.f32 %v3724_v40, %v8082_v48 }
 0xcfe   : > { %v8400_v58 = vmul.f32 0.70710677, %v8392_v26  ;;  %v8406_v33 = vmul.f32 %v4570_v32, %v8280_v1  ;;  %v4291_v28 = vsub.f32 0.0, %v8361_v61  ;;  %v8413_v13 = vmul.f32 %v4572_v17, %v8286_v27  ;;  %v3732_v17 = vpop.f32.mrf.mxu0 }
 0xcff   : > { %v3877_v36 = vmul.f32 0.3275911, %v8397_v11  ;;  %v4575_v10 = vadd.f32 1.0, %v4543_v35  ;;  %v8416_v31 = vmul.f32 0.5, %v8329_v46  ;;  %v8422_v1 = vmul.f32 %v4573_v52, %v8290_v29 }
 0xd00   : > { %v8419_v62 = vand.u32 2147483647, %v8400_v58  ;;  %v4574_v44 = vadd.f32 1.0, %v4542_v50  ;;  %v4258_v55 = vmul.f32 %v8303_v21, %v4226_v60  ;;  %v4544_v27 = vsel %vm4480_vm8, %v4448_v57, %v4512_v18 }
 0xd01   : > { %v3909_v34 = vadd.f32 1.0, %v3877_v36  ;;  %v4449_v4 = vsub.f32 1.0, %v4417_v22  ;;  %v8430_v30 = vmul.f32 0.70710677, %v8403_v8  ;;  %v4323_v23 = vmul.f32 %v4291_v28, %v8361_v61 }
 0xd02   : > { %v3878_v46 = vmul.f32 0.3275911, %v8419_v62  ;;  %v4292_v29 = vsub.f32 0.0, %v8365_v49  ;;  %v8435_v54 = vadd.f32 %v3726_v19, %v8086_v14  ;;  %v8438_v40 = vmul.f32 %v4575_v10, %v8307_v38 }
 0xd03   : > { %6270 = vrcp.f32 %v3909_v34  ;;  %v6265_v21 = vpop.eup %6264  ;;  %v8441_v0 = vmul.f32 0.5, %v8332_v6  ;;  %v3847_v12 = vand.u32 2147483647, %v8430_v30  ;;  %v8445_v20 = vmul.f32 %v4574_v44, %v8294_v47 }
 0xd04   : > { %v3910_v57 = vadd.f32 1.0, %v3878_v46  ;;  %v4576_v61 = vadd.f32 1.0, %v4544_v27  ;;  %v4418_v53 = vmul.f32 %v6265_v21, %v4258_v55  ;;  %v8448_v32 = vmul.f32 0.70710677, %v8435_v54 }
 0xd05   : > { %v4513_v52 = vsub.f32 0.0, %v4449_v4  ;;  %v8451_v50 = vmul.f32 0.5, %v8368_v42  ;;  %v3879_v38 = vmul.f32 0.3275911, %v3847_v12  ;;  %v4365_v35 = vmul.f32 1.442695, %v4323_v23 }
 0xd06   : > { %6272 = vrcp.f32 %v3910_v57  ;;  %v4324_v60 = vmul.f32 %v4292_v29, %v8365_v49  ;;  %v8457_v47 = vand.u32 2147483647, %v8448_v32  ;;  %v8460_v19 = vadd.f32 %v3730_v5, %v8082_v48 }
 0xd07   : > { %v8453_v6 = vpop.eup %6266  ;;  %v3911_v22 = vadd.f32 1.0, %v3879_v38  ;;  %v8467_v28 = vadd.f32 %v3732_v17, %v8086_v14  ;;  %v8470_v36 = vmul.f32 %v4576_v61, %v8310_v2  ;;  %v4450_v49 = vsub.f32 1.0, %v4418_v53 }
 0xd08   : > { %v4003_v42 = vmul.f32 1.0614054, %v8453_v6  ;;  %v4293_v10 = vsub.f32 0.0, %v8397_v11  ;;  %v3880_v44 = vmul.f32 0.3275911, %v8457_v47  ;;  %v4545_v34 = vsel %vm4481_vm9, %v4449_v4, %v4513_v52  ;;  %v3734_v4 = vpop.f32.mrf.mxu0 }
 0xd09   : > { %v8474_v55 = vpop.eup %6268  ;;  %6274 = vrcp.f32 %v3911_v22  ;;  %v8479_v27 = vmul.f32 0.70710677, %v8460_v19  ;;  %v4367_v2 = vmul.f32 1.442695, %v4324_v60  ;;  %v8484_v21 = vmul.f32 0.5, %v8392_v26 }
 0xd0a   : > { %v4035_v5 = vadd.f32 -1.4531521, %v4003_v42  ;;  %6276 = vpow2.f32 %v4365_v35  ;;  %v4004_v46 = vmul.f32 1.0614054, %v8474_v55  ;;  %v3912_v23 = vadd.f32 1.0, %v3880_v44 }
 0xd0b   : > { %v8487_v57 = vand.u32 2147483647, %v8479_v27  ;;  %v8490_v16 = vmul.f32 0.70710677, %v8467_v28  ;;  %v4577_v61 = vadd.f32 1.0, %v4545_v34  ;;  %v4514_v53 = vsub.f32 0.0, %v4450_v49 }
 0xd0c   : > { %v4067_v29 = vmul.f32 %v8453_v6, %v4035_v5  ;;  %v4036_v17 = vadd.f32 -1.4531521, %v4004_v46  ;;  %v4325_v52 = vmul.f32 %v4293_v10, %v8397_v11  ;;  %v4295_v35 = vsub.f32 0.0, %v3847_v12 }
 0xd0d   : > { %6278 = vrcp.f32 %v3912_v23  ;;  %v3881_v60 = vmul.f32 0.3275911, %v8487_v57  ;;  %v8496_v42 = vand.u32 2147483647, %v8490_v16  ;;  %v8499_v22 = vadd.f32 %v3734_v4, %v8082_v48 }
 0xd0e   : > { %v4099_v38 = vadd.f32 1.4214138, %v4067_v29  ;;  %v4068_v26 = vmul.f32 %v8474_v55, %v4036_v17  ;;  %6280 = vpow2.f32 %v4367_v2  ;;  %v4294_v11 = vsub.f32 0.0, %v8419_v62 }
 0xd0f   : > { %v8506_v10 = vmul.f32 0.5, %v8403_v8  ;;  %v3913_v5 = vadd.f32 1.0, %v3881_v60  ;;  %v4546_v46 = vsel %vm4482_vm10, %v4450_v49, %v4514_v53  ;;  %v3882_v29 = vmul.f32 0.3275911, %v8496_v42 }
 0xd10   : > { %v8501_v44 = vpop.eup %6270  ;;  %v4131_v34 = vmul.f32 %v8453_v6, %v4099_v38  ;;  %v4100_v2 = vadd.f32 1.4214138, %v4068_v26  ;;  %v4369_v17 = vmul.f32 1.442695, %v4325_v52  ;;  %v4327_v18 = vmul.f32 %v4295_v35, %v3847_v12 }
 0xd11   : > { %v4005_v23 = vmul.f32 1.0614054, %v8501_v44  ;;  %6282 = vrcp.f32 %v3913_v5  ;;  %v3914_v8 = vadd.f32 1.0, %v3882_v29  ;;  %v8516_v60 = vmul.f32 0.70710677, %v8499_v22 }
 0xd12   : > { %v4163_v4 = vadd.f32 -0.28449672, %v4131_v34  ;;  %v4132_v38 = vmul.f32 %v8474_v55, %v4100_v2  ;;  %v4326_v53 = vmul.f32 %v4294_v11, %v8419_v62  ;;  %v4296_v26 = vsub.f32 0.0, %v8457_v47 }
 0xd13   : > { %v8512_v51 = vpop.eup %6272  ;;  %v4037_v39 = vadd.f32 -1.4531521, %v4005_v23  ;;  %6284 = vrcp.f32 %v3914_v8  ;;  %v3851_v35 = vand.u32 2147483647, %v8516_v60  ;;  %v8525_v34 = vmul.f32 %v4577_v61, %v8314_v41 }
 0xd14   : > { %v4195_v9 = vmul.f32 %v8453_v6, %v4163_v4  ;;  %v4006_v49 = vmul.f32 1.0614054, %v8512_v51  ;;  %v4164_v52 = vadd.f32 -0.28449672, %v4132_v38  ;;  %v4578_v5 = vadd.f32 1.0, %v4546_v46 }
 0xd15   : > { %v4069_v12 = vmul.f32 %v8501_v44, %v4037_v39  ;;  %v4373_v23 = vmul.f32 1.442695, %v4327_v18  ;;  %6286 = vpow2.f32 %v4369_v17  ;;  %v3883_v62 = vmul.f32 0.3275911, %v3851_v35 }
 0xd16   : > { %v4038_v2 = vadd.f32 -1.4531521, %v4006_v49  ;;  %v8527_v29 = vpop.eup %6274  ;;  %v4227_v4 = vadd.f32 0.2548296, %v4195_v9  ;;  %v4196_v38 = vmul.f32 %v8474_v55, %v4164_v52  ;;  %v4371_v8 = vmul.f32 1.442695, %v4326_v53 }
 0xd17   : > { %v4101_v56 = vadd.f32 1.4214138, %v4069_v12  ;;  %v6277_v11 = vpop.eup %6276  ;;  %v4007_v24 = vmul.f32 1.0614054, %v8527_v29  ;;  %v4328_v61 = vmul.f32 %v4296_v26, %v8457_v47  ;;  %v4297_v18 = vsub.f32 0.0, %v8487_v57 }
 0xd18   : > { %v4070_v39 = vmul.f32 %v8512_v51, %v4038_v2  ;;  %v3915_v46 = vadd.f32 1.0, %v3883_v62  ;;  %6288 = vpow2.f32 %v4373_v23  ;;  %v8536_v17 = vmul.f32 0.5, %v8435_v54 }
 0xd19   : > { %v4133_v41 = vmul.f32 %v8501_v44, %v4101_v56  ;;  %v4039_v9 = vadd.f32 -1.4531521, %v4007_v24  ;;  %v8541_v52 = vmul.f32 %v4578_v5, %v8344_v25  ;;  %v4259_v53 = vmul.f32 %v8453_v6, %v4227_v4 }
 0xd1a   : > { %v4102_v49 = vadd.f32 1.4214138, %v4070_v39  ;;  %v8538_v12 = vpop.eup %6278  ;;  %6290 = vrcp.f32 %v3915_v46  ;;  %v4228_v47 = vadd.f32 0.2548296, %v4196_v38  ;;  %v4375_v54 = vmul.f32 1.442695, %v4328_v61 }
 0xd1b   : > { %v4165_v2 = vadd.f32 -0.28449672, %v4133_v41  ;;  %v6281_v56 = vpop.eup %6280  ;;  %v4071_v62 = vmul.f32 %v8527_v29, %v4039_v9  ;;  %v4008_v24 = vmul.f32 1.0614054, %v8538_v12  ;;  %6292 = vpow2.f32 %v4371_v8 }
 0xd1c   : > { %v4134_v26 = vmul.f32 %v8512_v51, %v4102_v49  ;;  %v4329_v23 = vmul.f32 %v4297_v18, %v8487_v57  ;;  %v4298_v39 = vsub.f32 0.0, %v8496_v42  ;;  %v4299_v4 = vsub.f32 0.0, %v3851_v35 }
 0xd1d   : > { %v4197_v25 = vmul.f32 %v8501_v44, %v4165_v2  ;;  %v4103_v6 = vadd.f32 1.4214138, %v4071_v62  ;;  %v8552_v38 = vmul.f32 %v6277_v11, %v4259_v53  ;;  %v4040_v46 = vadd.f32 -1.4531521, %v4008_v24  ;;  %v3736_v2 = vpop.f32.mrf.mxu0 }
 0xd1e   : > { %v4166_v5 = vadd.f32 -0.28449672, %v4134_v26  ;;  %v8550_v41 = vpop.eup %6282  ;;  %v8555_v49 = vmul.f32 0.5, %v8460_v19  ;;  %v8558_v8 = vmul.f32 0.5, %v8467_v28  ;;  %v4260_v57 = vmul.f32 %v8474_v55, %v4228_v47 }
 0xd1f   : > { %v4135_v18 = vmul.f32 %v8527_v29, %v4103_v6  ;;  %v4009_v9 = vmul.f32 1.0614054, %v8550_v41  ;;  %v4072_v26 = vmul.f32 %v8538_v12, %v4040_v46  ;;  %6294 = vpow2.f32 %v4375_v54 }
 0xd20   : > { %v4198_v61 = vmul.f32 %v8512_v51, %v4166_v5  ;;  %v4377_v11 = vmul.f32 1.442695, %v4329_v23  ;;  %v4330_v53 = vmul.f32 %v4298_v39, %v8496_v42  ;;  %v8566_v19 = vpop.eup %6284  ;;  %v4229_v62 = vadd.f32 0.2548296, %v4197_v25  ;;  %v3740_v25 = vpop.f32.mrf.mxu0 }
 0xd21   : > { %v4167_v28 = vadd.f32 -0.28449672, %v4135_v18  ;;  %v4041_v24 = vadd.f32 -1.4531521, %v4009_v9  ;;  %v4331_v59 = vmul.f32 %v4299_v4, %v3851_v35  ;;  %v4451_v55 = vsub.f32 1.0, %v8552_v38 }
 0xd22   : > { %vm4483_vm11 = vcmp.ge.f32.partialorder %v8347_v43, 0.0  ;;  %v4104_v47 = vadd.f32 1.4214138, %v4072_v26  ;;  %v8571_v5 = vmul.f32 0.5, %v8499_v22  ;;  %v3737_v6 = vadd.f32 %v3736_v2, %v8086_v14  ;;  %v6287_v54 = vpop.eup %6286 }
 0xd23   : > { %v4420_v23 = vmul.f32 %v6281_v56, %v4260_v57  ;;  %v4230_v46 = vadd.f32 0.2548296, %v4198_v61  ;;  %v4199_v42 = vmul.f32 %v8527_v29, %v4167_v28  ;;  %v4073_v39 = vmul.f32 %v8550_v41, %v4041_v24 }
 0xd24   : > { %v4136_v35 = vmul.f32 %v8538_v12, %v4104_v47  ;;  %6296 = vpow2.f32 %v4377_v11  ;;  %v4010_v4 = vmul.f32 1.0614054, %v8566_v19  ;;  %v4379_v38 = vmul.f32 1.442695, %v4330_v53 }
 0xd25   : > { %v4261_v18 = vmul.f32 %v8501_v44, %v4229_v62  ;;  %v4231_v22 = vadd.f32 0.2548296, %v4199_v42  ;;  %v4105_v9 = vadd.f32 1.4214138, %v4073_v39  ;;  %v4381_v26 = vmul.f32 1.442695, %v4331_v59  ;;  %v6289_v2 = vpop.eup %6288 }
 0xd26   : > { %v4515_v3 = vsub.f32 0.0, %v4451_v55  ;;  %vm4484_vm12 = vcmp.ge.f32.partialorder %v8350_v15, 0.0  ;;  %v4168_v56 = vadd.f32 -0.28449672, %v4136_v35  ;;  %v4042_v57 = vadd.f32 -1.4531521, %v4010_v4 }
 0xd27   : > { %v3741_v61 = vadd.f32 %v3740_v25, %v8082_v48  ;;  %v8581_v28 = vpop.eup %6290  ;;  %v4452_v24 = vsub.f32 1.0, %v4420_v23  ;;  %v4262_v11 = vmul.f32 %v8512_v51, %v4230_v46  ;;  %v4263_v53 = vmul.f32 %v8527_v29, %v4231_v22 }
 0xd28   : > { %v4137_v44 = vmul.f32 %v8550_v41, %v4105_v9  ;;  %v4200_v62 = vmul.f32 %v8538_v12, %v4168_v56  ;;  %v4074_v59 = vmul.f32 %v8566_v19, %v4042_v57  ;;  %6298 = vpow2.f32 %v4379_v38  ;;  %v6293_v42 = vpop.eup %6292 }
 0xd29   : > { %v4011_v47 = vmul.f32 1.0614054, %v8581_v28  ;;  %v8589_v39 = vmul.f32 %v6287_v54, %v4261_v18  ;;  %v4423_v25 = vmul.f32 %v6289_v2, %v4263_v53  ;;  %v8591_v4 = vmul.f32 0.70710677, %v3737_v6 }
 0xd2a   : > { %v4169_v35 = vadd.f32 -0.28449672, %v4137_v44  ;;  %v4232_v23 = vadd.f32 0.2548296, %v4200_v62  ;;  %v4106_v51 = vadd.f32 1.4214138, %v4074_v59  ;;  %6300 = vpow2.f32 %v4381_v26 }
 0xd2b   : > { %v4043_v46 = vadd.f32 -1.4531521, %v4011_v47  ;;  %v4547_v29 = vsel %vm4483_vm11, %v4451_v55, %v4515_v3  ;;  %v4516_v22 = vsub.f32 0.0, %v4452_v24  ;;  %v8595_v9 = vmul.f32 %v6293_v42, %v4262_v11  ;;  %v3742_v11 = vpop.f32.mrf.mxu0 }
 0xd2c   : > { %vm4487_vm13 = vcmp.ge.f32.partialorder %v8430_v30, 0.0  ;;  %v4201_v38 = vmul.f32 %v8550_v41, %v4169_v35  ;;  %v4455_v54 = vsub.f32 1.0, %v4423_v25  ;;  %v4264_v18 = vmul.f32 %v8538_v12, %v4232_v23  ;;  %v6295_v57 = vpop.eup %6294 }
 0xd2d   : > { %v4138_v2 = vmul.f32 %v8566_v19, %v4106_v51  ;;  %v4075_v56 = vmul.f32 %v8581_v28, %v4043_v46  ;;  %v4453_v26 = vsub.f32 1.0, %v8589_v39  ;;  %vm4485_vm14 = vcmp.ge.f32.partialorder %v8387_v37, 0.0 }
 0xd2e   : > { %v4233_v3 = vadd.f32 0.2548296, %v4201_v38  ;;  %v8604_v43 = vmul.f32 0.5, %v3737_v6  ;;  %v3852_v55 = vand.u32 2147483647, %v8591_v4  ;;  %v4424_v53 = vmul.f32 %v6295_v57, %v4264_v18 }
 0xd2f   : > { %v4170_v44 = vadd.f32 -0.28449672, %v4138_v2  ;;  %v4107_v62 = vadd.f32 1.4214138, %v4075_v56  ;;  %v8607_v59 = vmul.f32 0.5, %v3741_v61  ;;  %v4579_v12 = vadd.f32 1.0, %v4547_v29 }
 0xd30   : > { %v4548_v47 = vsel %vm4484_vm12, %v4452_v24, %v4516_v22  ;;  %vm4486_vm15 = vcmp.ge.f32.partialorder %v8400_v58, 0.0  ;;  %v4265_v42 = vmul.f32 %v8550_v41, %v4233_v3  ;;  %v3884_v39 = vmul.f32 0.3275911, %v3852_v55  ;;  %v3744_v24 = vpop.f32.mrf.mxu0 }
 0xd31   : > { %v4454_v6 = vsub.f32 1.0, %v8595_v9  ;;  %v4519_v25 = vsub.f32 0.0, %v4455_v54  ;;  %vm4488_vm0 = vcmp.ge.f32.partialorder %v8448_v32, 0.0  ;;  %v4202_v35 = vmul.f32 %v8566_v19, %v4170_v44  ;;  %v6297_v51 = vpop.eup %6296 }
 0xd32   : > { %v4139_v23 = vmul.f32 %v8581_v28, %v4107_v62  ;;  %v4517_v46 = vsub.f32 0.0, %v4453_v26  ;;  %v4456_v29 = vsub.f32 1.0, %v4424_v53  ;;  %v3916_v38 = vadd.f32 1.0, %v3884_v39 }
 0xd33   : > { %v8617_v15 = vmul.f32 0.70710677, %v3741_v61  ;;  %v4425_v22 = vmul.f32 %v6297_v51, %v4265_v42  ;;  %v4234_v18 = vadd.f32 0.2548296, %v4202_v35  ;;  %v4300_v2 = vsub.f32 0.0, %v3852_v55  ;;  %v3746_v35 = vpop.f32.mrf.mxu0 }
 0xd34   : > { %v4171_v41 = vadd.f32 -0.28449672, %v4139_v23  ;;  %v8620_v9 = vmul.f32 %v4579_v12, %v8416_v31  ;;  %6302 = vrcp.f32 %v3916_v38  ;;  %v3743_v57 = vadd.f32 %v3742_v11, %v8086_v14 }
 0xd35   : > { %v8623_v56 = vand.u32 2147483647, %v8617_v15  ;;  %v4518_v3 = vsub.f32 0.0, %v4454_v6  ;;  %v4551_v53 = vsel %vm4487_vm13, %v4455_v54, %v4519_v25  ;;  %v4266_v61 = vmul.f32 %v8566_v19, %v4234_v18  ;;  %v6299_v62 = vpop.eup %6298  ;;  %v3750_v32 = vpop.f32.mrf.mxu0 }
 0xd36   : > { %v4203_v44 = vmul.f32 %v8581_v28, %v4171_v41  ;;  %v4580_v42 = vadd.f32 1.0, %v4548_v47  ;;  %v4520_v39 = vsub.f32 0.0, %v4456_v29  ;;  %vm4489_vm1 = vcmp.ge.f32.partialorder %v8479_v27, 0.0 }
 0xd37   : > { %v3885_v31 = vmul.f32 0.3275911, %v8623_v56  ;;  %v8633_v12 = vadd.f32 %v3744_v24, %v8082_v48  ;;  %v4549_v11 = vsel %vm4485_vm14, %v4453_v26, %v4517_v46  ;;  %v4457_v30 = vsub.f32 1.0, %v4425_v22  ;;  %v6301_v19 = vpop.eup %6300 }
 0xd38   : > { %v4235_v54 = vadd.f32 0.2548296, %v4203_v44  ;;  %v4332_v25 = vmul.f32 %v4300_v2, %v3852_v55  ;;  %v4637_v23 = vpack.c.bf16 %v8620_v9, %v8525_v34  ;;  %v4583_v47 = vadd.f32 1.0, %v4551_v53 }
 0xd39   : > { %v3917_v51 = vadd.f32 1.0, %v3885_v31  ;;  %v8639_v38 = vmul.f32 0.70710677, %v3743_v57  ;;  %v4550_v18 = vsel %vm4486_vm15, %v4454_v6, %v4518_v3  ;;  %v4426_v24 = vmul.f32 %v6299_v62, %v4266_v61 }
 0xd3a   : > { %v4267_v41 = vmul.f32 %v8581_v28, %v4235_v54  ;;  %v3747_v37 = vadd.f32 %v3746_v35, %v8086_v14  ;;  %v4581_v26 = vadd.f32 1.0, %v4549_v11  ;;  %v4552_v55 = vsel %vm4488_vm0, %v4456_v29, %v4520_v39 }
 0xd3b   : > { %6304 = vrcp.f32 %v3917_v51  ;;  %v3854_v46 = vand.u32 2147483647, %v8639_v38  ;;  %v8649_v22 = vmul.f32 %v4580_v42, %v8441_v0  ;;  %v4521_v2 = vsub.f32 0.0, %v4457_v30 }
 0xd3c   : > { %v4427_v53 = vmul.f32 %v6301_v19, %v4267_v41  ;;  %v4383_v44 = vmul.f32 1.442695, %v4332_v25  ;;  %v4582_v58 = vadd.f32 1.0, %v4550_v18  ;;  %v8652_v6 = vmul.f32 %v4583_v47, %v8506_v10  ;;  %v3752_v19 = vpop.f32.mrf.mxu0 }
 0xd3d   : > { %vm4490_vm2 = vcmp.ge.f32.partialorder %v8490_v16, 0.0  ;;  %v3886_v28 = vmul.f32 0.3275911, %v3854_v46  ;;  %v8656_v3 = vmul.f32 0.70710677, %v8633_v12  ;;  %v4584_v29 = vadd.f32 1.0, %v4552_v55 }
 0xd3e   : > { %v4458_v61 = vsub.f32 1.0, %v4426_v24  ;;  %v8658_v62 = vmul.f32 0.5, %v3743_v57  ;;  %v8660_v0 = vmul.f32 0.70710677, %v3747_v37  ;;  %v8663_v42 = vmul.f32 %v4581_v26, %v8451_v50 }
 0xd3f   : > { %vm4491_vm3 = vcmp.ge.f32.partialorder %v8516_v60, 0.0  ;;  %v4301_v10 = vsub.f32 0.0, %v8623_v56  ;;  %v3918_v39 = vadd.f32 1.0, %v3886_v28  ;;  %v3855_v31 = vand.u32 2147483647, %v8656_v3 }
 0xd40   : > { %v4553_v35 = vsel %vm4489_vm1, %v4457_v30, %v4521_v2  ;;  %v4459_v11 = vsub.f32 1.0, %v4427_v53  ;;  %6306 = vpow2.f32 %v4383_v44  ;;  %v3856_v57 = vand.u32 2147483647, %v8660_v0 }
 0xd41   : > { %v8672_v54 = vmul.f32 %v4582_v58, %v8484_v21  ;;  %v4639_v50 = vpack.c.bf16 %v8652_v6, %v8663_v42  ;;  %6308 = vrcp.f32 %v3918_v39  ;;  %v3887_v25 = vmul.f32 0.3275911, %v3855_v31  ;;  %v8676_v47 = vpop.eup %6302 }
 0xd42   : > { %v8679_v51 = vmul.f32 %v4584_v29, %v8536_v17  ;;  %v4522_v27 = vsub.f32 0.0, %v4458_v61  ;;  %v4302_v30 = vsub.f32 0.0, %v3854_v46  ;;  %v3888_v18 = vmul.f32 0.3275911, %v3856_v57  ;;  %v3754_v29 = vpop.f32.mrf.mxu0 }
 0xd43   : > { %v4585_v24 = vadd.f32 1.0, %v4553_v35  ;;  %v4012_v41 = vmul.f32 1.0614054, %v8676_v47  ;;  %v4333_v21 = vmul.f32 %v4301_v10, %v8623_v56  ;;  %v3919_v26 = vadd.f32 1.0, %v3887_v25 }
 0xd44   : > { %v4523_v55 = vsub.f32 0.0, %v4459_v11  ;;  %v4303_v2 = vsub.f32 0.0, %v3855_v31  ;;  %v3920_v53 = vadd.f32 1.0, %v3888_v18  ;;  %v4634_v44 = vpack.c.bf16 %v8413_v13, %v8406_v33 }
 0xd45   : > { %v4044_v58 = vadd.f32 -1.4531521, %v4012_v41  ;;  %6310 = vrcp.f32 %v3919_v26  ;;  %v4304_v28 = vsub.f32 0.0, %v3856_v57  ;;  %v4636_v17 = vpack.c.bf16 %v8470_v36, %v8445_v20 }
 0xd46   : > { %v4554_v39 = vsel %vm4490_vm2, %v4458_v61, %v4522_v27  ;;  %v4334_v35 = vmul.f32 %v4302_v30, %v3854_v46  ;;  %v8690_v56 = vmul.f32 0.5, %v8633_v12  ;;  %6312 = vrcp.f32 %v3920_v53  ;;  %4816 = vmatprep.mubr.bf16.mxu1 %v4634_v44  ;;  %v3756_v44 = vpop.f32.mrf.mxu0 }
 0xd47   : > { %v4076_v10 = vmul.f32 %v8676_v47, %v4044_v58  ;;  %v4385_v25 = vmul.f32 1.442695, %v4333_v21  ;;  %v8693_v33 = vmul.f32 0.5, %v3747_v37  ;;  %v9146_v13 = vpack.c.bf16 %v8384_v45, %v8381_v63 }
 0xd48   : > { %v8699_v20 = vadd.f32 %v3750_v32, %v8082_v48  ;;  %v8701_v36 = vpop.eup %6304  ;;  %v4555_v16 = vsel %vm4491_vm3, %v4459_v11, %v4523_v55  ;;  %v4335_v12 = vmul.f32 %v4303_v2, %v3855_v31  ;;  %v8706_v46 = vadd.f32 %v3752_v19, %v8086_v14  ;;  %v3760_v34 = vpop.f32.mrf.mxu0 }
 0xd49   : > { %4817 = vmatmul.mubr.bf16.vlgmr.msra.gmra.mxu1 %v9146_v13  ;;  %v8709_v37 = vadd.f32 %v3754_v29, %v8082_v48  ;;  %v4586_v61 = vadd.f32 1.0, %v4554_v39  ;;  %v4108_v27 = vadd.f32 1.4214138, %v4076_v10  ;;  %v4013_v63 = vmul.f32 1.0614054, %v8701_v36 }
 0xd4a   : > { %4824 = vmatprep.mubr.bf16.mxu1 %v4636_v17  ;;  %v4336_v45 = vmul.f32 %v4304_v28, %v3856_v57  ;;  %v8713_v32 = vmul.f32 %v4585_v24, %v8555_v49  ;;  %v4387_v30 = vmul.f32 1.442695, %v4334_v35  ;;  %v8716_v60 = vmul.f32 0.70710677, %v8699_v20 }
 0xd4b   : > { %v8719_v31 = vmul.f32 0.70710677, %v8706_v46  ;;  %v4587_v11 = vadd.f32 1.0, %v4555_v16  ;;  %v4140_v19 = vmul.f32 %v8676_v47, %v4108_v27  ;;  %v4045_v18 = vadd.f32 -1.4531521, %v4013_v63 }
 0xd4c   : > { %v8723_v41 = vmul.f32 0.70710677, %v8709_v37  ;;  %v4389_v21 = vmul.f32 1.442695, %v4335_v12  ;;  %v4638_v57 = vpack.c.bf16 %v8649_v22, %v8541_v52  ;;  %v3857_v49 = vand.u32 2147483647, %v8716_v60 }
 0xd4d   : > { %v3858_v24 = vand.u32 2147483647, %v8719_v31  ;;  %v6307_v26 = vpop.eup %6306  ;;  %v4172_v55 = vadd.f32 -0.28449672, %v4140_v19  ;;  %v4077_v2 = vmul.f32 %v8701_v36, %v4045_v18  ;;  %6314 = vpow2.f32 %v4385_v25 }
 0xd4e   : > { %v4391_v53 = vmul.f32 1.442695, %v4336_v45  ;;  %v8730_v58 = vpop.eup %6308  ;;  %v8733_v28 = vmul.f32 %v4586_v61, %v8558_v8  ;;  %v3889_v17 = vmul.f32 0.3275911, %v3857_v49  ;;  %v8736_v52 = vand.u32 2147483647, %v8723_v41 }
 0xd4f   : > { %v3890_v29 = vmul.f32 0.3275911, %v3858_v24  ;;  %v4204_v22 = vmul.f32 %v8676_v47, %v4172_v55  ;;  %v4109_v39 = vadd.f32 1.4214138, %v4077_v2  ;;  %v4014_v35 = vmul.f32 1.0614054, %v8730_v58 }
 0xd50   : > { %6316 = vpow2.f32 %v4387_v30  ;;  %v9147_v10 = vpack.c.bf16 %v8438_v40, %v8422_v1  ;;  %v8744_v25 = vmul.f32 %v4587_v11, %v8571_v5  ;;  %v3921_v8 = vadd.f32 1.0, %v3889_v17 }
 0xd51   : > { %6318 = vpow2.f32 %v4389_v21  ;;  %v8747_v13 = vadd.f32 %v3756_v44, %v8086_v14  ;;  %v4236_v16 = vadd.f32 0.2548296, %v4204_v22  ;;  %v4141_v12 = vmul.f32 %v8701_v36, %v4109_v39 }
 0xd52   : > { %4825 = vmatmul.mubr.bf16.gmra.mxu1 %v9147_v10  ;;  %v4046_v61 = vadd.f32 -1.4531521, %v4014_v35  ;;  %6320 = vpow2.f32 %v4391_v53  ;;  %v8750_v27 = vpop.eup %6310  ;;  %vm4492_vm4 = vcmp.ge.f32.partialorder %v8591_v4, 0.0  ;;  %v4640_v1 = vpack.c.bf16 %v8679_v51, %v8672_v54 }
 0xd53   : > { %4832 = vmatprep.mubr.bf16.mxu1 %v4638_v57  ;;  %6322 = vrcp.f32 %v3921_v8  ;;  %v3922_v40 = vadd.f32 1.0, %v3890_v29  ;;  %v3891_v5 = vmul.f32 0.3275911, %v8736_v52  ;;  %v8756_v63 = vpop.eup %6312  ;;  %v4268_v45 = vmul.f32 %v8676_v47, %v4236_v16 }
 0xd54   : > { %v4173_v30 = vadd.f32 -0.28449672, %v4141_v12  ;;  %v4078_v11 = vmul.f32 %v8730_v58, %v4046_v61  ;;  %v4015_v19 = vmul.f32 1.0614054, %v8750_v27  ;;  %v4016_v18 = vmul.f32 1.0614054, %v8756_v63 }
 0xd55   : > { %v4305_v21 = vsub.f32 0.0, %v3857_v49  ;;  %v4306_v57 = vsub.f32 0.0, %v3858_v24  ;;  %v8763_v55 = vmul.f32 0.70710677, %v8747_v13  ;;  %v4428_v54 = vmul.f32 %v6307_v26, %v4268_v45 }
 0xd56   : > { %v4205_v51 = vmul.f32 %v8701_v36, %v4173_v30  ;;  %v4110_v2 = vadd.f32 1.4214138, %v4078_v11  ;;  %v4047_v53 = vadd.f32 -1.4531521, %v4015_v19  ;;  %v4048_v44 = vadd.f32 -1.4531521, %v4016_v18 }
 0xd57   : > { %6324 = vrcp.f32 %v3922_v40  ;;  %v3923_v47 = vadd.f32 1.0, %v3891_v5  ;;  %v8767_v17 = vand.u32 2147483647, %v8763_v55  ;;  %v4460_v29 = vsub.f32 1.0, %v4428_v54 }
 0xd58   : > { %v4237_v22 = vadd.f32 0.2548296, %v4205_v51  ;;  %v4142_v39 = vmul.f32 %v8730_v58, %v4110_v2  ;;  %v4079_v35 = vmul.f32 %v8750_v27, %v4047_v53  ;;  %v4080_v26 = vmul.f32 %v8756_v63, %v4048_v44 }
 0xd59   : > { %v4337_v10 = vmul.f32 %v4305_v21, %v3857_v49  ;;  %v4338_v8 = vmul.f32 %v4306_v57, %v3858_v24  ;;  %v3892_v16 = vmul.f32 0.3275911, %v8767_v17  ;;  %v4524_v12 = vsub.f32 0.0, %v4460_v29 }
 0xd5a   : > { %4833 = vmatmul.mubr.bf16.gmra.mxu1 %v4637_v23  ;;  %v4269_v61 = vmul.f32 %v8701_v36, %v4237_v22  ;;  %v4174_v40 = vadd.f32 -0.28449672, %v4142_v39  ;;  %v4111_v5 = vadd.f32 1.4214138, %v4079_v35  ;;  %v6315_v45 = vpop.eup %6314  ;;  %v4112_v30 = vadd.f32 1.4214138, %v4080_v26  ;;  %v3762_v39 = vpop.f32.mrf.mxu0 }
 0xd5b   : > { %4840 = vmatprep.mubr.bf16.mxu1 %v4640_v1  ;;  %6326 = vrcp.f32 %v3923_v47  ;;  %v4307_v11 = vsub.f32 0.0, %v8736_v52  ;;  %v3924_v19 = vadd.f32 1.0, %v3892_v16  ;;  %v4556_v9 = vsel %vm4492_vm4, %v4460_v29, %v4524_v12 }
 0xd5c   : > { %v4429_v23 = vmul.f32 %v6315_v45, %v4269_v61  ;;  %vm4493_vm5 = vcmp.ge.f32.partialorder %v8617_v15, 0.0  ;;  %v4206_v49 = vmul.f32 %v8730_v58, %v4174_v40  ;;  %v4143_v24 = vmul.f32 %v8750_v27, %v4111_v5 }
 0xd5d   : > { %v6317_v36 = vpop.eup %6316  ;;  %v4641_v1 = vpack.c.bf16 %v8744_v25, %v8713_v32  ;;  %v4588_v18 = vadd.f32 1.0, %v4556_v9  ;;  %v4144_v21 = vmul.f32 %v8756_v63, %v4112_v30  ;;  %v4393_v57 = vmul.f32 1.442695, %v4337_v10 }
 0xd5e   : > { %v6319_v54 = vpop.eup %6318  ;;  %v4461_v51 = vsub.f32 1.0, %v4429_v23  ;;  %v4238_v2 = vadd.f32 0.2548296, %v4206_v49  ;;  %v4175_v4 = vadd.f32 -0.28449672, %v4143_v24  ;;  %6328 = vrcp.f32 %v3924_v19 }
 0xd5f   : > { %v6321_v53 = vpop.eup %6320  ;;  %v4620_v44 = vmul.f32 %v4588_v18, %v8604_v43  ;;  %vm4494_vm6 = vcmp.ge.f32.partialorder %v8639_v38, 0.0  ;;  %v4176_v47 = vadd.f32 -0.28449672, %v4144_v21  ;;  %v4395_v29 = vmul.f32 1.442695, %v4338_v8 }
 0xd60   : > { %v4339_v22 = vmul.f32 %v4307_v11, %v8736_v52  ;;  %v8789_v32 = vpop.eup %6322  ;;  %v4270_v25 = vmul.f32 %v8730_v58, %v4238_v2  ;;  %v4207_v35 = vmul.f32 %v8750_v27, %v4175_v4  ;;  %v4308_v26 = vsub.f32 0.0, %v8767_v17 }
 0xd61   : > { %v8798_v43 = vadd.f32 %v3760_v34, %v8082_v48  ;;  %v4525_v10 = vsub.f32 0.0, %v4461_v51  ;;  %v4208_v8 = vmul.f32 %v8756_v63, %v4176_v47  ;;  %v4642_v52 = vpack.c.bf16 %v4620_v44, %v8733_v28 }
 0xd62   : > { %4841 = vmatmul.mubr.bf16.gmra.mxu1 %v4639_v50  ;;  %v4017_v16 = vmul.f32 1.0614054, %v8789_v32  ;;  %v4430_v12 = vmul.f32 %v6317_v36, %v4270_v25  ;;  %v4239_v58 = vadd.f32 0.2548296, %v4207_v35  ;;  %6330 = vpow2.f32 %v4393_v57 }
 0xd63   : > { %v8804_v61 = vadd.f32 %v3762_v39, %v8086_v14  ;;  %vm4495_vm7 = vcmp.ge.f32.partialorder %v8656_v3, 0.0  ;;  %v4240_v6 = vadd.f32 0.2548296, %v4208_v8  ;;  %4848 = vmatprep.mubr.bf16.mxu1 %v4642_v52  ;;  %6332 = vpow2.f32 %v4395_v29 }
 0xd64   : > { %v4049_v42 = vadd.f32 -1.4531521, %v4017_v16  ;;  %v4397_v50 = vmul.f32 1.442695, %v4339_v22  ;;  %v8807_v40 = vpop.eup %6324  ;;  %v4462_v5 = vsub.f32 1.0, %v4430_v12  ;;  %v4271_v28 = vmul.f32 %v8750_v27, %v4239_v58 }
 0xd65   : > { %vm4496_vm8 = vcmp.ge.f32.partialorder %v8660_v0, 0.0  ;;  %v4340_v45 = vmul.f32 %v4308_v26, %v8767_v17  ;;  %v8813_v30 = vmul.f32 0.70710677, %v8798_v43  ;;  %v4557_v11 = vsel %vm4493_vm5, %v4461_v51, %v4525_v10 }
 0xd66   : > { %v4272_v19 = vmul.f32 %v8756_v63, %v4240_v6  ;;  %v4081_v34 = vmul.f32 %v8789_v32, %v4049_v42  ;;  %v4018_v9 = vmul.f32 1.0614054, %v8807_v40  ;;  %v4526_v23 = vsub.f32 0.0, %v4462_v5 }
 0xd67   : > { %v4431_v49 = vmul.f32 %v6319_v54, %v4271_v28  ;;  %v8821_v27 = vand.u32 2147483647, %v8813_v30  ;;  %v8824_v24 = vmul.f32 0.70710677, %v8804_v61  ;;  %6334 = vpow2.f32 %v4397_v50 }
 0xd68   : > { %v4432_v17 = vmul.f32 %v6321_v53, %v4272_v19  ;;  %v4113_v36 = vadd.f32 1.4214138, %v4081_v34  ;;  %v4050_v18 = vadd.f32 -1.4531521, %v4018_v9  ;;  %v8826_v15 = vpop.eup %6326  ;;  %v4558_v63 = vsel %vm4494_vm6, %v4462_v5, %v4526_v23  ;;  %v3764_v5 = vpop.f32.mrf.mxu0 }
 0xd69   : > { %v4463_v21 = vsub.f32 1.0, %v4431_v49  ;;  %v4399_v57 = vmul.f32 1.442695, %v4340_v45  ;;  %v3893_v54 = vmul.f32 0.3275911, %v8821_v27  ;;  %v4589_v51 = vadd.f32 1.0, %v4557_v11 }
 0xd6a   : > { %4849 = vmatmul.mubr.bf16.gmra.mxu1 %v4641_v1  ;;  %v4464_v2 = vsub.f32 1.0, %v4432_v17  ;;  %v4145_v4 = vmul.f32 %v8789_v32, %v4113_v36  ;;  %v4082_v44 = vmul.f32 %v8807_v40, %v4050_v18  ;;  %v4019_v47 = vmul.f32 1.0614054, %v8826_v15 }
 0xd6b   : > { %v4527_v53 = vsub.f32 0.0, %v4463_v21  ;;  %v3925_v29 = vadd.f32 1.0, %v3893_v54  ;;  %v8835_v22 = vand.u32 2147483647, %v8824_v24  ;;  %v8837_v38 = vpop.eup %6328  ;;  %v4590_v39 = vadd.f32 1.0, %v4558_v63  ;;  %v3766_v54 = vpop.f32.mrf.mxu0 }
 0xd6c   : > { %v4528_v1 = vsub.f32 0.0, %v4464_v2  ;;  %v4177_v25 = vadd.f32 -0.28449672, %v4145_v4  ;;  %v4114_v35 = vadd.f32 1.4214138, %v4082_v44  ;;  %v4621_v17 = vmul.f32 %v4589_v51, %v8607_v59 }
 0xd6d   : > { %v4559_v26 = vsel %vm4495_vm7, %v4463_v21, %v4527_v53  ;;  %v4051_v10 = vadd.f32 -1.4531521, %v4019_v47  ;;  %v4020_v8 = vmul.f32 1.0614054, %v8837_v38  ;;  %6336 = vrcp.f32 %v3925_v29 }
 0xd6e   : > { %v4591_v52 = vadd.f32 1.0, %v4559_v26  ;;  %v4560_v16 = vsel %vm4496_vm8, %v4464_v2, %v4528_v1  ;;  %v4209_v12 = vmul.f32 %v8789_v32, %v4177_v25  ;;  %v4146_v58 = vmul.f32 %v8807_v40, %v4114_v35 }
 0xd6f   : > { %v4592_v6 = vadd.f32 1.0, %v4560_v16  ;;  %v4083_v42 = vmul.f32 %v8826_v15, %v4051_v10  ;;  %v4052_v50 = vadd.f32 -1.4531521, %v4020_v8  ;;  %6338 = vpow2.f32 %v4399_v57  ;;  %v6331_v3 = vpop.eup %6330 }
 0xd70   : > { %v4623_v28 = vmul.f32 %v4591_v52, %v8690_v56  ;;  %v4241_v45 = vadd.f32 0.2548296, %v4209_v12  ;;  %v4178_v11 = vadd.f32 -0.28449672, %v4146_v58  ;;  %v3894_v19 = vmul.f32 0.3275911, %v8835_v22  ;;  %v6333_v34 = vpop.eup %6332 }
 0xd71   : > { %v4622_v0 = vmul.f32 %v4590_v39, %v8658_v62  ;;  %v4624_v9 = vmul.f32 %v4592_v6, %v8693_v33  ;;  %v4115_v23 = vadd.f32 1.4214138, %v4083_v42  ;;  %v4084_v49 = vmul.f32 %v8837_v38, %v4052_v50 }
 0xd72   : > { %v4273_v36 = vmul.f32 %v8789_v32, %v4241_v45  ;;  %v4210_v18 = vmul.f32 %v8807_v40, %v4178_v11  ;;  %v3926_v63 = vadd.f32 1.0, %v3894_v19  ;;  %v4643_v2 = vpack.c.bf16 %v4623_v28, %v4621_v17 }
 0xd73   : > { %v4644_v56 = vpack.c.bf16 %v4624_v9, %v4622_v0  ;;  %v4147_v21 = vmul.f32 %v8826_v15, %v4115_v23  ;;  %v4116_v57 = vadd.f32 1.4214138, %v4084_v49  ;;  %v8858_v59 = vadd.f32 %v3764_v5, %v8082_v48 }
 0xd74   : > { %v4242_v4 = vadd.f32 0.2548296, %v4210_v18  ;;  %6340 = vrcp.f32 %v3926_v63  ;;  %v6335_v62 = vpop.eup %6334  ;;  %v4433_v32 = vmul.f32 %v6331_v3, %v4273_v36  ;;  %v8862_v53 = vadd.f32 %v3766_v54, %v8086_v14 }
 0xd75   : > { %4856 = vmatprep.mubr.bf16.mxu1 %v4644_v56  ;;  %v4179_v33 = vadd.f32 -0.28449672, %v4147_v21  ;;  %v4148_v44 = vmul.f32 %v8837_v38, %v4116_v57  ;;  %v8866_v1 = vmul.f32 0.70710677, %v8858_v59  ;;  %v3794_v58 = vmul.f32 0.5, %v8706_v46 }
 0xd76   : > { %4857 = vmatmul.mubr.bf16.gmra.mxu1 %v4643_v2  ;;  %v4274_v51 = vmul.f32 %v8807_v40, %v4242_v4  ;;  %v8870_v48 = vmul.f32 0.70710677, %v8862_v53  ;;  %v4465_v10 = vsub.f32 1.0, %v4433_v32  ;;  %vm4497_vm9 = vcmp.ge.f32.partialorder %v8716_v60, 0.0 }
 0xd77   : > { %v4211_v47 = vmul.f32 %v8826_v15, %v4179_v33  ;;  %v4180_v29 = vadd.f32 -0.28449672, %v4148_v44  ;;  %v3863_v14 = vand.u32 2147483647, %v8866_v1  ;;  %v4310_v9 = vsub.f32 0.0, %v8835_v22 }
 0xd78   : > { %v4434_v39 = vmul.f32 %v6333_v34, %v4274_v51  ;;  %v3864_v42 = vand.u32 2147483647, %v8870_v48  ;;  %v4529_v45 = vsub.f32 0.0, %v4465_v10  ;;  %vm4498_vm10 = vcmp.ge.f32.partialorder %v8719_v31, 0.0 }
 0xd79   : > { %v4243_v25 = vadd.f32 0.2548296, %v4211_v47  ;;  %v4212_v35 = vmul.f32 %v8837_v38, %v4180_v29  ;;  %v3895_v6 = vmul.f32 0.3275911, %v3863_v14  ;;  %v4309_v46 = vsub.f32 0.0, %v8821_v27 }
 0xd7a   : > { %v8872_v26 = vpop.eup %6336  ;;  %v4466_v40 = vsub.f32 1.0, %v4434_v39  ;;  %v3896_v19 = vmul.f32 0.3275911, %v3864_v42  ;;  %vm4499_vm11 = vcmp.ge.f32.partialorder %v8723_v41, 0.0  ;;  %v4561_v18 = vsel %vm4497_vm9, %v4465_v10, %v4529_v45 }
 0xd7b   : > { %v4275_v8 = vmul.f32 %v8826_v15, %v4243_v25  ;;  %v4244_v52 = vadd.f32 0.2548296, %v4212_v35  ;;  %v4021_v16 = vmul.f32 1.0614054, %v8872_v26  ;;  %v3927_v11 = vadd.f32 1.0, %v3895_v6 }
 0xd7c   : > { %v6339_v12 = vpop.eup %6338  ;;  %v4530_v50 = vsub.f32 0.0, %v4466_v40  ;;  %v3928_v23 = vadd.f32 1.0, %v3896_v19  ;;  %vm4500_vm12 = vcmp.ge.f32.partialorder %v8763_v55, 0.0  ;;  %v4342_v31 = vmul.f32 %v4310_v9, %v8835_v22 }
 0xd7d   : > { %v4435_v5 = vmul.f32 %v6335_v62, %v4275_v8  ;;  %v4276_v3 = vmul.f32 %v8837_v38, %v4244_v52  ;;  %v4053_v28 = vadd.f32 -1.4531521, %v4021_v16  ;;  %6342 = vrcp.f32 %v3927_v11 }
 0xd7e   : > { %v4562_v38 = vsel %vm4498_vm10, %v4466_v40, %v4530_v50  ;;  %6344 = vrcp.f32 %v3928_v23  ;;  %v4341_v4 = vmul.f32 %v4309_v46, %v8821_v27  ;;  %v4593_v41 = vadd.f32 1.0, %v4561_v18 }
 0xd7f   : > { %v4467_v15 = vsub.f32 1.0, %v4435_v5  ;;  %v4436_v34 = vmul.f32 %v6339_v12, %v4276_v3  ;;  %v4085_v0 = vmul.f32 %v8872_v26, %v4053_v28  ;;  %v4594_v54 = vadd.f32 1.0, %v4562_v38 }
 0xd80   : > { %v3795_v33 = vmul.f32 0.5, %v8709_v37  ;;  %v3796_v60 = vmul.f32 0.5, %v8747_v13  ;;  %v4311_v47 = vsub.f32 0.0, %v3863_v14  ;;  %v3793_v29 = vmul.f32 0.5, %v8699_v20 }
 0xd81   : > { %v6341_v49 = vpop.eup %6340  ;;  %v4531_v17 = vsub.f32 0.0, %v4467_v15  ;;  %v4468_v36 = vsub.f32 1.0, %v4436_v34  ;;  %v4117_v63 = vadd.f32 1.4214138, %v4085_v0  ;;  %v4403_v39 = vmul.f32 1.442695, %v4342_v31 }
 0xd82   : > { %v4022_v56 = vmul.f32 1.0614054, %v6341_v49  ;;  %v4626_v25 = vmul.f32 %v4594_v54, %v3794_v58  ;;  %v4401_v10 = vmul.f32 1.442695, %v4341_v4  ;;  %v4625_v40 = vmul.f32 %v4593_v41, %v3793_v29 }
 0xd83   : > { %v4563_v21 = vsel %vm4499_vm11, %v4467_v15, %v4531_v17  ;;  %v4532_v57 = vsub.f32 0.0, %v4468_v36  ;;  %v4149_v55 = vmul.f32 %v8872_v26, %v4117_v63  ;;  %v4312_v8 = vsub.f32 0.0, %v3864_v42 }
 0xd84   : > { %v4595_v2 = vadd.f32 1.0, %v4563_v21  ;;  %v4054_v62 = vadd.f32 -1.4531521, %v4022_v56  ;;  %v4343_v16 = vmul.f32 %v4311_v47, %v3863_v14  ;;  %6346 = vpow2.f32 %v4403_v39 }
 0xd85   : > { %v4564_v44 = vsel %vm4500_vm12, %v4468_v36, %v4532_v57  ;;  %v4181_v52 = vadd.f32 -0.28449672, %v4149_v55  ;;  %6348 = vpow2.f32 %v4401_v10  ;;  %v4344_v5 = vmul.f32 %v4312_v8, %v3864_v42 }
 0xd86   : > { %v4596_v32 = vadd.f32 1.0, %v4564_v44  ;;  %v4086_v51 = vmul.f32 %v6341_v49, %v4054_v62  ;;  %v4627_v22 = vmul.f32 %v4595_v2, %v3795_v33  ;;  %v4405_v28 = vmul.f32 1.442695, %v4343_v16 }
 0xd87   : > { %v4213_v20 = vmul.f32 %v8872_v26, %v4181_v52  ;;  %v4407_v34 = vmul.f32 1.442695, %v4344_v5  ;;  %vm4502_vm13 = vcmp.ge.f32.partialorder %v8824_v24, 0.0  ;;  %vm4501_vm14 = vcmp.ge.f32.partialorder %v8813_v30, 0.0 }
 0xd88   : > { %v4628_v35 = vmul.f32 %v4596_v32, %v3796_v60  ;;  %v4118_v27 = vadd.f32 1.4214138, %v4086_v51  ;;  %v4645_v12 = vpack.c.bf16 %v4627_v22, %v4625_v40  ;;  %6350 = vpow2.f32 %v4405_v28 }
 0xd89   : > { %v4245_v14 = vadd.f32 0.2548296, %v4213_v20  ;;  %6352 = vpow2.f32 %v4407_v34  ;;  %vm4503_vm15 = vcmp.ge.f32.partialorder %v8866_v1, 0.0  ;;  %vm4504_vm0 = vcmp.ge.f32.partialorder %v8870_v48, 0.0 }
 0xd8a   : > { %v4150_v37 = vmul.f32 %v6341_v49, %v4118_v27  ;;  %v4646_v13 = vpack.c.bf16 %v4628_v35, %v4626_v25  ;;  %v6343_v50 = vpop.eup %6342  ;;  %v3799_v16 = vmul.f32 0.5, %v8858_v59  ;;  %v3798_v24 = vmul.f32 0.5, %v8804_v61  ;;  %v8909_v61 = vld [vmem:[%s9022_s8] ss:$0 sm:$0xff] }
 0xd8b   : > { %v4023_v3 = vmul.f32 1.0614054, %v6343_v50  ;;  %v6345_v45 = vpop.eup %6344  ;;  %v4277_v42 = vmul.f32 %v8872_v26, %v4245_v14  ;;  %v3800_v30 = vmul.f32 0.5, %v8862_v53  ;;  %v3797_v1 = vmul.f32 0.5, %v8798_v43 }
 0xd8c   : > { %v4182_v6 = vadd.f32 -0.28449672, %v4150_v37  ;;  %4864 = vmatprep.mubr.bf16.mxu1 %v4646_v13  ;;  %v4024_v15 = vmul.f32 1.0614054, %v6345_v45 }
 0xd8d   : > { %4865 = vmatmul.mubr.bf16.gmra.mxu1 %v4645_v12  ;;  %v4055_v11 = vadd.f32 -1.4531521, %v4023_v3 }
 0xd8e   : > { %v4214_v58 = vmul.f32 %v6341_v49, %v4182_v6  ;;  %v4056_v9 = vadd.f32 -1.4531521, %v4024_v15 }
 0xd8f   : > { %v4087_v0 = vmul.f32 %v6343_v50, %v4055_v11 }
 0xd90   : > { %v4246_v19 = vadd.f32 0.2548296, %v4214_v58  ;;  %v4088_v38 = vmul.f32 %v6345_v45, %v4056_v9 }
 0xd91   : > { %v4119_v46 = vadd.f32 1.4214138, %v4087_v0  ;;  %v6347_v18 = vpop.eup %6346  ;;  %v9148_v0 = vld [vmem:[#allocation18_spill] sm:$0xff] }
 0xd92   : > { %v4278_v23 = vmul.f32 %v6341_v49, %v4246_v19  ;;  %v4120_v36 = vadd.f32 1.4214138, %v4088_v38  ;;  %v6349_v56 = vpop.eup %6348 }
 0xd93   : > { %v4151_v17 = vmul.f32 %v6343_v50, %v4119_v46  ;;  %v4437_v31 = vmul.f32 %v6349_v56, %v4277_v42  ;;  %v9149_v42 = vld [vmem:[#allocation16_spill] sm:$0xff] }
 0xd94   : > { %v4438_v21 = vmul.f32 %v6347_v18, %v4278_v23  ;;  %v4152_v57 = vmul.f32 %v6345_v45, %v4120_v36 }
 0xd95   : > { %v4183_v63 = vadd.f32 -0.28449672, %v4151_v17  ;;  %v4469_v33 = vsub.f32 1.0, %v4437_v31  ;;  %v6351_v49 = vpop.eup %6350 }
 0xd96   : > { %v4184_v2 = vadd.f32 -0.28449672, %v4152_v57  ;;  %v4470_v62 = vsub.f32 1.0, %v4438_v21  ;;  %v6353_v51 = vpop.eup %6352  ;;  %v9150_v21 = vld [vmem:[#allocation21_spill] sm:$0xff] }
 0xd97   : > { %v4215_v54 = vmul.f32 %v6343_v50, %v4183_v63  ;;  %v4533_v47 = vsub.f32 0.0, %v4469_v33 }
 0xd98   : > { %v4216_v41 = vmul.f32 %v6345_v45, %v4184_v2  ;;  %v4534_v55 = vsub.f32 0.0, %v4470_v62 }
 0xd99   : > { %v4247_v4 = vadd.f32 0.2548296, %v4215_v54  ;;  %v4565_v10 = vsel %vm4501_vm14, %v4469_v33, %v4533_v47 }
 0xd9a   : > { %v4248_v44 = vadd.f32 0.2548296, %v4216_v41  ;;  %v4566_v25 = vsel %vm4502_vm13, %v4470_v62, %v4534_v55  ;;  %v4597_v37 = vadd.f32 1.0, %v4565_v10  ;;  %v9151_v62 = vld [vmem:[#allocation23_spill] sm:$0xff] }
 0xd9b   : > { %v4279_v60 = vmul.f32 %v6343_v50, %v4247_v4  ;;  %v4598_v52 = vadd.f32 1.0, %v4566_v25 }
 0xd9c   : > { %v4280_v26 = vmul.f32 %v6345_v45, %v4248_v44  ;;  %v4629_v20 = vmul.f32 %v4597_v37, %v3797_v1 }
 0xd9d   : > { %v4439_v32 = vmul.f32 %v6351_v49, %v4279_v60  ;;  %v4630_v50 = vmul.f32 %v4598_v52, %v3798_v24  ;;  %v9155_v24 = vld [vmem:[#allocation25_spill] sm:$0xff] }
 0xd9e   : > { %v4440_v22 = vmul.f32 %v6353_v51, %v4280_v26 }
 0xd9f   : > { %v4471_v29 = vsub.f32 1.0, %v4439_v32  ;;  %v9152_v32 = vld [vmem:[#allocation20_spill] sm:$0xff] }
 0xda0   : > { %v4472_v35 = vsub.f32 1.0, %v4440_v22  ;;  %v9153_v22 = vld [vmem:[#allocation27_spill] sm:$0xff] }
 0xda1   : > { %v4535_v39 = vsub.f32 0.0, %v4471_v29 }
 0xda2   : > { %v4536_v8 = vsub.f32 0.0, %v4472_v35 }
 0xda3   : > { %v4567_v27 = vsel %vm4503_vm15, %v4471_v29, %v4535_v39 }
 0xda4   : > { %v4599_v40 = vadd.f32 1.0, %v4567_v27  ;;  %v4568_v13 = vsel %vm4504_vm0, %v4472_v35, %v4536_v8 }
 0xda5   : > { %v4600_v12 = vadd.f32 1.0, %v4568_v13 }
 0xda6   : > { %v4631_v6 = vmul.f32 %v4599_v40, %v3799_v16  ;;  %v9154_v40 = vld [vmem:[#allocation22_spill] sm:$0xff] }
 0xda7   : > { %v4632_v5 = vmul.f32 %v4600_v12, %v3800_v30 }
 0xda8   : > { %v4647_v3 = vpack.c.bf16 %v4631_v6, %v4629_v20  ;;  %v9156_v6 = vld [vmem:[#allocation26_spill] sm:$0xff] }
 0xda9   : > { %v4648_v58 = vpack.c.bf16 %v4632_v5, %v4630_v50 }
 0xdab   : > { %4872 = vmatprep.mubr.bf16.mxu1 %v4648_v58 }
 0xdac   : > { %4873 = vmatmul.mubr.bf16.gmra.mxu1 %v4647_v3 }
 0xe09   : > { %v5333_v48 = vpop.f32.mrf.mxu1 }
 0xe0b   : > { %v5334_v59 = vpop.f32.mrf.mxu1 }
 0xe0c   : > { %v5335_v53 = vadd.f32 %v5334_v59, %v5333_v48 }
 0xe0d   : > { %v5336_v43 = vpop.f32.mrf.mxu1 }
 0xe0e   : > { %v4819_v28 = vadd.f32 %v5335_v53, %v8909_v61  ;;  %v9157_v53 = vld [vmem:[#allocation24_spill] sm:$0xff] }
 0xe0f   : > { %v5337_v45 = vpop.f32.mrf.mxu1 }
 0xe10   : > { %v4881_v11 = vadd.f32 %v4819_v28, %v7820_v7  ;;  %v5338_v19 = vadd.f32 %v5337_v45, %v5336_v43 }
 0xe12   : > { %v5339_v15 = vpop.f32.mrf.mxu1  ;;  %4897 = vst [vmem:[%s8915_s29] sm:$0xff] %v4881_v11  ;;  %v4822_v34 = vadd.f32 %v5338_v19, %v8909_v61  ;;  %v9158_v11 = vld [vmem:[#allocation11_spill] sm:$0xff] }
 0xe14   : > { %v5340_v14 = vpop.f32.mrf.mxu1  ;;  %v4882_v9 = vadd.f32 %v4822_v34, %v9148_v0 }
 0xe15   : > { %v5341_v46 = vadd.f32 %v5340_v14, %v5339_v15 }
 0xe16   : > { %v5342_v23 = vpop.f32.mrf.mxu1  ;;  %4898 = vst [vmem:[%s8915_s29 + $0x8] sm:$0xff] %v4882_v9 }
 0xe17   : > { %v4827_v38 = vadd.f32 %v5341_v46, %v8909_v61 }
 0xe18   : > { %v5343_v7 = vpop.f32.mrf.mxu1 }
 0xe19   : > { %v4883_v17 = vadd.f32 %v4827_v38, %v9149_v42  ;;  %v5344_v36 = vadd.f32 %v5343_v7, %v5342_v23  ;;  %v9159_v23 = vld [vmem:[#allocation6_spill] sm:$0xff] }
 0xe1a   : > { %v5345_v18 = vpop.f32.mrf.mxu1 }
 0xe1b   : > { %4899 = vst [vmem:[%s8915_s29 + $0x10] sm:$0xff] %v4883_v17  ;;  %v4830_v63 = vadd.f32 %v5344_v36, %v8909_v61  ;;  %v9160_v17 = vld [vmem:[#allocation7_spill] sm:$0xff] }
 0xe1c   : > { %v5346_v56 = vpop.f32.mrf.mxu1 }
 0xe1d   : > { %v4884_v57 = vadd.f32 %v4830_v63, %v9150_v21  ;;  %v5347_v31 = vadd.f32 %v5346_v56, %v5345_v18 }
 0xe1e   : > { %v5348_v54 = vpop.f32.mrf.mxu1 }
 0xe1f   : > { %4900 = vst [vmem:[%s8915_s29 + $0x18] sm:$0xff] %v4884_v57  ;;  %v4835_v2 = vadd.f32 %v5347_v31, %v8909_v61 }
 0xe20   : > { %v5349_v4 = vpop.f32.mrf.mxu1 }
 0xe21   : > { %v4885_v41 = vadd.f32 %v4835_v2, %v9151_v62  ;;  %v5350_v33 = vadd.f32 %v5349_v4, %v5348_v54  ;;  %v9161_v54 = vld [vmem:[#allocation8_spill] sm:$0xff] }
 0xe22   : > { %v5351_v60 = vpop.f32.mrf.mxu1 }
 0xe23   : > { %4901 = vst [vmem:[%s8915_s29 + $0x20] sm:$0xff] %v4885_v41  ;;  %v4838_v49 = vadd.f32 %v5350_v33, %v8909_v61  ;;  %v9162_v41 = vld [vmem:[#allocation10_spill] sm:$0xff] }
 0xe24   : > { %v5352_v44 = vpop.f32.mrf.mxu1 }
 0xe25   : > { %v4886_v55 = vadd.f32 %v4838_v49, %v9152_v32  ;;  %v5353_v26 = vadd.f32 %v5352_v44, %v5351_v60 }
 0xe26   : > { %v5354_v51 = vpop.f32.mrf.mxu1 }
 0xe27   : > { %4902 = vst [vmem:[%s8915_s29 + $0x28] sm:$0xff] %v4886_v55  ;;  %v4843_v47 = vadd.f32 %v5353_v26, %v8909_v61 }
 0xe28   : > { %v5355_v29 = vpop.f32.mrf.mxu1 }
 0xe29   : > { %v4887_v39 = vadd.f32 %v4843_v47, %v9153_v22  ;;  %v5356_v25 = vadd.f32 %v5355_v29, %v5354_v51 }
 0xe2a   : > { %v5357_v35 = vpop.f32.mrf.mxu1 }
 0xe2b   : > { %4903 = vst [vmem:[%s8915_s29 + $0x30] sm:$0xff] %v4887_v39  ;;  %v4846_v10 = vadd.f32 %v5356_v25, %v8909_v61 }
 0xe2c   : > { %v5358_v27 = vpop.f32.mrf.mxu1 }
 0xe2d   : > { %v4888_v8 = vadd.f32 %v4846_v10, %v9154_v40  ;;  %v5359_v52 = vadd.f32 %v5358_v27, %v5357_v35 }
 0xe2e   : > { %v5360_v37 = vpop.f32.mrf.mxu1 }
 0xe2f   : > { %4904 = vst [vmem:[%s8915_s29 + $0x38] sm:$0xff] %v4888_v8  ;;  %v4851_v16 = vadd.f32 %v5359_v52, %v8909_v61 }
 0xe30   : > { %v5361_v13 = vpop.f32.mrf.mxu1 }
 0xe31   : > { %v4889_v30 = vadd.f32 %v4851_v16, %v9155_v24  ;;  %v5362_v12 = vadd.f32 %v5361_v13, %v5360_v37 }
 0xe33   : > { %4905 = vst [vmem:[%s8915_s29 + $0x40] sm:$0xff] %v4889_v30  ;;  %v4854_v1 = vadd.f32 %v5362_v12, %v8909_v61 }
 0xe35   : > { %v4890_v50 = vadd.f32 %v4854_v1, %v9156_v6 }
 0xe36   : > { %v5363_v5 = vpop.f32.mrf.mxu1 }
 0xe37   : > { %4906 = vst [vmem:[%s8915_s29 + $0x48] sm:$0xff] %v4890_v50 }
 0xe38   : > { %v5364_v20 = vpop.f32.mrf.mxu1 }
 0xe39   : > { %v5365_v58 = vadd.f32 %v5364_v20, %v5363_v5 }
 0xe3a   : > { %v5366_v3 = vpop.f32.mrf.mxu1 }
 0xe3b   : > { %v4859_v48 = vadd.f32 %v5365_v58, %v8909_v61 }
 0xe3c   : > { %v5367_v59 = vpop.f32.mrf.mxu1 }
 0xe3d   : > { %v4891_v43 = vadd.f32 %v4859_v48, %v9157_v53  ;;  %v5368_v28 = vadd.f32 %v5367_v59, %v5366_v3 }
 0xe3f   : > { %4907 = vst [vmem:[%s8915_s29 + $0x50] sm:$0xff] %v4891_v43  ;;  %v4862_v45 = vadd.f32 %v5368_v28, %v8909_v61 }
 0xe41   : > { %v4892_v19 = vadd.f32 %v4862_v45, %v9158_v11 }
 0xe43   : > { %4908 = vst [vmem:[%s8915_s29 + $0x58] sm:$0xff] %v4892_v19 }
 0xe4d   : > { %v5369_v15 = vpop.f32.mrf.mxu1 }
 0xe4f   : > { %v5370_v34 = vpop.f32.mrf.mxu1 }
 0xe50   : > { %v5371_v14 = vadd.f32 %v5370_v34, %v5369_v15 }
 0xe51   : > { %v5372_v0 = vpop.f32.mrf.mxu1 }
 0xe52   : > { %v4867_v9 = vadd.f32 %v5371_v14, %v8909_v61 }
 0xe53   : > { %v5373_v46 = vpop.f32.mrf.mxu1 }
 0xe54   : > { %v4893_v38 = vadd.f32 %v4867_v9, %v9159_v23  ;;  %v5374_v7 = vadd.f32 %v5373_v46, %v5372_v0 }
 0xe56   : > { %4909 = vst [vmem:[%s8915_s29 + $0x60] sm:$0xff] %v4893_v38  ;;  %v4870_v42 = vadd.f32 %v5374_v7, %v8909_v61 }
 0xe58   : > { %v4894_v36 = vadd.f32 %v4870_v42, %v9160_v17 }
 0xe5a   : > { %4910 = vst [vmem:[%s8915_s29 + $0x68] sm:$0xff] %v4894_v36 }
 0xe6c   : > { %v5375_v18 = vpop.f32.mrf.mxu1 }
 0xe6e   : > { %v5376_v63 = vpop.f32.mrf.mxu1 }
 0xe6f   : > { %v5377_v56 = vadd.f32 %v5376_v63, %v5375_v18 }
 0xe70   : > { %v5378_v21 = vpop.f32.mrf.mxu1 }
 0xe71   : > { %v4875_v57 = vadd.f32 %v5377_v56, %v8909_v61 }
 0xe72   : > { %v5379_v31 = vpop.f32.mrf.mxu1 }
 0xe73   : > { %v4895_v2 = vadd.f32 %v4875_v57, %v9161_v54  ;;  %v5380_v4 = vadd.f32 %v5379_v31, %v5378_v21 }
 0xe75   : > { %4911 = vst [vmem:[%s8915_s29 + $0x70] sm:$0xff] %v4895_v2  ;;  %v4878_v62 = vadd.f32 %v5380_v4, %v8909_v61 }
 0xe77   : > { %v4896_v33 = vadd.f32 %v4878_v62, %v9162_v41 }
 0xe79   : > { %4912 = vst [vmem:[%s8915_s29 + $0x78] sm:$0xff] %v4896_v33 }
 0xe7a   : > { %6383 = shalt.err (!%p6380_p3)
}
 0xe7b   : > { %s6384_s24 = scalar_lea.hbm %s8966_s21, 2048  ;;  %s6388_s14 = scalar_lea.hbm %s9023_s9, 4096 }
 0xe7c   : > { %p6385_p4 = scmp.ne.s32.totalorder %s8966_s21, %s6384_s24  ;;  %p6389_p9 = scmp.lt.s32.totalorder %s8966_s21, %s9023_s9 }
 0xe7d   : > { %p6390_p10 = scmp.lt.s32.totalorder %s6388_s14, %s6384_s24 }
 0xe7e   : > { %p6386_p7 = pnand %p6385_p4, %p6527_p5 }
 0xe7f   : > { %p6391_p11 = por %p6390_p10, %p6389_p9 }
 0xe80   : > { %p6387_p8 = pneg %p6386_p7 }
 0xe82   : > { %p6392_p12 = pnand %p6391_p11, %p6387_p8 }
 0xe84   : > { %6395 = shalt.err (!%p6392_p12)
}
 0xe85   : > { %s6437_s13 = smov 128   ;;  %s6438_s23 = smov 8  }
 0xe86   : > { %5781 = dma.vmem_to_hbm [thread:$0]  (%p6527_p5), %s8968_s25, 2048, %s8966_s21, %s8974_s22, %s6437_s13, %s6437_s13, %s6438_s23  }
 0xe87 PF: > { %p5787_p13 = scmp.ge.s32.totalorder %s6430_s12, 2  ;;  %s4942_s26 = sand.u32 1, %s6418_s30  }
 0xe88   : > { %s4943_s27 = scalar_lea.sflag [#allocation3], %s4942_s26 }
 0xe89   : > { %p5784_p0 = pnand %p5787_p13, %p6531_p6 }
 0xe8b   : > { %p5785_p1 = pneg %p5784_p0 }
 0xe8d   : > { %6413 = dma.done.wait (%p5785_p1), %s4943_s27, 2048  }
 0xe8e   : > { %6415 = vsyncadd (%p5785_p1), %s4943_s27, 4294965248  ;;  %p19_p2 = scmp.ge.s32.totalorder %s6514_s15, 4   ;;  %s9163_s30 = smov %s6422_s10 }
 0xe8f   : > { %s9164_s10 = smov %s6426_s11  ;;  %s9165_s11 = smov %s6525_s18 }
 0xe90   : > { %s9166_s12 = smov %s6514_s15  ;;  %21 = sbr.rel (!%p19_p2) target bundleno = 3 (0x3), region = 91 }
 0xe95   :  { %4948 = vsyncpa [#allocation3], 1 }
 0xe96   :  { %4950 = vsyncpa [#allocation3 + $0x1], 1 }

</bundles_post_ra>
